<compile_context>
chip_gen: v7x
topology: tpu7x:2x2x1
jax: 0.10.0
libtpu: 0.0.40
codegen_flags: <defaults>
</compile_context>

<pallas_src>
import jax
import jax.numpy as jnp
import numpy as np
from jax import lax
from jax.experimental import pallas as pl
from jax.experimental.pallas import tpu as pltpu


# ----------------------------- in-kernel helpers -----------------------------

def _dot(a, b):
    # Full-f32 MXU matmul (keeps the reference check tight; cast operands to
    # bf16 and keep f32 accumulation for an extra v6e/v7x speedup if a looser
    # tolerance is acceptable).
    return jnp.dot(a, b, preferred_element_type=jnp.float32,
                   precision=jax.lax.Precision.HIGHEST)


def _layernorm(x, g, b, eps=1e-5):
    # x: (R, C); g, b: (1, C); normalization over channels (lanes).
    mu = jnp.mean(x, axis=-1, keepdims=True)
    var = jnp.mean((x - mu) ** 2, axis=-1, keepdims=True)
    return (x - mu) * lax.rsqrt(var + eps) * g + b


def _leaky(x, slope=0.05):
    return jnp.where(x >= 0, x, slope * x)


# --------------------------------- kernel ------------------------------------

def lindisc_v2_kernel(
    x_ref,
    mprev, mnext,
    c1w, c1b, ln1g, ln1b,
    hws, hb, hln1g, hln1b, hln2g, hln2b,
    p8, c2w, c2b, ln2g, ln2b,
    p4, c3w, c3b, ln3g, ln3b,
    p2, c32w, c32b, ln32g, ln32b,
    c4w, c4b, ln4g, ln4b,
    pfin, c5w, c5b,
    o_ref,
):
    xb = x_ref[...]                                 # (Bb, T, F)
    Bb, T, F = xb.shape
    BT = Bb * T
    x = xb.reshape(BT, F)                           # flatten batch into sublanes

    # conv1 (1x1) + ln1   (+ dropout p=0.05 -> identity in eval)
    h = _dot(x, c1w[...]) + c1b[...]
    h = _layernorm(h, ln1g[...], ln1b[...])         # (BT, D)
    D = h.shape[1]

    # highwayConv: kernel_size=3, dilation=1, "same" padding, non-causal.
    # Neighbours via non-negative sublane rolls, batch/time-edge zeros via
    # precomputed (BT, 1) masks, then one fused K=3D matmul against the
    # pre-stacked weight.
    h_prev = pltpu.roll(h, shift=1, axis=0) * mprev[...]        # x[t-1]
    h_next = pltpu.roll(h, shift=BT - 1, axis=0) * mnext[...]   # x[t+1]
    cat = jnp.concatenate([h_prev, h, h_next], axis=1)          # (BT, 3D)
    conv = _dot(cat, hws[...]) + hb[...]                        # (BT, 2D)
    H1 = _layernorm(conv[:, :D], hln1g[...], hln1b[...])
    H2 = _layernorm(conv[:, D:], hln2g[...], hln2b[...])
    sig = jax.nn.sigmoid(H1)
    h = h + sig * (H2 - h)                  # highway gate (+ dropout = identity)

    # avgpool(8) -> conv2 (1x1) -> ln2 -> leaky   (pool hoisted before conv)
    h = _dot(p8[...], h)
    h = _dot(h, c2w[...]) + c2b[...]
    h = _leaky(_layernorm(h, ln2g[...], ln2b[...]))

    # avgpool(4) -> conv3 (1x1) -> ln3 -> leaky
    h = _dot(p4[...], h)
    h = _dot(h, c3w[...]) + c3b[...]
    h = _leaky(_layernorm(h, ln3g[...], ln3b[...]))

    # avgpool(2) -> conv3_2 (1x1) -> ln3_2 -> leaky
    h = _dot(p2[...], h)
    h = _dot(h, c32w[...]) + c32b[...]
    h = _leaky(_layernorm(h, ln32g[...], ln32b[...]))

    # conv4 (1x1) -> ln4 -> leaky
    h = _dot(h, c4w[...]) + c4b[...]
    h = _leaky(_layernorm(h, ln4g[...], ln4b[...]))

    # adaptive avg pool to length 1 (per batch) -> conv5 (1x1) -> sigmoid
    h = _dot(pfin[...], h)                          # (Bb, 4)
    h = _dot(h, c5w[...]) + c5b[...]                # (Bb, 1)
    o_ref[...] = jax.nn.sigmoid(h)


# --------------------------------- wrapper -----------------------------------

def _pool_matrix(rows_in, k):
    # Non-overlapping average-pool as a (rows_in//k, rows_in) matrix.  Because
    # every per-batch length at each stage is divisible by k, the flattened
    # rule `col // k == row` is exactly block-diagonal over the packed batch.
    rows_out = rows_in // k
    r = np.arange(rows_out)[:, None]
    c = np.arange(rows_in)[None, :]
    m = (c // k == r).astype(np.float32) / np.float32(k)
    return jnp.asarray(m, dtype=jnp.float32)


def _edge_masks(block_b, T):
    # (Bb*T, 1) masks zeroing the rolled neighbours that cross a batch /
    # sequence edge ("same" zero-padding of the 3-tap conv).
    t = np.arange(block_b * T) % T
    mprev = (t != 0).astype(np.float32)[:, None]
    mnext = (t != T - 1).astype(np.float32)[:, None]
    return jnp.asarray(mprev), jnp.asarray(mnext)


def lindisc_v2_forward(x_nct, params, *, block_b=None):
    """x_nct: (B, freq_bins, T) float32, as in the PyTorch module."""
    # One tiny HBM transpose keeps the in-kernel matmuls as plain
    # (rows, Cin) @ (Cin, Cout) dots (no transposed-LHS / batched-3D dots).
    x = jnp.transpose(x_nct, (0, 2, 1)).astype(jnp.float32)      # (B, T, F)
    B, T, F = x.shape
    if block_b is None:
        block_b = B            # pack the whole batch into one grid step
    assert B % block_b == 0
    # AvgPool1d(8) -> (4) -> (2) floor-mode shapes stay clean and per-batch.
    assert T % (8 * 4 * 2) == 0, "T must be a multiple of 64"

    (c1w, c1b, ln1g, ln1b,
     hw0, hw1, hw2, hb,
     hln1g, hln1b, hln2g, hln2b,
     c2w, c2b, ln2g, ln2b,
     c3w, c3b, ln3g, ln3b,
     c32w, c32b, ln32g, ln32b,
     c4w, c4b, ln4g, ln4b,
     c5w, c5b) = params

    # Fused highway weight: [x[t-1]; x[t]; x[t+1]] taps stacked along K.
    hws = jnp.concatenate([hw0, hw1, hw2], axis=0)               # (3D, 2D)

    # Precomputed edge masks and (block-diagonal) pooling matrices.
    mprev, mnext = _edge_masks(block_b, T)
    p8 = _pool_matrix(block_b * T, 8)
    p4 = _pool_matrix(block_b * T // 8, 4)
    p2 = _pool_matrix(block_b * T // 32, 2)
    pfin = _pool_matrix(block_b * T // 64, T // 64)              # (Bb, Bb*T/64)

    weight_list = [
        mprev, mnext,
        c1w, c1b, ln1g, ln1b,
        hws, hb, hln1g, hln1b, hln2g, hln2b,
        p8, c2w, c2b, ln2g, ln2b,
        p4, c3w, c3b, ln3g, ln3b,
        p2, c32w, c32b, ln32g, ln32b,
        c4w, c4b, ln4g, ln4b,
        pfin, c5w, c5b,
    ]

    in_specs = [pl.BlockSpec((block_b, T, F), lambda b: (b, 0, 0))]
    for w in weight_list:
        in_specs.append(pl.BlockSpec(w.shape, lambda b, _n=w.ndim: (0,) * _n))

    out = pl.pallas_call(
        lindisc_v2_kernel,
        grid=(B // block_b,),
        in_specs=in_specs,
        out_specs=pl.BlockSpec((block_b, 1), lambda b: (b, 0)),
        out_shape=jax.ShapeDtypeStruct((B, 1), jnp.float32),
        compiler_params=pltpu.CompilerParams(
            dimension_semantics=("parallel",)),
    )(x, *weight_list)
    return out.reshape(B, 1, 1)


# ----------------------- deterministic parameter setup -----------------------

def make_params(freq_bins, disc_dim, key):
    ks = jax.random.split(key, 16)
    f32 = jnp.float32

    def w(k, shape, fan_in):
        return (jax.random.normal(k, shape, dtype=f32) / jnp.sqrt(fan_in)).astype(f32)

    D = disc_dim
    params = [
        # conv1: freq_bins -> D, k=1
        w(ks[0], (freq_bins, D), freq_bins), jnp.zeros((1, D), f32),
        # ln1 (gamma=1, beta=0 as PyTorch default init)
        jnp.ones((1, D), f32), jnp.zeros((1, D), f32),
        # highway conv: D -> 2D, k=3 (taps for x[t-1], x[t], x[t+1])
        w(ks[1], (D, 2 * D), 3 * D), w(ks[2], (D, 2 * D), 3 * D),
        w(ks[3], (D, 2 * D), 3 * D), jnp.zeros((1, 2 * D), f32),
        # highway ln1 / ln2
        jnp.ones((1, D), f32), jnp.zeros((1, D), f32),
        jnp.ones((1, D), f32), jnp.zeros((1, D), f32),
        # conv2: D -> 64
        w(ks[4], (D, 64), D), jnp.zeros((1, 64), f32),
        jnp.ones((1, 64), f32), jnp.zeros((1, 64), f32),
        # conv3: 64 -> 16
        w(ks[5], (64, 16), 64), jnp.zeros((1, 16), f32),
        jnp.ones((1, 16), f32), jnp.zeros((1, 16), f32),
        # conv3_2: 16 -> 8
        w(ks[6], (16, 8), 16), jnp.zeros((1, 8), f32),
        jnp.ones((1, 8), f32), jnp.zeros((1, 8), f32),
        # conv4: 8 -> 4
        w(ks[7], (8, 4), 8), jnp.zeros((1, 4), f32),
        # ln4 (applied over the actual 4 channels; see TODO above)
        jnp.ones((1, 4), f32), jnp.zeros((1, 4), f32),
        # conv5: 4 -> 1
        w(ks[8], (4, 1), 4), jnp.zeros((1, 1), f32),
    ]
    return params


# ------------------------------- JAX reference --------------------------------

def reference_forward(x_nct, params):
    (c1w, c1b, ln1g, ln1b,
     hw0, hw1, hw2, hb,
     hln1g, hln1b, hln2g, hln2b,
     c2w, c2b, ln2g, ln2b,
     c3w, c3b, ln3g, ln3b,
     c32w, c32b, ln32g, ln32b,
     c4w, c4b, ln4g, ln4b,
     c5w, c5b) = params

    def mm(a, b):
        return jnp.matmul(a, b, precision=jax.lax.Precision.HIGHEST)

    def ln(x, g, b, eps=1e-5):
        mu = jnp.mean(x, axis=-1, keepdims=True)
        var = jnp.mean((x - mu) ** 2, axis=-1, keepdims=True)
        return (x - mu) / jnp.sqrt(var + eps) * g + b

    def leaky(x):
        return jnp.where(x >= 0, x, 0.05 * x)

    def pool(x, k):  # (B, T, C) -> (B, T//k, C)
        Bc, Tc, Cc = x.shape
        return jnp.mean(x.reshape(Bc, Tc // k, k, Cc), axis=2)

    x = jnp.transpose(x_nct, (0, 2, 1))            # (B, T, F)
    h = ln(mm(x, c1w) + c1b, ln1g, ln1b)
    hp = jnp.pad(h, ((0, 0), (1, 1), (0, 0)))
    conv = mm(hp[:, :-2], hw0) + mm(hp[:, 1:-1], hw1) + mm(hp[:, 2:], hw2) + hb
    D = h.shape[-1]
    H1 = ln(conv[..., :D], hln1g, hln1b)
    H2 = ln(conv[..., D:], hln2g, hln2b)
    s = jax.nn.sigmoid(H1)
    h = s * H2 + (1 - s) * h
    h = leaky(ln(pool(mm(h, c2w) + c2b, 8), ln2g, ln2b))
    h = leaky(ln(pool(mm(h, c3w) + c3b, 4), ln3g, ln3b))
    h = leaky(ln(pool(mm(h, c32w) + c32b, 2), ln32g, ln32b))
    h = leaky(ln(mm(h, c4w) + c4b, ln4g, ln4b))
    h = mm(h, c5w) + c5b                           # (B, T'', 1)
    return jax.nn.sigmoid(jnp.mean(h, axis=1, keepdims=True))  # (B, 1, 1)


# ----------------------------------- main -------------------------------------

if __name__ == "__main__":
    B, FREQ_BINS, DISC_DIM, T = 2, 32, 64, 128

    key = jax.random.PRNGKey(0)
    kx, kp = jax.random.split(key)
    x_nct = jax.random.normal(kx, (B, FREQ_BINS, T), dtype=jnp.float32)
    params = make_params(FREQ_BINS, DISC_DIM, kp)

    out = jax.block_until_ready(lindisc_v2_forward(x_nct, params))
    ref = jax.block_until_ready(reference_forward(x_nct, params))

    assert out.shape == (B, 1, 1), out.shape
    assert jnp.allclose(out, ref, rtol=1e-3, atol=1e-4), (out, ref)

    print("KERNEL_OK")
</pallas_src>

<mosaic_0001>
module attributes {stable_mosaic.version = 11 : i64} {
  func.func @lindisc_v2_kernel(%arg0: i32, %arg1: memref<2x128x32xf32, #tpu.memory_space<vmem>>, %arg2: memref<256x1xf32, #tpu.memory_space<vmem>>, %arg3: memref<256x1xf32, #tpu.memory_space<vmem>>, %arg4: memref<32x64xf32, #tpu.memory_space<vmem>>, %arg5: memref<1x64xf32, #tpu.memory_space<vmem>>, %arg6: memref<1x64xf32, #tpu.memory_space<vmem>>, %arg7: memref<1x64xf32, #tpu.memory_space<vmem>>, %arg8: memref<192x128xf32, #tpu.memory_space<vmem>>, %arg9: memref<1x128xf32, #tpu.memory_space<vmem>>, %arg10: memref<1x64xf32, #tpu.memory_space<vmem>>, %arg11: memref<1x64xf32, #tpu.memory_space<vmem>>, %arg12: memref<1x64xf32, #tpu.memory_space<vmem>>, %arg13: memref<1x64xf32, #tpu.memory_space<vmem>>, %arg14: memref<32x256xf32, #tpu.memory_space<vmem>>, %arg15: memref<64x64xf32, #tpu.memory_space<vmem>>, %arg16: memref<1x64xf32, #tpu.memory_space<vmem>>, %arg17: memref<1x64xf32, #tpu.memory_space<vmem>>, %arg18: memref<1x64xf32, #tpu.memory_space<vmem>>, %arg19: memref<8x32xf32, #tpu.memory_space<vmem>>, %arg20: memref<64x16xf32, #tpu.memory_space<vmem>>, %arg21: memref<1x16xf32, #tpu.memory_space<vmem>>, %arg22: memref<1x16xf32, #tpu.memory_space<vmem>>, %arg23: memref<1x16xf32, #tpu.memory_space<vmem>>, %arg24: memref<4x8xf32, #tpu.memory_space<vmem>>, %arg25: memref<16x8xf32, #tpu.memory_space<vmem>>, %arg26: memref<1x8xf32, #tpu.memory_space<vmem>>, %arg27: memref<1x8xf32, #tpu.memory_space<vmem>>, %arg28: memref<1x8xf32, #tpu.memory_space<vmem>>, %arg29: memref<8x4xf32, #tpu.memory_space<vmem>>, %arg30: memref<1x4xf32, #tpu.memory_space<vmem>>, %arg31: memref<1x4xf32, #tpu.memory_space<vmem>>, %arg32: memref<1x4xf32, #tpu.memory_space<vmem>>, %arg33: memref<2x4xf32, #tpu.memory_space<vmem>>, %arg34: memref<4x1xf32, #tpu.memory_space<vmem>>, %arg35: memref<1x1xf32, #tpu.memory_space<vmem>>, %arg36: memref<2x1xf32, #tpu.memory_space<vmem>>) attributes {dimension_semantics = [#tpu.dimension_semantics<parallel>], iteration_bounds = array<i64: 1>, scalar_prefetch = 0 : i64, scratch_operands = 0 : i64, tpu.core_type = #tpu.core_type<tc>, window_params = [{transform_indices = @transform_0, window_bounds = array<i64: 2, 128, 32>}, {pipeline_mode = #tpu.pipeline_mode<synchronous>, transform_indices = @transform_1, window_bounds = array<i64: 256, 1>}, {pipeline_mode = #tpu.pipeline_mode<synchronous>, transform_indices = @transform_2, window_bounds = array<i64: 256, 1>}, {pipeline_mode = #tpu.pipeline_mode<synchronous>, transform_indices = @transform_3, window_bounds = array<i64: 32, 64>}, {pipeline_mode = #tpu.pipeline_mode<synchronous>, transform_indices = @transform_4, window_bounds = array<i64: 1, 64>}, {pipeline_mode = #tpu.pipeline_mode<synchronous>, transform_indices = @transform_5, window_bounds = array<i64: 1, 64>}, {pipeline_mode = #tpu.pipeline_mode<synchronous>, transform_indices = @transform_6, window_bounds = array<i64: 1, 64>}, {pipeline_mode = #tpu.pipeline_mode<synchronous>, transform_indices = @transform_7, window_bounds = array<i64: 192, 128>}, {pipeline_mode = #tpu.pipeline_mode<synchronous>, transform_indices = @transform_8, window_bounds = array<i64: 1, 128>}, {pipeline_mode = #tpu.pipeline_mode<synchronous>, transform_indices = @transform_9, window_bounds = array<i64: 1, 64>}, {pipeline_mode = #tpu.pipeline_mode<synchronous>, transform_indices = @transform_10, window_bounds = array<i64: 1, 64>}, {pipeline_mode = #tpu.pipeline_mode<synchronous>, transform_indices = @transform_11, window_bounds = array<i64: 1, 64>}, {pipeline_mode = #tpu.pipeline_mode<synchronous>, transform_indices = @transform_12, window_bounds = array<i64: 1, 64>}, {pipeline_mode = #tpu.pipeline_mode<synchronous>, transform_indices = @transform_13, window_bounds = array<i64: 32, 256>}, {pipeline_mode = #tpu.pipeline_mode<synchronous>, transform_indices = @transform_14, window_bounds = array<i64: 64, 64>}, {pipeline_mode = #tpu.pipeline_mode<synchronous>, transform_indices = @transform_15, window_bounds = array<i64: 1, 64>}, {pipeline_mode = #tpu.pipeline_mode<synchronous>, transform_indices = @transform_16, window_bounds = array<i64: 1, 64>}, {pipeline_mode = #tpu.pipeline_mode<synchronous>, transform_indices = @transform_17, window_bounds = array<i64: 1, 64>}, {pipeline_mode = #tpu.pipeline_mode<synchronous>, transform_indices = @transform_18, window_bounds = array<i64: 8, 32>}, {pipeline_mode = #tpu.pipeline_mode<synchronous>, transform_indices = @transform_19, window_bounds = array<i64: 64, 16>}, {pipeline_mode = #tpu.pipeline_mode<synchronous>, transform_indices = @transform_20, window_bounds = array<i64: 1, 16>}, {pipeline_mode = #tpu.pipeline_mode<synchronous>, transform_indices = @transform_21, window_bounds = array<i64: 1, 16>}, {pipeline_mode = #tpu.pipeline_mode<synchronous>, transform_indices = @transform_22, window_bounds = array<i64: 1, 16>}, {pipeline_mode = #tpu.pipeline_mode<synchronous>, transform_indices = @transform_23, window_bounds = array<i64: 4, 8>}, {pipeline_mode = #tpu.pipeline_mode<synchronous>, transform_indices = @transform_24, window_bounds = array<i64: 16, 8>}, {pipeline_mode = #tpu.pipeline_mode<synchronous>, transform_indices = @transform_25, window_bounds = array<i64: 1, 8>}, {pipeline_mode = #tpu.pipeline_mode<synchronous>, transform_indices = @transform_26, window_bounds = array<i64: 1, 8>}, {pipeline_mode = #tpu.pipeline_mode<synchronous>, transform_indices = @transform_27, window_bounds = array<i64: 1, 8>}, {pipeline_mode = #tpu.pipeline_mode<synchronous>, transform_indices = @transform_28, window_bounds = array<i64: 8, 4>}, {pipeline_mode = #tpu.pipeline_mode<synchronous>, transform_indices = @transform_29, window_bounds = array<i64: 1, 4>}, {pipeline_mode = #tpu.pipeline_mode<synchronous>, transform_indices = @transform_30, window_bounds = array<i64: 1, 4>}, {pipeline_mode = #tpu.pipeline_mode<synchronous>, transform_indices = @transform_31, window_bounds = array<i64: 1, 4>}, {pipeline_mode = #tpu.pipeline_mode<synchronous>, transform_indices = @transform_32, window_bounds = array<i64: 2, 4>}, {pipeline_mode = #tpu.pipeline_mode<synchronous>, transform_indices = @transform_33, window_bounds = array<i64: 4, 1>}, {pipeline_mode = #tpu.pipeline_mode<synchronous>, transform_indices = @transform_34, window_bounds = array<i64: 1, 1>}, {transform_indices = @transform_35, window_bounds = array<i64: 2, 1>}]} {
    %c0 = arith.constant 0 : index
    %c0_0 = arith.constant 0 : index
    %c0_1 = arith.constant 0 : index
    %0 = vector.load %arg1[%c0, %c0_0, %c0_1] : memref<2x128x32xf32, #tpu.memory_space<vmem>>, vector<2x128x32xf32>
    %1 = vector.shape_cast %0 : vector<2x128x32xf32> to vector<256x32xf32>
    %c0_2 = arith.constant 0 : index
    %c0_3 = arith.constant 0 : index
    %2 = vector.load %arg4[%c0_2, %c0_3] : memref<32x64xf32, #tpu.memory_space<vmem>>, vector<32x64xf32>
    %cst = arith.constant dense<0.000000e+00> : vector<256x64xf32>
    %3 = tpu.matmul %1, %2, %cst {dimension_numbers = #tpu.dot_dimension_numbers<[1], [0], [0], [1], [0, 0, 1, 1], [], []>, precision = #tpu.contract_precision<fp32>} : vector<256x32xf32>, vector<32x64xf32>, vector<256x64xf32> -> vector<256x64xf32>
    %c0_4 = arith.constant 0 : index
    %c0_5 = arith.constant 0 : index
    %4 = vector.load %arg5[%c0_4, %c0_5] : memref<1x64xf32, #tpu.memory_space<vmem>>, vector<1x64xf32>
    %5 = vector.broadcast %4 : vector<1x64xf32> to vector<256x64xf32>
    %6 = arith.addf %3, %5 : vector<256x64xf32>
    %c0_6 = arith.constant 0 : index
    %c0_7 = arith.constant 0 : index
    %7 = vector.load %arg6[%c0_6, %c0_7] : memref<1x64xf32, #tpu.memory_space<vmem>>, vector<1x64xf32>
    %c0_8 = arith.constant 0 : index
    %c0_9 = arith.constant 0 : index
    %8 = vector.load %arg7[%c0_8, %c0_9] : memref<1x64xf32, #tpu.memory_space<vmem>>, vector<1x64xf32>
    %cst_10 = arith.constant dense<0.000000e+00> : vector<256xf32>
    %9 = vector.multi_reduction <add>, %6, %cst_10 [1] : vector<256x64xf32> to vector<256xf32>
    %10 = vector.shape_cast %9 : vector<256xf32> to vector<256x1xf32>
    %cst_11 = arith.constant 6.400000e+01 : f32
    %11 = vector.broadcast %cst_11 : f32 to vector<256x1xf32>
    %12 = arith.divf %10, %11 : vector<256x1xf32>
    %13 = vector.broadcast %12 : vector<256x1xf32> to vector<256x64xf32>
    %14 = arith.subf %6, %13 : vector<256x64xf32>
    %15 = arith.mulf %14, %14 : vector<256x64xf32>
    %cst_12 = arith.constant dense<0.000000e+00> : vector<256xf32>
    %16 = vector.multi_reduction <add>, %15, %cst_12 [1] : vector<256x64xf32> to vector<256xf32>
    %17 = vector.shape_cast %16 : vector<256xf32> to vector<256x1xf32>
    %cst_13 = arith.constant 6.400000e+01 : f32
    %18 = vector.broadcast %cst_13 : f32 to vector<256x1xf32>
    %19 = arith.divf %17, %18 : vector<256x1xf32>
    %20 = vector.broadcast %12 : vector<256x1xf32> to vector<256x64xf32>
    %21 = arith.subf %6, %20 : vector<256x64xf32>
    %cst_14 = arith.constant 9.99999974E-6 : f32
    %22 = vector.broadcast %cst_14 : f32 to vector<256x1xf32>
    %23 = arith.addf %19, %22 : vector<256x1xf32>
    %24 = math.rsqrt %23 : vector<256x1xf32>
    %25 = vector.broadcast %24 : vector<256x1xf32> to vector<256x64xf32>
    %26 = arith.mulf %21, %25 : vector<256x64xf32>
    %27 = vector.broadcast %7 : vector<1x64xf32> to vector<256x64xf32>
    %28 = arith.mulf %26, %27 : vector<256x64xf32>
    %29 = vector.broadcast %8 : vector<1x64xf32> to vector<256x64xf32>
    %30 = arith.addf %28, %29 : vector<256x64xf32>
    %c1_i32 = arith.constant 1 : i32
    %31 = tpu.dynamic_rotate %30 by %c1_i32 dim 0 : vector<256x64xf32>, i32 -> vector<256x64xf32>
    %c0_15 = arith.constant 0 : index
    %c0_16 = arith.constant 0 : index
    %32 = vector.load %arg2[%c0_15, %c0_16] : memref<256x1xf32, #tpu.memory_space<vmem>>, vector<256x1xf32>
    %33 = vector.broadcast %32 : vector<256x1xf32> to vector<256x64xf32>
    %34 = arith.mulf %31, %33 : vector<256x64xf32>
    %c255_i32 = arith.constant 255 : i32
    %35 = tpu.dynamic_rotate %30 by %c255_i32 dim 0 : vector<256x64xf32>, i32 -> vector<256x64xf32>
    %c0_17 = arith.constant 0 : index
    %c0_18 = arith.constant 0 : index
    %36 = vector.load %arg3[%c0_17, %c0_18] : memref<256x1xf32, #tpu.memory_space<vmem>>, vector<256x1xf32>
    %37 = vector.broadcast %36 : vector<256x1xf32> to vector<256x64xf32>
    %38 = arith.mulf %35, %37 : vector<256x64xf32>
    %39 = tpu.concatenate %34, %30, %38 in 1 : vector<256x64xf32>, vector<256x64xf32>, vector<256x64xf32> -> vector<256x192xf32>
    %c0_19 = arith.constant 0 : index
    %c0_20 = arith.constant 0 : index
    %40 = vector.load %arg8[%c0_19, %c0_20] : memref<192x128xf32, #tpu.memory_space<vmem>>, vector<192x128xf32>
    %cst_21 = arith.constant dense<0.000000e+00> : vector<256x128xf32>
    %41 = tpu.matmul %39, %40, %cst_21 {dimension_numbers = #tpu.dot_dimension_numbers<[1], [0], [0], [1], [0, 0, 1, 1], [], []>, precision = #tpu.contract_precision<fp32>} : vector<256x192xf32>, vector<192x128xf32>, vector<256x128xf32> -> vector<256x128xf32>
    %c0_22 = arith.constant 0 : index
    %c0_23 = arith.constant 0 : index
    %42 = vector.load %arg9[%c0_22, %c0_23] : memref<1x128xf32, #tpu.memory_space<vmem>>, vector<1x128xf32>
    %43 = vector.broadcast %42 : vector<1x128xf32> to vector<256x128xf32>
    %44 = arith.addf %41, %43 : vector<256x128xf32>
    %45 = vector.extract_strided_slice %44 {offsets = [0, 0], sizes = [256, 64], strides = [1, 1]} : vector<256x128xf32> to vector<256x64xf32>
    %c0_24 = arith.constant 0 : index
    %c0_25 = arith.constant 0 : index
    %46 = vector.load %arg10[%c0_24, %c0_25] : memref<1x64xf32, #tpu.memory_space<vmem>>, vector<1x64xf32>
    %c0_26 = arith.constant 0 : index
    %c0_27 = arith.constant 0 : index
    %47 = vector.load %arg11[%c0_26, %c0_27] : memref<1x64xf32, #tpu.memory_space<vmem>>, vector<1x64xf32>
    %cst_28 = arith.constant dense<0.000000e+00> : vector<256xf32>
    %48 = vector.multi_reduction <add>, %45, %cst_28 [1] : vector<256x64xf32> to vector<256xf32>
    %49 = vector.shape_cast %48 : vector<256xf32> to vector<256x1xf32>
    %cst_29 = arith.constant 6.400000e+01 : f32
    %50 = vector.broadcast %cst_29 : f32 to vector<256x1xf32>
    %51 = arith.divf %49, %50 : vector<256x1xf32>
    %52 = vector.broadcast %51 : vector<256x1xf32> to vector<256x64xf32>
    %53 = arith.subf %45, %52 : vector<256x64xf32>
    %54 = arith.mulf %53, %53 : vector<256x64xf32>
    %cst_30 = arith.constant dense<0.000000e+00> : vector<256xf32>
    %55 = vector.multi_reduction <add>, %54, %cst_30 [1] : vector<256x64xf32> to vector<256xf32>
    %56 = vector.shape_cast %55 : vector<256xf32> to vector<256x1xf32>
    %cst_31 = arith.constant 6.400000e+01 : f32
    %57 = vector.broadcast %cst_31 : f32 to vector<256x1xf32>
    %58 = arith.divf %56, %57 : vector<256x1xf32>
    %59 = vector.broadcast %51 : vector<256x1xf32> to vector<256x64xf32>
    %60 = arith.subf %45, %59 : vector<256x64xf32>
    %cst_32 = arith.constant 9.99999974E-6 : f32
    %61 = vector.broadcast %cst_32 : f32 to vector<256x1xf32>
    %62 = arith.addf %58, %61 : vector<256x1xf32>
    %63 = math.rsqrt %62 : vector<256x1xf32>
    %64 = vector.broadcast %63 : vector<256x1xf32> to vector<256x64xf32>
    %65 = arith.mulf %60, %64 : vector<256x64xf32>
    %66 = vector.broadcast %46 : vector<1x64xf32> to vector<256x64xf32>
    %67 = arith.mulf %65, %66 : vector<256x64xf32>
    %68 = vector.broadcast %47 : vector<1x64xf32> to vector<256x64xf32>
    %69 = arith.addf %67, %68 : vector<256x64xf32>
    %70 = vector.extract_strided_slice %44 {offsets = [0, 64], sizes = [256, 64], strides = [1, 1]} : vector<256x128xf32> to vector<256x64xf32>
    %c0_33 = arith.constant 0 : index
    %c0_34 = arith.constant 0 : index
    %71 = vector.load %arg12[%c0_33, %c0_34] : memref<1x64xf32, #tpu.memory_space<vmem>>, vector<1x64xf32>
    %c0_35 = arith.constant 0 : index
    %c0_36 = arith.constant 0 : index
    %72 = vector.load %arg13[%c0_35, %c0_36] : memref<1x64xf32, #tpu.memory_space<vmem>>, vector<1x64xf32>
    %cst_37 = arith.constant dense<0.000000e+00> : vector<256xf32>
    %73 = vector.multi_reduction <add>, %70, %cst_37 [1] : vector<256x64xf32> to vector<256xf32>
    %74 = vector.shape_cast %73 : vector<256xf32> to vector<256x1xf32>
    %cst_38 = arith.constant 6.400000e+01 : f32
    %75 = vector.broadcast %cst_38 : f32 to vector<256x1xf32>
    %76 = arith.divf %74, %75 : vector<256x1xf32>
    %77 = vector.broadcast %76 : vector<256x1xf32> to vector<256x64xf32>
    %78 = arith.subf %70, %77 : vector<256x64xf32>
    %79 = arith.mulf %78, %78 : vector<256x64xf32>
    %cst_39 = arith.constant dense<0.000000e+00> : vector<256xf32>
    %80 = vector.multi_reduction <add>, %79, %cst_39 [1] : vector<256x64xf32> to vector<256xf32>
    %81 = vector.shape_cast %80 : vector<256xf32> to vector<256x1xf32>
    %cst_40 = arith.constant 6.400000e+01 : f32
    %82 = vector.broadcast %cst_40 : f32 to vector<256x1xf32>
    %83 = arith.divf %81, %82 : vector<256x1xf32>
    %84 = vector.broadcast %76 : vector<256x1xf32> to vector<256x64xf32>
    %85 = arith.subf %70, %84 : vector<256x64xf32>
    %cst_41 = arith.constant 9.99999974E-6 : f32
    %86 = vector.broadcast %cst_41 : f32 to vector<256x1xf32>
    %87 = arith.addf %83, %86 : vector<256x1xf32>
    %88 = math.rsqrt %87 : vector<256x1xf32>
    %89 = vector.broadcast %88 : vector<256x1xf32> to vector<256x64xf32>
    %90 = arith.mulf %85, %89 : vector<256x64xf32>
    %91 = vector.broadcast %71 : vector<1x64xf32> to vector<256x64xf32>
    %92 = arith.mulf %90, %91 : vector<256x64xf32>
    %93 = vector.broadcast %72 : vector<1x64xf32> to vector<256x64xf32>
    %94 = arith.addf %92, %93 : vector<256x64xf32>
    %95 = arith.negf %69 : vector<256x64xf32>
    %96 = math.exp %95 : vector<256x64xf32>
    %cst_42 = arith.constant 1.000000e+00 : f32
    %97 = vector.broadcast %cst_42 : f32 to vector<256x64xf32>
    %98 = arith.addf %97, %96 : vector<256x64xf32>
    %99 = arith.divf %97, %98 : vector<256x64xf32>
    %100 = arith.subf %94, %30 : vector<256x64xf32>
    %101 = arith.mulf %99, %100 : vector<256x64xf32>
    %102 = arith.addf %30, %101 : vector<256x64xf32>
    %c0_43 = arith.constant 0 : index
    %c0_44 = arith.constant 0 : index
    %103 = vector.load %arg14[%c0_43, %c0_44] : memref<32x256xf32, #tpu.memory_space<vmem>>, vector<32x256xf32>
    %cst_45 = arith.constant dense<0.000000e+00> : vector<32x64xf32>
    %104 = tpu.matmul %103, %102, %cst_45 {dimension_numbers = #tpu.dot_dimension_numbers<[1], [0], [0], [1], [0, 0, 1, 1], [], []>, precision = #tpu.contract_precision<fp32>} : vector<32x256xf32>, vector<256x64xf32>, vector<32x64xf32> -> vector<32x64xf32>
    %c0_46 = arith.constant 0 : index
    %c0_47 = arith.constant 0 : index
    %105 = vector.load %arg15[%c0_46, %c0_47] : memref<64x64xf32, #tpu.memory_space<vmem>>, vector<64x64xf32>
    %cst_48 = arith.constant dense<0.000000e+00> : vector<32x64xf32>
    %106 = tpu.matmul %104, %105, %cst_48 {dimension_numbers = #tpu.dot_dimension_numbers<[1], [0], [0], [1], [0, 0, 1, 1], [], []>, precision = #tpu.contract_precision<fp32>} : vector<32x64xf32>, vector<64x64xf32>, vector<32x64xf32> -> vector<32x64xf32>
    %c0_49 = arith.constant 0 : index
    %c0_50 = arith.constant 0 : index
    %107 = vector.load %arg16[%c0_49, %c0_50] : memref<1x64xf32, #tpu.memory_space<vmem>>, vector<1x64xf32>
    %108 = vector.broadcast %107 : vector<1x64xf32> to vector<32x64xf32>
    %109 = arith.addf %106, %108 : vector<32x64xf32>
    %c0_51 = arith.constant 0 : index
    %c0_52 = arith.constant 0 : index
    %110 = vector.load %arg17[%c0_51, %c0_52] : memref<1x64xf32, #tpu.memory_space<vmem>>, vector<1x64xf32>
    %c0_53 = arith.constant 0 : index
    %c0_54 = arith.constant 0 : index
    %111 = vector.load %arg18[%c0_53, %c0_54] : memref<1x64xf32, #tpu.memory_space<vmem>>, vector<1x64xf32>
    %cst_55 = arith.constant dense<0.000000e+00> : vector<32xf32>
    %112 = vector.multi_reduction <add>, %109, %cst_55 [1] : vector<32x64xf32> to vector<32xf32>
    %113 = vector.shape_cast %112 : vector<32xf32> to vector<32x1xf32>
    %cst_56 = arith.constant 6.400000e+01 : f32
    %114 = vector.broadcast %cst_56 : f32 to vector<32x1xf32>
    %115 = arith.divf %113, %114 : vector<32x1xf32>
    %116 = vector.broadcast %115 : vector<32x1xf32> to vector<32x64xf32>
    %117 = arith.subf %109, %116 : vector<32x64xf32>
    %118 = arith.mulf %117, %117 : vector<32x64xf32>
    %cst_57 = arith.constant dense<0.000000e+00> : vector<32xf32>
    %119 = vector.multi_reduction <add>, %118, %cst_57 [1] : vector<32x64xf32> to vector<32xf32>
    %120 = vector.shape_cast %119 : vector<32xf32> to vector<32x1xf32>
    %cst_58 = arith.constant 6.400000e+01 : f32
    %121 = vector.broadcast %cst_58 : f32 to vector<32x1xf32>
    %122 = arith.divf %120, %121 : vector<32x1xf32>
    %123 = vector.broadcast %115 : vector<32x1xf32> to vector<32x64xf32>
    %124 = arith.subf %109, %123 : vector<32x64xf32>
    %cst_59 = arith.constant 9.99999974E-6 : f32
    %125 = vector.broadcast %cst_59 : f32 to vector<32x1xf32>
    %126 = arith.addf %122, %125 : vector<32x1xf32>
    %127 = math.rsqrt %126 : vector<32x1xf32>
    %128 = vector.broadcast %127 : vector<32x1xf32> to vector<32x64xf32>
    %129 = arith.mulf %124, %128 : vector<32x64xf32>
    %130 = vector.broadcast %110 : vector<1x64xf32> to vector<32x64xf32>
    %131 = arith.mulf %129, %130 : vector<32x64xf32>
    %132 = vector.broadcast %111 : vector<1x64xf32> to vector<32x64xf32>
    %133 = arith.addf %131, %132 : vector<32x64xf32>
    %cst_60 = arith.constant 0.000000e+00 : f32
    %134 = vector.broadcast %cst_60 : f32 to vector<32x64xf32>
    %135 = arith.cmpf oge, %133, %134 : vector<32x64xf32>
    %cst_61 = arith.constant 5.000000e-02 : f32
    %136 = vector.broadcast %cst_61 : f32 to vector<32x64xf32>
    %137 = arith.mulf %136, %133 : vector<32x64xf32>
    %138 = arith.select %135, %133, %137 : vector<32x64xi1>, vector<32x64xf32>
    %c0_62 = arith.constant 0 : index
    %c0_63 = arith.constant 0 : index
    %139 = vector.load %arg19[%c0_62, %c0_63] : memref<8x32xf32, #tpu.memory_space<vmem>>, vector<8x32xf32>
    %cst_64 = arith.constant dense<0.000000e+00> : vector<8x64xf32>
    %140 = tpu.matmul %139, %138, %cst_64 {dimension_numbers = #tpu.dot_dimension_numbers<[1], [0], [0], [1], [0, 0, 1, 1], [], []>, precision = #tpu.contract_precision<fp32>} : vector<8x32xf32>, vector<32x64xf32>, vector<8x64xf32> -> vector<8x64xf32>
    %c0_65 = arith.constant 0 : index
    %c0_66 = arith.constant 0 : index
    %141 = vector.load %arg20[%c0_65, %c0_66] : memref<64x16xf32, #tpu.memory_space<vmem>>, vector<64x16xf32>
    %cst_67 = arith.constant dense<0.000000e+00> : vector<8x16xf32>
    %142 = tpu.matmul %140, %141, %cst_67 {dimension_numbers = #tpu.dot_dimension_numbers<[1], [0], [0], [1], [0, 0, 1, 1], [], []>, precision = #tpu.contract_precision<fp32>} : vector<8x64xf32>, vector<64x16xf32>, vector<8x16xf32> -> vector<8x16xf32>
    %c0_68 = arith.constant 0 : index
    %c0_69 = arith.constant 0 : index
    %143 = vector.load %arg21[%c0_68, %c0_69] : memref<1x16xf32, #tpu.memory_space<vmem>>, vector<1x16xf32>
    %144 = vector.broadcast %143 : vector<1x16xf32> to vector<8x16xf32>
    %145 = arith.addf %142, %144 : vector<8x16xf32>
    %c0_70 = arith.constant 0 : index
    %c0_71 = arith.constant 0 : index
    %146 = vector.load %arg22[%c0_70, %c0_71] : memref<1x16xf32, #tpu.memory_space<vmem>>, vector<1x16xf32>
    %c0_72 = arith.constant 0 : index
    %c0_73 = arith.constant 0 : index
    %147 = vector.load %arg23[%c0_72, %c0_73] : memref<1x16xf32, #tpu.memory_space<vmem>>, vector<1x16xf32>
    %cst_74 = arith.constant dense<0.000000e+00> : vector<8xf32>
    %148 = vector.multi_reduction <add>, %145, %cst_74 [1] : vector<8x16xf32> to vector<8xf32>
    %149 = vector.shape_cast %148 : vector<8xf32> to vector<8x1xf32>
    %cst_75 = arith.constant 1.600000e+01 : f32
    %150 = vector.broadcast %cst_75 : f32 to vector<8x1xf32>
    %151 = arith.divf %149, %150 : vector<8x1xf32>
    %152 = vector.broadcast %151 : vector<8x1xf32> to vector<8x16xf32>
    %153 = arith.subf %145, %152 : vector<8x16xf32>
    %154 = arith.mulf %153, %153 : vector<8x16xf32>
    %cst_76 = arith.constant dense<0.000000e+00> : vector<8xf32>
    %155 = vector.multi_reduction <add>, %154, %cst_76 [1] : vector<8x16xf32> to vector<8xf32>
    %156 = vector.shape_cast %155 : vector<8xf32> to vector<8x1xf32>
    %cst_77 = arith.constant 1.600000e+01 : f32
    %157 = vector.broadcast %cst_77 : f32 to vector<8x1xf32>
    %158 = arith.divf %156, %157 : vector<8x1xf32>
    %159 = vector.broadcast %151 : vector<8x1xf32> to vector<8x16xf32>
    %160 = arith.subf %145, %159 : vector<8x16xf32>
    %cst_78 = arith.constant 9.99999974E-6 : f32
    %161 = vector.broadcast %cst_78 : f32 to vector<8x1xf32>
    %162 = arith.addf %158, %161 : vector<8x1xf32>
    %163 = math.rsqrt %162 : vector<8x1xf32>
    %164 = vector.broadcast %163 : vector<8x1xf32> to vector<8x16xf32>
    %165 = arith.mulf %160, %164 : vector<8x16xf32>
    %166 = vector.broadcast %146 : vector<1x16xf32> to vector<8x16xf32>
    %167 = arith.mulf %165, %166 : vector<8x16xf32>
    %168 = vector.broadcast %147 : vector<1x16xf32> to vector<8x16xf32>
    %169 = arith.addf %167, %168 : vector<8x16xf32>
    %cst_79 = arith.constant 0.000000e+00 : f32
    %170 = vector.broadcast %cst_79 : f32 to vector<8x16xf32>
    %171 = arith.cmpf oge, %169, %170 : vector<8x16xf32>
    %cst_80 = arith.constant 5.000000e-02 : f32
    %172 = vector.broadcast %cst_80 : f32 to vector<8x16xf32>
    %173 = arith.mulf %172, %169 : vector<8x16xf32>
    %174 = arith.select %171, %169, %173 : vector<8x16xi1>, vector<8x16xf32>
    %c0_81 = arith.constant 0 : index
    %c0_82 = arith.constant 0 : index
    %175 = vector.load %arg24[%c0_81, %c0_82] : memref<4x8xf32, #tpu.memory_space<vmem>>, vector<4x8xf32>
    %cst_83 = arith.constant dense<0.000000e+00> : vector<4x16xf32>
    %176 = tpu.matmul %175, %174, %cst_83 {dimension_numbers = #tpu.dot_dimension_numbers<[1], [0], [0], [1], [0, 0, 1, 1], [], []>, precision = #tpu.contract_precision<fp32>} : vector<4x8xf32>, vector<8x16xf32>, vector<4x16xf32> -> vector<4x16xf32>
    %c0_84 = arith.constant 0 : index
    %c0_85 = arith.constant 0 : index
    %177 = vector.load %arg25[%c0_84, %c0_85] : memref<16x8xf32, #tpu.memory_space<vmem>>, vector<16x8xf32>
    %cst_86 = arith.constant dense<0.000000e+00> : vector<4x8xf32>
    %178 = tpu.matmul %176, %177, %cst_86 {dimension_numbers = #tpu.dot_dimension_numbers<[1], [0], [0], [1], [0, 0, 1, 1], [], []>, precision = #tpu.contract_precision<fp32>} : vector<4x16xf32>, vector<16x8xf32>, vector<4x8xf32> -> vector<4x8xf32>
    %c0_87 = arith.constant 0 : index
    %c0_88 = arith.constant 0 : index
    %179 = vector.load %arg26[%c0_87, %c0_88] : memref<1x8xf32, #tpu.memory_space<vmem>>, vector<1x8xf32>
    %180 = vector.broadcast %179 : vector<1x8xf32> to vector<4x8xf32>
    %181 = arith.addf %178, %180 : vector<4x8xf32>
    %c0_89 = arith.constant 0 : index
    %c0_90 = arith.constant 0 : index
    %182 = vector.load %arg27[%c0_89, %c0_90] : memref<1x8xf32, #tpu.memory_space<vmem>>, vector<1x8xf32>
    %c0_91 = arith.constant 0 : index
    %c0_92 = arith.constant 0 : index
    %183 = vector.load %arg28[%c0_91, %c0_92] : memref<1x8xf32, #tpu.memory_space<vmem>>, vector<1x8xf32>
    %cst_93 = arith.constant dense<0.000000e+00> : vector<4xf32>
    %184 = vector.multi_reduction <add>, %181, %cst_93 [1] : vector<4x8xf32> to vector<4xf32>
    %185 = vector.shape_cast %184 : vector<4xf32> to vector<4x1xf32>
    %cst_94 = arith.constant 8.000000e+00 : f32
    %186 = vector.broadcast %cst_94 : f32 to vector<4x1xf32>
    %187 = arith.divf %185, %186 : vector<4x1xf32>
    %188 = vector.broadcast %187 : vector<4x1xf32> to vector<4x8xf32>
    %189 = arith.subf %181, %188 : vector<4x8xf32>
    %190 = arith.mulf %189, %189 : vector<4x8xf32>
    %cst_95 = arith.constant dense<0.000000e+00> : vector<4xf32>
    %191 = vector.multi_reduction <add>, %190, %cst_95 [1] : vector<4x8xf32> to vector<4xf32>
    %192 = vector.shape_cast %191 : vector<4xf32> to vector<4x1xf32>
    %cst_96 = arith.constant 8.000000e+00 : f32
    %193 = vector.broadcast %cst_96 : f32 to vector<4x1xf32>
    %194 = arith.divf %192, %193 : vector<4x1xf32>
    %195 = vector.broadcast %187 : vector<4x1xf32> to vector<4x8xf32>
    %196 = arith.subf %181, %195 : vector<4x8xf32>
    %cst_97 = arith.constant 9.99999974E-6 : f32
    %197 = vector.broadcast %cst_97 : f32 to vector<4x1xf32>
    %198 = arith.addf %194, %197 : vector<4x1xf32>
    %199 = math.rsqrt %198 : vector<4x1xf32>
    %200 = vector.broadcast %199 : vector<4x1xf32> to vector<4x8xf32>
    %201 = arith.mulf %196, %200 : vector<4x8xf32>
    %202 = vector.broadcast %182 : vector<1x8xf32> to vector<4x8xf32>
    %203 = arith.mulf %201, %202 : vector<4x8xf32>
    %204 = vector.broadcast %183 : vector<1x8xf32> to vector<4x8xf32>
    %205 = arith.addf %203, %204 : vector<4x8xf32>
    %cst_98 = arith.constant 0.000000e+00 : f32
    %206 = vector.broadcast %cst_98 : f32 to vector<4x8xf32>
    %207 = arith.cmpf oge, %205, %206 : vector<4x8xf32>
    %cst_99 = arith.constant 5.000000e-02 : f32
    %208 = vector.broadcast %cst_99 : f32 to vector<4x8xf32>
    %209 = arith.mulf %208, %205 : vector<4x8xf32>
    %210 = arith.select %207, %205, %209 : vector<4x8xi1>, vector<4x8xf32>
    %c0_100 = arith.constant 0 : index
    %c0_101 = arith.constant 0 : index
    %211 = vector.load %arg29[%c0_100, %c0_101] : memref<8x4xf32, #tpu.memory_space<vmem>>, vector<8x4xf32>
    %cst_102 = arith.constant dense<0.000000e+00> : vector<4x4xf32>
    %212 = tpu.matmul %210, %211, %cst_102 {dimension_numbers = #tpu.dot_dimension_numbers<[1], [0], [0], [1], [0, 0, 1, 1], [], []>, precision = #tpu.contract_precision<fp32>} : vector<4x8xf32>, vector<8x4xf32>, vector<4x4xf32> -> vector<4x4xf32>
    %c0_103 = arith.constant 0 : index
    %c0_104 = arith.constant 0 : index
    %213 = vector.load %arg30[%c0_103, %c0_104] : memref<1x4xf32, #tpu.memory_space<vmem>>, vector<1x4xf32>
    %214 = vector.broadcast %213 : vector<1x4xf32> to vector<4x4xf32>
    %215 = arith.addf %212, %214 : vector<4x4xf32>
    %c0_105 = arith.constant 0 : index
    %c0_106 = arith.constant 0 : index
    %216 = vector.load %arg31[%c0_105, %c0_106] : memref<1x4xf32, #tpu.memory_space<vmem>>, vector<1x4xf32>
    %c0_107 = arith.constant 0 : index
    %c0_108 = arith.constant 0 : index
    %217 = vector.load %arg32[%c0_107, %c0_108] : memref<1x4xf32, #tpu.memory_space<vmem>>, vector<1x4xf32>
    %cst_109 = arith.constant dense<0.000000e+00> : vector<4xf32>
    %218 = vector.multi_reduction <add>, %215, %cst_109 [1] : vector<4x4xf32> to vector<4xf32>
    %219 = vector.shape_cast %218 : vector<4xf32> to vector<4x1xf32>
    %cst_110 = arith.constant 4.000000e+00 : f32
    %220 = vector.broadcast %cst_110 : f32 to vector<4x1xf32>
    %221 = arith.divf %219, %220 : vector<4x1xf32>
    %222 = vector.broadcast %221 : vector<4x1xf32> to vector<4x4xf32>
    %223 = arith.subf %215, %222 : vector<4x4xf32>
    %224 = arith.mulf %223, %223 : vector<4x4xf32>
    %cst_111 = arith.constant dense<0.000000e+00> : vector<4xf32>
    %225 = vector.multi_reduction <add>, %224, %cst_111 [1] : vector<4x4xf32> to vector<4xf32>
    %226 = vector.shape_cast %225 : vector<4xf32> to vector<4x1xf32>
    %cst_112 = arith.constant 4.000000e+00 : f32
    %227 = vector.broadcast %cst_112 : f32 to vector<4x1xf32>
    %228 = arith.divf %226, %227 : vector<4x1xf32>
    %229 = vector.broadcast %221 : vector<4x1xf32> to vector<4x4xf32>
    %230 = arith.subf %215, %229 : vector<4x4xf32>
    %cst_113 = arith.constant 9.99999974E-6 : f32
    %231 = vector.broadcast %cst_113 : f32 to vector<4x1xf32>
    %232 = arith.addf %228, %231 : vector<4x1xf32>
    %233 = math.rsqrt %232 : vector<4x1xf32>
    %234 = vector.broadcast %233 : vector<4x1xf32> to vector<4x4xf32>
    %235 = arith.mulf %230, %234 : vector<4x4xf32>
    %236 = vector.broadcast %216 : vector<1x4xf32> to vector<4x4xf32>
    %237 = arith.mulf %235, %236 : vector<4x4xf32>
    %238 = vector.broadcast %217 : vector<1x4xf32> to vector<4x4xf32>
    %239 = arith.addf %237, %238 : vector<4x4xf32>
    %cst_114 = arith.constant 0.000000e+00 : f32
    %240 = vector.broadcast %cst_114 : f32 to vector<4x4xf32>
    %241 = arith.cmpf oge, %239, %240 : vector<4x4xf32>
    %cst_115 = arith.constant 5.000000e-02 : f32
    %242 = vector.broadcast %cst_115 : f32 to vector<4x4xf32>
    %243 = arith.mulf %242, %239 : vector<4x4xf32>
    %244 = arith.select %241, %239, %243 : vector<4x4xi1>, vector<4x4xf32>
    %c0_116 = arith.constant 0 : index
    %c0_117 = arith.constant 0 : index
    %245 = vector.load %arg33[%c0_116, %c0_117] : memref<2x4xf32, #tpu.memory_space<vmem>>, vector<2x4xf32>
    %cst_118 = arith.constant dense<0.000000e+00> : vector<2x4xf32>
    %246 = tpu.matmul %245, %244, %cst_118 {dimension_numbers = #tpu.dot_dimension_numbers<[1], [0], [0], [1], [0, 0, 1, 1], [], []>, precision = #tpu.contract_precision<fp32>} : vector<2x4xf32>, vector<4x4xf32>, vector<2x4xf32> -> vector<2x4xf32>
    %c0_119 = arith.constant 0 : index
    %c0_120 = arith.constant 0 : index
    %247 = vector.load %arg34[%c0_119, %c0_120] : memref<4x1xf32, #tpu.memory_space<vmem>>, vector<4x1xf32>
    %cst_121 = arith.constant dense<0.000000e+00> : vector<2x1xf32>
    %248 = tpu.matmul %246, %247, %cst_121 {dimension_numbers = #tpu.dot_dimension_numbers<[1], [0], [0], [1], [0, 0, 1, 1], [], []>, precision = #tpu.contract_precision<fp32>} : vector<2x4xf32>, vector<4x1xf32>, vector<2x1xf32> -> vector<2x1xf32>
    %c0_122 = arith.constant 0 : index
    %c0_123 = arith.constant 0 : index
    %249 = vector.load %arg35[%c0_122, %c0_123] : memref<1x1xf32, #tpu.memory_space<vmem>>, vector<1x1xf32>
    %250 = vector.broadcast %249 : vector<1x1xf32> to vector<2x1xf32>
    %251 = arith.addf %248, %250 : vector<2x1xf32>
    %252 = arith.negf %251 : vector<2x1xf32>
    %253 = math.exp %252 : vector<2x1xf32>
    %cst_124 = arith.constant 1.000000e+00 : f32
    %254 = vector.broadcast %cst_124 : f32 to vector<2x1xf32>
    %255 = arith.addf %254, %253 : vector<2x1xf32>
    %256 = arith.divf %254, %255 : vector<2x1xf32>
    %c0_125 = arith.constant 0 : index
    %c0_126 = arith.constant 0 : index
    %257 = vector.load %arg36[%c0_125, %c0_126] : memref<2x1xf32, #tpu.memory_space<vmem>>, vector<2x1xf32>
    tpu.vector_store %arg36[%c0_125, %c0_126], %256 {strides = array<i32>} : memref<2x1xf32, #tpu.memory_space<vmem>>, vector<2x1xf32>,
    return
  }
  func.func @transform_0(%arg0: i32) -> (i32, i32, i32) {
    %c0_i32 = arith.constant 0 : i32
    %c0_i32_0 = arith.constant 0 : i32
    %c0_i32_1 = arith.constant 0 : i32
    return %arg0, %c0_i32, %c0_i32_0 : i32, i32, i32
  }
  func.func @transform_1(%arg0: i32) -> (i32, i32) {
    %c0_i32 = arith.constant 0 : i32
    %c0_i32_0 = arith.constant 0 : i32
    %c0_i32_1 = arith.constant 0 : i32
    return %c0_i32, %c0_i32_0 : i32, i32
  }
  func.func @transform_2(%arg0: i32) -> (i32, i32) {
    %c0_i32 = arith.constant 0 : i32
    %c0_i32_0 = arith.constant 0 : i32
    %c0_i32_1 = arith.constant 0 : i32
    return %c0_i32, %c0_i32_0 : i32, i32
  }
  func.func @transform_3(%arg0: i32) -> (i32, i32) {
    %c0_i32 = arith.constant 0 : i32
    %c0_i32_0 = arith.constant 0 : i32
    %c0_i32_1 = arith.constant 0 : i32
    return %c0_i32, %c0_i32_0 : i32, i32
  }
  func.func @transform_4(%arg0: i32) -> (i32, i32) {
    %c0_i32 = arith.constant 0 : i32
    %c0_i32_0 = arith.constant 0 : i32
    %c0_i32_1 = arith.constant 0 : i32
    return %c0_i32, %c0_i32_0 : i32, i32
  }
  func.func @transform_5(%arg0: i32) -> (i32, i32) {
    %c0_i32 = arith.constant 0 : i32
    %c0_i32_0 = arith.constant 0 : i32
    %c0_i32_1 = arith.constant 0 : i32
    return %c0_i32, %c0_i32_0 : i32, i32
  }
  func.func @transform_6(%arg0: i32) -> (i32, i32) {
    %c0_i32 = arith.constant 0 : i32
    %c0_i32_0 = arith.constant 0 : i32
    %c0_i32_1 = arith.constant 0 : i32
    return %c0_i32, %c0_i32_0 : i32, i32
  }
  func.func @transform_7(%arg0: i32) -> (i32, i32) {
    %c0_i32 = arith.constant 0 : i32
    %c0_i32_0 = arith.constant 0 : i32
    %c0_i32_1 = arith.constant 0 : i32
    return %c0_i32, %c0_i32_0 : i32, i32
  }
  func.func @transform_8(%arg0: i32) -> (i32, i32) {
    %c0_i32 = arith.constant 0 : i32
    %c0_i32_0 = arith.constant 0 : i32
    %c0_i32_1 = arith.constant 0 : i32
    return %c0_i32, %c0_i32_0 : i32, i32
  }
  func.func @transform_9(%arg0: i32) -> (i32, i32) {
    %c0_i32 = arith.constant 0 : i32
    %c0_i32_0 = arith.constant 0 : i32
    %c0_i32_1 = arith.constant 0 : i32
    return %c0_i32, %c0_i32_0 : i32, i32
  }
  func.func @transform_10(%arg0: i32) -> (i32, i32) {
    %c0_i32 = arith.constant 0 : i32
    %c0_i32_0 = arith.constant 0 : i32
    %c0_i32_1 = arith.constant 0 : i32
    return %c0_i32, %c0_i32_0 : i32, i32
  }
  func.func @transform_11(%arg0: i32) -> (i32, i32) {
    %c0_i32 = arith.constant 0 : i32
    %c0_i32_0 = arith.constant 0 : i32
    %c0_i32_1 = arith.constant 0 : i32
    return %c0_i32, %c0_i32_0 : i32, i32
  }
  func.func @transform_12(%arg0: i32) -> (i32, i32) {
    %c0_i32 = arith.constant 0 : i32
    %c0_i32_0 = arith.constant 0 : i32
    %c0_i32_1 = arith.constant 0 : i32
    return %c0_i32, %c0_i32_0 : i32, i32
  }
  func.func @transform_13(%arg0: i32) -> (i32, i32) {
    %c0_i32 = arith.constant 0 : i32
    %c0_i32_0 = arith.constant 0 : i32
    %c0_i32_1 = arith.constant 0 : i32
    return %c0_i32, %c0_i32_0 : i32, i32
  }
  func.func @transform_14(%arg0: i32) -> (i32, i32) {
    %c0_i32 = arith.constant 0 : i32
    %c0_i32_0 = arith.constant 0 : i32
    %c0_i32_1 = arith.constant 0 : i32
    return %c0_i32, %c0_i32_0 : i32, i32
  }
  func.func @transform_15(%arg0: i32) -> (i32, i32) {
    %c0_i32 = arith.constant 0 : i32
    %c0_i32_0 = arith.constant 0 : i32
    %c0_i32_1 = arith.constant 0 : i32
    return %c0_i32, %c0_i32_0 : i32, i32
  }
  func.func @transform_16(%arg0: i32) -> (i32, i32) {
    %c0_i32 = arith.constant 0 : i32
    %c0_i32_0 = arith.constant 0 : i32
    %c0_i32_1 = arith.constant 0 : i32
    return %c0_i32, %c0_i32_0 : i32, i32
  }
  func.func @transform_17(%arg0: i32) -> (i32, i32) {
    %c0_i32 = arith.constant 0 : i32
    %c0_i32_0 = arith.constant 0 : i32
    %c0_i32_1 = arith.constant 0 : i32
    return %c0_i32, %c0_i32_0 : i32, i32
  }
  func.func @transform_18(%arg0: i32) -> (i32, i32) {
    %c0_i32 = arith.constant 0 : i32
    %c0_i32_0 = arith.constant 0 : i32
    %c0_i32_1 = arith.constant 0 : i32
    return %c0_i32, %c0_i32_0 : i32, i32
  }
  func.func @transform_19(%arg0: i32) -> (i32, i32) {
    %c0_i32 = arith.constant 0 : i32
    %c0_i32_0 = arith.constant 0 : i32
    %c0_i32_1 = arith.constant 0 : i32
    return %c0_i32, %c0_i32_0 : i32, i32
  }
  func.func @transform_20(%arg0: i32) -> (i32, i32) {
    %c0_i32 = arith.constant 0 : i32
    %c0_i32_0 = arith.constant 0 : i32
    %c0_i32_1 = arith.constant 0 : i32
    return %c0_i32, %c0_i32_0 : i32, i32
  }
  func.func @transform_21(%arg0: i32) -> (i32, i32) {
    %c0_i32 = arith.constant 0 : i32
    %c0_i32_0 = arith.constant 0 : i32
    %c0_i32_1 = arith.constant 0 : i32
    return %c0_i32, %c0_i32_0 : i32, i32
  }
  func.func @transform_22(%arg0: i32) -> (i32, i32) {
    %c0_i32 = arith.constant 0 : i32
    %c0_i32_0 = arith.constant 0 : i32
    %c0_i32_1 = arith.constant 0 : i32
    return %c0_i32, %c0_i32_0 : i32, i32
  }
  func.func @transform_23(%arg0: i32) -> (i32, i32) {
    %c0_i32 = arith.constant 0 : i32
    %c0_i32_0 = arith.constant 0 : i32
    %c0_i32_1 = arith.constant 0 : i32
    return %c0_i32, %c0_i32_0 : i32, i32
  }
  func.func @transform_24(%arg0: i32) -> (i32, i32) {
    %c0_i32 = arith.constant 0 : i32
    %c0_i32_0 = arith.constant 0 : i32
    %c0_i32_1 = arith.constant 0 : i32
    return %c0_i32, %c0_i32_0 : i32, i32
  }
  func.func @transform_25(%arg0: i32) -> (i32, i32) {
    %c0_i32 = arith.constant 0 : i32
    %c0_i32_0 = arith.constant 0 : i32
    %c0_i32_1 = arith.constant 0 : i32
    return %c0_i32, %c0_i32_0 : i32, i32
  }
  func.func @transform_26(%arg0: i32) -> (i32, i32) {
    %c0_i32 = arith.constant 0 : i32
    %c0_i32_0 = arith.constant 0 : i32
    %c0_i32_1 = arith.constant 0 : i32
    return %c0_i32, %c0_i32_0 : i32, i32
  }
  func.func @transform_27(%arg0: i32) -> (i32, i32) {
    %c0_i32 = arith.constant 0 : i32
    %c0_i32_0 = arith.constant 0 : i32
    %c0_i32_1 = arith.constant 0 : i32
    return %c0_i32, %c0_i32_0 : i32, i32
  }
  func.func @transform_28(%arg0: i32) -> (i32, i32) {
    %c0_i32 = arith.constant 0 : i32
    %c0_i32_0 = arith.constant 0 : i32
    %c0_i32_1 = arith.constant 0 : i32
    return %c0_i32, %c0_i32_0 : i32, i32
  }
  func.func @transform_29(%arg0: i32) -> (i32, i32) {
    %c0_i32 = arith.constant 0 : i32
    %c0_i32_0 = arith.constant 0 : i32
    %c0_i32_1 = arith.constant 0 : i32
    return %c0_i32, %c0_i32_0 : i32, i32
  }
  func.func @transform_30(%arg0: i32) -> (i32, i32) {
    %c0_i32 = arith.constant 0 : i32
    %c0_i32_0 = arith.constant 0 : i32
    %c0_i32_1 = arith.constant 0 : i32
    return %c0_i32, %c0_i32_0 : i32, i32
  }
  func.func @transform_31(%arg0: i32) -> (i32, i32) {
    %c0_i32 = arith.constant 0 : i32
    %c0_i32_0 = arith.constant 0 : i32
    %c0_i32_1 = arith.constant 0 : i32
    return %c0_i32, %c0_i32_0 : i32, i32
  }
  func.func @transform_32(%arg0: i32) -> (i32, i32) {
    %c0_i32 = arith.constant 0 : i32
    %c0_i32_0 = arith.constant 0 : i32
    %c0_i32_1 = arith.constant 0 : i32
    return %c0_i32, %c0_i32_0 : i32, i32
  }
  func.func @transform_33(%arg0: i32) -> (i32, i32) {
    %c0_i32 = arith.constant 0 : i32
    %c0_i32_0 = arith.constant 0 : i32
    %c0_i32_1 = arith.constant 0 : i32
    return %c0_i32, %c0_i32_0 : i32, i32
  }
  func.func @transform_34(%arg0: i32) -> (i32, i32) {
    %c0_i32 = arith.constant 0 : i32
    %c0_i32_0 = arith.constant 0 : i32
    %c0_i32_1 = arith.constant 0 : i32
    return %c0_i32, %c0_i32_0 : i32, i32
  }
  func.func @transform_35(%arg0: i32) -> (i32, i32) {
    %c0_i32 = arith.constant 0 : i32
    %c0_i32_0 = arith.constant 0 : i32
    return %arg0, %c0_i32 : i32, i32
  }
}

</mosaic_0001>

<bundles_post_ra>
// kernel: tpu_custom_call.1
= control target key start
LH: loop header
LB: loop body
LE: loop exit
PB: predicated region body
PF: predicated region fallthrough
CT: control target
= control target key end

     0   :  { %s16199_s3 = smov 3   ;;  %vm191_vm0 = vcmask 261120   ;;  %s16200_s10 = smov 1   ;;  %vm2108_vm1 = vcmask 523264   ;;  %vm16217_vm4 = vmmov 0   ;;  %vm10490_vm9 = vcmask 130048   ;;  %s22276_s0 = inlined_call_operand.smem [shape: u32[36], index: -1, kind: input, shape index: {}] }
   0x1   :  { %s12898_s6 = sld [smem:[%s22276_s0 + %s16199_s3]]   ;;  %s16202_s14 = smov 2   ;;  %vm10523_vm10 = vcmask 64512   ;;  %vm11446_vm12 = vcmask 60416   ;;  %vm11937_vm14 = vcmask 27648   ;;  %vm11970_vm15 = vcmask 31744  }
   0x2   :  { %s16250_s9 = sld [smem:[%s22276_s0]]   ;;  %s16203_s18 = smov 4  }
   0x3   :  { %s16685_s13 = sld [smem:[%s22276_s0 + %s16200_s10]]   ;;  %s16204_s22 = smov 7  }
   0x4   :  { %s16692_s17 = sld [smem:[%s22276_s0 + %s16202_s14]]   ;;  %s16206_s26 = smov 5  }
   0x5   :  { %s12899_s21 = sld [smem:[%s22276_s0 + %s16203_s18]]   ;;  %s16207_s30 = smov 6  }
   0x6   :  { %s17409_s25 = sld [smem:[%s22276_s0 + %s16204_s22]]   ;;  %s16208_s4 = smov 64  }
   0x7   :  { %v180_v0 = vld [vmem:[%s12898_s6] sm:$0xff]  ;;  %v181_v1 = vld [vmem:[%s12898_s6 + $0x8] sm:$0xff]  ;;  %v16252_v2 = vld [vmem:[%s12898_s6 + $0x10] sm:$0xff]  ;;  %s12900_s29 = sld [smem:[%s22276_s0 + %s16206_s26]]   ;;  %s16209_s5 = smov 12  }
   0x8   :  { %v289_v3 = vand.u32 4294901760, %v180_v0  ;;  %v292_v4 = vand.u32 4294901760, %v181_v1  ;;  %v16254_v5 = vld [vmem:[%s12898_s6 + $0x18] sm:$0xff]  ;;  %v295_v6 = vand.u32 4294901760, %v16252_v2  ;;  %v148_v7 = vld [vmem:[%s16250_s9] sm:$0xff]  ;;  %v149_v8 = vld [vmem:[%s16250_s9 + $0x8] sm:$0xff]  ;;  %s12901_s3 = sld [smem:[%s22276_s0 + %s16207_s30]]  }
   0x9   :  { %v298_v9 = vand.u32 4294901760, %v16254_v5  ;;  %v193_v10 = vsel %vm191_vm0, %v148_v7, 0  ;;  %v196_v11 = vsel %vm191_vm0, %v149_v8, 0  ;;  %v150_v12 = vld [vmem:[%s16250_s9 + $0x10] sm:$0xff]  ;;  %v151_v13 = vld [vmem:[%s16250_s9 + $0x18] sm:$0xff]  ;;  %v152_v18 = vld [vmem:[%s16250_s9 + $0x20] sm:$0xff]  ;;  %s12907_s8 = sld [smem:[%s22276_s0 + %s16209_s5]]  }
   0xa   :  { %v16264_v14 = vpack.c.bf16 %v292_v4, %v289_v3  ;;  %v16266_v15 = vand.u32 4294901760, %v193_v10  ;;  %v16268_v16 = vand.u32 4294901760, %v196_v11  ;;  %v199_v17 = vsel %vm191_vm0, %v150_v12, 0  ;;  %v153_v19 = vld [vmem:[%s16250_s9 + $0x28] sm:$0xff]  ;;  %v154_v44 = vld [vmem:[%s16250_s9 + $0x30] sm:$0xff]  ;;  %v155_v49 = vld [vmem:[%s16250_s9 + $0x38] sm:$0xff] }
   0xb   :  { %v16277_v20 = vpack.c.bf16 %v298_v9, %v295_v6  ;;  %v16279_v21 = vand.u32 4294901760, %v199_v17  ;;  %v202_v22 = vsel %vm191_vm0, %v151_v13, 0  ;;  %v16282_v23 = vsub.f32 %v180_v0, %v289_v3  ;;  %v156_v54 = vld [vmem:[%s16250_s9 + $0x40] sm:$0xff]  ;;  %v157_v59 = vld [vmem:[%s16250_s9 + $0x48] sm:$0xff]  ;;  %v158_v60 = vld [vmem:[%s16250_s9 + $0x50] sm:$0xff]  ;;  %s16219_s7 = smov 19  }
   0xc   :  { %14498 = vmatprep.subr.bf16.mxu0 %v16264_v14  ;;  %v16286_v24 = vsub.f32 %v193_v10, %v16266_v15  ;;  %v16289_v25 = vsub.f32 %v196_v11, %v16268_v16  ;;  %v16291_v26 = vand.u32 4294901760, %v202_v22  ;;  %v16293_v27 = vsub.f32 %v181_v1, %v292_v4  ;;  %v159_v8 = vld [vmem:[%s16250_s9 + $0x58] sm:$0xff]  ;;  %s21952_s10 = sld [smem:[%s22276_s0 + %s16219_s7]]   ;;  %s16220_s11 = smov 18  }
   0xd   :  { %14500 = vmatpush3.bf16.msra.mxu0 %v16264_v14  ;;  %v16297_v28 = vsub.f32 %v199_v17, %v16279_v21  ;;  %v22294_v29 = vand.u32 4294901760, %v16282_v23  ;;  %v205_v30 = vsel %vm191_vm0, %v152_v18, 0  ;;  %v208_v31 = vsel %vm191_vm0, %v153_v19, 0  ;;  %v160_v17 = vld [vmem:[%s16250_s9 + $0x60] sm:$0xff]  ;;  %s12913_s14 = sld [smem:[%s22276_s0 + %s16220_s11]]   ;;  %s16221_s15 = smov 16  }
   0xe   :  { %14502 = vmatprep.subr.bf16.mxu0 %v16277_v20  ;;  %v22292_v32 = vand.u32 4294901760, %v16286_v24  ;;  %v22290_v33 = vand.u32 4294901760, %v16289_v25  ;;  %v16306_v34 = vsub.f32 %v202_v22, %v16291_v26  ;;  %v22293_v35 = vand.u32 4294901760, %v16293_v27  ;;  %s12911_s18 = sld [smem:[%s22276_s0 + %s16221_s15]]   ;;  %s16222_s19 = smov 17  }
   0xf   :  { %v22289_v36 = vand.u32 4294901760, %v16297_v28  ;;  %v681_v37 = vsub.f32 %v16282_v23, %v22294_v29  ;;  %v16313_v38 = vand.u32 4294901760, %v205_v30  ;;  %v16315_v39 = vand.u32 4294901760, %v208_v31  ;;  %v170_v29 = vld [vmem:[%s16250_s9 + $0xb0] sm:$0xff]  ;;  %s12912_s22 = sld [smem:[%s22276_s0 + %s16222_s19]]   ;;  %s16223_s23 = smov 20  }
  0x10   :  { %v360_v40 = vsub.f32 %v16286_v24, %v22292_v32  ;;  %v370_v41 = vsub.f32 %v16289_v25, %v22290_v33  ;;  %v22286_v42 = vand.u32 4294901760, %v16306_v34  ;;  %v688_v43 = vsub.f32 %v16293_v27, %v22293_v35  ;;  %v169_v32 = vld [vmem:[%s16250_s9 + $0xa8] sm:$0xff]  ;;  %s12915_s26 = sld [smem:[%s22276_s0 + %s16223_s23]]   ;;  %s16224_s27 = smov 24  }
  0x11   :  { %14504 = vmatpush3.bf16.msra.mxu0 %v16277_v20  ;;  %v380_v45 = vsub.f32 %v16297_v28, %v22289_v36  ;;  %v682_v46 = vand.u32 4294901760, %v681_v37  ;;  %v16333_v47 = vsub.f32 %v205_v30, %v16313_v38  ;;  %v16336_v48 = vsub.f32 %v208_v31, %v16315_v39  ;;  %s12919_s30 = sld [smem:[%s22276_s0 + %s16224_s27]]   ;;  %s16225_s1 = smov 23  }
  0x12   :  { %v361_v50 = vand.u32 4294901760, %v360_v40  ;;  %v371_v51 = vand.u32 4294901760, %v370_v41  ;;  %v390_v52 = vsub.f32 %v16306_v34, %v22286_v42  ;;  %v689_v53 = vand.u32 4294901760, %v688_v43  ;;  %v161_v43 = vld [vmem:[%s16250_s9 + $0x68] sm:$0xff]  ;;  %s16226_s5 = smov 21   ;;  %s16234_s7 = smov 30  }
  0x13   :  { %v381_v55 = vand.u32 4294901760, %v380_v45  ;;  %v22284_v56 = vand.u32 4294901760, %v16333_v47  ;;  %v22283_v57 = vand.u32 4294901760, %v16336_v48  ;;  %v211_v58 = vsel %vm191_vm0, %v154_v44, 0  ;;  %s16235_s11 = smov 31   ;;  %s16236_s15 = smov 33  }
  0x14   :  { %13695 = vmatprep.mubr.f32.mxu0 %v361_v50  ;;  %v391_v61 = vand.u32 4294901760, %v390_v52  ;;  %v14505_v62 = vpack.c.bf16 %v689_v53, %v682_v46  ;;  %v16348_v63 = vand.u32 4294901760, %v211_v58  ;;  %v214_v0 = vsel %vm191_vm0, %v155_v49, 0  ;;  %s16237_s19 = smov 34   ;;  %s16238_s23 = smov 35  }
  0x15   :  { %13696 = vmatmul.mubr.f32.vlgmr.msra.gmra.mrb[0].mxu0 %v371_v51  ;;  %v400_v1 = vsub.f32 %v16333_v47, %v22284_v56  ;;  %v410_v3 = vsub.f32 %v16336_v48, %v22283_v57  ;;  %v16357_v4 = vand.u32 4294901760, %v214_v0  ;;  %v217_v7 = vsel %vm191_vm0, %v156_v54, 0  ;;  %v167_v57 = vld [vmem:[%s16250_s9 + $0x98] sm:$0xff] }
  0x16   :  { %13698 = vmatprep.mubr.f32.mxu0 %v381_v55  ;;  %14506 = vmatprep.subr.bf16.mxu0 %v14505_v62  ;;  %v16362_v10 = vsub.f32 %v211_v58, %v16348_v63  ;;  %v16364_v11 = vand.u32 4294901760, %v217_v7  ;;  %v220_v12 = vsel %vm191_vm0, %v157_v59, 0  ;;  %v223_v13 = vsel %vm191_vm0, %v158_v60, 0  ;;  %v162_v60 = vld [vmem:[%s16250_s9 + $0x70] sm:$0xff] }
  0x17   :  { %v401_v18 = vand.u32 4294901760, %v400_v1  ;;  %14508 = vmatpush3.bf16.msra.mxu0 %v14505_v62  ;;  %v411_v19 = vand.u32 4294901760, %v410_v3  ;;  %v16370_v22 = vsub.f32 %v214_v0, %v16357_v4  ;;  %v16372_v30 = vand.u32 4294901760, %v220_v12 }
  0x18   :  { %22896 = vst [vmem:[#allocation3_spill] sm:$0xff] %v16362_v10  ;;  %v22282_v31 = vand.u32 4294901760, %v16362_v10  ;;  %v16376_v37 = vsub.f32 %v217_v7, %v16364_v11  ;;  %v16378_v40 = vand.u32 4294901760, %v223_v13  ;;  %v226_v41 = vsel %vm191_vm0, %v159_v8, 0 }
  0x19   :  { %22897 = vst [vmem:[#allocation4_spill] sm:$0xff] %v16370_v22  ;;  %13699 = vmatmul.mubr.f32.gmra.mrb[2].mxu0 %v391_v61  ;;  %v22280_v44 = vand.u32 4294901760, %v16370_v22  ;;  %v16384_v45 = vsub.f32 %v220_v12, %v16372_v30  ;;  %v16386_v46 = vand.u32 4294901760, %v226_v41  ;;  %v229_v49 = vsel %vm191_vm0, %v160_v17, 0  ;;  %v164_v17 = vld [vmem:[%s16250_s9 + $0x80] sm:$0xff] }
  0x1a   :  { %22898 = vst [vmem:[#allocation5_spill] sm:$0xff] %v16376_v37  ;;  %13701 = vmatprep.mubr.f32.mxu0 %v401_v18  ;;  %v420_v50 = vsub.f32 %v16362_v10, %v22282_v31  ;;  %v22279_v51 = vand.u32 4294901760, %v16376_v37  ;;  %v16394_v52 = vsub.f32 %v223_v13, %v16378_v40  ;;  %v16396_v53 = vand.u32 4294901760, %v229_v49  ;;  %v163_v13 = vld [vmem:[%s16250_s9 + $0x78] sm:$0xff] }
  0x1b   :  { %22899 = vst [vmem:[#allocation6_spill] sm:$0xff] %v16384_v45  ;;  %v430_v54 = vsub.f32 %v16370_v22, %v22280_v44  ;;  %v22277_v55 = vand.u32 4294901760, %v16384_v45  ;;  %v16403_v58 = vsub.f32 %v226_v41, %v16386_v46  ;;  %v232_v59 = vsel %vm191_vm0, %v161_v43, 0 }
  0x1c   :  { %22900 = vst [vmem:[#allocation7_spill] sm:$0xff] %v16394_v52  ;;  %v421_v61 = vand.u32 4294901760, %v420_v50  ;;  %v440_v62 = vsub.f32 %v16376_v37, %v22279_v51  ;;  %v22278_v0 = vand.u32 4294901760, %v16394_v52  ;;  %v16412_v1 = vsub.f32 %v229_v49, %v16396_v53 }
  0x1d   :  { %22901 = vst [vmem:[#allocation8_spill] sm:$0xff] %v16403_v58  ;;  %13702 = vmatmul.mubr.f32.gmra.mrb[4].mxu0 %v411_v19  ;;  %v431_v3 = vand.u32 4294901760, %v430_v54  ;;  %v450_v7 = vsub.f32 %v16384_v45, %v22277_v55  ;;  %v22281_v8 = vand.u32 4294901760, %v16403_v58  ;;  %v16418_v12 = vand.u32 4294901760, %v232_v59 }
  0x1e   :  { %22902 = vst [vmem:[#allocation9_spill] sm:$0xff] %v16412_v1  ;;  %13704 = vmatprep.mubr.f32.mxu0 %v421_v61  ;;  %v441_v18 = vand.u32 4294901760, %v440_v62  ;;  %v460_v41 = vsub.f32 %v16394_v52, %v22278_v0  ;;  %v22285_v19 = vand.u32 4294901760, %v16412_v1  ;;  %v235_v43 = vsel %vm191_vm0, %v162_v60, 0  ;;  %v165_v61 = vld [vmem:[%s16250_s9 + $0x88] sm:$0xff]  ;;  %v166_v62 = vld [vmem:[%s16250_s9 + $0x90] sm:$0xff] }
  0x1f   :  { %v470_v49 = vsub.f32 %v16403_v58, %v22281_v8  ;;  %v16431_v50 = vsub.f32 %v232_v59, %v16418_v12  ;;  %v16433_v54 = vand.u32 4294901760, %v235_v43  ;;  %v451_v55 = vand.u32 4294901760, %v450_v7 }
  0x20   :  { %v480_v0 = vsub.f32 %v16412_v1, %v22285_v19  ;;  %v238_v51 = vsel %vm191_vm0, %v163_v13, 0  ;;  %v241_v60 = vsel %vm191_vm0, %v164_v17, 0  ;;  %v461_v44 = vand.u32 4294901760, %v460_v41  ;;  %v174_v1 = vld [vmem:[%s16250_s9 + $0xd0] sm:$0xff] }
  0x21   :  { %22903 = vst [vmem:[#allocation10_spill] sm:$0xff] %v16431_v50  ;;  %13705 = vmatmul.mubr.f32.gmra.mrb[6].mxu0 %v431_v3  ;;  %v22287_v8 = vand.u32 4294901760, %v16431_v50  ;;  %v16444_v59 = vsub.f32 %v235_v43, %v16433_v54  ;;  %v16446_v31 = vand.u32 4294901760, %v238_v51  ;;  %v471_v7 = vand.u32 4294901760, %v470_v49 }
  0x22   :  { %13707 = vmatprep.mubr.f32.mxu0 %v441_v18  ;;  %v16449_v56 = vand.u32 4294901760, %v241_v60  ;;  %v244_v19 = vsel %vm191_vm0, %v165_v61, 0  ;;  %v247_v13 = vsel %vm191_vm0, %v166_v62, 0  ;;  %v481_v42 = vand.u32 4294901760, %v480_v0 }
  0x23   :  { %22904 = vst [vmem:[#allocation11_spill] sm:$0xff] %v16444_v59  ;;  %v22288_v3 = vand.u32 4294901760, %v16444_v59  ;;  %v16455_v17 = vsub.f32 %v238_v51, %v16446_v31  ;;  %v16457_v41 = vand.u32 4294901760, %v244_v19  ;;  %v16462_v18 = vand.u32 4294901760, %v247_v13 }
  0x24   :  { %v16460_v43 = vsub.f32 %v241_v60, %v16449_v56  ;;  %v250_v49 = vsel %vm191_vm0, %v167_v57, 0  ;;  %v16468_v61 = vsub.f32 %v16252_v2, %v295_v6  ;;  %v490_v51 = vsub.f32 %v16431_v50, %v22287_v8  ;;  %v168_v8 = vld [vmem:[%s16250_s9 + $0xa0] sm:$0xff]  ;;  %v173_v50 = vld [vmem:[%s16250_s9 + $0xc8] sm:$0xff] }
  0x25   :  { %22905 = vst [vmem:[#allocation12_spill] sm:$0xff] %v16455_v17  ;;  %22907 = vst [vmem:[#allocation14_spill] sm:$0xff] %v16462_v18  ;;  %13708 = vmatmul.mubr.f32.gmra.mrb[8].mxu0 %v451_v55  ;;  %v500_v0 = vsub.f32 %v16444_v59, %v22288_v3  ;;  %v22291_v62 = vand.u32 4294901760, %v16455_v17  ;;  %v16478_v60 = vsub.f32 %v244_v19, %v16457_v41  ;;  %v16484_v6 = vand.u32 4294901760, %v250_v49 }
  0x26   :  { %22906 = vst [vmem:[#allocation13_spill] sm:$0xff] %v16460_v43  ;;  %13710 = vmatprep.mubr.f32.mxu0 %v461_v44  ;;  %v22295_v57 = vand.u32 4294901760, %v16460_v43  ;;  %v16482_v2 = vsub.f32 %v247_v13, %v16462_v18  ;;  %v22300_v55 = vand.u32 4294901760, %v16468_v61  ;;  %v16495_v44 = vsub.f32 %v16254_v5, %v298_v9 }
  0x27   :  { %22908 = vst [vmem:[#allocation15_spill] sm:$0xff] %v16478_v60  ;;  %22910 = vst [vmem:[#allocation17_spill] sm:$0xff] %v16484_v6  ;;  %v510_v3 = vsub.f32 %v16455_v17, %v22291_v62  ;;  %v16502_v33 = vsub.f32 %v250_v49, %v16484_v6  ;;  %v491_v35 = vand.u32 4294901760, %v490_v51  ;;  %v253_v9 = vsel %vm191_vm0, %v168_v8, 0  ;;  %v171_v17 = vld [vmem:[%s16250_s9 + $0xb8] sm:$0xff] }
  0x28   :  { %22909 = vst [vmem:[#allocation16_spill] sm:$0xff] %v16482_v2  ;;  %v520_v19 = vsub.f32 %v16460_v43, %v22295_v57  ;;  %v695_v62 = vsub.f32 %v16468_v61, %v22300_v55  ;;  %v22303_v5 = vand.u32 4294901760, %v16495_v44  ;;  %v501_v57 = vand.u32 4294901760, %v500_v0 }
  0x29   :  { %22911 = vst [vmem:[#allocation18_spill] sm:$0xff] %v16502_v33  ;;  %13711 = vmatmul.mubr.f32.gmra.mrb[10].mxu0 %v471_v7  ;;  %v511_v36 = vand.u32 4294901760, %v510_v3  ;;  %v22912_v49 = vand.u32 4294901760, %v16478_v60  ;;  %v16518_v51 = vand.u32 4294901760, %v253_v9  ;;  %v256_v8 = vsel %vm191_vm0, %v169_v32, 0 }
  0x2a   :  { %13713 = vmatprep.mubr.f32.mxu0 %v481_v42  ;;  %v521_v13 = vand.u32 4294901760, %v520_v19  ;;  %v696_v55 = vand.u32 4294901760, %v695_v62  ;;  %v702_v7 = vsub.f32 %v16495_v44, %v22303_v5  ;;  %v172_v42 = vld [vmem:[%s16250_s9 + $0xc0] sm:$0xff]  ;;  %v22914_v3 = vand.u32 4294901760, %v16482_v2 }
  0x2b   :  { %v530_v43 = vsub.f32 %v16478_v60, %v22912_v49  ;;  %22913 = vst [vmem:[#allocation19_spill] sm:$0xff] %v16518_v51  ;;  %v16526_v49 = vand.u32 4294901760, %v256_v8  ;;  %v259_v60 = vsel %vm191_vm0, %v170_v29, 0  ;;  %v16530_v5 = vsub.f32 %v253_v9, %v16518_v51 }
  0x2c   :  { %v540_v0 = vsub.f32 %v16482_v2, %v22914_v3  ;;  %v703_v62 = vand.u32 4294901760, %v702_v7  ;;  %v16532_v59 = vand.u32 4294901760, %v259_v60  ;;  %v262_v32 = vsel %vm191_vm0, %v171_v17, 0  ;;  %v175_v17 = vld [vmem:[%s16250_s9 + $0xd8] sm:$0xff] }
  0x2d   :  { %22915 = vst [vmem:[#allocation20_spill] sm:$0xff] %v16526_v49  ;;  %13714 = vmatmul.mubr.f32.gmra.mrb[12].mxu0 %v491_v35  ;;  %22916 = vst [vmem:[#allocation21_spill] sm:$0xff] %v16530_v5  ;;  %v531_v3 = vand.u32 4294901760, %v530_v43  ;;  %v16538_v19 = vsub.f32 %v256_v8, %v16526_v49  ;;  %v16540_v2 = vand.u32 4294901760, %v262_v32  ;;  %v265_v29 = vsel %vm191_vm0, %v172_v42, 0 }
  0x2e   :  { %22917 = vst [vmem:[#allocation22_spill] sm:$0xff] %v16532_v59  ;;  %13716 = vmatprep.mubr.f32.mxu0 %v501_v57  ;;  %v14509_v35 = vpack.c.bf16 %v703_v62, %v696_v55  ;;  %v22320_v7 = vand.u32 4294901760, %v16530_v5  ;;  %v16545_v9 = vsub.f32 %v259_v60, %v16532_v59  ;;  %v16547_v58 = vand.u32 4294901760, %v265_v29 }
  0x2f   :  { %22918 = vst [vmem:[#allocation23_spill] sm:$0xff] %v16538_v19  ;;  %22919 = vst [vmem:[#allocation24_spill] sm:$0xff] %v16540_v2  ;;  %v16552_v43 = vsub.f32 %v262_v32, %v16540_v2  ;;  %v268_v57 = vsel %vm191_vm0, %v173_v50, 0  ;;  %v271_v8 = vsel %vm191_vm0, %v174_v1, 0  ;;  %v22923_v55 = vand.u32 4294901760, %v16502_v33 }
  0x30   :  { %22920 = vst [vmem:[#allocation25_spill] sm:$0xff] %v16545_v9  ;;  %22921 = vst [vmem:[#allocation26_spill] sm:$0xff] %v16547_v58  ;;  %14510 = vmatprep.subr.bf16.mxu0 %v14509_v35  ;;  %v16561_v62 = vsub.f32 %v265_v29, %v16547_v58  ;;  %v16563_v52 = vand.u32 4294901760, %v268_v57  ;;  %v541_v32 = vand.u32 4294901760, %v540_v0  ;;  %v16568_v1 = vand.u32 4294901760, %v271_v8 }
  0x31   :  { %22922 = vst [vmem:[#allocation27_spill] sm:$0xff] %v16552_v43  ;;  %13717 = vmatmul.mubr.f32.gmra.mrb[14].mxu0 %v511_v36  ;;  %v550_v42 = vsub.f32 %v16502_v33, %v22923_v55  ;;  %v560_v36 = vsub.f32 %v16530_v5, %v22320_v7  ;;  %v274_v50 = vsel %vm191_vm0, %v175_v17, 0  ;;  %v176_v55 = vld [vmem:[%s16250_s9 + $0xe0] sm:$0xff]  ;;  %v22927_v33 = vand.u32 4294901760, %v16538_v19  ;;  %v177_v7 = vld [vmem:[%s16250_s9 + $0xe8] sm:$0xff] }
  0x32   :  { %22924 = vst [vmem:[#allocation28_spill] sm:$0xff] %v16561_v62  ;;  %22925 = vst [vmem:[#allocation29_spill] sm:$0xff] %v16563_v52  ;;  %13719 = vmatprep.mubr.f32.mxu0 %v521_v13  ;;  %14512 = vmatpush3.bf16.msra.mxu0 %v14509_v35  ;;  %v22928_v29 = vand.u32 4294901760, %v16545_v9  ;;  %v178_v35 = vld [vmem:[%s16250_s9 + $0xf0] sm:$0xff]  ;;  %v16583_v17 = vsub.f32 %v268_v57, %v16563_v52  ;;  %v16585_v37 = vand.u32 4294901760, %v274_v50  ;;  %v280_v0 = vsel %vm191_vm0, %v177_v7, 0 }
  0x33   :  { %22926 = vst [vmem:[#allocation30_spill] sm:$0xff] %v16568_v1  ;;  %v570_v60 = vsub.f32 %v16538_v19, %v22927_v33  ;;  %v551_v5 = vand.u32 4294901760, %v550_v42  ;;  %v277_v33 = vsel %vm191_vm0, %v176_v55, 0  ;;  %v561_v19 = vand.u32 4294901760, %v560_v36 }
  0x34   :  { %v580_v45 = vsub.f32 %v16545_v9, %v22928_v29  ;;  %22929 = vst [vmem:[#allocation31_spill] sm:$0xff] %v16583_v17  ;;  %22930 = vst [vmem:[#allocation32_spill] sm:$0xff] %v16585_v37  ;;  %v16589_v29 = vsub.f32 %v271_v8, %v16568_v1  ;;  %v16591_v9 = vand.u32 4294901760, %v277_v33  ;;  %v283_v13 = vsel %vm191_vm0, %v178_v35, 0 }
  0x35   :  { %13720 = vmatmul.mubr.f32.gmra.mrb[16].mxu0 %v531_v3  ;;  %v179_v3 = vld [vmem:[%s16250_s9 + $0xf8] sm:$0xff]  ;;  %v571_v42 = vand.u32 4294901760, %v570_v60  ;;  %v22932_v57 = vand.u32 4294901760, %v16552_v43  ;;  %v22933_v55 = vand.u32 4294901760, %v16561_v62  ;;  %v22337_v8 = vand.u32 4294901760, %v16583_v17  ;;  %s16210_s9 = smov 11  }
  0x36   :  { %13722 = vmatprep.mubr.f32.mxu0 %v541_v32  ;;  %22931 = vst [vmem:[#allocation33_spill] sm:$0xff] %v16591_v9  ;;  %v581_v22 = vand.u32 4294901760, %v580_v45  ;;  %v16604_v36 = vsub.f32 %v274_v50, %v16585_v37  ;;  %v16606_v7 = vand.u32 4294901760, %v280_v0  ;;  %v14513_v60 = vpack.c.bf16 %v16293_v27, %v16282_v23  ;;  %s12906_s12 = sld [smem:[%s22276_s0 + %s16210_s9]]   ;;  %s16227_s9 = smov 22  }
  0x37   :  { %v590_v10 = vsub.f32 %v16552_v43, %v22932_v57  ;;  %v600_v32 = vsub.f32 %v16561_v62, %v22933_v55  ;;  %v16612_v35 = vsub.f32 %v277_v33, %v16591_v9  ;;  %v16614_v57 = vand.u32 4294901760, %v283_v13 }
  0x38   :  { %22934 = vst [vmem:[#allocation34_spill] sm:$0xff] %v16604_v36  ;;  %22935 = vst [vmem:[#allocation35_spill] sm:$0xff] %v16606_v7  ;;  %14514 = vmatprep.subr.bf16.mxu0 %v14513_v60  ;;  %v610_v50 = vsub.f32 %v16583_v17, %v22337_v8  ;;  %v22340_v62 = vand.u32 4294901760, %v16604_v36  ;;  %v22938_v43 = vand.u32 4294901760, %v16589_v29 }
  0x39   :  { %13723 = vmatmul.mubr.f32.gmra.mrb[18].mxu0 %v551_v5  ;;  %22936 = vst [vmem:[#allocation36_spill] sm:$0xff] %v16614_v57  ;;  %v286_v5 = vsel %vm191_vm0, %v179_v3, 0  ;;  %v591_v55 = vand.u32 4294901760, %v590_v10  ;;  %v601_v33 = vand.u32 4294901760, %v600_v32  ;;  %v22346_v10 = vand.u32 4294901760, %v16612_v35 }
  0x3a   :  { %13725 = vmatprep.mubr.f32.mxu0 %v561_v19  ;;  %v16622_v19 = vsub.f32 %v280_v0, %v16606_v7  ;;  %v16624_v45 = vand.u32 4294901760, %v286_v5  ;;  %v620_v3 = vsub.f32 %v16589_v29, %v22938_v43  ;;  %v611_v8 = vand.u32 4294901760, %v610_v50 }
  0x3b   :  { %v630_v0 = vsub.f32 %v16604_v36, %v22340_v62  ;;  %v640_v43 = vsub.f32 %v16612_v35, %v22346_v10  ;;  %v22952_v10 = vld [vmem:[#allocation15_spill] sm:$0xff] }
  0x3c   :  { %22937 = vst [vmem:[#allocation37_spill] sm:$0xff] %v16624_v45  ;;  %v22345_v17 = vand.u32 4294901760, %v16622_v19  ;;  %v621_v32 = vand.u32 4294901760, %v620_v3 }
  0x3d   :  { %13726 = vmatmul.mubr.f32.gmra.mrb[20].mxu0 %v571_v42  ;;  %v16631_v42 = vsub.f32 %v283_v13, %v16614_v57  ;;  %v641_v36 = vand.u32 4294901760, %v640_v43  ;;  %v2959_v43 = vld [vmem:[%s16692_s17 + $0x8] sm:$0xff] }
  0x3e   :  { %13728 = vmatprep.mubr.f32.mxu0 %v581_v22  ;;  %v16638_v22 = vsub.f32 %v286_v5, %v16624_v45  ;;  %v650_v50 = vsub.f32 %v16622_v19, %v22345_v17  ;;  %v2967_v17 = vld [vmem:[%s16692_s17 + $0x48] sm:$0xff] }
  0x3f   :  { %v22344_v13 = vand.u32 4294901760, %v16631_v42 }
  0x40   :  { %v22343_v62 = vand.u32 4294901760, %v16638_v22 }
  0x41   :  { %13729 = vmatmul.mubr.f32.gmra.mrb[22].mxu0 %v591_v55  ;;  %v631_v55 = vand.u32 4294901760, %v630_v0  ;;  %v660_v5 = vsub.f32 %v16631_v42, %v22344_v13  ;;  %v22950_v13 = vld [vmem:[#allocation12_spill] sm:$0xff] }
  0x42   :  { %13731 = vmatprep.mubr.f32.mxu0 %v601_v33  ;;  %v651_v33 = vand.u32 4294901760, %v650_v50  ;;  %v670_v3 = vsub.f32 %v16638_v22, %v22343_v62  ;;  %v2961_v50 = vld [vmem:[%s16692_s17 + $0x18] sm:$0xff]  ;;  %v2677_v62 = vld [vmem:[%s16685_s13 + $0x40] sm:$0xff] }
  0x44   :  { %v671_v0 = vand.u32 4294901760, %v670_v3  ;;  %v22940_v3 = vand.u32 4294901760, %v16293_v27  ;;  %v2674_v27 = vld [vmem:[%s16685_s13 + $0x28] sm:$0xff] }
  0x45   :  { %13732 = vmatmul.mubr.f32.gmra.mrb[24].mxu0 %v611_v8  ;;  %v661_v8 = vand.u32 4294901760, %v660_v5  ;;  %v2672_v5 = vld [vmem:[%s16685_s13 + $0x18] sm:$0xff] }
  0x46   :  { %13734 = vmatprep.mubr.f32.mxu0 %v621_v32  ;;  %v14517_v32 = vpack.c.bf16 %v16495_v44, %v16468_v61 }
  0x49   :  { %13735 = vmatmul.mubr.f32.gmra.mrb[26].mxu0 %v631_v55  ;;  %v2671_v55 = vld [vmem:[%s16685_s13 + $0x10] sm:$0xff] }
  0x4a   :  { %13737 = vmatprep.mubr.f32.mxu0 %v641_v36  ;;  %v16201_v36 = vmov 0  }
  0x4b   :  { %15858 = vset.pattern.permute.xlu1 %v16201_v36  ;;  %15857 = vset.pattern.permute.xlu0 %v16201_v36  ;;  %v22943_v36 = vld [vmem:[#allocation5_spill] sm:$0xff] }
  0x4d   :  { %13738 = vmatmul.mubr.f32.gmra.mrb[28].mxu0 %v651_v33  ;;  %v22939_v33 = vand.u32 4294901760, %v16282_v23  ;;  %v22941_v23 = vld [vmem:[#allocation3_spill] sm:$0xff] }
  0x4e   :  { %13740 = vmatprep.mubr.f32.mxu0 %v661_v8 }
  0x4f   :  { %v16713_v8 = vpack.c.bf16 %v22940_v3, %v22939_v33  ;;  %v22947_v33 = vld [vmem:[#allocation9_spill] sm:$0xff] }
  0x50   :  { %v2965_v3 = vld [vmem:[%s16692_s17 + $0x38] sm:$0xff] }
  0x51   :  { %13741 = vmatmul.mubr.f32.gmra.mrb[30].mxu0 %v671_v0  ;;  %v2962_v0 = vld [vmem:[%s16692_s17 + $0x20] sm:$0xff] }
  0x52   :  { %13751 = vmatprep.mubr.f32.mxu0 %v16266_v15 }
  0x55   :  { %13752 = vmatmul.mubr.f32.vlgmr.msra.gmra.mrb[0].mxu0 %v16268_v16 }
  0x56   :  { %13754 = vmatprep.mubr.f32.mxu0 %v16279_v21  ;;  %14516 = vmatpush3.bf16.msra.mxu0 %v14513_v60  ;;  %v2669_v60 = vld [vmem:[%s16685_s13] sm:$0xff] }
  0x57   :  { %14518 = vmatprep.subr.bf16.mxu0 %v14517_v32  ;;  %2703 = vperm.xlu1 %15858, %v2669_v60   ;;  %v2964_v60 = vld [vmem:[%s16692_s17 + $0x30] sm:$0xff] }
  0x59   :  { %13755 = vmatmul.mubr.f32.gmra.mrb[2].mxu0 %v16291_v26 }
  0x5a   :  { %13757 = vmatprep.mubr.f32.mxu0 %v16313_v38  ;;  %14520 = vmatpush3.bf16.msra.mxu0 %v14517_v32  ;;  %v22942_v32 = vld [vmem:[#allocation4_spill] sm:$0xff] }
  0x5b   :  { %14522 = vmatprep.subr.bf16.mxu0 %v16264_v14  ;;  %2997 = vperm.xlu1 %15858, %v2959_v43   ;;  %v22944_v43 = vld [vmem:[#allocation6_spill] sm:$0xff] }
  0x5d   :  { %13758 = vmatmul.mubr.f32.gmra.mrb[4].mxu0 %v16315_v39 }
  0x5e   :  { %13760 = vmatprep.mubr.f32.mxu0 %v16348_v63 }
  0x5f   :  { %2713 = vperm.xlu1 %15858, %v2671_v55   ;;  %v22945_v55 = vld [vmem:[#allocation7_spill] sm:$0xff] }
  0x61   :  { %13761 = vmatmul.mubr.f32.gmra.mrb[6].mxu0 %v16357_v4 }
  0x62   :  { %13763 = vmatprep.mubr.f32.mxu0 %v16364_v11 }
  0x63   :  { %3007 = vperm.xlu1 %15858, %v2961_v50   ;;  %v2675_v50 = vld [vmem:[%s16685_s13 + $0x30] sm:$0xff] }
  0x65   :  { %13764 = vmatmul.mubr.f32.gmra.mrb[8].mxu0 %v16372_v30 }
  0x66   :  { %13766 = vmatprep.mubr.f32.mxu0 %v16378_v40 }
  0x67   :  { %2718 = vperm.xlu1 %15858, %v2672_v5   ;;  %v22946_v5 = vld [vmem:[#allocation8_spill] sm:$0xff] }
  0x69   :  { %13767 = vmatmul.mubr.f32.gmra.mrb[10].mxu0 %v16386_v46 }
  0x6a   :  { %13769 = vmatprep.mubr.f32.mxu0 %v16396_v53 }
  0x6b   :  { %3012 = vperm.xlu1 %15858, %v2962_v0   ;;  %v22948_v0 = vld [vmem:[#allocation10_spill] sm:$0xff] }
  0x6d   :  { %13770 = vmatmul.mubr.f32.gmra.mrb[12].mxu0 %v16418_v12 }
  0x6e   :  { %13772 = vmatprep.mubr.f32.mxu0 %v16433_v54 }
  0x6f   :  { %2728 = vperm.xlu1 %15858, %v2674_v27   ;;  %v22949_v27 = vld [vmem:[#allocation11_spill] sm:$0xff] }
  0x71   :  { %13773 = vmatmul.mubr.f32.gmra.mrb[14].mxu0 %v16446_v31 }
  0x72   :  { %13775 = vmatprep.mubr.f32.mxu0 %v16449_v56 }
  0x73   :  { %3022 = vperm.xlu1 %15858, %v2964_v60   ;;  %v22951_v60 = vld [vmem:[#allocation13_spill] sm:$0xff] }
  0x75   :  { %13776 = vmatmul.mubr.f32.gmra.mrb[16].mxu0 %v16457_v41 }
  0x76   :  { %13778 = vmatprep.mubr.f32.mxu0 %v16462_v18  ;;  %v22966_v18 = vand.u32 4294901760, %v16297_v28 }
  0x77   :  { %2733 = vperm.xlu1 %15858, %v2675_v50   ;;  %v22953_v50 = vld [vmem:[#allocation16_spill] sm:$0xff] }
  0x79   :  { %13779 = vmatmul.mubr.f32.gmra.mrb[18].mxu0 %v16484_v6  ;;  %v22965_v6 = vand.u32 4294901760, %v16289_v25 }
  0x7a   :  { %13781 = vmatprep.mubr.f32.mxu0 %v16518_v51 }
  0x7b   :  { %3027 = vperm.xlu1 %15858, %v2965_v3   ;;  %v22955_v3 = vld [vmem:[#allocation21_spill] sm:$0xff] }
  0x7d   :  { %13782 = vmatmul.mubr.f32.gmra.mrb[20].mxu0 %v16526_v49  ;;  %v22964_v49 = vand.u32 4294901760, %v16495_v44  ;;  %v2670_v44 = vld [vmem:[%s16685_s13 + $0x8] sm:$0xff] }
  0x7e   :  { %13784 = vmatprep.mubr.f32.mxu0 %v16532_v59  ;;  %v2972_v59 = vld [vmem:[%s16692_s17 + $0x70] sm:$0xff] }
  0x7f   :  { %2743 = vperm.xlu1 %15858, %v2677_v62   ;;  %v22957_v62 = vld [vmem:[#allocation25_spill] sm:$0xff] }
  0x81   :  { %13785 = vmatmul.mubr.f32.gmra.mrb[22].mxu0 %v16540_v2  ;;  %v22961_v2 = vld [vmem:[#allocation34_spill] sm:$0xff] }
  0x82   :  { %13787 = vmatprep.mubr.f32.mxu0 %v16547_v58  ;;  %v22960_v58 = vld [vmem:[#allocation31_spill] sm:$0xff] }
  0x83   :  { %3037 = vperm.xlu1 %15858, %v2967_v17   ;;  %v22959_v17 = vld [vmem:[#allocation28_spill] sm:$0xff] }
  0x85   :  { %13788 = vmatmul.mubr.f32.gmra.mrb[24].mxu0 %v16563_v52  ;;  %v2969_v52 = vld [vmem:[%s16692_s17 + $0x58] sm:$0xff] }
  0x86   :  { %13790 = vmatprep.mubr.f32.mxu0 %v16568_v1  ;;  %v22958_v1 = vld [vmem:[#allocation27_spill] sm:$0xff] }
  0x89   :  { %13791 = vmatmul.mubr.f32.gmra.mrb[26].mxu0 %v16585_v37  ;;  %v2679_v37 = vld [vmem:[%s16685_s13 + $0x50] sm:$0xff] }
  0x8a   :  { %13793 = vmatprep.mubr.f32.mxu0 %v16591_v9  ;;  %v22956_v9 = vld [vmem:[#allocation23_spill] sm:$0xff] }
  0x8d   :  { %13794 = vmatmul.mubr.f32.gmra.mrb[28].mxu0 %v16606_v7  ;;  %v2968_v7 = vld [vmem:[%s16692_s17 + $0x50] sm:$0xff] }
  0x8e   :  { %13796 = vmatprep.mubr.f32.mxu0 %v16614_v57  ;;  %v22954_v57 = vld [vmem:[#allocation18_spill] sm:$0xff] }
  0x91   :  { %13797 = vmatmul.mubr.f32.gmra.mrb[30].mxu0 %v16624_v45  ;;  %v2678_v45 = vld [vmem:[%s16685_s13 + $0x48] sm:$0xff] }
  0x92   :  { %13807 = vmatprep.mubr.f32.mxu0 %v16286_v24  ;;  %2748 = vperm.xlu1 %15858, %v2678_v45   ;;  %v2680_v45 = vld [vmem:[%s16685_s13 + $0x58] sm:$0xff] }
  0x95   :  { %13808 = vmatmul.mubr.f32.vlgmr.msra.gmra.mrb[0].mxu0 %v16289_v25  ;;  %v22968_v25 = vand.u32 4294901760, %v16333_v47 }
  0x96   :  { %13810 = vmatprep.mubr.f32.mxu0 %v16297_v28  ;;  %14524 = vmatpush3.bf16.msra.mxu0 %v16264_v14  ;;  %v2974_v28 = vld [vmem:[%s16692_s17 + $0x80] sm:$0xff] }
  0x97   :  { %14526 = vmatprep.subr.bf16.mxu0 %v16277_v20  ;;  %3042 = vperm.xlu1 %15858, %v2968_v7   ;;  %v2970_v7 = vld [vmem:[%s16692_s17 + $0x60] sm:$0xff] }
  0x99   :  { %13811 = vmatmul.mubr.f32.gmra.mrb[2].mxu0 %v16306_v34 }
  0x9a   :  { %13813 = vmatprep.mubr.f32.mxu0 %v16333_v47  ;;  %14528 = vmatpush3.bf16.msra.mxu0 %v16277_v20  ;;  %v22971_v47 = vand.u32 4294901760, %v22942_v32 }
  0x9b   :  { %14530 = vmatprep.subr.bf16.mxu0 %v16713_v8  ;;  %2753 = vperm.xlu1 %15858, %v2679_v37   ;;  %v2682_v37 = vld [vmem:[%s16685_s13 + $0x68] sm:$0xff] }
  0x9d   :  { %13814 = vmatmul.mubr.f32.gmra.mrb[4].mxu0 %v16336_v48 }
  0x9e   :  { %13816 = vmatprep.mubr.f32.mxu0 %v22941_v23 }
  0x9f   :  { %3047 = vperm.xlu1 %15858, %v2969_v52   ;;  %v22962_v52 = vand.u32 4294901760, %v16286_v24  ;;  %v2684_v24 = vld [vmem:[%s16685_s13 + $0x78] sm:$0xff] }
  0xa1   :  { %13817 = vmatmul.mubr.f32.gmra.mrb[6].mxu0 %v22942_v32  ;;  %v2688_v32 = vld [vmem:[%s16685_s13 + $0x98] sm:$0xff] }
  0xa2   :  { %13819 = vmatprep.mubr.f32.mxu0 %v22943_v36 }
  0xa3   :  { %2758 = vperm.xlu1 %15858, %v2680_v45   ;;  %v22963_v45 = vand.u32 4294901760, %v16468_v61  ;;  %v22967_v61 = vand.u32 4294901760, %v16306_v34  ;;  %v2960_v34 = vld [vmem:[%s16692_s17 + $0x10] sm:$0xff] }
  0xa5   :  { %13820 = vmatmul.mubr.f32.gmra.mrb[8].mxu0 %v22944_v43  ;;  %v14533_v51 = vpack.c.bf16 %v22964_v49, %v22963_v45  ;;  %v22972_v49 = vand.u32 4294901760, %v22943_v36  ;;  %v2676_v36 = vld [vmem:[%s16685_s13 + $0x38] sm:$0xff]  ;;  %v22976_v45 = vand.u32 4294901760, %v22947_v33 }
  0xa6   :  { %13822 = vmatprep.mubr.f32.mxu0 %v22945_v55 }
  0xa7   :  { %3052 = vperm.xlu1 %15858, %v2970_v7   ;;  %v2958_v7 = vld [vmem:[%s16692_s17] sm:$0xff] }
  0xa8   :  { %2992 = vperm.xlu0 %15857, %v2958_v7   ;;  %v22977_v7 = vand.u32 4294901760, %v22948_v0 }
  0xa9   :  { %13823 = vmatmul.mubr.f32.gmra.mrb[10].mxu0 %v22946_v5 }
  0xaa   :  { %13825 = vmatprep.mubr.f32.mxu0 %v22947_v33  ;;  %v2681_v33 = vld [vmem:[%s16685_s13 + $0x60] sm:$0xff] }
  0xab   :  { %2768 = vperm.xlu1 %15858, %v2682_v37   ;;  %v22974_v37 = vand.u32 4294901760, %v22945_v55  ;;  %v2966_v55 = vld [vmem:[%s16692_s17 + $0x40] sm:$0xff] }
  0xac   :  { %2708 = vperm.xlu0 %15857, %v2670_v44   ;;  %v22980_v44 = vand.u32 4294901760, %v22951_v60 }
  0xad   :  { %13826 = vmatmul.mubr.f32.gmra.mrb[12].mxu0 %v22948_v0  ;;  %v2980_v0 = vld [vmem:[%s16692_s17 + $0xb0] sm:$0xff] }
  0xae   :  { %13828 = vmatprep.mubr.f32.mxu0 %v22949_v27 }
  0xaf   :  { %3062 = vperm.xlu1 %15858, %v2972_v59   ;;  %v22969_v59 = vand.u32 4294901760, %v16336_v48  ;;  %v2976_v48 = vld [vmem:[%s16692_s17 + $0x90] sm:$0xff] }
  0xb0   :  { %3002 = vperm.xlu0 %15857, %v2960_v34   ;;  %v22984_v34 = vand.u32 4294901760, %v22955_v3 }
  0xb1   :  { %13829 = vmatmul.mubr.f32.gmra.mrb[14].mxu0 %v22950_v13 }
  0xb2   :  { %13831 = vmatprep.mubr.f32.mxu0 %v22951_v60  ;;  %v2683_v60 = vld [vmem:[%s16685_s13 + $0x70] sm:$0xff] }
  0xb3   :  { %2778 = vperm.xlu1 %15858, %v2684_v24   ;;  %v22978_v24 = vand.u32 4294901760, %v22949_v27  ;;  %v2971_v27 = vld [vmem:[%s16692_s17 + $0x68] sm:$0xff] }
  0xb5   :  { %13832 = vmatmul.mubr.f32.gmra.mrb[16].mxu0 %v22952_v10 }
  0xb6   :  { %13834 = vmatprep.mubr.f32.mxu0 %v22953_v50 }
  0xb7   :  { %3072 = vperm.xlu1 %15858, %v2974_v28   ;;  %v22982_v28 = vand.u32 4294901760, %v22953_v50  ;;  %v2973_v50 = vld [vmem:[%s16692_s17 + $0x78] sm:$0xff] }
  0xb9   :  { %13835 = vmatmul.mubr.f32.gmra.mrb[18].mxu0 %v22954_v57 }
  0xba   :  { %13837 = vmatprep.mubr.f32.mxu0 %v22955_v3  ;;  %v2685_v3 = vld [vmem:[%s16685_s13 + $0x80] sm:$0xff] }
  0xbd   :  { %13838 = vmatmul.mubr.f32.gmra.mrb[20].mxu0 %v22956_v9 }
  0xbe   :  { %13840 = vmatprep.mubr.f32.mxu0 %v22957_v62 }
  0xc1   :  { %13841 = vmatmul.mubr.f32.gmra.mrb[22].mxu0 %v22958_v1 }
  0xc2   :  { %13843 = vmatprep.mubr.f32.mxu0 %v22959_v17 }
  0xc5   :  { %13844 = vmatmul.mubr.f32.gmra.mrb[24].mxu0 %v22960_v58 }
  0xc6   :  { %13846 = vmatprep.mubr.f32.mxu0 %v16589_v29 }
  0xc9   :  { %13847 = vmatmul.mubr.f32.gmra.mrb[26].mxu0 %v22961_v2 }
  0xca   :  { %13849 = vmatprep.mubr.f32.mxu0 %v16612_v35 }
  0xcd   :  { %13850 = vmatmul.mubr.f32.gmra.mrb[28].mxu0 %v16622_v19 }
  0xce   :  { %13852 = vmatprep.mubr.f32.mxu0 %v16631_v42 }
  0xd1   :  { %13853 = vmatmul.mubr.f32.gmra.mrb[30].mxu0 %v16638_v22 }
  0xd2   :  { %13863 = vmatprep.mubr.f32.mxu0 %v22962_v52  ;;  %v22975_v52 = vand.u32 4294901760, %v22946_v5  ;;  %v2690_v5 = vld [vmem:[%s16685_s13 + $0xa8] sm:$0xff] }
  0xd5   :  { %13864 = vmatmul.mubr.f32.vlgmr.msra.gmra.mrb[0].mxu0 %v22965_v6  ;;  %v2686_v6 = vld [vmem:[%s16685_s13 + $0x88] sm:$0xff] }
  0xd6   :  { %13866 = vmatprep.mubr.f32.mxu0 %v22966_v18  ;;  %14532 = vmatpush3.bf16.msra.mxu0 %v16713_v8  ;;  %v22970_v18 = vand.u32 4294901760, %v22941_v23  ;;  %v22973_v8 = vand.u32 4294901760, %v22944_v43  ;;  %v2963_v23 = vld [vmem:[%s16692_s17 + $0x28] sm:$0xff]  ;;  %v2978_v43 = vld [vmem:[%s16692_s17 + $0xa0] sm:$0xff] }
  0xd7   :  { %14534 = vmatprep.subr.bf16.mxu0 %v14533_v51  ;;  %2788 = vperm.xlu1 %15858, %v2686_v6   ;;  %v22986_v6 = vand.u32 4294901760, %v22957_v62  ;;  %v2975_v62 = vld [vmem:[%s16692_s17 + $0x88] sm:$0xff] }
  0xd9   :  { %13867 = vmatmul.mubr.f32.gmra.mrb[2].mxu0 %v22967_v61  ;;  %v22979_v61 = vand.u32 4294901760, %v22950_v13  ;;  %v2692_v13 = vld [vmem:[%s16685_s13 + $0xb8] sm:$0xff] }
  0xda   :  { %13869 = vmatprep.mubr.f32.mxu0 %v22968_v25  ;;  %14536 = vmatpush3.bf16.msra.mxu0 %v14533_v51  ;;  %v2673_v51 = vld [vmem:[%s16685_s13 + $0x20] sm:$0xff]  ;;  %v22981_v25 = vand.u32 4294901760, %v22952_v10 }
  0xdb   :  { %14538 = vmatprep.subr.bf16.mxu0 %v16264_v14  ;;  %2723 = vperm.xlu0 %15857, %v2673_v51   ;;  %v2982_v10 = vld [vmem:[%s16692_s17 + $0xc0] sm:$0xff]  ;;  %v22988_v51 = vand.u32 4294901760, %v22959_v17  ;;  %v2687_v17 = vld [vmem:[%s16685_s13 + $0x90] sm:$0xff] }
  0xdc   :  { %3082 = vperm.xlu1 %15858, %v2976_v48   ;;  %v22990_v48 = vand.u32 4294901760, %v16589_v29  ;;  %v2977_v29 = vld [vmem:[%s16692_s17 + $0x98] sm:$0xff] }
  0xdd   :  { %13870 = vmatmul.mubr.f32.gmra.mrb[4].mxu0 %v22969_v59  ;;  %v22983_v59 = vand.u32 4294901760, %v22954_v57  ;;  %v2694_v57 = vld [vmem:[%s16685_s13 + $0xc8] sm:$0xff] }
  0xde   :  { %13872 = vmatprep.mubr.f32.mxu0 %v22970_v18  ;;  %v22985_v18 = vand.u32 4294901760, %v22956_v9  ;;  %v2984_v9 = vld [vmem:[%s16692_s17 + $0xd0] sm:$0xff] }
  0xdf   :  { %3017 = vperm.xlu0 %15857, %v2963_v23   ;;  %v22992_v23 = vand.u32 4294901760, %v16612_v35  ;;  %v2979_v35 = vld [vmem:[%s16692_s17 + $0xa8] sm:$0xff] }
  0xe0   :  { %2798 = vperm.xlu1 %15858, %v2688_v32   ;;  %v22994_v32 = vand.u32 4294901760, %v16631_v42  ;;  %v2981_v42 = vld [vmem:[%s16692_s17 + $0xb8] sm:$0xff] }
  0xe1   :  { %13873 = vmatmul.mubr.f32.gmra.mrb[6].mxu0 %v22971_v47  ;;  %v22987_v47 = vand.u32 4294901760, %v22958_v1  ;;  %v2696_v1 = vld [vmem:[%s16685_s13 + $0xd8] sm:$0xff] }
  0xe2   :  { %13875 = vmatprep.mubr.f32.mxu0 %v22972_v49  ;;  %v22989_v49 = vand.u32 4294901760, %v22960_v58  ;;  %v22993_v58 = vand.u32 4294901760, %v16622_v19  ;;  %v2691_v19 = vld [vmem:[%s16685_s13 + $0xb0] sm:$0xff] }
  0xe3   :  { %2738 = vperm.xlu0 %15857, %v2676_v36   ;;  %v2985_v36 = vld [vmem:[%s16692_s17 + $0xd8] sm:$0xff] }
  0xe4   :  { %3092 = vperm.xlu1 %15858, %v2978_v43   ;;  %v22996_v43 = vld [vmem:[#allocation14_spill] sm:$0xff] }
  0xe5   :  { %13876 = vmatmul.mubr.f32.gmra.mrb[8].mxu0 %v22973_v8  ;;  %v22991_v8 = vand.u32 4294901760, %v22961_v2  ;;  %v22995_v2 = vand.u32 4294901760, %v16638_v22  ;;  %v2983_v22 = vld [vmem:[%s16692_s17 + $0xc8] sm:$0xff] }
  0xe6   :  { %13878 = vmatprep.mubr.f32.mxu0 %v22974_v37  ;;  %v2986_v37 = vld [vmem:[%s16692_s17 + $0xe0] sm:$0xff] }
  0xe7   :  { %3032 = vperm.xlu0 %15857, %v2966_v55   ;;  %v22998_v55 = vld [vmem:[#allocation19_spill] sm:$0xff] }
  0xe8   :  { %2808 = vperm.xlu1 %15858, %v2690_v5   ;;  %v23000_v5 = vld [vmem:[#allocation22_spill] sm:$0xff] }
  0xe9   :  { %13879 = vmatmul.mubr.f32.gmra.mrb[10].mxu0 %v22975_v52  ;;  %v2689_v52 = vld [vmem:[%s16685_s13 + $0xa0] sm:$0xff] }
  0xea   :  { %13881 = vmatprep.mubr.f32.mxu0 %v22976_v45  ;;  %v2697_v45 = vld [vmem:[%s16685_s13 + $0xe0] sm:$0xff] }
  0xeb   :  { %2763 = vperm.xlu0 %15857, %v2681_v33   ;;  %v23002_v33 = vld [vmem:[#allocation26_spill] sm:$0xff] }
  0xec   :  { %3102 = vperm.xlu1 %15858, %v2980_v0   ;;  %v23004_v0 = vld [vmem:[#allocation30_spill] sm:$0xff] }
  0xed   :  { %13882 = vmatmul.mubr.f32.gmra.mrb[12].mxu0 %v22977_v7  ;;  %v22997_v7 = vld [vmem:[#allocation17_spill] sm:$0xff] }
  0xee   :  { %13884 = vmatprep.mubr.f32.mxu0 %v22978_v24  ;;  %v22999_v24 = vld [vmem:[#allocation20_spill] sm:$0xff] }
  0xef   :  { %3057 = vperm.xlu0 %15857, %v2971_v27   ;;  %v23006_v27 = vld [vmem:[#allocation33_spill] sm:$0xff] }
  0xf0   :  { %2818 = vperm.xlu1 %15858, %v2692_v13   ;;  %v23008_v13 = vld [vmem:[#allocation36_spill] sm:$0xff] }
  0xf1   :  { %13885 = vmatmul.mubr.f32.gmra.mrb[14].mxu0 %v22979_v61  ;;  %v23001_v61 = vld [vmem:[#allocation24_spill] sm:$0xff] }
  0xf2   :  { %13887 = vmatprep.mubr.f32.mxu0 %v22980_v44  ;;  %v23003_v44 = vld [vmem:[#allocation29_spill] sm:$0xff] }
  0xf3   :  { %2773 = vperm.xlu0 %15857, %v2683_v60  }
  0xf4   :  { %3112 = vperm.xlu1 %15858, %v2982_v10  }
  0xf5   :  { %13888 = vmatmul.mubr.f32.gmra.mrb[16].mxu0 %v22981_v25  ;;  %v23005_v25 = vld [vmem:[#allocation32_spill] sm:$0xff] }
  0xf6   :  { %13890 = vmatprep.mubr.f32.mxu0 %v22982_v28  ;;  %v23007_v28 = vld [vmem:[#allocation35_spill] sm:$0xff] }
  0xf7   :  { %3067 = vperm.xlu0 %15857, %v2973_v50  }
  0xf8   :  { %2828 = vperm.xlu1 %15858, %v2694_v57  }
  0xf9   :  { %13891 = vmatmul.mubr.f32.gmra.mrb[18].mxu0 %v22983_v59  ;;  %v23009_v59 = vld [vmem:[#allocation37_spill] sm:$0xff] }
  0xfa   :  { %13893 = vmatprep.mubr.f32.mxu0 %v22984_v34 }
  0xfb   :  { %2783 = vperm.xlu0 %15857, %v2685_v3  }
  0xfc   :  { %3122 = vperm.xlu1 %15858, %v2984_v9  }
  0xfd   :  { %13894 = vmatmul.mubr.f32.gmra.mrb[20].mxu0 %v22985_v18 }
  0xfe   :  { %13896 = vmatprep.mubr.f32.mxu0 %v22986_v6 }
  0xff   :  { %3077 = vperm.xlu0 %15857, %v2975_v62  }
 0x100   :  { %2838 = vperm.xlu1 %15858, %v2696_v1  }
 0x101   :  { %13897 = vmatmul.mubr.f32.gmra.mrb[22].mxu0 %v22987_v47 }
 0x102   :  { %13899 = vmatprep.mubr.f32.mxu0 %v22988_v51 }
 0x103   :  { %2793 = vperm.xlu0 %15857, %v2687_v17  }
 0x104   :  { %3132 = vperm.xlu1 %15858, %v2986_v37  }
 0x105   :  { %13900 = vmatmul.mubr.f32.gmra.mrb[24].mxu0 %v22989_v49 }
 0x106   :  { %13902 = vmatprep.mubr.f32.mxu0 %v22990_v48 }
 0x107   :  { %3087 = vperm.xlu0 %15857, %v2977_v29  }
 0x109   :  { %13903 = vmatmul.mubr.f32.gmra.mrb[26].mxu0 %v22991_v8 }
 0x10a   :  { %13905 = vmatprep.mubr.f32.mxu0 %v22992_v23 }
 0x10b   :  { %2803 = vperm.xlu0 %15857, %v2689_v52  }
 0x10d   :  { %13906 = vmatmul.mubr.f32.gmra.mrb[28].mxu0 %v22993_v58 }
 0x10e   :  { %13908 = vmatprep.mubr.f32.mxu0 %v22994_v32 }
 0x10f   :  { %3097 = vperm.xlu0 %15857, %v2979_v35  }
 0x111   :  { %13909 = vmatmul.mubr.f32.gmra.mrb[30].mxu0 %v22995_v2 }
 0x112   :  { %13919 = vmatprep.mubr.f32.mxu0 %v16266_v15 }
 0x113   :  { %2813 = vperm.xlu0 %15857, %v2691_v19  }
 0x115   :  { %13920 = vmatmul.mubr.f32.vlgmr.msra.gmra.mrb[0].mxu0 %v16268_v16 }
 0x116   :  { %13922 = vmatprep.mubr.f32.mxu0 %v16279_v21  ;;  %14540 = vmatpush3.bf16.msra.mxu0 %v16264_v14  ;;  %v2693_v14 = vld [vmem:[%s16685_s13 + $0xc0] sm:$0xff] }
 0x117   :  { %14542 = vmatprep.subr.bf16.mxu0 %v16277_v20  ;;  %3107 = vperm.xlu0 %15857, %v2981_v42  }
 0x119   :  { %13923 = vmatmul.mubr.f32.gmra.mrb[2].mxu0 %v16291_v26 }
 0x11a   :  { %13925 = vmatprep.mubr.f32.mxu0 %v16313_v38  ;;  %14544 = vmatpush3.bf16.msra.mxu0 %v16277_v20  ;;  %v2695_v20 = vld [vmem:[%s16685_s13 + $0xd0] sm:$0xff] }
 0x11b   :  { %2823 = vperm.xlu0 %15857, %v2693_v14  }
 0x11d   :  { %13926 = vmatmul.mubr.f32.gmra.mrb[4].mxu0 %v16315_v39 }
 0x11e   :  { %13928 = vmatprep.mubr.f32.mxu0 %v16348_v63 }
 0x11f   :  { %3117 = vperm.xlu0 %15857, %v2983_v22  }
 0x121   :  { %13929 = vmatmul.mubr.f32.gmra.mrb[6].mxu0 %v16357_v4 }
 0x122   :  { %13931 = vmatprep.mubr.f32.mxu0 %v16364_v11 }
 0x123   :  { %2833 = vperm.xlu0 %15857, %v2695_v20  }
 0x125   :  { %13932 = vmatmul.mubr.f32.gmra.mrb[8].mxu0 %v16372_v30 }
 0x126   :  { %13934 = vmatprep.mubr.f32.mxu0 %v16378_v40 }
 0x127   :  { %3127 = vperm.xlu0 %15857, %v2985_v36  }
 0x129   :  { %13935 = vmatmul.mubr.f32.gmra.mrb[10].mxu0 %v16386_v46 }
 0x12a   :  { %13937 = vmatprep.mubr.f32.mxu0 %v16396_v53 }
 0x12b   :  { %2843 = vperm.xlu0 %15857, %v2697_v45  }
 0x12d   :  { %13938 = vmatmul.mubr.f32.gmra.mrb[12].mxu0 %v16418_v12 }
 0x12e   :  { %13940 = vmatprep.mubr.f32.mxu0 %v16433_v54 }
 0x131   :  { %13941 = vmatmul.mubr.f32.gmra.mrb[14].mxu0 %v16446_v31 }
 0x132   :  { %13943 = vmatprep.mubr.f32.mxu0 %v16449_v56 }
 0x135   :  { %13944 = vmatmul.mubr.f32.gmra.mrb[16].mxu0 %v16457_v41 }
 0x136   :  { %13946 = vmatprep.mubr.f32.mxu0 %v22996_v43 }
 0x139   :  { %13947 = vmatmul.mubr.f32.gmra.mrb[18].mxu0 %v22997_v7 }
 0x13a   :  { %13949 = vmatprep.mubr.f32.mxu0 %v22998_v55 }
 0x13d   :  { %13950 = vmatmul.mubr.f32.gmra.mrb[20].mxu0 %v22999_v24 }
 0x13e   :  { %13952 = vmatprep.mubr.f32.mxu0 %v23000_v5 }
 0x141   :  { %13953 = vmatmul.mubr.f32.gmra.mrb[22].mxu0 %v23001_v61 }
 0x142   :  { %13955 = vmatprep.mubr.f32.mxu0 %v23002_v33 }
 0x145   :  { %13956 = vmatmul.mubr.f32.gmra.mrb[24].mxu0 %v23003_v44 }
 0x146   :  { %13958 = vmatprep.mubr.f32.mxu0 %v23004_v0 }
 0x149   :  { %13959 = vmatmul.mubr.f32.gmra.mrb[26].mxu0 %v23005_v25 }
 0x14a   :  { %13961 = vmatprep.mubr.f32.mxu0 %v23006_v27 }
 0x14d   :  { %13962 = vmatmul.mubr.f32.gmra.mrb[28].mxu0 %v23007_v28 }
 0x14e   :  { %13964 = vmatprep.mubr.f32.mxu0 %v23008_v13 }
 0x151   :  { %13965 = vmatmul.mubr.f32.gmra.mrb[30].mxu0 %v23009_v59 }
 0x152   :  { %13975 = vmatprep.mubr.f32.mxu0 %v16266_v15  ;;  %v16936_v15 = vpop.permute.xlu1 %2703 }
 0x153   :  { %23010 = vst [vmem:[#allocation3_spill] sm:$0xff] %v16936_v15 }
 0x155   :  { %13976 = vmatmul.mubr.f32.vlgmr.msra.gmra.mrb[0].mxu0 %v16268_v16 }
 0x156   :  { %13978 = vmatprep.mubr.f32.mxu0 %v16279_v21  ;;  %v16938_v16 = vpop.permute.xlu1 %2997 }
 0x159   :  { %13979 = vmatmul.mubr.f32.gmra.mrb[2].mxu0 %v16291_v26 }
 0x15a   :  { %13981 = vmatprep.mubr.f32.mxu0 %v16313_v38  ;;  %v16940_v21 = vpop.permute.xlu1 %2713 }
 0x15b   :  { %23011 = vst [vmem:[#allocation4_spill] sm:$0xff] %v16940_v21 }
 0x15d   :  { %13982 = vmatmul.mubr.f32.gmra.mrb[4].mxu0 %v16315_v39 }
 0x15e   :  { %13984 = vmatprep.mubr.f32.mxu0 %v16348_v63  ;;  %v16942_v26 = vpop.permute.xlu1 %3007 }
 0x161   :  { %13985 = vmatmul.mubr.f32.gmra.mrb[6].mxu0 %v16357_v4 }
 0x162   :  { %13987 = vmatprep.mubr.f32.mxu0 %v16364_v11  ;;  %v16944_v38 = vpop.permute.xlu1 %2718  ;;  %v16957_v11 = vld [vmem:[%s12899_s21] ss:$0 sm:$0xff]  ;;  %s16213_s21 = smov 10  }
 0x163   :  { %23012 = vst [vmem:[#allocation5_spill] sm:$0xff] %v16944_v38  ;;  %v3356_v38 = vld [vmem:[%s17409_s25 + $0x70] sm:$0xff]  ;;  %s20664_s24 = sld [smem:[%s22276_s0 + %s16213_s21]]   ;;  %s16230_s21 = smov 26  }
 0x165   :  { %13988 = vmatmul.mubr.f32.gmra.mrb[8].mxu0 %v16372_v30 }
 0x166   :  { %13990 = vmatprep.mubr.f32.mxu0 %v16378_v40  ;;  %v16946_v39 = vpop.permute.xlu1 %3012 }
 0x169   :  { %13991 = vmatmul.mubr.f32.gmra.mrb[10].mxu0 %v16386_v46 }
 0x16a   :  { %13993 = vmatprep.mubr.f32.mxu0 %v16396_v53  ;;  %v16964_v53 = vpop.permute.xlu0 %2992 }
 0x16d   :  { %13994 = vmatmul.mubr.f32.gmra.mrb[12].mxu0 %v16418_v12 }
 0x16e   :  { %13996 = vmatprep.mubr.f32.mxu0 %v16433_v54  ;;  %v16983_v47 = vpop.permute.xlu0 %2708 }
 0x16f   :  { %23018 = vst [vmem:[#allocation11_spill] sm:$0xff] %v16983_v47 }
 0x171   :  { %13997 = vmatmul.mubr.f32.gmra.mrb[14].mxu0 %v16446_v31 }
 0x172   :  { %13999 = vmatprep.mubr.f32.mxu0 %v16449_v56  ;;  %v16948_v56 = vpop.permute.xlu1 %2728  ;;  %v17000_v23 = vpop.permute.xlu0 %3002 }
 0x173   :  { %23013 = vst [vmem:[#allocation6_spill] sm:$0xff] %v16948_v56  ;;  %v3354_v56 = vld [vmem:[%s17409_s25 + $0x60] sm:$0xff] }
 0x175   :  { %14000 = vmatmul.mubr.f32.gmra.mrb[16].mxu0 %v16457_v41 }
 0x176   :  { %14002 = vmatprep.mubr.f32.mxu0 %v22996_v43  ;;  %v16950_v63 = vpop.permute.xlu1 %3022  ;;  %v17021_v20 = vpop.permute.xlu0 %2723 }
 0x177   :  { %23014 = vst [vmem:[#allocation7_spill] sm:$0xff] %v16950_v63  ;;  %23021 = vst [vmem:[#allocation15_spill] sm:$0xff] %v17021_v20  ;;  %v3357_v63 = vld [vmem:[%s17409_s25 + $0x78] sm:$0xff] }
 0x179   :  { %14003 = vmatmul.mubr.f32.gmra.mrb[18].mxu0 %v22997_v7 }
 0x17a   :  { %14005 = vmatprep.mubr.f32.mxu0 %v22998_v55  ;;  %v16955_v4 = vpop.permute.xlu1 %2733 }
 0x17b   :  { %23015 = vst [vmem:[#allocation8_spill] sm:$0xff] %v16955_v4 }
 0x17d   :  { %14006 = vmatmul.mubr.f32.gmra.mrb[20].mxu0 %v22999_v24 }
 0x17e   :  { %14008 = vmatprep.mubr.f32.mxu0 %v23000_v5  ;;  %v16959_v31 = vpop.permute.xlu1 %3027 }
 0x17f   :  { %23016 = vst [vmem:[#allocation9_spill] sm:$0xff] %v16959_v31 }
 0x181   :  { %14009 = vmatmul.mubr.f32.gmra.mrb[22].mxu0 %v23001_v61 }
 0x182   :  { %14011 = vmatprep.mubr.f32.mxu0 %v23002_v33  ;;  %v16974_v10 = vpop.permute.xlu1 %2743 }
 0x183   :  { %23017 = vst [vmem:[#allocation10_spill] sm:$0xff] %v16974_v10 }
 0x185   :  { %14012 = vmatmul.mubr.f32.gmra.mrb[24].mxu0 %v23003_v44  ;;  %v17038_v44 = vpop.permute.xlu0 %3017 }
 0x186   :  { %14014 = vmatprep.mubr.f32.mxu0 %v23004_v0  ;;  %v16995_v1 = vpop.permute.xlu1 %3037  ;;  %23023 = vst [vmem:[#allocation18_spill] sm:$0xff] %v17038_v44 }
 0x187   :  { %23019 = vst [vmem:[#allocation12_spill] sm:$0xff] %v16995_v1 }
 0x189   :  { %14015 = vmatmul.mubr.f32.gmra.mrb[26].mxu0 %v23005_v25 }
 0x18a   :  { %14017 = vmatprep.mubr.f32.mxu0 %v23006_v27  ;;  %v17012_v35 = vpop.permute.xlu1 %2748 }
 0x18b   :  { %23020 = vst [vmem:[#allocation13_spill] sm:$0xff] %v17012_v35 }
 0x18d   :  { %14018 = vmatmul.mubr.f32.gmra.mrb[28].mxu0 %v23007_v28 }
 0x18e   :  { %14020 = vmatprep.mubr.f32.mxu0 %v23008_v13  ;;  %v17033_v5 = vpop.permute.xlu1 %3042 }
 0x18f   :  { %23022 = vst [vmem:[#allocation16_spill] sm:$0xff] %v17033_v5 }
 0x191   :  { %14021 = vmatmul.mubr.f32.gmra.mrb[30].mxu0 %v23009_v59 }
 0x228   :  { %v13977_v30 = vpop.f32.mrb[0].mxu0 }
 0x229   :  { %v16962_v40 = vadd.f32 %v13977_v30, %v16957_v11  ;;  %v1916_v46 = vpop.f32.mrb[1].mxu0  ;;  %v17050_v30 = vpop.permute.xlu1 %2753 }
 0x22a   :  { %v16967_v12 = vadd.f32 %v16957_v11, %v1916_v46  ;;  %23024 = vst [vmem:[#allocation21_spill] sm:$0xff] %v17050_v30 }
 0x22b   :  { %v2112_v54 = vsel %vm2108_vm1, %v16962_v40, 0.0 }
 0x22c   :  { %2113 = vadd.xlane.f32.xlu0 %v2112_v54  ;;  %v13980_v41 = vpop.f32.mrb[2].mxu0  ;;  %v2109_v6 = vsel %vm2108_vm1, %v16967_v12, 0.0 }
 0x22d   :  { %v16972_v60 = vadd.f32 %v13980_v41, %v16957_v11  ;;  %v1928_v34 = vpop.f32.mrb[3].mxu0 }
 0x22e   :  { %v16977_v18 = vadd.f32 %v16957_v11, %v1928_v34 }
 0x22f   :  { %v2118_v50 = vsel %vm2108_vm1, %v16972_v60, 0.0 }
 0x230   :  { %2119 = vadd.xlane.f32.xlu1 %v2118_v50  ;;  %v13983_v57 = vpop.f32.mrb[4].mxu0  ;;  %2110 = vadd.xlane.f32.xlu0 %v2109_v6  ;;  %v2115_v49 = vsel %vm2108_vm1, %v16977_v18, 0.0  ;;  %v17059_v50 = vpop.permute.xlu0 %2738 }
 0x231   :  { %v1940_v3 = vpop.f32.mrb[5].mxu0  ;;  %v16989_v9 = vadd.f32 %v13983_v57, %v16957_v11  ;;  %23025 = vst [vmem:[#allocation23_spill] sm:$0xff] %v17059_v50  ;;  %v3348_v50 = vld [vmem:[%s17409_s25 + $0x30] sm:$0xff] }
 0x232   :  { %v16986_v51 = vadd.f32 %v16957_v11, %v1940_v3 }
 0x233   :  { %v2124_v58 = vsel %vm2108_vm1, %v16989_v9, 0.0 }
 0x234   :  { %v13986_v62 = vpop.f32.mrb[6].mxu0  ;;  %2116 = vadd.xlane.f32.xlu1 %v2115_v49  ;;  %v2121_v48 = vsel %vm2108_vm1, %v16986_v51, 0.0 }
 0x235   :  { %v1952_v8 = vpop.f32.mrb[7].mxu0  ;;  %2122 = vadd.xlane.f32.xlu0 %v2121_v48  ;;  %v17003_v37 = vadd.f32 %v13986_v62, %v16957_v11 }
 0x236   :  { %v16998_v17 = vadd.f32 %v16957_v11, %v1952_v8  ;;  %v17071_v8 = vpop.permute.xlu1 %3047 }
 0x237   :  { %v2130_v42 = vsel %vm2108_vm1, %v17003_v37, 0.0  ;;  %23026 = vst [vmem:[#allocation25_spill] sm:$0xff] %v17071_v8 }
 0x238   :  { %v13989_v29 = vpop.f32.mrb[8].mxu0  ;;  %2125 = vadd.xlane.f32.xlu1 %v2124_v58  ;;  %v2127_v32 = vsel %vm2108_vm1, %v16998_v17, 0.0 }
 0x239   :  { %v1964_v2 = vpop.f32.mrb[9].mxu0  ;;  %2128 = vadd.xlane.f32.xlu0 %v2127_v32  ;;  %v17015_v19 = vadd.f32 %v13989_v29, %v16957_v11  ;;  %v17076_v32 = vpop.permute.xlu0 %3032 }
 0x23a   :  { %v17010_v52 = vadd.f32 %v16957_v11, %v1964_v2  ;;  %23027 = vst [vmem:[#allocation27_spill] sm:$0xff] %v17076_v32 }
 0x23b   :  { %v2136_v7 = vsel %vm2108_vm1, %v17015_v19, 0.0 }
 0x23c   :  { %v13992_v14 = vpop.f32.mrb[10].mxu0  ;;  %2131 = vadd.xlane.f32.xlu1 %v2130_v42  ;;  %v2133_v22 = vsel %vm2108_vm1, %v17010_v52, 0.0 }
 0x23d   :  { %v1976_v36 = vpop.f32.mrb[11].mxu0  ;;  %2134 = vadd.xlane.f32.xlu0 %v2133_v22  ;;  %v17027_v43 = vadd.f32 %v13992_v14, %v16957_v11 }
 0x23e   :  { %v17024_v45 = vadd.f32 %v16957_v11, %v1976_v36 }
 0x23f   :  { %v2142_v25 = vsel %vm2108_vm1, %v17027_v43, 0.0 }
 0x240   :  { %v13995_v55 = vpop.f32.mrb[12].mxu0  ;;  %2137 = vadd.xlane.f32.xlu1 %v2136_v7  ;;  %v2139_v24 = vsel %vm2108_vm1, %v17024_v45, 0.0 }
 0x241   :  { %v1988_v61 = vpop.f32.mrb[13].mxu0  ;;  %2140 = vadd.xlane.f32.xlu0 %v2139_v24  ;;  %v17041_v0 = vadd.f32 %v13995_v55, %v16957_v11  ;;  %v17088_v55 = vpop.permute.xlu1 %2758 }
 0x242   :  { %v17036_v33 = vadd.f32 %v16957_v11, %v1988_v61  ;;  %23028 = vst [vmem:[#allocation28_spill] sm:$0xff] %v17088_v55 }
 0x243   :  { %v2148_v54 = vsel %vm2108_vm1, %v17041_v0, 0.0 }
 0x244   :  { %v13998_v27 = vpop.f32.mrb[14].mxu0  ;;  %2143 = vadd.xlane.f32.xlu1 %v2142_v25  ;;  %v2145_v28 = vsel %vm2108_vm1, %v17036_v33, 0.0 }
 0x245   :  { %v17048_v13 = vadd.f32 %v13998_v27, %v16957_v11  ;;  %v2000_v59 = vpop.f32.mrb[15].mxu0  ;;  %2146 = vadd.xlane.f32.xlu0 %v2145_v28  ;;  %v17097_v28 = vpop.permute.xlu0 %2763 }
 0x246   :  { %v17053_v46 = vadd.f32 %v16957_v11, %v2000_v59  ;;  %23029 = vst [vmem:[#allocation31_spill] sm:$0xff] %v17097_v28 }
 0x247   :  { %v2154_v41 = vsel %vm2108_vm1, %v17048_v13, 0.0 }
 0x248   :  { %v14001_v34 = vpop.f32.mrb[16].mxu0  ;;  %2149 = vadd.xlane.f32.xlu1 %v2148_v54  ;;  %v2151_v49 = vsel %vm2108_vm1, %v17053_v46, 0.0 }
 0x249   :  { %v17062_v6 = vadd.f32 %v14001_v34, %v16957_v11  ;;  %v2012_v57 = vpop.f32.mrb[17].mxu0  ;;  %2155 = vadd.xlane.f32.xlu0 %v2154_v41 }
 0x24a   :  { %v17065_v3 = vadd.f32 %v16957_v11, %v2012_v57  ;;  %v17104_v57 = vpop.permute.xlu1 %3052 }
 0x24b   :  { %v2160_v62 = vsel %vm2108_vm1, %v17062_v6, 0.0  ;;  %23030 = vst [vmem:[#allocation34_spill] sm:$0xff] %v17104_v57 }
 0x24c   :  { %v14004_v48 = vpop.f32.mrb[18].mxu0  ;;  %2152 = vadd.xlane.f32.xlu1 %v2151_v49  ;;  %v2157_v42 = vsel %vm2108_vm1, %v17065_v3, 0.0 }
 0x24d   :  { %v17074_v58 = vadd.f32 %v14004_v48, %v16957_v11  ;;  %v2024_v29 = vpop.f32.mrb[19].mxu0  ;;  %2161 = vadd.xlane.f32.xlu0 %v2160_v62  ;;  %v17106_v62 = vpop.permute.xlu0 %3057 }
 0x24e   :  { %v17079_v2 = vadd.f32 %v16957_v11, %v2024_v29  ;;  %23031 = vst [vmem:[#allocation14_spill] sm:$0xff] %v17106_v62 }
 0x24f   :  { %v2166_v14 = vsel %vm2108_vm1, %v17074_v58, 0.0 }
 0x250   :  { %v14007_v22 = vpop.f32.mrb[20].mxu0  ;;  %2158 = vadd.xlane.f32.xlu1 %v2157_v42  ;;  %v2163_v24 = vsel %vm2108_vm1, %v17079_v2, 0.0 }
 0x251   :  { %v17086_v36 = vadd.f32 %v14007_v22, %v16957_v11  ;;  %v2036_v7 = vpop.f32.mrb[21].mxu0  ;;  %2167 = vadd.xlane.f32.xlu0 %v2166_v14 }
 0x252   :  { %v17095_v25 = vadd.f32 %v16957_v11, %v2036_v7 }
 0x253   :  { %v2172_v61 = vsel %vm2108_vm1, %v17086_v36, 0.0 }
 0x254   :  { %v14010_v27 = vpop.f32.mrb[22].mxu0  ;;  %2164 = vadd.xlane.f32.xlu1 %v2163_v24  ;;  %v2169_v34 = vsel %vm2108_vm1, %v17095_v25, 0.0  ;;  %v17119_v24 = vpop.permute.xlu1 %2768 }
 0x255   :  { %v2048_v59 = vpop.f32.mrb[23].mxu0  ;;  %2173 = vadd.xlane.f32.xlu0 %v2172_v61  ;;  %v17100_v54 = vadd.f32 %v14010_v27, %v16957_v11  ;;  %23032 = vst [vmem:[#allocation17_spill] sm:$0xff] %v17119_v24 }
 0x256   :  { %v17109_v48 = vadd.f32 %v16957_v11, %v2048_v59 }
 0x257   :  { %v2178_v42 = vsel %vm2108_vm1, %v17100_v54, 0.0 }
 0x258   :  { %v14013_v41 = vpop.f32.mrb[24].mxu0  ;;  %v2175_v59 = vsel %vm2108_vm1, %v17109_v48, 0.0  ;;  %v17139_v8 = vpop.permute.xlu1 %3062 }
 0x259   :  { %v2060_v49 = vpop.f32.mrb[25].mxu0  ;;  %2170 = vadd.xlane.f32.xlu0 %v2169_v34  ;;  %v17122_v61 = vadd.f32 %v14013_v41, %v16957_v11  ;;  %v17126_v34 = vpop.permute.xlu0 %2773  ;;  %23034 = vst [vmem:[#allocation20_spill] sm:$0xff] %v17139_v8 }
 0x25a   :  { %23033 = vst [vmem:[#allocation19_spill] sm:$0xff] %v17126_v34 }
 0x25b   :  { %v2184_v41 = vsel %vm2108_vm1, %v17122_v61, 0.0 }
 0x25c   :  { %v14016_v29 = vpop.f32.mrb[26].mxu0 }
 0x25d   :  { %v17114_v14 = vadd.f32 %v14016_v29, %v16957_v11  ;;  %v2072_v22 = vpop.f32.mrb[27].mxu0  ;;  %2179 = vadd.xlane.f32.xlu0 %v2178_v42 }
 0x25e   :  { %v17117_v7 = vadd.f32 %v16957_v11, %v2072_v22  ;;  %v17135_v22 = vadd.f32 %v16957_v11, %v2060_v49 }
 0x25f   :  { %v2190_v1 = vsel %vm2108_vm1, %v17114_v14, 0.0 }
 0x260   :  { %v14019_v27 = vpop.f32.mrb[28].mxu0  ;;  %v2181_v49 = vsel %vm2108_vm1, %v17135_v22, 0.0 }
 0x261   :  { %v17129_v62 = vadd.f32 %v14019_v27, %v16957_v11  ;;  %v2084_v29 = vpop.f32.mrb[29].mxu0  ;;  %2176 = vadd.xlane.f32.xlu0 %v2175_v59  ;;  %v17147_v59 = vpop.permute.xlu0 %3067 }
 0x262   :  { %v17132_v42 = vadd.f32 %v16957_v11, %v2084_v29  ;;  %23035 = vst [vmem:[#allocation22_spill] sm:$0xff] %v17147_v59  ;;  %v17151_v29 = vpop.permute.xlu1 %2778 }
 0x263   :  { %23036 = vst [vmem:[#allocation24_spill] sm:$0xff] %v17151_v29 }
 0x264   :  { %v14022_v57 = vpop.f32.mrb[30].mxu0  ;;  %v2193_v59 = vsel %vm2108_vm1, %v17132_v42, 0.0 }
 0x265   :  { %v17142_v24 = vadd.f32 %v14022_v57, %v16957_v11  ;;  %v2096_v5 = vpop.f32.mrb[31].mxu0  ;;  %2185 = vadd.xlane.f32.xlu0 %v2184_v41  ;;  %v17155_v8 = vpop.permute.xlu0 %2783  ;;  %v2187_v57 = vsel %vm2108_vm1, %v17117_v7, 0.0 }
 0x266   :  { %v17145_v27 = vadd.f32 %v16957_v11, %v2096_v5  ;;  %23037 = vst [vmem:[#allocation26_spill] sm:$0xff] %v17155_v8  ;;  %v17159_v41 = vpop.permute.xlu1 %3072  ;;  %v2196_v5 = vsel %vm2108_vm1, %v17129_v62, 0.0 }
 0x267   :  { %23038 = vst [vmem:[#allocation29_spill] sm:$0xff] %v17159_v41 }
 0x269   :  { %2182 = vadd.xlane.f32.xlu0 %v2181_v49  ;;  %v17161_v11 = vpop.permute.xlu0 %3077 }
 0x26a   :  { %23039 = vst [vmem:[#allocation30_spill] sm:$0xff] %v17161_v11  ;;  %v17165_v49 = vpop.permute.xlu1 %2788  ;;  %v2199_v11 = vsel %vm2108_vm1, %v17145_v27, 0.0 }
 0x26b   :  { %23040 = vst [vmem:[#allocation32_spill] sm:$0xff] %v17165_v49 }
 0x26d   :  { %2191 = vadd.xlane.f32.xlu0 %v2190_v1  ;;  %v17169_v29 = vpop.permute.xlu0 %2793  ;;  %v2202_v1 = vsel %vm2108_vm1, %v17142_v24, 0.0 }
 0x26e   :  { %23041 = vst [vmem:[#allocation33_spill] sm:$0xff] %v17169_v29  ;;  %v17173_v8 = vpop.permute.xlu1 %3082 }
 0x26f   :  { %23042 = vst [vmem:[#allocation35_spill] sm:$0xff] %v17173_v8 }
 0x271   :  { %2188 = vadd.xlane.f32.xlu0 %v2187_v57  ;;  %v17175_v57 = vpop.permute.xlu0 %3087 }
 0x272   :  { %23043 = vst [vmem:[#allocation36_spill] sm:$0xff] %v17175_v57 }
 0x275   :  { %2197 = vadd.xlane.f32.xlu0 %v2196_v5  ;;  %v17179_v5 = vpop.permute.xlu1 %2798  ;;  %v17181_v41 = vpop.permute.xlu0 %2803 }
 0x276   :  { %23044 = vst [vmem:[#allocation37_spill] sm:$0xff] %v17179_v5  ;;  %23045 = vst [vmem:[#allocation38_spill] sm:$0xff] %v17181_v41 }
 0x279   :  { %2194 = vadd.xlane.f32.xlu0 %v2193_v59  ;;  %v17183_v49 = vpop.permute.xlu1 %3092  ;;  %v17185_v29 = vpop.permute.xlu0 %3097 }
 0x27a   :  { %23046 = vst [vmem:[#allocation39_spill] sm:$0xff] %v17183_v49  ;;  %23047 = vst [vmem:[#allocation40_spill] sm:$0xff] %v17185_v29 }
 0x27d   :  { %2203 = vadd.xlane.f32.xlu0 %v2202_v1  ;;  %v17187_v59 = vpop.permute.xlu1 %2808  ;;  %v17189_v55 = vpop.permute.xlu0 %2813 }
 0x27e   :  { %23048 = vst [vmem:[#allocation41_spill] sm:$0xff] %v17187_v59  ;;  %23049 = vst [vmem:[#allocation42_spill] sm:$0xff] %v17189_v55 }
 0x281   :  { %2200 = vadd.xlane.f32.xlu0 %v2199_v11  ;;  %v17191_v8 = vpop.permute.xlu1 %3102  ;;  %v17193_v1 = vpop.permute.xlu0 %3107 }
 0x282   :  { %23050 = vst [vmem:[#allocation43_spill] sm:$0xff] %v17191_v8  ;;  %23051 = vst [vmem:[#allocation44_spill] sm:$0xff] %v17193_v1 }
 0x285   :  { %v17195_v57 = vpop.permute.xlu1 %2818  ;;  %v17197_v34 = vpop.permute.xlu0 %2823 }
 0x286   :  { %23052 = vst [vmem:[#allocation45_spill] sm:$0xff] %v17195_v57  ;;  %23053 = vst [vmem:[#allocation46_spill] sm:$0xff] %v17197_v34 }
 0x289   :  { %v17199_v11 = vpop.permute.xlu1 %3112  ;;  %v17201_v5 = vpop.permute.xlu0 %3117 }
 0x28a   :  { %23054 = vst [vmem:[#allocation47_spill] sm:$0xff] %v17199_v11  ;;  %23055 = vst [vmem:[#allocation48_spill] sm:$0xff] %v17201_v5 }
 0x28d   :  { %v17203_v41 = vpop.permute.xlu1 %2828  ;;  %v17205_v49 = vpop.permute.xlu0 %2833 }
 0x28e   :  { %23056 = vst [vmem:[#allocation49_spill] sm:$0xff] %v17203_v41  ;;  %23057 = vst [vmem:[#allocation50_spill] sm:$0xff] %v17205_v49 }
 0x291   :  { %v17207_v29 = vpop.permute.xlu1 %3122  ;;  %v17209_v59 = vpop.permute.xlu0 %3127 }
 0x292   :  { %23058 = vst [vmem:[#allocation51_spill] sm:$0xff] %v17207_v29  ;;  %23059 = vst [vmem:[#allocation52_spill] sm:$0xff] %v17209_v59 }
 0x295   :  { %v17211_v55 = vpop.permute.xlu1 %2838  ;;  %v17213_v8 = vpop.permute.xlu0 %2843 }
 0x296   :  { %23060 = vst [vmem:[#allocation53_spill] sm:$0xff] %v17211_v55  ;;  %23061 = vst [vmem:[#allocation54_spill] sm:$0xff] %v17213_v8 }
 0x299   :  { %v17215_v1 = vpop.permute.xlu1 %3132 }
 0x29a   :  { %23062 = vst [vmem:[#allocation55_spill] sm:$0xff] %v17215_v1 }
 0x2b9   :  { %v2114_v57 = vpop.xlane.xlu0 %2113 }
 0x2ba   :  { %v2207_v34 = vmul.f32 0.015625, %v2114_v57 }
 0x2bc   :  { %v17218_v11 = vsub.f32 %v16962_v40, %v2207_v34 }
 0x2bd   :  { %v2120_v5 = vpop.xlane.xlu1 %2119  ;;  %v2111_v28 = vpop.xlane.xlu0 %2110 }
 0x2be   :  { %v2209_v41 = vmul.f32 0.015625, %v2120_v5  ;;  %v2206_v35 = vmul.f32 0.015625, %v2111_v28  ;;  %v2271_v49 = vmul.f32 %v17218_v11, %v17218_v11 }
 0x2c0   :  { %v17223_v59 = vsub.f32 %v16972_v60, %v2209_v41  ;;  %v17226_v55 = vsub.f32 %v16967_v12, %v2206_v35  ;;  %v2305_v8 = vsel %vm2108_vm1, %v2271_v49, 0.0 }
 0x2c1   :  { %2306 = vadd.xlane.f32.xlu1 %v2305_v8  ;;  %v2117_v57 = vpop.xlane.xlu1 %2116 }
 0x2c2   :  { %v2208_v1 = vmul.f32 0.015625, %v2117_v57  ;;  %v2123_v40 = vpop.xlane.xlu0 %2122  ;;  %v2270_v34 = vmul.f32 %v17226_v55, %v17226_v55  ;;  %v2273_v60 = vmul.f32 %v17223_v59, %v17223_v59 }
 0x2c3   :  { %v2210_v49 = vmul.f32 0.015625, %v2123_v40 }
 0x2c4   :  { %v17232_v28 = vsub.f32 %v16977_v18, %v2208_v1  ;;  %v2302_v5 = vsel %vm2108_vm1, %v2270_v34, 0.0  ;;  %v2311_v57 = vsel %vm2108_vm1, %v2273_v60, 0.0 }
 0x2c5   :  { %v2126_v41 = vpop.xlane.xlu1 %2125  ;;  %2303 = vadd.xlane.f32.xlu1 %v2302_v5  ;;  %v17244_v34 = vsub.f32 %v16986_v51, %v2210_v49 }
 0x2c6   :  { %v2211_v12 = vmul.f32 0.015625, %v2126_v41  ;;  %v2129_v35 = vpop.xlane.xlu0 %2128  ;;  %v2272_v29 = vmul.f32 %v17232_v28, %v17232_v28 }
 0x2c8   :  { %v17238_v8 = vsub.f32 %v16989_v9, %v2211_v12  ;;  %v2308_v5 = vsel %vm2108_vm1, %v2272_v29, 0.0  ;;  %v2212_v12 = vmul.f32 0.015625, %v2129_v35 }
 0x2c9   :  { %v2132_v18 = vpop.xlane.xlu1 %2131  ;;  %2312 = vadd.xlane.f32.xlu1 %v2311_v57  ;;  %v2274_v57 = vmul.f32 %v17244_v34, %v17244_v34 }
 0x2ca   :  { %v2135_v1 = vpop.xlane.xlu0 %2134  ;;  %v2213_v15 = vmul.f32 0.015625, %v2132_v18  ;;  %v2275_v40 = vmul.f32 %v17238_v8, %v17238_v8  ;;  %v17256_v29 = vsub.f32 %v16998_v17, %v2212_v12 }
 0x2cc   :  { %v17250_v60 = vsub.f32 %v17003_v37, %v2213_v15  ;;  %v2317_v32 = vsel %vm2108_vm1, %v2275_v40, 0.0  ;;  %v2276_v12 = vmul.f32 %v17256_v29, %v17256_v29 }
 0x2cd   :  { %2309 = vadd.xlane.f32.xlu1 %v2308_v5  ;;  %v2138_v41 = vpop.xlane.xlu1 %2137  ;;  %v2314_v5 = vsel %vm2108_vm1, %v2274_v57, 0.0 }
 0x2ce   :  { %v2141_v9 = vpop.xlane.xlu0 %2140  ;;  %v2215_v18 = vmul.f32 0.015625, %v2138_v41  ;;  %v2277_v35 = vmul.f32 %v17250_v60, %v17250_v60 }
 0x2d0   :  { %v17267_v17 = vsub.f32 %v17015_v19, %v2215_v18  ;;  %v2323_v41 = vsel %vm2108_vm1, %v2277_v35, 0.0  ;;  %v2320_v35 = vsel %vm2108_vm1, %v2276_v12, 0.0 }
 0x2d1   :  { %2318 = vadd.xlane.f32.xlu1 %v2317_v32  ;;  %v2144_v30 = vpop.xlane.xlu1 %2143 }
 0x2d2   :  { %v2147_v51 = vpop.xlane.xlu0 %2146  ;;  %v2217_v18 = vmul.f32 0.015625, %v2144_v30 }
 0x2d3   :  { %v2218_v49 = vmul.f32 0.015625, %v2147_v51  ;;  %v2214_v51 = vmul.f32 0.015625, %v2135_v1 }
 0x2d4   :  { %v17291_v30 = vsub.f32 %v17027_v43, %v2217_v18 }
 0x2d5   :  { %v17262_v15 = vsub.f32 %v17036_v33, %v2218_v49  ;;  %2315 = vadd.xlane.f32.xlu1 %v2314_v5  ;;  %v2150_v5 = vpop.xlane.xlu1 %2149  ;;  %v17279_v19 = vsub.f32 %v17010_v52, %v2214_v51  ;;  %v2216_v52 = vmul.f32 0.015625, %v2141_v9 }
 0x2d6   :  { %v2156_v37 = vpop.xlane.xlu0 %2155  ;;  %v2219_v18 = vmul.f32 0.015625, %v2150_v5 }
 0x2d7   :  { %v2221_v40 = vmul.f32 0.015625, %v2156_v37  ;;  %v2282_v32 = vmul.f32 %v17262_v15, %v17262_v15  ;;  %v2278_v12 = vmul.f32 %v17279_v19, %v17279_v19  ;;  %v17303_v43 = vsub.f32 %v17024_v45, %v2216_v52 }
 0x2d9   :  { %v17273_v57 = vsub.f32 %v17048_v13, %v2221_v40  ;;  %2324 = vadd.xlane.f32.xlu1 %v2323_v41  ;;  %v2338_v33 = vsel %vm2108_vm1, %v2282_v32, 0.0  ;;  %v2279_v13 = vmul.f32 %v17267_v17, %v17267_v17  ;;  %v2280_v45 = vmul.f32 %v17303_v43, %v17303_v43 }
 0x2da   :  { %2339 = vadd.xlane.f32.xlu0 %v2338_v33  ;;  %v2162_v49 = vpop.xlane.xlu0 %2161 }
 0x2db   :  { %v2223_v37 = vmul.f32 0.015625, %v2162_v49  ;;  %v2285_v1 = vmul.f32 %v17273_v57, %v17273_v57  ;;  %v2329_v51 = vsel %vm2108_vm1, %v2279_v13, 0.0  ;;  %v2326_v13 = vsel %vm2108_vm1, %v2278_v12, 0.0 }
 0x2dd   :  { %v17285_v40 = vsub.f32 %v17062_v6, %v2223_v37  ;;  %2321 = vadd.xlane.f32.xlu1 %v2320_v35  ;;  %v2347_v32 = vsel %vm2108_vm1, %v2285_v1, 0.0  ;;  %v2153_v6 = vpop.xlane.xlu1 %2152 }
 0x2de   :  { %2348 = vadd.xlane.f32.xlu0 %v2347_v32  ;;  %v2168_v41 = vpop.xlane.xlu0 %2167  ;;  %v2281_v32 = vmul.f32 %v17291_v30, %v17291_v30 }
 0x2df   :  { %v2225_v33 = vmul.f32 0.015625, %v2168_v41  ;;  %v2287_v49 = vmul.f32 %v17285_v40, %v17285_v40 }
 0x2e1   :  { %v17297_v37 = vsub.f32 %v17074_v58, %v2225_v33  ;;  %2330 = vadd.xlane.f32.xlu1 %v2329_v51  ;;  %v2353_v1 = vsel %vm2108_vm1, %v2287_v49, 0.0  ;;  %v2159_v33 = vpop.xlane.xlu1 %2158  ;;  %v17310_v49 = vsub.f32 %v17041_v0, %v2219_v18  ;;  %v2220_v51 = vmul.f32 0.015625, %v2153_v6 }
 0x2e2   :  { %2354 = vadd.xlane.f32.xlu0 %v2353_v1  ;;  %v2174_v35 = vpop.xlane.xlu0 %2173  ;;  %v2335_v1 = vsel %vm2108_vm1, %v2281_v32, 0.0 }
 0x2e3   :  { %v2289_v9 = vmul.f32 %v17297_v37, %v17297_v37  ;;  %v17316_v12 = vsub.f32 %v17053_v46, %v2220_v51 }
 0x2e5   :  { %2327 = vadd.xlane.f32.xlu1 %v2326_v13  ;;  %v2359_v58 = vsel %vm2108_vm1, %v2289_v9, 0.0  ;;  %v2222_v13 = vmul.f32 0.015625, %v2159_v33  ;;  %v2332_v9 = vsel %vm2108_vm1, %v2280_v45, 0.0  ;;  %v2165_v0 = vpop.xlane.xlu1 %2164  ;;  %v2284_v51 = vmul.f32 %v17316_v12, %v17316_v12 }
 0x2e6   :  { %2360 = vadd.xlane.f32.xlu0 %v2359_v58  ;;  %v2171_v41 = vpop.xlane.xlu0 %2170  ;;  %v2283_v58 = vmul.f32 %v17310_v49, %v17310_v49  ;;  %v2224_v46 = vmul.f32 0.015625, %v2165_v0 }
 0x2e8   :  { %v2341_v33 = vsel %vm2108_vm1, %v2283_v58, 0.0 }
 0x2e9   :  { %2336 = vadd.xlane.f32.xlu1 %v2335_v1  ;;  %v17327_v1 = vsub.f32 %v17065_v3, %v2222_v13 }
 0x2ea   :  { %v2180_v5 = vpop.xlane.xlu0 %2179 }
 0x2eb   :  { %v2229_v52 = vmul.f32 0.015625, %v2180_v5  ;;  %v17334_v5 = vsub.f32 %v17079_v2, %v2224_v46  ;;  %v2286_v3 = vmul.f32 %v17327_v1, %v17327_v1 }
 0x2ed   :  { %v17322_v6 = vsub.f32 %v17100_v54, %v2229_v52  ;;  %2333 = vadd.xlane.f32.xlu1 %v2332_v9  ;;  %v2227_v52 = vmul.f32 0.015625, %v2174_v35  ;;  %v2344_v9 = vsel %vm2108_vm1, %v2284_v51, 0.0 }
 0x2ee   :  { %v2177_v18 = vpop.xlane.xlu0 %2176 }
 0x2ef   :  { %v2293_v32 = vmul.f32 %v17322_v6, %v17322_v6  ;;  %v17340_v0 = vsub.f32 %v17086_v36, %v2227_v52  ;;  %v2228_v36 = vmul.f32 0.015625, %v2177_v18 }
 0x2f1   :  { %2342 = vadd.xlane.f32.xlu1 %v2341_v33  ;;  %v2371_v45 = vsel %vm2108_vm1, %v2293_v32, 0.0  ;;  %v2226_v33 = vmul.f32 0.015625, %v2171_v41  ;;  %v2350_v32 = vsel %vm2108_vm1, %v2286_v3, 0.0  ;;  %v2291_v52 = vmul.f32 %v17340_v0, %v17340_v0 }
 0x2f2   :  { %2372 = vadd.xlane.f32.xlu0 %v2371_v45  ;;  %v2186_v54 = vpop.xlane.xlu0 %2185  ;;  %v2288_v45 = vmul.f32 %v17334_v5, %v17334_v5 }
 0x2f3   :  { %v2231_v18 = vmul.f32 0.015625, %v2186_v54 }
 0x2f4   :  { %v2356_v41 = vsel %vm2108_vm1, %v2288_v45, 0.0 }
 0x2f5   :  { %2345 = vadd.xlane.f32.xlu1 %v2344_v9  ;;  %v17351_v9 = vsub.f32 %v17095_v25, %v2226_v33  ;;  %v17363_v25 = vsub.f32 %v17109_v48, %v2228_v36  ;;  %v2365_v33 = vsel %vm2108_vm1, %v2291_v52, 0.0  ;;  %v17375_v48 = vsub.f32 %v17122_v61, %v2231_v18 }
 0x2f6   :  { %v2183_v13 = vpop.xlane.xlu0 %2182 }
 0x2f7   :  { %v2230_v58 = vmul.f32 0.015625, %v2183_v13  ;;  %v2290_v45 = vmul.f32 %v17351_v9, %v17351_v9  ;;  %v2292_v36 = vmul.f32 %v17363_v25, %v17363_v25 }
 0x2f9   :  { %v17346_v2 = vsub.f32 %v17135_v22, %v2230_v58  ;;  %2351 = vadd.xlane.f32.xlu1 %v2350_v32  ;;  %v2362_v54 = vsel %vm2108_vm1, %v2290_v45, 0.0  ;;  %v2368_v61 = vsel %vm2108_vm1, %v2292_v36, 0.0  ;;  %v2698_v36 = vld [vmem:[%s16685_s13 + $0xe8] sm:$0xff] }
 0x2fa   :  { %v2192_v35 = vpop.xlane.xlu0 %2191 }
 0x2fb   :  { %v2233_v46 = vmul.f32 0.015625, %v2192_v35  ;;  %v2294_v51 = vmul.f32 %v17346_v2, %v17346_v2 }
 0x2fd   :  { %v17357_v3 = vsub.f32 %v17114_v14, %v2233_v46  ;;  %2357 = vadd.xlane.f32.xlu1 %v2356_v41  ;;  %v2374_v22 = vsel %vm2108_vm1, %v2294_v51, 0.0 }
 0x2fe   :  { %2375 = vadd.xlane.f32.xlu0 %v2374_v22  ;;  %v2189_v13 = vpop.xlane.xlu0 %2188 }
 0x2ff   :  { %v2232_v58 = vmul.f32 0.015625, %v2189_v13  ;;  %v2297_v32 = vmul.f32 %v17357_v3, %v17357_v3 }
 0x301   :  { %v17369_v14 = vsub.f32 %v17117_v7, %v2232_v58  ;;  %2366 = vadd.xlane.f32.xlu1 %v2365_v33  ;;  %v2383_v35 = vsel %vm2108_vm1, %v2297_v32, 0.0  ;;  %v2295_v32 = vmul.f32 %v17375_v48, %v17375_v48 }
 0x302   :  { %2384 = vadd.xlane.f32.xlu0 %v2383_v35  ;;  %v2198_v46 = vpop.xlane.xlu0 %2197 }
 0x303   :  { %v2235_v51 = vmul.f32 0.015625, %v2198_v46  ;;  %v2296_v41 = vmul.f32 %v17369_v14, %v17369_v14  ;;  %v2377_v35 = vsel %vm2108_vm1, %v2295_v32, 0.0 }
 0x305   :  { %v17381_v7 = vsub.f32 %v17129_v62, %v2235_v51  ;;  %2363 = vadd.xlane.f32.xlu1 %v2362_v54  ;;  %v2380_v52 = vsel %vm2108_vm1, %v2296_v41, 0.0 }
 0x306   :  { %2381 = vadd.xlane.f32.xlu0 %v2380_v52  ;;  %v2195_v22 = vpop.xlane.xlu0 %2194  ;;  %v2988_v52 = vld [vmem:[%s16692_s17 + $0xf0] sm:$0xff] }
 0x307   :  { %v2234_v13 = vmul.f32 0.015625, %v2195_v22  ;;  %v2299_v58 = vmul.f32 %v17381_v7, %v17381_v7  ;;  %v2987_v22 = vld [vmem:[%s16692_s17 + $0xe8] sm:$0xff] }
 0x309   :  { %v17390_v18 = vsub.f32 %v17132_v42, %v2234_v13  ;;  %2369 = vadd.xlane.f32.xlu1 %v2368_v61  ;;  %v2389_v62 = vsel %vm2108_vm1, %v2299_v58, 0.0  ;;  %v3343_v13 = vld [vmem:[%s17409_s25 + $0x8] sm:$0xff] }
 0x30a   :  { %2390 = vadd.xlane.f32.xlu0 %v2389_v62  ;;  %v2204_v33 = vpop.xlane.xlu0 %2203  ;;  %v3473_v61 = vand.u32 4294901760, %v3343_v13 }
 0x30b   :  { %v2237_v45 = vmul.f32 0.015625, %v2204_v33  ;;  %v2298_v46 = vmul.f32 %v17390_v18, %v17390_v18  ;;  %v22377_v33 = vmov 0.0|0.0  }
 0x30c   :  { %14545 = vmatprep.subr.bf16.mxu1 %v22377_v33 }
 0x30d   :  { %v17397_v51 = vsub.f32 %v17142_v24, %v2237_v45  ;;  %2378 = vadd.xlane.f32.xlu1 %v2377_v35  ;;  %v2386_v41 = vsel %vm2108_vm1, %v2298_v46, 0.0  ;;  %v3342_v24 = vld [vmem:[%s17409_s25] sm:$0xff]  ;;  %v17418_v35 = vsub.f32 %v3343_v13, %v3473_v61  ;;  %v3344_v46 = vld [vmem:[%s17409_s25 + $0x10] sm:$0xff] }
 0x30e   :  { %v3470_v58 = vand.u32 4294901760, %v3342_v24  ;;  %v2201_v32 = vpop.xlane.xlu0 %2200  ;;  %v3346_v13 = vld [vmem:[%s17409_s25 + $0x20] sm:$0xff] }
 0x30f   :  { %v2301_v42 = vmul.f32 %v17397_v51, %v17397_v51  ;;  %23065 = vst [vmem:[#allocation58_spill] sm:$0xff] %v17418_v35 }
 0x310   :  { %v17413_v62 = vpack.c.bf16 %v3473_v61, %v3470_v58  ;;  %v17416_v45 = vsub.f32 %v3342_v24, %v3470_v58  ;;  %v3347_v58 = vld [vmem:[%s17409_s25 + $0x28] sm:$0xff]  ;;  %v3482_v61 = vand.u32 4294901760, %v3346_v13 }
 0x311   :  { %2387 = vadd.xlane.f32.xlu1 %v2386_v41  ;;  %v2395_v54 = vsel %vm2108_vm1, %v2301_v42, 0.0  ;;  %v3345_v42 = vld [vmem:[%s17409_s25 + $0x18] sm:$0xff]  ;;  %v3476_v41 = vand.u32 4294901760, %v3344_v46 }
 0x312   :  { %2396 = vadd.xlane.f32.xlu0 %v2395_v54  ;;  %23063 = vst [vmem:[#allocation56_spill] sm:$0xff] %v17413_v62  ;;  %23064 = vst [vmem:[#allocation57_spill] sm:$0xff] %v17416_v45  ;;  %14547 = vmatpush1.bf16.msra.mxu1 %v17413_v62  ;;  %v3479_v54 = vand.u32 4294901760, %v3345_v42  ;;  %v3485_v62 = vand.u32 4294901760, %v3347_v58  ;;  %v17445_v35 = vsub.f32 %v3346_v13, %v3482_v61 }
 0x313   :  { %14548 = vmatprep.subr.bf16.mxu1 %v22377_v33  ;;  %v3350_v33 = vld [vmem:[%s17409_s25 + $0x40] sm:$0xff] }
 0x314   :  { %v17428_v24 = vsub.f32 %v3345_v42, %v3479_v54  ;;  %v3488_v42 = vand.u32 4294901760, %v3348_v50  ;;  %v17443_v4 = vpack.c.bf16 %v3485_v62, %v3482_v61  ;;  %23072 = vst [vmem:[#allocation64_spill] sm:$0xff] %v17445_v35  ;;  %v17447_v20 = vsub.f32 %v3347_v58, %v3485_v62 }
 0x316   :  { %23068 = vst [vmem:[#allocation61_spill] sm:$0xff] %v17428_v24  ;;  %v3494_v24 = vand.u32 4294901760, %v3350_v33  ;;  %23071 = vst [vmem:[#allocation63_spill] sm:$0xff] %v17443_v4 }
 0x317   :  { %23073 = vst [vmem:[#allocation65_spill] sm:$0xff] %v17447_v20 }
 0x318   :  { %v17455_v21 = vsub.f32 %v3350_v33, %v3494_v24 }
 0x31a   :  { %23075 = vst [vmem:[#allocation67_spill] sm:$0xff] %v17455_v21  ;;  %v3512_v21 = vand.u32 4294901760, %v3356_v38 }
 0x322   :  { %2848 = vperm.xlu1 %15858, %v2698_v36   ;;  %v2236_v36 = vmul.f32 0.015625, %v2201_v32  ;;  %v3349_v32 = vld [vmem:[%s17409_s25 + $0x38] sm:$0xff] }
 0x324   :  { %v17437_v10 = vsub.f32 %v17145_v27, %v2236_v36  ;;  %v3355_v27 = vld [vmem:[%s17409_s25 + $0x68] sm:$0xff]  ;;  %v17451_v36 = vsub.f32 %v3348_v50, %v3488_v42  ;;  %v3506_v50 = vand.u32 4294901760, %v3354_v56 }
 0x325   :  { %v3509_v61 = vand.u32 4294901760, %v3355_v27 }
 0x326   :  { %3142 = vperm.xlu1 %15858, %v2988_v52   ;;  %v17424_v52 = vpack.c.bf16 %v3479_v54, %v3476_v41  ;;  %23069 = vst [vmem:[#allocation62_spill] sm:$0xff] %v17437_v10  ;;  %v3351_v54 = vld [vmem:[%s17409_s25 + $0x48] sm:$0xff]  ;;  %v2300_v58 = vmul.f32 %v17437_v10, %v17437_v10 }
 0x327   :  { %v3497_v45 = vand.u32 4294901760, %v3351_v54 }
 0x328   :  { %3137 = vperm.xlu0 %15857, %v2987_v22   ;;  %23066 = vst [vmem:[#allocation59_spill] sm:$0xff] %v17424_v52  ;;  %v17426_v22 = vsub.f32 %v3344_v46, %v3476_v41  ;;  %14550 = vmatpush1.bf16.msra.mxu1 %v17424_v52  ;;  %v23070_v46 = vmov 0.0|0.0   ;;  %v3491_v41 = vand.u32 4294901760, %v3349_v32  ;;  %v3353_v52 = vld [vmem:[%s17409_s25 + $0x58] sm:$0xff] }
 0x329   :  { %14551 = vmatprep.subr.bf16.mxu1 %v23070_v46  ;;  %v17462_v44 = vsub.f32 %v3351_v54, %v3497_v45  ;;  %v3503_v62 = vand.u32 4294901760, %v3353_v52  ;;  %v17478_v54 = vsub.f32 %v3356_v38, %v3512_v21 }
 0x32a   :  { %23067 = vst [vmem:[#allocation60_spill] sm:$0xff] %v17426_v22  ;;  %v3352_v22 = vld [vmem:[%s17409_s25 + $0x50] sm:$0xff]  ;;  %v17453_v31 = vsub.f32 %v3349_v32, %v3491_v41  ;;  %v17460_v47 = vpack.c.bf16 %v3491_v41, %v3488_v42  ;;  %v17473_v42 = vsub.f32 %v3355_v27, %v3509_v61  ;;  %v17476_v41 = vpack.c.bf16 %v3497_v45, %v3494_v24 }
 0x32b   :  { %23077 = vst [vmem:[#allocation69_spill] sm:$0xff] %v17462_v44  ;;  %v3500_v13 = vand.u32 4294901760, %v3352_v22  ;;  %v17469_v33 = vsub.f32 %v3353_v52, %v3503_v62  ;;  %23083 = vst [vmem:[#allocation75_spill] sm:$0xff] %v17478_v54  ;;  %v17489_v45 = vpack.c.bf16 %v3509_v61, %v3506_v50 }
 0x32c   :  { %23074 = vst [vmem:[#allocation66_spill] sm:$0xff] %v17453_v31  ;;  %14553 = vmatpush1.bf16.msra.mxu1 %v17443_v4  ;;  %23076 = vst [vmem:[#allocation68_spill] sm:$0xff] %v17460_v47  ;;  %v3515_v31 = vand.u32 4294901760, %v3357_v63  ;;  %v17471_v4 = vsub.f32 %v3354_v56, %v3506_v50 }
 0x32d   :  { %14554 = vmatprep.subr.bf16.mxu1 %v23070_v46  ;;  %v17467_v32 = vsub.f32 %v3352_v22, %v3500_v13  ;;  %23079 = vst [vmem:[#allocation71_spill] sm:$0xff] %v17469_v33  ;;  %23081 = vst [vmem:[#allocation73_spill] sm:$0xff] %v17473_v42  ;;  %v2392_v22 = vsel %vm2108_vm1, %v2300_v58, 0.0  ;;  %v17485_v56 = vpack.c.bf16 %v3503_v62, %v3500_v13  ;;  %v3358_v62 = vld [vmem:[%s17409_s25 + $0x80] sm:$0xff]  ;;  %v3359_v58 = vld [vmem:[%s17409_s25 + $0x88] sm:$0xff] }
 0x32e   :  { %23080 = vst [vmem:[#allocation72_spill] sm:$0xff] %v17471_v4  ;;  %23082 = vst [vmem:[#allocation74_spill] sm:$0xff] %v17476_v41  ;;  %v17480_v44 = vsub.f32 %v3357_v63, %v3515_v31  ;;  %v17493_v52 = vpack.c.bf16 %v3515_v31, %v3512_v21  ;;  %v3518_v50 = vand.u32 4294901760, %v3358_v62  ;;  %v3521_v61 = vand.u32 4294901760, %v3359_v58  ;;  %v17520_v42 = vld [vmem:[%s12900_s29] ss:$0 sm:$0xff] }
 0x32f   :  { %23078 = vst [vmem:[#allocation70_spill] sm:$0xff] %v17467_v32  ;;  %23085 = vst [vmem:[#allocation77_spill] sm:$0xff] %v17485_v56  ;;  %s16215_s29 = smov 14  }
 0x330   :  { %14556 = vmatpush1.bf16.msra.mxu1 %v17460_v47  ;;  %23084 = vst [vmem:[#allocation76_spill] sm:$0xff] %v17480_v44  ;;  %23086 = vst [vmem:[#allocation78_spill] sm:$0xff] %v17489_v45  ;;  %v17503_v31 = vpack.c.bf16 %v3521_v61, %v3518_v50  ;;  %v3362_v47 = vld [vmem:[%s17409_s25 + $0xa0] sm:$0xff]  ;;  %v3363_v44 = vld [vmem:[%s17409_s25 + $0xa8] sm:$0xff]  ;;  %s12909_s2 = sld [smem:[%s22276_s0 + %s16215_s29]]   ;;  %s16232_s29 = smov 29  }
 0x331   :  { %14557 = vmatprep.subr.bf16.mxu1 %v23070_v46  ;;  %23087 = vst [vmem:[#allocation79_spill] sm:$0xff] %v17493_v52 }
 0x332   :  { %23088 = vst [vmem:[#allocation80_spill] sm:$0xff] %v17503_v31 }
 0x334   :  { %14559 = vmatpush1.bf16.msra.mxu1 %v17476_v41 }
 0x335   :  { %14560 = vmatprep.subr.bf16.mxu1 %v23070_v46 }
 0x338   :  { %14562 = vmatpush1.bf16.msra.mxu1 %v17485_v56 }
 0x339   :  { %14563 = vmatprep.subr.bf16.mxu1 %v23070_v46 }
 0x33c   :  { %14565 = vmatpush1.bf16.msra.mxu1 %v17489_v45 }
 0x33d   :  { %14566 = vmatprep.subr.bf16.mxu1 %v23070_v46 }
 0x340   :  { %14568 = vmatpush1.bf16.msra.mxu1 %v17493_v52  ;;  %v17513_v52 = vsub.f32 %v3359_v58, %v3521_v61  ;;  %v3533_v58 = vand.u32 4294901760, %v3363_v44 }
 0x341   :  { %14569 = vmatprep.subr.bf16.mxu1 %v23070_v46 }
 0x342   :  { %23090 = vst [vmem:[#allocation82_spill] sm:$0xff] %v17513_v52 }
 0x344   :  { %14571 = vmatpush1.bf16.msra.mxu1 %v17503_v31 }
 0x345   :  { %14572 = vmatprep.subr.bf16.mxu1 %v23070_v46 }
 0x347   :  { %2393 = vadd.xlane.f32.xlu0 %v2392_v22 }
 0x34e   :  { %v2307_v38 = vpop.xlane.xlu1 %2306 }
 0x34f   :  { %v2399_v63 = vmul.f32 0.015625, %v2307_v38 }
 0x351   :  { %v2431_v24 = vadd.f32 1e-05, %v2399_v63  ;;  %v3360_v63 = vld [vmem:[%s17409_s25 + $0x90] sm:$0xff] }
 0x352   :  { %v2304_v27 = vpop.xlane.xlu1 %2303 }
 0x353   :  { %15859 = vrsqrt.f32 %v2431_v24  ;;  %v2398_v13 = vmul.f32 0.015625, %v2304_v27  ;;  %v3361_v24 = vld [vmem:[%s17409_s25 + $0x98] sm:$0xff] }
 0x354   :  { %v3527_v45 = vand.u32 4294901760, %v3361_v24 }
 0x355   :  { %v2430_v22 = vadd.f32 1e-05, %v2398_v13  ;;  %v17511_v13 = vsub.f32 %v3358_v62, %v3518_v50  ;;  %v3530_v62 = vand.u32 4294901760, %v3362_v47 }
 0x356   :  { %v2313_v21 = vpop.xlane.xlu1 %2312 }
 0x357   :  { %15861 = vrsqrt.f32 %v2430_v22  ;;  %v2401_v38 = vmul.f32 0.015625, %v2313_v21  ;;  %23089 = vst [vmem:[#allocation81_spill] sm:$0xff] %v17511_v13  ;;  %v3524_v22 = vand.u32 4294901760, %v3360_v63  ;;  %v17528_v13 = vld [vmem:[%s12901_s3] ss:$0 sm:$0xff]  ;;  %s16216_s3 = smov 15  }
 0x358   :  { %s12910_s6 = sld [smem:[%s22276_s0 + %s16216_s3]]   ;;  %s16233_s3 = smov 32  }
 0x359   :  { %v2433_v27 = vadd.f32 1e-05, %v2401_v38  ;;  %v17516_v41 = vpack.c.bf16 %v3527_v45, %v3524_v22  ;;  %v2634_v38 = vlaneseq }
 0x35a   :  { %v2310_v21 = vpop.xlane.xlu1 %2309 }
 0x35b   :  { %15863 = vrsqrt.f32 %v2433_v27  ;;  %v2400_v56 = vmul.f32 0.015625, %v2310_v21  ;;  %23091 = vst [vmem:[#allocation83_spill] sm:$0xff] %v17516_v41  ;;  %14574 = vmatpush1.bf16.msra.mxu1 %v17516_v41  ;;  %v17524_v27 = vsub.f32 %v3360_v63, %v3524_v22  ;;  %v17526_v21 = vsub.f32 %v3361_v24, %v3527_v45 }
 0x35c   :  { %14575 = vmatprep.subr.bf16.mxu1 %v23070_v46  ;;  %v17534_v10 = vshrl.u32 %v2634_v38, 7  ;;  %v17543_v24 = vsub.f32 %v3362_v47, %v3530_v62  ;;  %v17545_v22 = vsub.f32 %v3363_v44, %v3533_v58 }
 0x35d   :  { %v15860_v54 = vpop.eup %15859  ;;  %v2432_v31 = vadd.f32 1e-05, %v2400_v56  ;;  %23092 = vst [vmem:[#allocation84_spill] sm:$0xff] %v17524_v27  ;;  %23093 = vst [vmem:[#allocation85_spill] sm:$0xff] %v17526_v21  ;;  %v17531_v56 = vpack.c.bf16 %v3533_v58, %v3530_v62 }
 0x35e   :  { %v2319_v50 = vpop.xlane.xlu1 %2318  ;;  %v2495_v61 = vmul.f32 %v15860_v54, %v17218_v11  ;;  %v3364_v11 = vld [vmem:[%s17409_s25 + $0xb0] sm:$0xff]  ;;  %v3365_v54 = vld [vmem:[%s17409_s25 + $0xb8] sm:$0xff]  ;;  %23096 = vst [vmem:[#allocation88_spill] sm:$0xff] %v17543_v24  ;;  %23097 = vst [vmem:[#allocation89_spill] sm:$0xff] %v17545_v22  ;;  %vm2925_vm2 = vcmp.lt.s32.totalorder %v17534_v10, 7  ;;  %vm2636_vm3 = vcmp.lt.s32.totalorder %v17534_v10, 1 }
 0x35f   :  { %15865 = vrsqrt.f32 %v2432_v31  ;;  %v2403_v52 = vmul.f32 0.015625, %v2319_v50  ;;  %23094 = vst [vmem:[#allocation86_spill] sm:$0xff] %v17531_v56  ;;  %14577 = vmatpush1.bf16.msra.mxu1 %v17531_v56  ;;  %v3539_v38 = vand.u32 4294901760, %v3365_v54  ;;  %v23165_v24 = vld [vmem:[#allocation61_spill] sm:$0xff]  ;;  %s16214_s25 = smov 13  }
 0x360   :  { %v2533_v4 = vmul.f32 %v17520_v42, %v2495_v61  ;;  %14578 = vmatprep.subr.bf16.mxu1 %v23070_v46  ;;  %s21021_s28 = sld [smem:[%s22276_s0 + %s16214_s25]]   ;;  %s16231_s25 = smov 27  }
 0x361   :  { %v15862_v33 = vpop.eup %15861  ;;  %v2435_v32 = vadd.f32 1e-05, %v2403_v52  ;;  %v3536_v52 = vand.u32 4294901760, %v3364_v11  ;;  %v17559_v58 = vsub.f32 %v3365_v54, %v3539_v38 }
 0x362   :  { %v2316_v63 = vpop.xlane.xlu1 %2315  ;;  %v17539_v45 = vadd.f32 %v17528_v13, %v2533_v4  ;;  %v2494_v31 = vmul.f32 %v15862_v33, %v17226_v55 }
 0x363   :  { %15867 = vrsqrt.f32 %v2435_v32  ;;  %v2402_v50 = vmul.f32 0.015625, %v2316_v63  ;;  %v17551_v33 = vpack.c.bf16 %v3539_v38, %v3536_v52  ;;  %v17557_v62 = vsub.f32 %v3364_v11, %v3536_v52  ;;  %23101 = vst [vmem:[#allocation93_spill] sm:$0xff] %v17559_v58 }
 0x364   :  { %23095 = vst [vmem:[#allocation87_spill] sm:$0xff] %v17539_v45  ;;  %3216 = vrot.lane.b32.xlu0 %v17539_v45, %s16208_s4  ;;  %v2532_v4 = vmul.f32 %v17520_v42, %v2494_v31 }
 0x365   :  { %v15864_v61 = vpop.eup %15863  ;;  %v2434_v55 = vadd.f32 1e-05, %v2402_v50  ;;  %23098 = vst [vmem:[#allocation90_spill] sm:$0xff] %v17551_v33  ;;  %23100 = vst [vmem:[#allocation92_spill] sm:$0xff] %v17557_v62  ;;  %14580 = vmatpush1.bf16.msra.mxu1 %v17551_v33 }
 0x366   :  { %v2325_v47 = vpop.xlane.xlu1 %2324  ;;  %v17554_v44 = vadd.f32 %v17528_v13, %v2532_v4  ;;  %v2497_v32 = vmul.f32 %v15864_v61, %v17223_v59  ;;  %v22418_v4 = vrot.slane %v17539_v45, 1  ;;  %14581 = vmatprep.subr.bf16.mxu1 %v23070_v46 }
 0x367   :  { %15869 = vrsqrt.f32 %v2434_v55  ;;  %v2405_v63 = vmul.f32 0.015625, %v2325_v47 }
 0x368   :  { %23099 = vst [vmem:[#allocation91_spill] sm:$0xff] %v17554_v44  ;;  %3214 = vrot.lane.b32.xlu1 %v17554_v44, %s16208_s4  ;;  %v2535_v31 = vmul.f32 %v17520_v42, %v2497_v32  ;;  %v22417_v50 = vrot.slane %v17554_v44, 1  ;;  %v2340_v32 = vpop.xlane.xlu0 %2339 }
 0x369   :  { %v15866_v59 = vpop.eup %15865  ;;  %v2437_v11 = vadd.f32 1e-05, %v2405_v63 }
 0x36a   :  { %v2322_v54 = vpop.xlane.xlu1 %2321  ;;  %v17570_v52 = vadd.f32 %v17528_v13, %v2535_v31  ;;  %v2496_v38 = vmul.f32 %v15866_v59, %v17232_v28  ;;  %v2956_v61 = vsel %vm2925_vm2, %v22417_v50, %v22418_v4  ;;  %v2700_v28 = vld [vmem:[%s16685_s13 + $0xf8] sm:$0xff] }
 0x36b   :  { %15871 = vrsqrt.f32 %v2437_v11  ;;  %v2404_v55 = vmul.f32 0.015625, %v2322_v54  ;;  %v3150_v47 = vmul.f32 %v16964_v53, %v2956_v61 }
 0x36c   :  { %23102 = vst [vmem:[#allocation94_spill] sm:$0xff] %v17570_v52  ;;  %3220 = vrot.lane.b32.xlu1 %v17570_v52, %s16208_s4  ;;  %v2534_v63 = vmul.f32 %v17520_v42, %v2496_v38  ;;  %v2349_v50 = vpop.xlane.xlu0 %2348 }
 0x36d   :  { %v15868_v31 = vpop.eup %15867  ;;  %v2436_v33 = vadd.f32 1e-05, %v2404_v55  ;;  %v3374_v59 = vsel %vm2108_vm1, %v3150_v47, 0 }
 0x36e   :  { %v2331_v56 = vpop.xlane.xlu1 %2330  ;;  %v17586_v41 = vadd.f32 %v17528_v13, %v2534_v63  ;;  %v2499_v11 = vmul.f32 %v15868_v31, %v17238_v8  ;;  %v17589_v54 = vand.u32 4294901760, %v3374_v59 }
 0x36f   :  { %15873 = vrsqrt.f32 %v2436_v33  ;;  %v2407_v53 = vmul.f32 0.015625, %v2331_v56 }
 0x370   :  { %23103 = vst [vmem:[#allocation95_spill] sm:$0xff] %v17586_v41  ;;  %23104 = vst [vmem:[#allocation96_spill] sm:$0xff] %v17589_v54  ;;  %2858 = vperm.xlu1 %15858, %v2700_v28   ;;  %3218 = vrot.lane.b32.xlu0 %v17586_v41, %s16208_s4  ;;  %v2537_v38 = vmul.f32 %v17520_v42, %v2499_v11  ;;  %v17595_v47 = vsub.f32 %v3374_v59, %v17589_v54  ;;  %v2410_v11 = vmul.f32 0.015625, %v2340_v32  ;;  %v2355_v58 = vpop.xlane.xlu0 %2354 }
 0x371   :  { %v15870_v61 = vpop.eup %15869  ;;  %v2439_v55 = vadd.f32 1e-05, %v2407_v53  ;;  %v2413_v54 = vmul.f32 0.015625, %v2349_v50 }
 0x372   :  { %23105 = vst [vmem:[#allocation97_spill] sm:$0xff] %v17595_v47  ;;  %v2328_v63 = vpop.xlane.xlu1 %2327  ;;  %v17598_v4 = vadd.f32 %v17528_v13, %v2537_v38  ;;  %v2498_v8 = vmul.f32 %v15870_v61, %v17244_v34  ;;  %v22422_v33 = vand.u32 4294901760, %v17595_v47 }
 0x373   :  { %15875 = vrsqrt.f32 %v2439_v55  ;;  %v2406_v56 = vmul.f32 0.015625, %v2328_v63 }
 0x374   :  { %23106 = vst [vmem:[#allocation98_spill] sm:$0xff] %v17598_v4  ;;  %3224 = vrot.lane.b32.xlu0 %v17598_v4, %s16208_s4  ;;  %v2536_v31 = vmul.f32 %v17520_v42, %v2498_v8  ;;  %v3560_v53 = vsub.f32 %v17595_v47, %v22422_v33  ;;  %v2442_v8 = vadd.f32 1e-05, %v2410_v11  ;;  %v2415_v47 = vmul.f32 0.015625, %v2355_v58  ;;  %v2361_v11 = vpop.xlane.xlu0 %2360  ;;  %v12938_v58 = vld [vmem:[%s12907_s8] ss:$0 sm:$0xff]  ;;  %s12916_s8 = sld [smem:[%s22276_s0 + %s16226_s5]]  }
 0x375   :  { %v15872_v28 = vpop.eup %15871  ;;  %v2438_v59 = vadd.f32 1e-05, %v2406_v56 }
 0x376   :  { %v2337_v38 = vpop.xlane.xlu1 %2336  ;;  %v17609_v34 = vadd.f32 %v17528_v13, %v2536_v31  ;;  %v2501_v61 = vmul.f32 %v15872_v28, %v17250_v60  ;;  %v3561_v63 = vand.u32 4294901760, %v3560_v53  ;;  %v2699_v31 = vld [vmem:[%s16685_s13 + $0xf0] sm:$0xff]  ;;  %s16211_s13 = smov 8  }
 0x377   :  { %15877 = vrsqrt.f32 %v2438_v59  ;;  %v2409_v55 = vmul.f32 0.015625, %v2337_v38  ;;  %v2445_v59 = vadd.f32 1e-05, %v2413_v54  ;;  %s12903_s16 = sld [smem:[%s22276_s0 + %s16211_s13]]   ;;  %s16228_s13 = smov 25  }
 0x378   :  { %23107 = vst [vmem:[#allocation99_spill] sm:$0xff] %v17609_v34  ;;  %3222 = vrot.lane.b32.xlu0 %v17609_v34, %s16208_s4  ;;  %3562 = vmatprep.mubr.f32.mxu1 %v3561_v63  ;;  %v2539_v28 = vmul.f32 %v17520_v42, %v2501_v61 }
 0x379   :  { %v15874_v32 = vpop.eup %15873  ;;  %v2441_v56 = vadd.f32 1e-05, %v2409_v55 }
 0x37a   :  { %v2334_v33 = vpop.xlane.xlu1 %2333  ;;  %v2500_v60 = vmul.f32 %v15874_v32, %v17256_v29  ;;  %v17625_v29 = vadd.f32 %v17528_v13, %v2539_v28  ;;  %v2447_v32 = vadd.f32 1e-05, %v2415_v47 }
 0x37b   :  { %15879 = vrsqrt.f32 %v2441_v56  ;;  %v2408_v50 = vmul.f32 0.015625, %v2334_v33 }
 0x37c   :  { %2853 = vperm.xlu0 %15857, %v2699_v31   ;;  %v2538_v53 = vmul.f32 %v17520_v42, %v2500_v60  ;;  %15881 = vrsqrt.f32 %v2442_v8  ;;  %23109 = vst [vmem:[#allocation101_spill] sm:$0xff] %v17625_v29  ;;  %v2417_v8 = vmul.f32 0.015625, %v2361_v11  ;;  %v2989_v31 = vld [vmem:[%s16692_s17 + $0xf8] sm:$0xff]  ;;  %s16212_s17 = smov 9  }
 0x37d   :  { %v15876_v38 = vpop.eup %15875  ;;  %v2440_v62 = vadd.f32 1e-05, %v2408_v50  ;;  %s20659_s20 = sld [smem:[%s22276_s0 + %s16212_s17]]   ;;  %s16229_s17 = smov 28  }
 0x37e   :  { %v2343_v55 = vpop.xlane.xlu1 %2342  ;;  %v17622_v63 = vadd.f32 %v17528_v13, %v2538_v53  ;;  %v2503_v61 = vmul.f32 %v15876_v38, %v17267_v17 }
 0x37f   :  { %15883 = vrsqrt.f32 %v2440_v62  ;;  %v2411_v54 = vmul.f32 0.015625, %v2343_v55  ;;  %v2373_v38 = vpop.xlane.xlu0 %2372 }
 0x380   :  { %23108 = vst [vmem:[#allocation100_spill] sm:$0xff] %v17622_v63  ;;  %15885 = vrsqrt.f32 %v2445_v59  ;;  %3226 = vrot.lane.b32.xlu1 %v17622_v63, %s16208_s4  ;;  %3228 = vrot.lane.b32.xlu0 %v17625_v29, %s16208_s4  ;;  %v2541_v60 = vmul.f32 %v17520_v42, %v2503_v61  ;;  %v2449_v59 = vadd.f32 1e-05, %v2417_v8 }
 0x381   :  { %v15878_v33 = vpop.eup %15877  ;;  %v2443_v56 = vadd.f32 1e-05, %v2411_v54 }
 0x382   :  { %v2346_v17 = vpop.xlane.xlu1 %2345  ;;  %v2502_v62 = vmul.f32 %v15878_v33, %v17279_v19  ;;  %v17644_v19 = vadd.f32 %v17528_v13, %v2541_v60 }
 0x383   :  { %15887 = vrsqrt.f32 %v2443_v56  ;;  %v2412_v28 = vmul.f32 0.015625, %v2346_v17  ;;  %v12937_v56 = vld [vmem:[%s12906_s12] ss:$0 sm:$0xff]  ;;  %s12917_s12 = sld [smem:[%s22276_s0 + %s16227_s9]]  }
 0x384   :  { %7176 = vrot.lane.b32.xlu1 %v12938_v58, %s16208_s4  ;;  %3147 = vperm.xlu0 %15857, %v2989_v31   ;;  %v2540_v47 = vmul.f32 %v17520_v42, %v2502_v62  ;;  %15889 = vrsqrt.f32 %v2447_v32  ;;  %23111 = vst [vmem:[#allocation103_spill] sm:$0xff] %v17644_v19  ;;  %v2421_v32 = vmul.f32 0.015625, %v2373_v38 }
 0x385   :  { %v15880_v50 = vpop.eup %15879  ;;  %v2444_v53 = vadd.f32 1e-05, %v2412_v28 }
 0x386   :  { %v2352_v11 = vpop.xlane.xlu1 %2351  ;;  %v17641_v55 = vadd.f32 %v17528_v13, %v2540_v47  ;;  %v2505_v61 = vmul.f32 %v15880_v50, %v17291_v30  ;;  %v15882_v54 = vpop.eup %15881 }
 0x387   :  { %15891 = vrsqrt.f32 %v2444_v53  ;;  %v2414_v58 = vmul.f32 0.015625, %v2352_v11  ;;  %v2506_v60 = vmul.f32 %v15882_v54, %v17262_v15 }
 0x388   :  { %23110 = vst [vmem:[#allocation102_spill] sm:$0xff] %v17641_v55  ;;  %3230 = vrot.lane.b32.xlu1 %v17641_v55, %s16208_s4  ;;  %3232 = vrot.lane.b32.xlu0 %v17644_v19, %s16208_s4  ;;  %15893 = vrsqrt.f32 %v2449_v59  ;;  %v2543_v30 = vmul.f32 %v17520_v42, %v2505_v61  ;;  %v2453_v59 = vadd.f32 1e-05, %v2421_v32 }
 0x389   :  { %v15884_v33 = vpop.eup %15883  ;;  %v2446_v8 = vadd.f32 1e-05, %v2414_v58  ;;  %v2544_v61 = vmul.f32 %v17520_v42, %v2506_v60 }
 0x38a   :  { %v15886_v31 = vpop.eup %15885  ;;  %v2358_v17 = vpop.xlane.xlu1 %2357  ;;  %v2504_v62 = vmul.f32 %v15884_v33, %v17303_v43  ;;  %v17661_v43 = vadd.f32 %v17528_v13, %v2543_v30 }
 0x38b   :  { %15895 = vrsqrt.f32 %v2446_v8  ;;  %v2416_v28 = vmul.f32 0.015625, %v2358_v17  ;;  %v2376_v47 = vpop.xlane.xlu0 %2375  ;;  %v2509_v11 = vmul.f32 %v15886_v31, %v17273_v57  ;;  %v17675_v30 = vadd.f32 %v17528_v13, %v2544_v61 }
 0x38c   :  { %7136 = vrot.lane.b32.xlu0 %v12937_v56, %s16208_s4  ;;  %v2542_v50 = vmul.f32 %v17520_v42, %v2504_v62  ;;  %23113 = vst [vmem:[#allocation105_spill] sm:$0xff] %v17661_v43  ;;  %v2422_v56 = vmul.f32 0.015625, %v2376_v47 }
 0x38d   :  { %v15888_v53 = vpop.eup %15887  ;;  %v2448_v38 = vadd.f32 1e-05, %v2416_v28  ;;  %23115 = vst [vmem:[#allocation107_spill] sm:$0xff] %v17675_v30 }
 0x38e   :  { %v2367_v58 = vpop.xlane.xlu1 %2366  ;;  %v17658_v22 = vadd.f32 %v17528_v13, %v2542_v50  ;;  %v2507_v15 = vmul.f32 %v15888_v53, %v17310_v49  ;;  %v15890_v54 = vpop.eup %15889  ;;  %v2547_v49 = vmul.f32 %v17520_v42, %v2509_v11 }
 0x38f   :  { %15897 = vrsqrt.f32 %v2448_v38  ;;  %v2419_v33 = vmul.f32 0.015625, %v2367_v58  ;;  %v2385_v8 = vpop.xlane.xlu0 %2384  ;;  %v2511_v28 = vmul.f32 %v15890_v54, %v17285_v40  ;;  %v2454_v38 = vadd.f32 1e-05, %v2422_v56 }
 0x390   :  { %23112 = vst [vmem:[#allocation104_spill] sm:$0xff] %v17658_v22  ;;  %3234 = vrot.lane.b32.xlu1 %v17658_v22, %s16208_s4  ;;  %3236 = vrot.lane.b32.xlu0 %v17661_v43, %s16208_s4  ;;  %v2545_v57 = vmul.f32 %v17520_v42, %v2507_v15  ;;  %15899 = vrsqrt.f32 %v2453_v59  ;;  %v2425_v59 = vmul.f32 0.015625, %v2385_v8 }
 0x391   :  { %v15892_v32 = vpop.eup %15891  ;;  %v2451_v31 = vadd.f32 1e-05, %v2419_v33  ;;  %v2549_v8 = vmul.f32 %v17520_v42, %v2511_v28 }
 0x392   :  { %v2364_v17 = vpop.xlane.xlu1 %2363  ;;  %v17672_v62 = vadd.f32 %v17528_v13, %v2545_v57  ;;  %v2508_v60 = vmul.f32 %v15892_v32, %v17316_v12  ;;  %v15894_v47 = vpop.eup %15893  ;;  %v17685_v12 = vadd.f32 %v17528_v13, %v2547_v49 }
 0x393   :  { %15901 = vrsqrt.f32 %v2451_v31  ;;  %v2418_v50 = vmul.f32 0.015625, %v2364_v17  ;;  %v2382_v53 = vpop.xlane.xlu0 %2381  ;;  %v2513_v56 = vmul.f32 %v15894_v47, %v17297_v37  ;;  %v2457_v31 = vadd.f32 1e-05, %v2425_v59 }
 0x394   :  { %23114 = vst [vmem:[#allocation106_spill] sm:$0xff] %v17672_v62  ;;  %3240 = vrot.lane.b32.xlu0 %v17672_v62, %s16208_s4  ;;  %3238 = vrot.lane.b32.xlu1 %v17675_v30, %s16208_s4  ;;  %v2546_v11 = vmul.f32 %v17520_v42, %v2508_v60  ;;  %v2424_v61 = vmul.f32 0.015625, %v2382_v53  ;;  %23116 = vst [vmem:[#allocation108_spill] sm:$0xff] %v17685_v12  ;;  %v17702_v47 = vadd.f32 %v17528_v13, %v2549_v8 }
 0x395   :  { %v15896_v58 = vpop.eup %15895  ;;  %v2450_v15 = vadd.f32 1e-05, %v2418_v50 }
 0x396   :  { %v2370_v40 = vpop.xlane.xlu1 %2369  ;;  %v17688_v54 = vadd.f32 %v17528_v13, %v2546_v11  ;;  %v2510_v33 = vmul.f32 %v15896_v58, %v17327_v1  ;;  %v2456_v60 = vadd.f32 1e-05, %v2424_v61  ;;  %23119 = vst [vmem:[#allocation111_spill] sm:$0xff] %v17702_v47 }
 0x397   :  { %15903 = vrsqrt.f32 %v2450_v15  ;;  %v2420_v57 = vmul.f32 0.015625, %v2370_v40  ;;  %v2391_v32 = vpop.xlane.xlu0 %2390 }
 0x398   :  { %23117 = vst [vmem:[#allocation109_spill] sm:$0xff] %v17688_v54  ;;  %15905 = vrsqrt.f32 %v2454_v38  ;;  %3242 = vrot.lane.b32.xlu1 %v17688_v54, %s16208_s4  ;;  %3244 = vrot.lane.b32.xlu0 %v17685_v12, %s16208_s4  ;;  %v2548_v49 = vmul.f32 %v17520_v42, %v2510_v33  ;;  %v2427_v50 = vmul.f32 0.015625, %v2391_v32  ;;  %v2551_v38 = vmul.f32 %v17520_v42, %v2513_v56 }
 0x399   :  { %v15898_v17 = vpop.eup %15897  ;;  %v2452_v1 = vadd.f32 1e-05, %v2420_v57 }
 0x39a   :  { %v2379_v28 = vpop.xlane.xlu1 %2378  ;;  %v17699_v37 = vadd.f32 %v17528_v13, %v2548_v49  ;;  %v2512_v53 = vmul.f32 %v15898_v17, %v17334_v5  ;;  %v15900_v59 = vpop.eup %15899  ;;  %v2459_v61 = vadd.f32 1e-05, %v2427_v50  ;;  %v17715_v8 = vadd.f32 %v17528_v13, %v2551_v38 }
 0x39b   :  { %15907 = vrsqrt.f32 %v2452_v1  ;;  %v2423_v11 = vmul.f32 0.015625, %v2379_v28  ;;  %v2517_v57 = vmul.f32 %v15900_v59, %v17322_v6 }
 0x39c   :  { %23118 = vst [vmem:[#allocation110_spill] sm:$0xff] %v17699_v37  ;;  %15909 = vrsqrt.f32 %v2457_v31  ;;  %3246 = vrot.lane.b32.xlu1 %v17699_v37, %s16208_s4  ;;  %3248 = vrot.lane.b32.xlu0 %v17702_v47, %s16208_s4  ;;  %v2550_v58 = vmul.f32 %v17520_v42, %v2512_v53  ;;  %23121 = vst [vmem:[#allocation113_spill] sm:$0xff] %v17715_v8 }
 0x39d   :  { %v15902_v15 = vpop.eup %15901  ;;  %15911 = vrsqrt.f32 %v2456_v60  ;;  %v2455_v40 = vadd.f32 1e-05, %v2423_v11  ;;  %v2555_v53 = vmul.f32 %v17520_v42, %v2517_v57 }
 0x39e   :  { %v2388_v33 = vpop.xlane.xlu1 %2387  ;;  %v17712_v5 = vadd.f32 %v17528_v13, %v2550_v58  ;;  %v2515_v56 = vmul.f32 %v15902_v15, %v17340_v0 }
 0x39f   :  { %15913 = vrsqrt.f32 %v2455_v40  ;;  %v2426_v32 = vmul.f32 0.015625, %v2388_v33  ;;  %v2397_v31 = vpop.xlane.xlu0 %2396 }
 0x3a0   :  { %23120 = vst [vmem:[#allocation112_spill] sm:$0xff] %v17712_v5  ;;  %v2429_v49 = vmul.f32 0.015625, %v2397_v31  ;;  %3250 = vrot.lane.b32.xlu1 %v17712_v5, %s16208_s4  ;;  %3252 = vrot.lane.b32.xlu0 %v17715_v8, %s16208_s4  ;;  %v2553_v17 = vmul.f32 %v17520_v42, %v2515_v56  ;;  %15915 = vrsqrt.f32 %v2459_v61  ;;  %v17737_v61 = vadd.f32 %v17528_v13, %v2555_v53 }
 0x3a1   :  { %v15904_v60 = vpop.eup %15903  ;;  %v2458_v1 = vadd.f32 1e-05, %v2426_v32 }
 0x3a2   :  { %v15906_v50 = vpop.eup %15905  ;;  %v2461_v28 = vadd.f32 1e-05, %v2429_v49  ;;  %v17725_v0 = vadd.f32 %v17528_v13, %v2553_v17  ;;  %v2514_v6 = vmul.f32 %v15904_v60, %v17351_v9  ;;  %23124 = vst [vmem:[#allocation116_spill] sm:$0xff] %v17737_v61  ;;  %v17968_v21 = vpop.permute.xlu1 %2848 }
 0x3a3   :  { %15917 = vrsqrt.f32 %v2458_v1  ;;  %v2518_v11 = vmul.f32 %v15906_v50, %v17346_v2  ;;  %v2895_v2 = vrot.slane %v17586_v41, 1  ;;  %v2897_v50 = vrot.slane %v17609_v34, 1 }
 0x3a4   :  { %23122 = vst [vmem:[#allocation114_spill] sm:$0xff] %v17725_v0  ;;  %3256 = vrot.lane.b32.xlu0 %v17725_v0, %s16208_s4  ;;  %v2552_v38 = vmul.f32 %v17520_v42, %v2514_v6  ;;  %15919 = vrsqrt.f32 %v2461_v28  ;;  %v23127_v6 = vrot.slane %v17539_v45, 1 }
 0x3a5   :  { %v15908_v59 = vpop.eup %15907  ;;  %v2556_v57 = vmul.f32 %v17520_v42, %v2518_v11 }
 0x3a6   :  { %v15910_v58 = vpop.eup %15909  ;;  %v17734_v15 = vadd.f32 %v17528_v13, %v2552_v38  ;;  %v2516_v9 = vmul.f32 %v15908_v59, %v17363_v25 }
 0x3a7   :  { %v15912_v40 = vpop.eup %15911  ;;  %v2521_v32 = vmul.f32 %v15910_v58, %v17357_v3  ;;  %v17758_v28 = vadd.f32 %v17528_v13, %v2556_v57  ;;  %v2896_v58 = vrot.slane %v17570_v52, 1 }
 0x3a8   :  { %23123 = vst [vmem:[#allocation115_spill] sm:$0xff] %v17734_v15  ;;  %3254 = vrot.lane.b32.xlu1 %v17734_v15, %s16208_s4  ;;  %3260 = vrot.lane.b32.xlu0 %v17737_v61, %s16208_s4  ;;  %v2554_v33 = vmul.f32 %v17520_v42, %v2516_v9  ;;  %v2520_v49 = vmul.f32 %v15912_v40, %v17369_v14  ;;  %v2898_v9 = vrot.slane %v17598_v4, 1 }
 0x3a9   :  { %v15914_v56 = vpop.eup %15913  ;;  %23126 = vst [vmem:[#allocation118_spill] sm:$0xff] %v17758_v28  ;;  %v2559_v3 = vmul.f32 %v17520_v42, %v2521_v32  ;;  %v2954_v40 = vsel %vm2925_vm2, %v2895_v2, %v2896_v58 }
 0x3aa   :  { %v17749_v31 = vadd.f32 %v17528_v13, %v2554_v33  ;;  %v2519_v25 = vmul.f32 %v15914_v56, %v17375_v48  ;;  %v15916_v17 = vpop.eup %15915  ;;  %v2955_v48 = vsel %vm2925_vm2, %v23127_v6, %v2895_v2  ;;  %v2558_v59 = vmul.f32 %v17520_v42, %v2520_v49 }
 0x3ab   :  { %v2523_v14 = vmul.f32 %v15916_v17, %v17381_v7  ;;  %v17778_v7 = vadd.f32 %v17528_v13, %v2559_v3  ;;  %v2953_v33 = vsel %vm2925_vm2, %v2896_v58, %v2897_v50  ;;  %v2899_v49 = vrot.slane %v17622_v63, 1 }
 0x3ac   :  { %23125 = vst [vmem:[#allocation117_spill] sm:$0xff] %v17749_v31  ;;  %3258 = vrot.lane.b32.xlu1 %v17749_v31, %s16208_s4  ;;  %v2557_v60 = vmul.f32 %v17520_v42, %v2519_v25  ;;  %v17788_v32 = vadd.f32 %v17528_v13, %v2558_v59  ;;  %v2952_v2 = vsel %vm2925_vm2, %v2897_v50, %v2898_v9  ;;  %v22428_v58 = vrot.slane %v17554_v44, 7 }
 0x3ad   :  { %v15918_v1 = vpop.eup %15917  ;;  %23129 = vst [vmem:[#allocation120_spill] sm:$0xff] %v17778_v7  ;;  %v2561_v56 = vmul.f32 %v17520_v42, %v2523_v14  ;;  %v3153_v17 = vmul.f32 %v16942_v26, %v2953_v33  ;;  %v3154_v6 = vmul.f32 %v16946_v39, %v2952_v2  ;;  %v2605_v2 = vrot.slane %v17570_v52, 7 }
 0x3ae   :  { %v2522_v53 = vmul.f32 %v15918_v1, %v17390_v18  ;;  %v17768_v38 = vadd.f32 %v17528_v13, %v2557_v60  ;;  %v15920_v11 = vpop.eup %15919  ;;  %v3151_v18 = vmul.f32 %v16938_v16, %v2955_v48  ;;  %23130 = vst [vmem:[#allocation121_spill] sm:$0xff] %v17788_v32  ;;  %v3152_v16 = vmul.f32 %v17000_v23, %v2954_v40 }
 0x3af   :  { %v2525_v25 = vmul.f32 %v15920_v11, %v17397_v51  ;;  %v17804_v51 = vadd.f32 %v17528_v13, %v2561_v56  ;;  %v2951_v23 = vsel %vm2925_vm2, %v2898_v9, %v2899_v49  ;;  %v3383_v48 = vsel %vm2108_vm1, %v3153_v17, 0 }
 0x3b0   :  { %23128 = vst [vmem:[#allocation119_spill] sm:$0xff] %v17768_v38  ;;  %3264 = vrot.lane.b32.xlu0 %v17768_v38, %s16208_s4  ;;  %3262 = vrot.lane.b32.xlu1 %v17758_v28, %s16208_s4  ;;  %v2560_v57 = vmul.f32 %v17520_v42, %v2522_v53  ;;  %v3377_v3 = vsel %vm2108_vm1, %v3151_v18, 0  ;;  %v3380_v26 = vsel %vm2108_vm1, %v3152_v16, 0  ;;  %v23135_v53 = vld [vmem:[#allocation18_spill] sm:$0xff]  ;;  %v3386_v11 = vsel %vm2108_vm1, %v3154_v6, 0 }
 0x3b1   :  { %23132 = vst [vmem:[#allocation123_spill] sm:$0xff] %v17804_v51  ;;  %v2563_v1 = vmul.f32 %v17520_v42, %v2525_v25  ;;  %v17816_v50 = vand.u32 4294901760, %v3377_v3  ;;  %v3155_v39 = vmul.f32 %v23135_v53, %v2951_v23  ;;  %v17823_v59 = vand.u32 4294901760, %v3380_v26 }
 0x3b2   :  { %v17801_v60 = vadd.f32 %v17528_v13, %v2560_v57  ;;  %v17829_v9 = vand.u32 4294901760, %v3383_v48  ;;  %v2603_v18 = vrot.slane %v17539_v45, 7  ;;  %v2604_v40 = vrot.slane %v17586_v41, 7  ;;  %v23146_v45 = vld [vmem:[#allocation7_spill] sm:$0xff]  ;;  %v23153_v57 = vld [vmem:[#allocation57_spill] sm:$0xff] }
 0x3b3   :  { %23133 = vst [vmem:[#allocation124_spill] sm:$0xff] %v17816_v50  ;;  %v17820_v14 = vadd.f32 %v17528_v13, %v2563_v1  ;;  %23136 = vst [vmem:[#allocation18_spill] sm:$0xff] %v17823_v59  ;;  %v17835_v33 = vsub.f32 %v3377_v3, %v17816_v50  ;;  %v2900_v56 = vrot.slane %v17625_v29, 1  ;;  %v17839_v25 = vand.u32 4294901760, %v3386_v11 }
 0x3b4   :  { %3268 = vrot.lane.b32.xlu0 %v17778_v7, %s16208_s4  ;;  %3266 = vrot.lane.b32.xlu1 %v17788_v32, %s16208_s4  ;;  %23131 = vst [vmem:[#allocation122_spill] sm:$0xff] %v17801_v60  ;;  %23137 = vst [vmem:[#allocation126_spill] sm:$0xff] %v17829_v9  ;;  %v3389_v16 = vsel %vm2108_vm1, %v3155_v39, 0  ;;  %v2606_v17 = vrot.slane %v17609_v34, 7  ;;  %v17845_v1 = vsub.f32 %v3380_v26, %v17823_v59  ;;  %v2607_v39 = vrot.slane %v17598_v4, 7  ;;  %v23145_v34 = vld [vmem:[#allocation11_spill] sm:$0xff] }
 0x3b5   :  { %23134 = vst [vmem:[#allocation125_spill] sm:$0xff] %v17820_v14  ;;  %23138 = vst [vmem:[#allocation127_spill] sm:$0xff] %v17835_v33  ;;  %v2667_v3 = vsel %vm2636_vm3, %v22428_v58, %v2603_v18  ;;  %v17852_v6 = vsub.f32 %v3383_v48, %v17829_v9  ;;  %v2950_v23 = vsel %vm2925_vm2, %v2899_v49, %v2900_v56  ;;  %v17860_v26 = vand.u32 4294901760, %v3389_v16  ;;  %v23147_v59 = vld [vmem:[#allocation5_spill] sm:$0xff] }
 0x3b6   :  { %23139 = vst [vmem:[#allocation128_spill] sm:$0xff] %v17839_v25  ;;  %23140 = vst [vmem:[#allocation129_spill] sm:$0xff] %v17845_v1  ;;  %v2665_v53 = vsel %vm2636_vm3, %v2604_v40, %v2605_v2  ;;  %v2666_v52 = vsel %vm2636_vm3, %v2603_v18, %v2604_v40  ;;  %v17865_v58 = vsub.f32 %v3386_v11, %v17839_v25  ;;  %v23144_v48 = vrot.slane %v17641_v55, 1 }
 0x3b7   :  { %23141 = vst [vmem:[#allocation130_spill] sm:$0xff] %v17852_v6  ;;  %23142 = vst [vmem:[#allocation131_spill] sm:$0xff] %v17860_v26  ;;  %v17872_v41 = vmul.f32 %v23145_v34, %v2667_v3  ;;  %v2663_v4 = vsel %vm2636_vm3, %v2606_v17, %v2607_v39  ;;  %v3156_v9 = vmul.f32 %v23146_v45, %v2950_v23  ;;  %v23149_v3 = vand.u32 4294901760, %v17835_v33 }
 0x3b8   :  { %3270 = vrot.lane.b32.xlu1 %v17801_v60, %s16208_s4  ;;  %3272 = vrot.lane.b32.xlu0 %v17804_v51, %s16208_s4  ;;  %23143 = vst [vmem:[#allocation132_spill] sm:$0xff] %v17865_v58  ;;  %v2949_v49 = vsel %vm2925_vm2, %v2900_v56, %v23144_v48  ;;  %v17879_v18 = vmul.f32 %v23147_v59, %v2665_v53  ;;  %v2608_v56 = vrot.slane %v17622_v63, 7  ;;  %v23148_v48 = vld [vmem:[#allocation4_spill] sm:$0xff]  ;;  %v23151_v59 = vld [vmem:[#allocation9_spill] sm:$0xff]  ;;  %v22446_v40 = vand.u32 4294901760, %v17865_v58 }
 0x3b9   :  { %v2664_v11 = vsel %vm2636_vm3, %v2605_v2, %v2606_v17  ;;  %v17886_v34 = vmul.f32 %v23148_v48, %v2666_v52  ;;  %v17891_v25 = vsub.f32 %v17835_v33, %v23149_v3  ;;  %v17894_v45 = vsub.f32 %v3389_v16, %v17860_v26  ;;  %v23152_v2 = vld [vmem:[#allocation6_spill] sm:$0xff]  ;;  %v23154_v48 = vld [vmem:[#allocation15_spill] sm:$0xff]  ;;  %v23159_v26 = vld [vmem:[#allocation8_spill] sm:$0xff]  ;;  %23166 = vst [vmem:[#allocation9_spill] sm:$0xff] %v17968_v21 }
 0x3ba   :  { %v3157_v23 = vmul.f32 %v23151_v59, %v2949_v49  ;;  %v17899_v17 = vmul.f32 %v23152_v2, %v2663_v4  ;;  %v22451_v52 = vand.u32 4294901760, %v23153_v57  ;;  %v17904_v63 = vmul.f32 %v23154_v48, %v2664_v11  ;;  %v23156_v16 = vld [vmem:[#allocation58_spill] sm:$0xff]  ;;  %v23211_v60 = vld [vmem:[#allocation28_spill] sm:$0xff] }
 0x3bb   :  { %23150 = vst [vmem:[#allocation11_spill] sm:$0xff] %v17894_v45  ;;  %v23155_v3 = vand.u32 4294901760, %v17845_v1  ;;  %v3392_v49 = vsel %vm2108_vm1, %v3156_v9, 0  ;;  %v23157_v2 = vand.u32 4294901760, %v17852_v6  ;;  %v2662_v11 = vsel %vm2636_vm3, %v2607_v39, %v2608_v56  ;;  %v23172_v21 = vld [vmem:[#allocation10_spill] sm:$0xff] }
 0x3bc   :  { %3276 = vrot.lane.b32.xlu0 %v17820_v14, %s16208_s4  ;;  %v3395_v9 = vsel %vm2108_vm1, %v3157_v23, 0  ;;  %v17930_v4 = vsub.f32 %v17865_v58, %v22446_v40  ;;  %v17935_v39 = vand.u32 4294901760, %v3392_v49  ;;  %v23160_v23 = vand.u32 4294901760, %v23156_v16 }
 0x3bd   :  { %v17909_v33 = vsub.f32 %v17845_v1, %v23155_v3  ;;  %v17918_v53 = vsub.f32 %v17852_v6, %v23157_v2  ;;  %v4042_v2 = vsub.f32 %v23153_v57, %v22451_v52  ;;  %v17940_v6 = vmul.f32 %v23159_v26, %v2662_v11  ;;  %v23164_v57 = vld [vmem:[#allocation60_spill] sm:$0xff] }
 0x3be   :  { %23158 = vst [vmem:[#allocation7_spill] sm:$0xff] %v17935_v39  ;;  %v4049_v59 = vsub.f32 %v23156_v16, %v23160_v23  ;;  %v17948_v52 = vand.u32 4294901760, %v3395_v9  ;;  %v23162_v3 = vand.u32 4294901760, %v17894_v45  ;;  %v2610_v11 = vrot.slane %v17641_v55, 7  ;;  %v17970_v23 = vpop.permute.xlu0 %3137 }
 0x3bf   :  { %v4043_v40 = vand.u32 4294901760, %v4042_v2  ;;  %v2609_v58 = vrot.slane %v17625_v29, 7  ;;  %v17961_v1 = vsub.f32 %v3392_v49, %v17935_v39  ;;  %23167 = vst [vmem:[#allocation6_spill] sm:$0xff] %v17970_v23  ;;  %v23170_v39 = vand.u32 4294901760, %v23164_v57  ;;  %v23180_v23 = vld [vmem:[#allocation21_spill] sm:$0xff] }
 0x3c0   :  { %23161 = vst [vmem:[#allocation5_spill] sm:$0xff] %v17948_v52  ;;  %v17955_v26 = vsub.f32 %v17894_v45, %v23162_v3  ;;  %v4050_v16 = vand.u32 4294901760, %v4049_v59  ;;  %v17974_v49 = vsub.f32 %v3395_v9, %v17948_v52  ;;  %v2611_v3 = vrot.slane %v17644_v19, 7 }
 0x3c1   :  { %23163 = vst [vmem:[#allocation4_spill] sm:$0xff] %v17961_v1  ;;  %v2660_v48 = vsel %vm2636_vm3, %v2609_v58, %v2610_v11  ;;  %v2661_v61 = vsel %vm2636_vm3, %v2608_v56, %v2609_v58  ;;  %v23169_v59 = vrot.slane %v17658_v22, 7  ;;  %v4056_v58 = vsub.f32 %v23164_v57, %v23170_v39 }
 0x3c2   :  { %23168 = vst [vmem:[#allocation15_spill] sm:$0xff] %v17974_v49  ;;  %v17986_v9 = vpack.c.bf16 %v4050_v16, %v4043_v40  ;;  %v23171_v56 = vand.u32 4294901760, %v23165_v24  ;;  %v18000_v2 = vmul.f32 %v23172_v21, %v2660_v48  ;;  %v23173_v40 = vld [vmem:[#allocation23_spill] sm:$0xff]  ;;  %v23174_v57 = vrot.slane %v17644_v19, 1  ;;  %v18015_v48 = vpop.permute.xlu1 %3142 }
 0x3c3   :  { %v2658_v52 = vsel %vm2636_vm3, %v2611_v3, %v23169_v59  ;;  %v18003_v16 = vmul.f32 %v23173_v40, %v2661_v61  ;;  %23176 = vst [vmem:[#allocation8_spill] sm:$0xff] %v18015_v48  ;;  %v23177_v61 = vrot.slane %v17554_v44, 7  ;;  %v23178_v40 = vrot.slane %v17820_v14, 7 }
 0x3c4   :  { %v4063_v45 = vsub.f32 %v23165_v24, %v23171_v56  ;;  %v23175_v56 = vrot.slane %v17641_v55, 1  ;;  %v18029_v55 = vmul.f32 %v23180_v23, %v2658_v52  ;;  %v4057_v21 = vand.u32 4294901760, %v4056_v58 }
 0x3c5   :  { %v2668_v59 = vsel %vm2636_vm3, %v23178_v40, %v23177_v61  ;;  %v23182_v44 = vand.u32 4294901760, %v17974_v49  ;;  %v2613_v61 = vrot.slane %v17661_v43, 7  ;;  %v2659_v40 = vsel %vm2636_vm3, %v2610_v11, %v2611_v3 }
 0x3c6   :  { %v2948_v50 = vsel %vm2925_vm2, %v23175_v56, %v23174_v57  ;;  %v4064_v24 = vand.u32 4294901760, %v4063_v45  ;;  %v23184_v45 = vld [vmem:[#allocation3_spill] sm:$0xff] }
 0x3c7   :  { %v18037_v51 = vsub.f32 %v17974_v49, %v23182_v44  ;;  %v2861_v58 = vmul.f32 %v23184_v45, %v2668_v59 }
 0x3c8   :  { %v18057_v3 = vpack.c.bf16 %v4064_v24, %v4057_v21  ;;  %v23199_v21 = vld [vmem:[#allocation19_spill] sm:$0xff] }
 0x3d4   :  { %v2394_v29 = vpop.xlane.xlu0 %2393 }
 0x3d5   :  { %v2428_v39 = vmul.f32 0.015625, %v2394_v29  ;;  %v23179_v29 = vand.u32 4294901760, %v17961_v1 }
 0x3d7   :  { %v18026_v7 = vsub.f32 %v17961_v1, %v23179_v29  ;;  %v2460_v56 = vadd.f32 1e-05, %v2428_v39  ;;  %v23183_v29 = vld [vmem:[#allocation27_spill] sm:$0xff]  ;;  %v22481_v39 = vand.u32 4294901760, %v17445_v35  ;;  %v22480_v1 = vrot.slane %v17675_v30, 7 }
 0x3d8   :  { %v18032_v48 = vpop.permute.xlu0 %3216  ;;  %v3158_v52 = vmul.f32 %v23183_v29, %v2948_v50 }
 0x3d9   :  { %23181 = vst [vmem:[#allocation10_spill] sm:$0xff] %v18032_v48  ;;  %15921 = vrsqrt.f32 %v2460_v56  ;;  %v3311_v23 = vsel %vm2108_vm1, %v17872_v41, %v18032_v48  ;;  %v23187_v41 = vld [vmem:[#allocation13_spill] sm:$0xff]  ;;  %v2656_v49 = vsel %vm2636_vm3, %v2613_v61, %v22480_v1  ;;  %v23192_v1 = vrot.slane %v17688_v54, 7 }
 0x3da   :  { %v18048_v57 = vand.u32 4294901760, %v3311_v23  ;;  %v18050_v44 = vpop.permute.xlu1 %3214  ;;  %v18060_v56 = vmul.f32 %v23187_v41, %v2659_v40  ;;  %v3398_v11 = vsel %vm2108_vm1, %v3158_v52, 0  ;;  %v4070_v40 = vsub.f32 %v17445_v35, %v22481_v39 }
 0x3db   :  { %23186 = vst [vmem:[#allocation21_spill] sm:$0xff] %v18050_v44  ;;  %v3310_v50 = vsel %vm2108_vm1, %v2861_v58, %v18050_v44  ;;  %v23193_v52 = vrot.slane %v17672_v62, 7  ;;  %v18099_v44 = vand.u32 4294901760, %v3398_v11 }
 0x3dc   :  { %23185 = vst [vmem:[#allocation23_spill] sm:$0xff] %v18048_v57  ;;  %v18064_v29 = vsub.f32 %v3311_v23, %v18048_v57  ;;  %v18066_v45 = vand.u32 4294901760, %v3310_v50  ;;  %v23194_v23 = vld [vmem:[#allocation31_spill] sm:$0xff] }
 0x3dd   :  { %v2654_v24 = vsel %vm2636_vm3, %v23193_v52, %v23192_v1  ;;  %v18097_v48 = vmul.f32 %v23194_v23, %v2656_v49  ;;  %23196 = vst [vmem:[#allocation134_spill] sm:$0xff] %v18099_v44  ;;  %v23198_v1 = vrot.slane %v17658_v22, 7  ;;  %v23201_v49 = vand.u32 4294901760, %v17447_v20 }
 0x3de   :  { %23188 = vst [vmem:[#allocation27_spill] sm:$0xff] %v18064_v29  ;;  %23189 = vst [vmem:[#allocation3_spill] sm:$0xff] %v18066_v45  ;;  %v18080_v58 = vsub.f32 %v3310_v50, %v18066_v45  ;;  %v18082_v41 = vpop.permute.xlu1 %3220  ;;  %v4071_v50 = vand.u32 4294901760, %v4070_v40  ;;  %v23203_v45 = vrot.slane %v17644_v19, 1 }
 0x3df   :  { %23191 = vst [vmem:[#allocation133_spill] sm:$0xff] %v18082_v41  ;;  %v3313_v39 = vsel %vm2108_vm1, %v17879_v18, %v18082_v41  ;;  %23195 = vst [vmem:[#allocation31_spill] sm:$0xff] %v18097_v48  ;;  %v2657_v52 = vsel %vm2636_vm3, %v23198_v1, %v2613_v61  ;;  %v18110_v18 = vmul.f32 %v23199_v21, %v2654_v24  ;;  %v23202_v41 = vrot.slane %v17658_v22, 1  ;;  %v23214_v1 = vld [vmem:[#allocation62_spill] sm:$0xff]  ;;  %v23216_v48 = vld [vmem:[#allocation12_spill] sm:$0xff] }
 0x3e0   :  { %23190 = vst [vmem:[#allocation13_spill] sm:$0xff] %v18080_v58  ;;  %v18101_v59 = vand.u32 4294901760, %v3313_v39  ;;  %v4077_v23 = vsub.f32 %v17447_v20, %v23201_v49  ;;  %v23205_v14 = vand.u32 4294901760, %v18080_v58  ;;  %v23206_v24 = vrot.slane %v17699_v37, 7  ;;  %v23208_v49 = vld [vmem:[#allocation66_spill] sm:$0xff] }
 0x3e1   :  { %23200 = vst [vmem:[#allocation19_spill] sm:$0xff] %v18110_v18  ;;  %v2947_v57 = vsel %vm2925_vm2, %v23203_v45, %v23202_v41  ;;  %v23207_v21 = vrot.slane %v17685_v12, 7  ;;  %v23209_v41 = vand.u32 4294901760, %v18064_v29  ;;  %v18144_v32 = vmul.f32 %v23211_v60, %v2657_v52 }
 0x3e2   :  { %23197 = vst [vmem:[#allocation135_spill] sm:$0xff] %v18101_v59  ;;  %v18121_v35 = vpop.permute.xlu0 %3218  ;;  %v3566_v61 = vsub.f32 %v18080_v58, %v23205_v14  ;;  %v18141_v58 = vsub.f32 %v3398_v11, %v18099_v44  ;;  %v4078_v18 = vand.u32 4294901760, %v4077_v23  ;;  %v23219_v52 = vand.u32 4294901760, %v17451_v36 }
 0x3e3   :  { %23204 = vst [vmem:[#allocation136_spill] sm:$0xff] %v18121_v35  ;;  %v2652_v40 = vsel %vm2636_vm3, %v23207_v21, %v23206_v24  ;;  %v15922_v20 = vpop.eup %15921  ;;  %v3312_v45 = vsel %vm2108_vm1, %v17886_v34, %v18121_v35  ;;  %v3581_v14 = vsub.f32 %v18064_v29, %v23209_v41  ;;  %v18147_v24 = vsub.f32 %v3313_v39, %v18101_v59  ;;  %v23215_v34 = vld [vmem:[#allocation26_spill] sm:$0xff] }
 0x3e4   :  { %23210 = vst [vmem:[#allocation66_spill] sm:$0xff] %v18141_v58  ;;  %v18149_v21 = vand.u32 4294901760, %v3312_v45  ;;  %v3567_v19 = vand.u32 4294901760, %v3566_v61  ;;  %v2524_v38 = vmul.f32 %v15922_v20, %v23214_v1  ;;  %v18153_v35 = vmul.f32 %v23215_v34, %v2652_v40  ;;  %v23222_v40 = vld [vmem:[#allocation67_spill] sm:$0xff] }
 0x3e5   :  { %23212 = vst [vmem:[#allocation28_spill] sm:$0xff] %v18147_v24  ;;  %v3159_v41 = vmul.f32 %v23216_v48, %v2947_v57  ;;  %v4084_v20 = vsub.f32 %v17451_v36, %v23219_v52  ;;  %v23220_v23 = vand.u32 4294901760, %v23208_v49  ;;  %v23221_v57 = vand.u32 4294901760, %v17891_v25 }
 0x3e6   :  { %23213 = vst [vmem:[#allocation137_spill] sm:$0xff] %v18149_v21  ;;  %v18158_v29 = vsub.f32 %v3312_v45, %v18149_v21  ;;  %3568 = vmatmul.mubr.f32.vlgmr.msra.gmra.mrb[0].mxu1 %v3567_v19  ;;  %v18160_v60 = vpop.permute.xlu0 %3224  ;;  %v2562_v39 = vmul.f32 %v17520_v42, %v2524_v38  ;;  %v3582_v19 = vand.u32 4294901760, %v3581_v14  ;;  %v23223_v38 = vld [vmem:[#allocation69_spill] sm:$0xff]  ;;  %v14588_v25 = vpack.c.bf16 %v4078_v18, %v4071_v50 }
 0x3e7   :  { %23218 = vst [vmem:[#allocation26_spill] sm:$0xff] %v18160_v60  ;;  %v4091_v61 = vsub.f32 %v23208_v49, %v23220_v23  ;;  %v3315_v48 = vsel %vm2108_vm1, %v17899_v17, %v18160_v60  ;;  %3577 = vmatprep.mubr.f32.mxu1 %v23221_v57  ;;  %14583 = vmatpush1.bf16.msra.mxu1 %v17986_v9  ;;  %v3401_v17 = vsel %vm2108_vm1, %v3159_v41, 0  ;;  %v23226_v9 = vrot.slane %v17672_v62, 7  ;;  %v23231_v23 = vld [vmem:[#allocation70_spill] sm:$0xff]  ;;  %v23240_v60 = vld [vmem:[#allocation16_spill] sm:$0xff] }
 0x3e8   :  { %23217 = vst [vmem:[#allocation62_spill] sm:$0xff] %v18158_v29  ;;  %v18177_v45 = vand.u32 4294901760, %v3315_v48  ;;  %v18180_v34 = vadd.f32 %v17528_v13, %v2562_v39  ;;  %v22508_v52 = vand.u32 4294901760, %v18158_v29  ;;  %14584 = vmatprep.subr.bf16.mxu1 %v23070_v46  ;;  %v23227_v14 = vrot.slane %v17675_v30, 7 }
 0x3e9   :  { %v23228_v11 = vrot.slane %v17661_v43, 1  ;;  %v23229_v13 = vrot.slane %v17658_v22, 1  ;;  %v4085_v41 = vand.u32 4294901760, %v4084_v20  ;;  %v23235_v20 = vand.u32 4294901760, %v23223_v38 }
 0x3ea   :  { %23224 = vst [vmem:[#allocation12_spill] sm:$0xff] %v18177_v45  ;;  %23225 = vst [vmem:[#allocation67_spill] sm:$0xff] %v18180_v34  ;;  %v2655_v57 = vsel %vm2636_vm3, %v23227_v14, %v23226_v9  ;;  %3274 = vrot.lane.b32.xlu1 %v18180_v34, %s16208_s4  ;;  %3583 = vmatmul.mubr.f32.gmra.mrb[2].mxu1 %v3582_v19  ;;  %v18200_v50 = vpop.permute.xlu0 %3222  ;;  %v3596_v18 = vsub.f32 %v18158_v29, %v22508_v52  ;;  %v23232_v14 = vld [vmem:[#allocation71_spill] sm:$0xff]  ;;  %v4092_v19 = vand.u32 4294901760, %v4091_v61 }
 0x3eb   :  { %v2946_v39 = vsel %vm2925_vm2, %v23229_v13, %v23228_v11  ;;  %23230 = vst [vmem:[#allocation69_spill] sm:$0xff] %v18200_v50  ;;  %v3314_v42 = vsel %vm2108_vm1, %v17904_v63, %v18200_v50  ;;  %v23233_v11 = vand.u32 4294901760, %v17909_v33  ;;  %14586 = vmatpush1.bf16.msra.mxu1 %v18057_v3  ;;  %v23234_v13 = vand.u32 4294901760, %v23222_v40  ;;  %v23242_v50 = vld [vmem:[#allocation17_spill] sm:$0xff] }
 0x3ec   :  { %v4105_v52 = vsub.f32 %v23223_v38, %v23235_v20  ;;  %v18220_v1 = vsub.f32 %v3315_v48, %v18177_v45  ;;  %v18222_v9 = vand.u32 4294901760, %v3314_v42  ;;  %v3597_v63 = vand.u32 4294901760, %v3596_v18  ;;  %14587 = vmatprep.subr.bf16.mxu1 %v23070_v46 }
 0x3ed   :  { %3592 = vmatprep.mubr.f32.mxu1 %v23233_v11  ;;  %v4098_v22 = vsub.f32 %v23222_v40, %v23234_v13  ;;  %v23238_v33 = vand.u32 4294901760, %v18147_v24  ;;  %v18229_v61 = vand.u32 4294901760, %v3401_v17  ;;  %v3160_v20 = vmul.f32 %v23240_v60, %v2946_v39 }
 0x3ee   :  { %23236 = vst [vmem:[#allocation138_spill] sm:$0xff] %v18220_v1  ;;  %23237 = vst [vmem:[#allocation139_spill] sm:$0xff] %v18222_v9  ;;  %v18234_v48 = vsub.f32 %v3314_v42, %v18222_v9  ;;  %3598 = vmatmul.mubr.f32.gmra.mrb[4].mxu1 %v3597_v63  ;;  %v18237_v18 = vmul.f32 %v23242_v50, %v2655_v57  ;;  %v23243_v29 = vand.u32 4294901760, %v23231_v23  ;;  %v23245_v13 = vand.u32 4294901760, %v17918_v53  ;;  %v23246_v63 = vld [vmem:[#allocation72_spill] sm:$0xff] }
 0x3ef   :  { %v3611_v11 = vsub.f32 %v18147_v24, %v23238_v33  ;;  %23239 = vst [vmem:[#allocation140_spill] sm:$0xff] %v18229_v61  ;;  %v23244_v24 = vand.u32 4294901760, %v23232_v14  ;;  %v18245_v44 = vpop.permute.xlu1 %2858  ;;  %14589 = vmatpush1.bf16.msra.mxu1 %v14588_v25  ;;  %v14591_v60 = vpack.c.bf16 %v4092_v19, %v4085_v41  ;;  %v4099_v42 = vand.u32 4294901760, %v4098_v22 }
 0x3f0   :  { %23241 = vst [vmem:[#allocation16_spill] sm:$0xff] %v18234_v48  ;;  %v4112_v33 = vsub.f32 %v23231_v23, %v23243_v29  ;;  %3607 = vmatprep.mubr.f32.mxu1 %v23245_v13  ;;  %v4106_v39 = vand.u32 4294901760, %v4105_v52  ;;  %v22521_v45 = vand.u32 4294901760, %v18234_v48  ;;  %14590 = vmatprep.subr.bf16.mxu1 %v23070_v46  ;;  %v23247_v23 = vld [vmem:[#allocation73_spill] sm:$0xff]  ;;  %v18260_v25 = vsub.f32 %v3401_v17, %v18229_v61 }
 0x3f1   :  { %v4119_v3 = vsub.f32 %v23232_v14, %v23244_v24  ;;  %v3612_v50 = vand.u32 4294901760, %v3611_v11  ;;  %v23248_v14 = vand.u32 4294901760, %v18141_v58  ;;  %v23250_v22 = vrot.slane %v17712_v5, 7 }
 0x3f2   :  { %23249 = vst [vmem:[#allocation17_spill] sm:$0xff] %v18260_v25  ;;  %v23251_v52 = vrot.slane %v17702_v47, 7  ;;  %v3404_v19 = vsel %vm2108_vm1, %v3160_v20, 0  ;;  %v3626_v11 = vsub.f32 %v18234_v48, %v22521_v45  ;;  %v23253_v13 = vrot.slane %v17661_v43, 1  ;;  %v23257_v45 = vld [vmem:[#allocation75_spill] sm:$0xff]  ;;  %v23258_v48 = vld [vmem:[#allocation76_spill] sm:$0xff] }
 0x3f3   :  { %v18257_v53 = vsub.f32 %v18141_v58, %v23248_v14  ;;  %3613 = vmatmul.mubr.f32.gmra.mrb[6].mxu1 %v3612_v50  ;;  %v23252_v14 = vrot.slane %v17675_v30, 1  ;;  %v4113_v24 = vand.u32 4294901760, %v4112_v33  ;;  %v4120_v29 = vand.u32 4294901760, %v4119_v3  ;;  %v18278_v57 = vpop.permute.xlu1 %3226 }
 0x3f4   :  { %v2650_v41 = vsel %vm2636_vm3, %v23251_v52, %v23250_v22  ;;  %23254 = vst [vmem:[#allocation72_spill] sm:$0xff] %v18278_v57  ;;  %v23255_v22 = vand.u32 4294901760, %v17930_v4  ;;  %14592 = vmatpush1.bf16.msra.mxu1 %v14591_v60  ;;  %v14594_v20 = vpack.c.bf16 %v4106_v39, %v4099_v42  ;;  %v23256_v50 = vand.u32 4294901760, %v23246_v63 }
 0x3f5   :  { %v2945_v17 = vsel %vm2925_vm2, %v23253_v13, %v23252_v14  ;;  %v3316_v33 = vsel %vm2108_vm1, %v17940_v6, %v18278_v57  ;;  %v3627_v3 = vand.u32 4294901760, %v3626_v11  ;;  %v23259_v14 = vand.u32 4294901760, %v18220_v1  ;;  %14593 = vmatprep.subr.bf16.mxu1 %v23070_v46  ;;  %v23264_v6 = vld [vmem:[#allocation25_spill] sm:$0xff] }
 0x3f6   :  { %3622 = vmatprep.mubr.f32.mxu1 %v23255_v22  ;;  %v4126_v52 = vsub.f32 %v23246_v63, %v23256_v50  ;;  %v23260_v60 = vand.u32 4294901760, %v23247_v23  ;;  %v18297_v39 = vand.u32 4294901760, %v3316_v33  ;;  %v23262_v22 = vld [vmem:[#allocation33_spill] sm:$0xff]  ;;  %v18303_v43 = vand.u32 4294901760, %v3404_v19 }
 0x3f7   :  { %v3641_v4 = vsub.f32 %v18220_v1, %v23259_v14  ;;  %v18301_v50 = vmul.f32 %v23262_v22, %v2650_v41  ;;  %3628 = vmatmul.mubr.f32.gmra.mrb[8].mxu1 %v3627_v3  ;;  %v3161_v11 = vmul.f32 %v23264_v6, %v2945_v17  ;;  %v14597_v57 = vpack.c.bf16 %v4120_v29, %v4113_v24  ;;  %v23270_v6 = vld [vmem:[#allocation81_spill] sm:$0xff]  ;;  %v23271_v14 = vld [vmem:[#allocation82_spill] sm:$0xff] }
 0x3f8   :  { %v4133_v42 = vsub.f32 %v23247_v23, %v23260_v60  ;;  %23261 = vst [vmem:[#allocation141_spill] sm:$0xff] %v18297_v39  ;;  %23263 = vst [vmem:[#allocation33_spill] sm:$0xff] %v18303_v43  ;;  %v18309_v1 = vsub.f32 %v3316_v33, %v18297_v39  ;;  %v18311_v60 = vpop.permute.xlu1 %7176  ;;  %v23267_v13 = vand.u32 4294901760, %v17955_v26  ;;  %14595 = vmatpush1.bf16.msra.mxu1 %v14594_v20  ;;  %v23268_v41 = vand.u32 4294901760, %v23257_v45 }
 0x3f9   :  { %23266 = vst [vmem:[#allocation142_spill] sm:$0xff] %v18311_v60  ;;  %v23269_v17 = vand.u32 4294901760, %v23258_v48  ;;  %v3642_v29 = vand.u32 4294901760, %v3641_v4  ;;  %14596 = vmatprep.subr.bf16.mxu1 %v23070_v46  ;;  %v4127_v24 = vand.u32 4294901760, %v4126_v52  ;;  %v23275_v52 = vand.u32 4294901760, %v18260_v25 }
 0x3fa   :  { %23265 = vst [vmem:[#allocation25_spill] sm:$0xff] %v18309_v1  ;;  %3637 = vmatprep.mubr.f32.mxu1 %v23267_v13  ;;  %v4140_v3 = vsub.f32 %v23257_v45, %v23268_v41  ;;  %v4134_v33 = vand.u32 4294901760, %v4133_v42  ;;  %v18327_v13 = vsub.f32 %v3404_v19, %v18303_v43  ;;  %v23273_v41 = vrot.slane %v17685_v12, 7 }
 0x3fb   :  { %v4147_v22 = vsub.f32 %v23258_v48, %v23269_v17  ;;  %v23274_v17 = vrot.slane %v17688_v54, 7  ;;  %3643 = vmatmul.mubr.f32.gmra.mrb[10].mxu1 %v3642_v29  ;;  %v18338_v42 = vsub.f32 %v18260_v25, %v23275_v52  ;;  %v3407_v60 = vsel %vm2108_vm1, %v3161_v11, 0  ;;  %v18357_v11 = vpop.permute.xlu0 %2853  ;;  %v23294_v48 = vld [vmem:[#allocation14_spill] sm:$0xff] }
 0x3fc   :  { %23272 = vst [vmem:[#allocation143_spill] sm:$0xff] %v18327_v13  ;;  %v23276_v20 = vrot.slane %v17734_v15, 7  ;;  %v23277_v19 = vrot.slane %v17715_v8, 7  ;;  %v23278_v26 = vrot.slane %v17672_v62, 1  ;;  %v23279_v43 = vrot.slane %v17675_v30, 1  ;;  %14598 = vmatpush1.bf16.msra.mxu1 %v14597_v57  ;;  %v23288_v62 = vld [vmem:[#allocation24_spill] sm:$0xff] }
 0x3fd   :  { %v2653_v4 = vsel %vm2636_vm3, %v23274_v17, %v23273_v41  ;;  %v18353_v41 = vpop.permute.xlu1 %3230  ;;  %v23281_v17 = vand.u32 4294901760, %v18026_v7  ;;  %v23282_v52 = vand.u32 4294901760, %v18309_v1  ;;  %v23283_v61 = vand.u32 4294901760, %v23270_v6  ;;  %14599 = vmatprep.subr.bf16.mxu1 %v23070_v46 }
 0x3fe   :  { %v2648_v58 = vsel %vm2636_vm3, %v23277_v19, %v23276_v20  ;;  %v2944_v29 = vsel %vm2925_vm2, %v23279_v43, %v23278_v26  ;;  %23280 = vst [vmem:[#allocation144_spill] sm:$0xff] %v18353_v41  ;;  %v4141_v20 = vand.u32 4294901760, %v4140_v3  ;;  %v4148_v19 = vand.u32 4294901760, %v4147_v22 }
 0x3ff   :  { %3652 = vmatprep.mubr.f32.mxu1 %v23281_v17  ;;  %v3656_v25 = vsub.f32 %v18309_v1, %v23282_v52  ;;  %v4154_v30 = vsub.f32 %v23270_v6, %v23283_v61  ;;  %v3318_v43 = vsel %vm2108_vm1, %v18000_v2, %v18353_v41  ;;  %v23284_v7 = vrot.slane %v17688_v54, 1  ;;  %v23293_v1 = vld [vmem:[#allocation38_spill] sm:$0xff] }
 0x400   :  { %v14600_v57 = vpack.c.bf16 %v4134_v33, %v4127_v24  ;;  %v23285_v3 = vand.u32 4294901760, %v23271_v14  ;;  %v18378_v52 = vand.u32 4294901760, %v3318_v43  ;;  %v18381_v2 = vand.u32 4294901760, %v3407_v60 }
 0x401   :  { %v2943_v17 = vsel %vm2925_vm2, %v23278_v26, %v23284_v7  ;;  %v3657_v61 = vand.u32 4294901760, %v3656_v25  ;;  %v18385_v6 = vmul.f32 %v23288_v62, %v2653_v4  ;;  %v23289_v7 = vrot.slane %v17702_v47, 7  ;;  %v23291_v26 = vld [vmem:[#allocation34_spill] sm:$0xff]  ;;  %v18394_v25 = vpop.permute.xlu0 %3228 }
 0x402   :  { %v4161_v22 = vsub.f32 %v23271_v14, %v23285_v3  ;;  %23286 = vst [vmem:[#allocation145_spill] sm:$0xff] %v18378_v52  ;;  %23287 = vst [vmem:[#allocation146_spill] sm:$0xff] %v18381_v2  ;;  %v23290_v24 = vrot.slane %v17699_v37, 7  ;;  %v3162_v3 = vmul.f32 %v23291_v26, %v2944_v29  ;;  %v18397_v14 = vmul.f32 %v23293_v1, %v2648_v58 }
 0x403   :  { %3658 = vmatmul.mubr.f32.gmra.mrb[12].mxu1 %v3657_v61  ;;  %23292 = vst [vmem:[#allocation24_spill] sm:$0xff] %v18394_v25  ;;  %v3163_v41 = vmul.f32 %v23294_v48, %v2943_v17  ;;  %v14603_v45 = vpack.c.bf16 %v4148_v19, %v4141_v20  ;;  %v4155_v62 = vand.u32 4294901760, %v4154_v30  ;;  %v18401_v4 = vsub.f32 %v3318_v43, %v18378_v52  ;;  %v23300_v20 = vld [vmem:[#allocation32_spill] sm:$0xff] }
 0x404   :  { %v2651_v33 = vsel %vm2636_vm3, %v23290_v24, %v23289_v7  ;;  %v3317_v39 = vsel %vm2108_vm1, %v18003_v16, %v18394_v25  ;;  %v23296_v7 = vand.u32 4294901760, %v18037_v51  ;;  %14601 = vmatpush1.bf16.msra.mxu1 %v14600_v57  ;;  %v4162_v29 = vand.u32 4294901760, %v4161_v22  ;;  %v18423_v51 = vpop.permute.xlu1 %3234  ;;  %v23302_v57 = vld [vmem:[#allocation85_spill] sm:$0xff] }
 0x405   :  { %23295 = vst [vmem:[#allocation34_spill] sm:$0xff] %v18401_v4  ;;  %v22549_v61 = vand.u32 4294901760, %v17524_v27  ;;  %v18409_v58 = vand.u32 4294901760, %v3317_v39  ;;  %v23298_v1 = vand.u32 4294901760, %v18327_v13  ;;  %v18417_v48 = vsub.f32 %v3407_v60, %v18381_v2  ;;  %14602 = vmatprep.subr.bf16.mxu1 %v23070_v46  ;;  %23301 = vst [vmem:[#allocation32_spill] sm:$0xff] %v18423_v51  ;;  %v23317_v2 = vld [vmem:[#allocation20_spill] sm:$0xff] }
 0x406   :  { %3667 = vmatprep.mubr.f32.mxu1 %v23296_v7  ;;  %v18420_v19 = vmul.f32 %v23300_v20, %v2651_v33  ;;  %v3410_v16 = vsel %vm2108_vm1, %v3162_v3, 0  ;;  %v2623_v43 = vrot.slane %v17725_v0, 7  ;;  %v3320_v60 = vsel %vm2108_vm1, %v18029_v55, %v18423_v51  ;;  %v18435_v33 = vpop.permute.xlu0 %3147  ;;  %v23309_v51 = vld [vmem:[#allocation116_spill] sm:$0xff] }
 0x407   :  { %23297 = vst [vmem:[#allocation38_spill] sm:$0xff] %v18409_v58  ;;  %v18414_v30 = vsub.f32 %v18327_v13, %v23298_v1  ;;  %23299 = vst [vmem:[#allocation14_spill] sm:$0xff] %v18417_v48  ;;  %v18430_v24 = vsub.f32 %v3317_v39, %v18409_v58  ;;  %v3413_v26 = vsel %vm2108_vm1, %v3163_v41, 0  ;;  %v4168_v3 = vsub.f32 %v17524_v27, %v22549_v61 }
 0x408   :  { %v18441_v7 = vand.u32 4294901760, %v3320_v60  ;;  %v23305_v20 = vrot.slane %v17685_v12, 1  ;;  %v23306_v39 = vrot.slane %v17688_v54, 1  ;;  %14604 = vmatpush1.bf16.msra.mxu1 %v14603_v45  ;;  %v14606_v55 = vpack.c.bf16 %v4162_v29, %v4155_v62 }
 0x409   :  { %23303 = vst [vmem:[#allocation147_spill] sm:$0xff] %v18430_v24  ;;  %v23307_v41 = vrot.slane %v17715_v8, 7  ;;  %v23308_v25 = vrot.slane %v17712_v5, 7  ;;  %14605 = vmatprep.subr.bf16.mxu1 %v23070_v46  ;;  %v23310_v54 = vand.u32 4294901760, %v23302_v57  ;;  %v18465_v62 = vand.u32 4294901760, %v3410_v16 }
 0x40a   :  { %23304 = vst [vmem:[#allocation148_spill] sm:$0xff] %v18441_v7  ;;  %v2942_v17 = vsel %vm2925_vm2, %v23306_v39, %v23305_v20  ;;  %v18462_v20 = vpop.permute.xlu1 %3238  ;;  %v18467_v29 = vand.u32 4294901760, %v3413_v26  ;;  %v18470_v22 = vpop.permute.xlu0 %3232  ;;  %v23316_v1 = vrot.slane %v17749_v31, 7  ;;  %v4169_v45 = vand.u32 4294901760, %v4168_v3 }
 0x40b   :  { %v2649_v61 = vsel %vm2636_vm3, %v23308_v25, %v23307_v41  ;;  %v4175_v13 = vsub.f32 %v23302_v57, %v23310_v54  ;;  %23311 = vst [vmem:[#allocation149_spill] sm:$0xff] %v18462_v20  ;;  %23312 = vst [vmem:[#allocation150_spill] sm:$0xff] %v18465_v62  ;;  %v23315_v25 = vand.u32 4294901760, %v18430_v24  ;;  %v3164_v57 = vmul.f32 %v23317_v2, %v2942_v17  ;;  %v23322_v2 = vld [vmem:[#allocation31_spill] sm:$0xff] }
 0x40c   :  { %23313 = vst [vmem:[#allocation151_spill] sm:$0xff] %v18467_v29  ;;  %23314 = vst [vmem:[#allocation152_spill] sm:$0xff] %v18470_v22  ;;  %v2646_v54 = vsel %vm2636_vm3, %v2623_v43, %v23316_v1  ;;  %v18481_v27 = vsub.f32 %v3320_v60, %v18441_v7  ;;  %v3319_v39 = vsel %vm2108_vm1, %v18060_v56, %v18470_v22  ;;  %v23319_v52 = vand.u32 4294901760, %v18401_v4 }
 0x40d   :  { %v3671_v41 = vsub.f32 %v18430_v24, %v23315_v25  ;;  %v23320_v25 = vrot.slane %v17699_v37, 1  ;;  %v23321_v24 = vrot.slane %v17685_v12, 1  ;;  %14607 = vmatpush1.bf16.msra.mxu1 %v14606_v55  ;;  %v3322_v17 = vsel %vm2108_vm1, %v23322_v2, %v18462_v20 }
 0x40e   :  { %23318 = vst [vmem:[#allocation20_spill] sm:$0xff] %v18481_v27  ;;  %v3686_v58 = vsub.f32 %v18401_v4, %v23319_v52  ;;  %v18498_v60 = vand.u32 4294901760, %v3319_v39  ;;  %14608 = vmatprep.subr.bf16.mxu1 %v23070_v46  ;;  %v4176_v56 = vand.u32 4294901760, %v4175_v13  ;;  %v23324_v52 = vand.u32 4294901760, %v18417_v48  ;;  %v18521_v2 = vpop.permute.xlu0 %7136 }
 0x40f   :  { %v2941_v1 = vsel %vm2925_vm2, %v23321_v24, %v23320_v25  ;;  %v3672_v3 = vand.u32 4294901760, %v3671_v41  ;;  %v18507_v12 = vsub.f32 %v3410_v16, %v18465_v62  ;;  %v18510_v24 = vsub.f32 %v3413_v26, %v18467_v29  ;;  %23330 = vst [vmem:[#allocation156_spill] sm:$0xff] %v18521_v2  ;;  %v23331_v16 = vld [vmem:[#allocation22_spill] sm:$0xff] }
 0x410   :  { %23323 = vst [vmem:[#allocation31_spill] sm:$0xff] %v18498_v60  ;;  %v18504_v22 = vsub.f32 %v18417_v48, %v23324_v52  ;;  %v23327_v55 = vrot.slane %v17758_v28, 7  ;;  %v23328_v25 = vrot.slane %v23309_v51, 7  ;;  %v18519_v13 = vsub.f32 %v3319_v39, %v18498_v60  ;;  %v23334_v62 = vld [vmem:[#allocation42_spill] sm:$0xff]  ;;  %v23335_v39 = vld [vmem:[#allocation37_spill] sm:$0xff] }
 0x411   :  { %23325 = vst [vmem:[#allocation153_spill] sm:$0xff] %v18507_v12  ;;  %23326 = vst [vmem:[#allocation154_spill] sm:$0xff] %v18510_v24  ;;  %3673 = vmatmul.mubr.f32.gmra.mrb[14].mxu1 %v3672_v3  ;;  %v3416_v52 = vsel %vm2108_vm1, %v3164_v57, 0  ;;  %v3165_v20 = vmul.f32 %v23331_v16, %v2941_v1  ;;  %v14609_v48 = vpack.c.bf16 %v4176_v56, %v4169_v45  ;;  %v18525_v26 = vand.u32 4294901760, %v3322_v17 }
 0x412   :  { %v2644_v41 = vsel %vm2636_vm3, %v23328_v25, %v23327_v55  ;;  %23329 = vst [vmem:[#allocation155_spill] sm:$0xff] %v18519_v13  ;;  %v23333_v4 = vand.u32 4294901760, %v18257_v53  ;;  %v3711_v29 = vand.u32 4294901760, %v18414_v30  ;;  %v18531_v55 = vmul.f32 %v23334_v62, %v2646_v54  ;;  %v18542_v53 = vpop.permute.xlu1 %3242  ;;  %v23338_v62 = vld [vmem:[#allocation46_spill] sm:$0xff]  ;;  %v18552_v54 = vpop.permute.xlu0 %3236 }
 0x413   :  { %23332 = vst [vmem:[#allocation22_spill] sm:$0xff] %v18525_v26  ;;  %v18534_v25 = vmul.f32 %v23335_v39, %v2649_v61  ;;  %v3687_v3 = vand.u32 4294901760, %v3686_v58  ;;  %v22577_v2 = vand.u32 4294901760, %v18519_v13  ;;  %v22580_v57 = vand.u32 4294901760, %v18481_v27  ;;  %14610 = vmatpush1.bf16.msra.mxu1 %v14609_v48  ;;  %23337 = vst [vmem:[#allocation42_spill] sm:$0xff] %v18542_v53 }
 0x414   :  { %3682 = vmatprep.mubr.f32.mxu1 %v23333_v4  ;;  %v23336_v45 = vrot.slane %v17734_v15, 7  ;;  %v3726_v4 = vand.u32 4294901760, %v18504_v22  ;;  %v18547_v61 = vmul.f32 %v23338_v62, %v2644_v41  ;;  %v18549_v58 = vand.u32 4294901760, %v3416_v52  ;;  %14611 = vmatprep.subr.bf16.mxu1 %v23070_v46  ;;  %23340 = vst [vmem:[#allocation46_spill] sm:$0xff] %v18552_v54  ;;  %v23345_v62 = vld [vmem:[#allocation41_spill] sm:$0xff] }
 0x415   :  { %3688 = vmatmul.mubr.f32.gmra.mrb[16].mxu1 %v3687_v3  ;;  %v3701_v48 = vsub.f32 %v18519_v13, %v22577_v2  ;;  %v3419_v22 = vsel %vm2108_vm1, %v3165_v20, 0  ;;  %v23341_v56 = vrot.slane %v17702_v47, 1  ;;  %v23342_v41 = vrot.slane %v17699_v37, 1 }
 0x416   :  { %v2647_v1 = vsel %vm2636_vm3, %v23336_v45, %v2623_v43  ;;  %23339 = vst [vmem:[#allocation37_spill] sm:$0xff] %v18549_v58  ;;  %v18566_v39 = vsub.f32 %v3322_v17, %v18525_v26  ;;  %v3321_v3 = vsel %vm2108_vm1, %v18144_v32, %v18552_v54  ;;  %v23344_v45 = vand.u32 4294901760, %v18338_v42  ;;  %v23348_v17 = vld [vmem:[#allocation19_spill] sm:$0xff]  ;;  %v23358_v54 = vld [vmem:[#allocation30_spill] sm:$0xff] }
 0x417   :  { %v2940_v16 = vsel %vm2925_vm2, %v23342_v41, %v23341_v56  ;;  %v18574_v2 = vmul.f32 %v23345_v62, %v2647_v1  ;;  %v23346_v20 = vrot.slane %v17712_v5, 1  ;;  %v23347_v43 = vmov %v23341_v56 }
 0x418   :  { %23343 = vst [vmem:[#allocation157_spill] sm:$0xff] %v18566_v39  ;;  %3697 = vmatprep.mubr.f32.mxu1 %v23344_v45  ;;  %v3324_v41 = vsel %vm2108_vm1, %v23348_v17, %v18542_v53  ;;  %v18585_v30 = vand.u32 4294901760, %v3321_v3  ;;  %v3702_v32 = vand.u32 4294901760, %v3701_v48  ;;  %v3716_v42 = vsub.f32 %v18481_v27, %v22580_v57  ;;  %v18602_v48 = vpop.permute.xlu0 %3240  ;;  %v23357_v53 = vld [vmem:[#allocation119_spill] sm:$0xff]  ;;  %v23364_v27 = vld [vmem:[#allocation88_spill] sm:$0xff] }
 0x419   :  { %v2939_v56 = vsel %vm2925_vm2, %v23347_v43, %v23346_v20  ;;  %v23350_v1 = vand.u32 4294901760, %v18507_v12  ;;  %v18594_v62 = vsub.f32 %v3416_v52, %v18549_v58  ;;  %v18596_v47 = vand.u32 4294901760, %v3419_v22  ;;  %v23353_v43 = vld [vmem:[#allocation29_spill] sm:$0xff]  ;;  %23355 = vst [vmem:[#allocation159_spill] sm:$0xff] %v18602_v48 }
 0x41a   :  { %23349 = vst [vmem:[#allocation41_spill] sm:$0xff] %v18585_v30  ;;  %v3166_v20 = vmul.f32 %v23353_v43, %v2940_v16  ;;  %v18600_v17 = vsub.f32 %v3321_v3, %v18585_v30  ;;  %3703 = vmatmul.mubr.f32.gmra.mrb[18].mxu1 %v3702_v32  ;;  %v23356_v37 = vand.u32 4294901760, %v18510_v24  ;;  %v3167_v52 = vmul.f32 %v23358_v54, %v2939_v56 }
 0x41b   :  { %v3740_v45 = vsub.f32 %v18507_v12, %v23350_v1  ;;  %23351 = vst [vmem:[#allocation19_spill] sm:$0xff] %v18594_v62  ;;  %23352 = vst [vmem:[#allocation158_spill] sm:$0xff] %v18596_v47  ;;  %v18611_v12 = vand.u32 4294901760, %v3324_v41  ;;  %v3323_v16 = vsel %vm2108_vm1, %v18237_v18, %v18602_v48  ;;  %3712 = vmatprep.mubr.f32.mxu1 %v3711_v29  ;;  %v23360_v32 = vrot.slane %v17715_v8, 1  ;;  %v23369_v18 = vld [vmem:[#allocation35_spill] sm:$0xff] }
 0x41c   :  { %23354 = vst [vmem:[#allocation29_spill] sm:$0xff] %v18600_v17  ;;  %v18607_v57 = vsub.f32 %v18510_v24, %v23356_v37  ;;  %v23361_v43 = vrot.slane %v17712_v5, 1  ;;  %v18623_v24 = vpop.permute.xlu1 %3246  ;;  %v18625_v1 = vand.u32 4294901760, %v3323_v16  ;;  %v3717_v54 = vand.u32 4294901760, %v3716_v42  ;;  %v23366_v5 = vld [vmem:[#allocation89_spill] sm:$0xff] }
 0x41d   :  { %23359 = vst [vmem:[#allocation30_spill] sm:$0xff] %v18611_v12  ;;  %23362 = vst [vmem:[#allocation160_spill] sm:$0xff] %v18623_v24  ;;  %v22595_v56 = vand.u32 4294901760, %v18600_v17  ;;  %v18631_v29 = vsub.f32 %v3419_v22, %v18596_v47  ;;  %v3422_v3 = vsel %vm2108_vm1, %v3166_v20, 0  ;;  %v3425_v13 = vsel %vm2108_vm1, %v3167_v52, 0 }
 0x41e   :  { %v2938_v37 = vsel %vm2925_vm2, %v23361_v43, %v23360_v32  ;;  %23363 = vst [vmem:[#allocation161_spill] sm:$0xff] %v18625_v1  ;;  %v18636_v32 = vsub.f32 %v3323_v16, %v18625_v1  ;;  %3718 = vmatmul.mubr.f32.gmra.mrb[20].mxu1 %v3717_v54  ;;  %v18638_v43 = vpop.permute.xlu0 %3244  ;;  %v18646_v22 = vsub.f32 %v3324_v41, %v18611_v12  ;;  %v23371_v54 = vand.u32 4294901760, %v18566_v39 }
 0x41f   :  { %23365 = vst [vmem:[#allocation88_spill] sm:$0xff] %v18631_v29  ;;  %23368 = vst [vmem:[#allocation162_spill] sm:$0xff] %v18638_v43  ;;  %v3731_v42 = vsub.f32 %v18600_v17, %v22595_v56  ;;  %v3168_v58 = vmul.f32 %v23369_v18, %v2938_v37  ;;  %v3326_v20 = vsel %vm2108_vm1, %v18153_v35, %v18623_v24  ;;  %3727 = vmatprep.mubr.f32.mxu1 %v3726_v4 }
 0x420   :  { %23367 = vst [vmem:[#allocation89_spill] sm:$0xff] %v18636_v32  ;;  %23370 = vst [vmem:[#allocation35_spill] sm:$0xff] %v18646_v22  ;;  %v3325_v16 = vsel %vm2108_vm1, %v18385_v6, %v18638_v43  ;;  %v3746_v56 = vsub.f32 %v18566_v39, %v23371_v54  ;;  %v23373_v41 = vand.u32 4294901760, %v23364_v27  ;;  %v3741_v17 = vand.u32 4294901760, %v3740_v45  ;;  %v23379_v39 = vld [vmem:[#allocation121_spill] sm:$0xff]  ;;  %v18688_v26 = vpop.permute.xlu1 %3250 }
 0x421   :  { %v18657_v48 = vand.u32 4294901760, %v3325_v16  ;;  %v3732_v52 = vand.u32 4294901760, %v3731_v42  ;;  %v18663_v35 = vand.u32 4294901760, %v3422_v3  ;;  %v18665_v24 = vand.u32 4294901760, %v3425_v13  ;;  %23383 = vst [vmem:[#allocation168_spill] sm:$0xff] %v18688_v26 }
 0x422   :  { %v4182_v18 = vsub.f32 %v23364_v27, %v23373_v41  ;;  %v23376_v6 = vand.u32 4294901760, %v23366_v5  ;;  %v18670_v54 = vpop.permute.xlu0 %3248  ;;  %v3756_v42 = vand.u32 4294901760, %v18607_v57  ;;  %v23378_v37 = vand.u32 4294901760, %v18594_v62 }
 0x423   :  { %23372 = vst [vmem:[#allocation163_spill] sm:$0xff] %v18657_v48  ;;  %23374 = vst [vmem:[#allocation164_spill] sm:$0xff] %v18663_v35  ;;  %3733 = vmatmul.mubr.f32.gmra.mrb[22].mxu1 %v3732_v52  ;;  %v18678_v47 = vand.u32 4294901760, %v3326_v20  ;;  %v23381_v52 = vrot.slane %v17734_v15, 1  ;;  %v23382_v1 = vrot.slane %v17715_v8, 1  ;;  %v3747_v41 = vand.u32 4294901760, %v3746_v56 }
 0x424   :  { %23375 = vst [vmem:[#allocation165_spill] sm:$0xff] %v18665_v24  ;;  %v4189_v4 = vsub.f32 %v23366_v5, %v23376_v6  ;;  %23377 = vst [vmem:[#allocation166_spill] sm:$0xff] %v18670_v54  ;;  %v3770_v43 = vsub.f32 %v18594_v62, %v23378_v37  ;;  %3742 = vmatprep.mubr.f32.mxu1 %v3741_v17  ;;  %v3428_v6 = vsel %vm2108_vm1, %v3168_v58, 0  ;;  %v23385_v45 = vand.u32 4294901760, %v18636_v32  ;;  %v23391_v62 = vld [vmem:[#allocation36_spill] sm:$0xff] }
 0x425   :  { %23380 = vst [vmem:[#allocation167_spill] sm:$0xff] %v18678_v47  ;;  %v2937_v57 = vsel %vm2925_vm2, %v23382_v1, %v23381_v52  ;;  %v18691_v37 = vsub.f32 %v3325_v16, %v18657_v48  ;;  %v4183_v12 = vand.u32 4294901760, %v4182_v18  ;;  %v3327_v58 = vsel %vm2108_vm1, %v18420_v19, %v18670_v54 }
 0x426   :  { %v3761_v17 = vsub.f32 %v18636_v32, %v23385_v45  ;;  %v18700_v8 = vsub.f32 %v3422_v3, %v18663_v35  ;;  %v18703_v1 = vsub.f32 %v3425_v13, %v18665_v24  ;;  %v4190_v52 = vand.u32 4294901760, %v4189_v4 }
 0x427   :  { %23384 = vst [vmem:[#allocation169_spill] sm:$0xff] %v18691_v37  ;;  %3748 = vmatmul.mubr.f32.gmra.mrb[24].mxu1 %v3747_v41  ;;  %v23388_v16 = vrot.slane %v23309_v51, 7  ;;  %v23389_v56 = vrot.slane %v17749_v31, 7  ;;  %v18713_v18 = vand.u32 4294901760, %v3428_v6  ;;  %v3169_v19 = vmul.f32 %v23391_v62, %v2937_v57 }
 0x428   :  { %23386 = vst [vmem:[#allocation170_spill] sm:$0xff] %v18700_v8  ;;  %23387 = vst [vmem:[#allocation171_spill] sm:$0xff] %v18703_v1  ;;  %v23392_v3 = vrot.slane %v17725_v0, 1  ;;  %v23393_v54 = vrot.slane %v17734_v15, 1  ;;  %v18723_v4 = vsub.f32 %v3326_v20, %v18678_v47  ;;  %v3328_v41 = vsel %vm2108_vm1, %v18301_v50, %v18688_v26  ;;  %3757 = vmatprep.mubr.f32.mxu1 %v3756_v42 }
 0x429   :  { %v18711_v45 = vsel %vm2636_vm3, %v23389_v56, %v23388_v16  ;;  %23390 = vst [vmem:[#allocation172_spill] sm:$0xff] %v18713_v18  ;;  %v23395_v16 = vand.u32 4294901760, %v18646_v22  ;;  %v23396_v62 = vrot.slane %v17749_v31, 1  ;;  %v3762_v20 = vand.u32 4294901760, %v3761_v17 }
 0x42a   :  { %v2936_v13 = vsel %vm2925_vm2, %v23393_v54, %v23392_v3  ;;  %23394 = vst [vmem:[#allocation36_spill] sm:$0xff] %v18723_v4  ;;  %v23397_v57 = vmov %v23392_v3  ;;  %v18737_v54 = vand.u32 4294901760, %v3327_v58  ;;  %v14612_v32 = vpack.c.bf16 %v4190_v52, %v4183_v12  ;;  %v23403_v12 = vld [vmem:[#allocation40_spill] sm:$0xff] }
 0x42b   :  { %v3776_v56 = vsub.f32 %v18646_v22, %v23395_v16  ;;  %v2935_v15 = vsel %vm2925_vm2, %v23397_v57, %v23396_v62  ;;  %v3771_v24 = vand.u32 4294901760, %v3770_v43  ;;  %v23399_v50 = vand.u32 4294901760, %v18631_v29  ;;  %v18745_v22 = vpop.permute.xlu0 %3252  ;;  %3763 = vmatmul.mubr.f32.gmra.mrb[26].mxu1 %v3762_v20  ;;  %v23402_v57 = vld [vmem:[#allocation39_spill] sm:$0xff] }
 0x42c   :  { %23398 = vst [vmem:[#allocation173_spill] sm:$0xff] %v18737_v54  ;;  %23400 = vst [vmem:[#allocation174_spill] sm:$0xff] %v18745_v22  ;;  %v18748_v62 = vsub.f32 %v3428_v6, %v18713_v18  ;;  %v3431_v17 = vsel %vm2108_vm1, %v3169_v19, 0  ;;  %v3170_v3 = vmul.f32 %v23402_v57, %v2936_v13  ;;  %v3171_v43 = vmul.f32 %v23403_v12, %v2935_v15  ;;  %v18770_v13 = vpop.permute.xlu1 %3254 }
 0x42d   :  { %v3785_v42 = vsub.f32 %v18631_v29, %v23399_v50  ;;  %v18753_v52 = vand.u32 4294901760, %v3328_v41  ;;  %3772 = vmatprep.mubr.f32.mxu1 %v3771_v24  ;;  %v23405_v50 = vrot.slane %v23379_v39, 7  ;;  %v23406_v16 = vrot.slane %v23357_v53, 7  ;;  %14613 = vmatpush1.bf16.msra.mxu1 %v14612_v32  ;;  %23409 = vst [vmem:[#allocation40_spill] sm:$0xff] %v18770_v13 }
 0x42e   :  { %23401 = vst [vmem:[#allocation175_spill] sm:$0xff] %v18748_v62  ;;  %v23407_v20 = vrot.slane %v23309_v51, 1  ;;  %v23408_v19 = vrot.slane %v17749_v31, 1  ;;  %v18773_v24 = vsub.f32 %v3327_v58, %v18737_v54  ;;  %v3777_v57 = vand.u32 4294901760, %v3776_v56  ;;  %14614 = vmatprep.subr.bf16.mxu1 %v23070_v46 }
 0x42f   :  { %23404 = vst [vmem:[#allocation39_spill] sm:$0xff] %v18753_v52  ;;  %v18761_v26 = vsel %vm2636_vm3, %v23406_v16, %v23405_v50  ;;  %v23411_v12 = vand.u32 4294901760, %v18691_v37  ;;  %v23412_v50 = vld [vmem:[#allocation92_spill] sm:$0xff]  ;;  %v3329_v31 = vsel %vm2108_vm1, %v18534_v25, %v18745_v22  ;;  %v23413_v32 = vand.u32 4294901760, %v18700_v8  ;;  %v23418_v22 = vld [vmem:[#allocation43_spill] sm:$0xff] }
 0x430   :  { %v2934_v15 = vsel %vm2925_vm2, %v23408_v19, %v23407_v20  ;;  %23410 = vst [vmem:[#allocation176_spill] sm:$0xff] %v18773_v24  ;;  %v3786_v20 = vand.u32 4294901760, %v3785_v42  ;;  %v18786_v58 = vand.u32 4294901760, %v3431_v17  ;;  %3778 = vmatmul.mubr.f32.gmra.mrb[28].mxu1 %v3777_v57  ;;  %v23415_v56 = vand.u32 4294901760, %v18703_v1 }
 0x431   :  { %v3791_v16 = vsub.f32 %v18691_v37, %v23411_v12  ;;  %v3800_v19 = vsub.f32 %v18700_v8, %v23413_v32  ;;  %v3434_v6 = vsel %vm2108_vm1, %v3170_v3, 0  ;;  %v3437_v37 = vsel %vm2108_vm1, %v3171_v43, 0 }
 0x432   :  { %23414 = vst [vmem:[#allocation177_spill] sm:$0xff] %v18786_v58  ;;  %v3815_v12 = vsub.f32 %v18703_v1, %v23415_v56  ;;  %v18795_v25 = vsub.f32 %v3328_v41, %v18753_v52  ;;  %v3330_v42 = vsel %vm2108_vm1, %v18397_v14, %v18770_v13  ;;  %3787 = vmatprep.mubr.f32.mxu1 %v3786_v20  ;;  %v23417_v57 = vand.u32 4294901760, %v18723_v4  ;;  %v18833_v52 = vpop.permute.xlu1 %3258 }
 0x433   :  { %v3172_v56 = vmul.f32 %v23418_v22, %v2934_v15  ;;  %v18804_v1 = vand.u32 4294901760, %v3329_v31  ;;  %v3792_v0 = vand.u32 4294901760, %v3791_v16  ;;  %v23420_v43 = vand.u32 4294901760, %v23412_v50  ;;  %23430 = vst [vmem:[#allocation184_spill] sm:$0xff] %v18833_v52 }
 0x434   :  { %23416 = vst [vmem:[#allocation178_spill] sm:$0xff] %v18795_v25  ;;  %v3806_v32 = vsub.f32 %v18723_v4, %v23417_v57  ;;  %v3801_v8 = vand.u32 4294901760, %v3800_v19  ;;  %v18811_v29 = vsub.f32 %v3431_v17, %v18786_v58  ;;  %v18813_v14 = vand.u32 4294901760, %v3434_v6  ;;  %v18817_v57 = vpop.permute.xlu0 %3256  ;;  %v23428_v19 = vld [vmem:[#allocation93_spill] sm:$0xff] }
 0x435   :  { %23419 = vst [vmem:[#allocation43_spill] sm:$0xff] %v18804_v1  ;;  %v4196_v41 = vsub.f32 %v23412_v50, %v23420_v43  ;;  %v18815_v20 = vand.u32 4294901760, %v3437_v37  ;;  %23424 = vst [vmem:[#allocation182_spill] sm:$0xff] %v18817_v57  ;;  %3793 = vmatmul.mubr.f32.gmra.mrb[30].mxu1 %v3792_v0  ;;  %v3816_v22 = vand.u32 4294901760, %v3815_v12  ;;  %v23425_v15 = vand.u32 4294901760, %v18748_v62 }
 0x436   :  { %23421 = vst [vmem:[#allocation179_spill] sm:$0xff] %v18811_v29  ;;  %23422 = vst [vmem:[#allocation180_spill] sm:$0xff] %v18813_v14  ;;  %v23426_v3 = vrot.slane %v17758_v28, 1  ;;  %v23427_v43 = vrot.slane %v23309_v51, 1  ;;  %v22645_v13 = vand.u32 4294901760, %v23428_v19  ;;  %v18829_v4 = vand.u32 4294901760, %v3330_v42  ;;  %3802 = vmatprep.mubr.f32.mxu1 %v3801_v8 }
 0x437   :  { %23423 = vst [vmem:[#allocation181_spill] sm:$0xff] %v18815_v20  ;;  %v3830_v16 = vsub.f32 %v18748_v62, %v23425_v15  ;;  %v3807_v58 = vand.u32 4294901760, %v3806_v32  ;;  %v3440_v12 = vsel %vm2108_vm1, %v3172_v56, 0  ;;  %v18836_v15 = vsub.f32 %v3329_v31, %v18804_v1 }
 0x438   :  { %v2933_v17 = vsel %vm2925_vm2, %v23427_v43, %v23426_v3  ;;  %23429 = vst [vmem:[#allocation183_spill] sm:$0xff] %v18829_v4  ;;  %v23432_v51 = vand.u32 4294901760, %v18773_v24  ;;  %v4197_v3 = vand.u32 4294901760, %v4196_v41  ;;  %v4203_v43 = vsub.f32 %v23428_v19, %v22645_v13 }
 0x439   :  { %23431 = vst [vmem:[#allocation185_spill] sm:$0xff] %v18836_v15  ;;  %v3331_v8 = vsel %vm2108_vm1, %v18574_v2, %v18817_v57  ;;  %v18849_v56 = vsub.f32 %v3434_v6, %v18813_v14  ;;  %v18852_v31 = vsub.f32 %v3437_v37, %v18815_v20  ;;  %3808 = vmatmul.mubr.f32.gmra.mrb[32].mxu1 %v3807_v58  ;;  %v18854_v0 = vand.u32 4294901760, %v3440_v12 }
 0x43a   :  { %v3821_v62 = vsub.f32 %v18773_v24, %v23432_v51  ;;  %v23436_v51 = vld [vmem:[#allocation44_spill] sm:$0xff]  ;;  %v23437_v24 = vrot.slane %v23357_v53, 1  ;;  %v23438_v13 = vrot.slane %v17758_v28, 1  ;;  %v4204_v57 = vand.u32 4294901760, %v4203_v43  ;;  %3817 = vmatprep.mubr.f32.mxu1 %v3816_v22 }
 0x43b   :  { %23433 = vst [vmem:[#allocation186_spill] sm:$0xff] %v18849_v56  ;;  %23434 = vst [vmem:[#allocation187_spill] sm:$0xff] %v18852_v31  ;;  %v3173_v41 = vmul.f32 %v23436_v51, %v2933_v17  ;;  %v18864_v32 = vsub.f32 %v3330_v42, %v18829_v4  ;;  %v3332_v37 = vsel %vm2108_vm1, %v18531_v55, %v18833_v52  ;;  %v23440_v6 = vand.u32 4294901760, %v18795_v25 }
 0x43c   :  { %23435 = vst [vmem:[#allocation188_spill] sm:$0xff] %v18854_v0  ;;  %v2932_v2 = vsel %vm2925_vm2, %v23438_v13, %v23437_v24  ;;  %v23441_v17 = vrot.slane %v23379_v39, 1  ;;  %v23442_v51 = vmov %v23437_v24  ;;  %v18878_v24 = vand.u32 4294901760, %v3331_v8 }
 0x43d   :  { %23439 = vst [vmem:[#allocation44_spill] sm:$0xff] %v18864_v32  ;;  %v3836_v58 = vsub.f32 %v18795_v25, %v23440_v6  ;;  %v3822_v42 = vand.u32 4294901760, %v3821_v62  ;;  %v14615_v20 = vpack.c.bf16 %v4204_v57, %v4197_v3  ;;  %v3831_v4 = vand.u32 4294901760, %v3830_v16  ;;  %v18886_v25 = vpop.permute.xlu0 %3260  ;;  %v23448_v57 = vld [vmem:[#allocation48_spill] sm:$0xff] }
 0x43e   :  { %v2931_v13 = vsel %vm2925_vm2, %v23442_v51, %v23441_v17  ;;  %23443 = vst [vmem:[#allocation189_spill] sm:$0xff] %v18878_v24  ;;  %v23444_v55 = vand.u32 4294901760, %v18811_v29  ;;  %23445 = vst [vmem:[#allocation190_spill] sm:$0xff] %v18886_v25  ;;  %v18889_v17 = vsub.f32 %v3440_v12, %v18854_v0  ;;  %v3443_v62 = vsel %vm2108_vm1, %v3173_v41, 0  ;;  %v23447_v51 = vld [vmem:[#allocation47_spill] sm:$0xff] }
 0x43f   :  { %3823 = vmatmul.mubr.f32.gmra.mrb[34].mxu1 %v3822_v42  ;;  %v3174_v43 = vmul.f32 %v23447_v51, %v2932_v2  ;;  %v3175_v16 = vmul.f32 %v23448_v57, %v2931_v13  ;;  %v18894_v3 = vand.u32 4294901760, %v3332_v37  ;;  %v23451_v6 = vrot.slane %v23357_v53, 7 }
 0x440   :  { %v3845_v22 = vsub.f32 %v18811_v29, %v23444_v55  ;;  %23446 = vst [vmem:[#allocation191_spill] sm:$0xff] %v18889_v17  ;;  %v23450_v55 = vld [vmem:[#allocation45_spill] sm:$0xff]  ;;  %v23452_v52 = vrot.slane %v17758_v28, 7  ;;  %3832 = vmatprep.mubr.f32.mxu1 %v3831_v4  ;;  %14616 = vmatpush1.bf16.msra.mxu1 %v14615_v20  ;;  %v18906_v41 = vsub.f32 %v3331_v8, %v18878_v24  ;;  %v3837_v2 = vand.u32 4294901760, %v3836_v58  ;;  %v18918_v4 = vpop.permute.xlu1 %3262 }
 0x441   :  { %23449 = vst [vmem:[#allocation47_spill] sm:$0xff] %v18894_v3  ;;  %v2884_v29 = vmul.f32 %v23450_v55, %v18711_v45  ;;  %v23454_v13 = vand.u32 4294901760, %v18836_v15  ;;  %v23455_v45 = vld [vmem:[#allocation120_spill] sm:$0xff]  ;;  %v23457_v55 = vrot.slane %v23379_v39, 1  ;;  %14617 = vmatprep.subr.bf16.mxu1 %v23070_v46  ;;  %23458 = vst [vmem:[#allocation45_spill] sm:$0xff] %v18918_v4  ;;  %v23459_v8 = vand.u32 4294901760, %v18849_v56  ;;  %v18956_v0 = vpop.permute.xlu0 %3264 }
 0x442   :  { %v2643_v42 = vsel %vm2636_vm3, %v23452_v52, %v23451_v6  ;;  %23453 = vst [vmem:[#allocation48_spill] sm:$0xff] %v18906_v41  ;;  %v23456_v57 = vrot.slane %v23455_v45, 1  ;;  %v3846_v20 = vand.u32 4294901760, %v3845_v22  ;;  %v18925_v6 = vand.u32 4294901760, %v3443_v62 }
 0x443   :  { %v3851_v51 = vsub.f32 %v18836_v15, %v23454_v13  ;;  %v3333_v52 = vsel %vm2108_vm1, %v2884_v29, %v18886_v25  ;;  %v3860_v58 = vsub.f32 %v18849_v56, %v23459_v8  ;;  %3838 = vmatmul.mubr.f32.gmra.mrb[36].mxu1 %v3837_v2  ;;  %v23461_v13 = vand.u32 4294901760, %v18852_v31  ;;  %v23464_v25 = vld [vmem:[#allocation51_spill] sm:$0xff]  ;;  %v23465_v56 = vld [vmem:[#allocation122_spill] sm:$0xff] }
 0x444   :  { %v2930_v53 = vsel %vm2925_vm2, %v23457_v55, %v23456_v57  ;;  %23460 = vst [vmem:[#allocation192_spill] sm:$0xff] %v18925_v6  ;;  %v3446_v55 = vsel %vm2108_vm1, %v3174_v43, 0  ;;  %v3449_v28 = vsel %vm2108_vm1, %v3175_v16, 0  ;;  %v18934_v29 = vsub.f32 %v3332_v37, %v18894_v3  ;;  %3847 = vmatprep.mubr.f32.mxu1 %v3846_v20  ;;  %v23467_v37 = vld [vmem:[#allocation50_spill] sm:$0xff] }
 0x445   :  { %v3875_v12 = vsub.f32 %v18852_v31, %v23461_v13  ;;  %v23463_v22 = vand.u32 4294901760, %v18864_v32  ;;  %v3176_v2 = vmul.f32 %v23464_v25, %v2930_v53  ;;  %v2921_v15 = vrot.slane %v23465_v56, 1  ;;  %v23470_v25 = vld [vmem:[#allocation49_spill] sm:$0xff] }
 0x446   :  { %23462 = vst [vmem:[#allocation193_spill] sm:$0xff] %v18934_v29  ;;  %v3334_v13 = vsel %vm2108_vm1, %v18547_v61, %v18918_v4  ;;  %v18944_v57 = vand.u32 4294901760, %v3333_v52  ;;  %v3852_v43 = vand.u32 4294901760, %v3851_v51  ;;  %v2887_v20 = vmul.f32 %v23467_v37, %v18761_v26  ;;  %23471 = vst [vmem:[#allocation49_spill] sm:$0xff] %v18956_v0 }
 0x447   :  { %v3866_v8 = vsub.f32 %v18864_v32, %v23463_v22  ;;  %v3861_v31 = vand.u32 4294901760, %v3860_v58  ;;  %v18950_v3 = vsub.f32 %v3443_v62, %v18925_v6  ;;  %v18952_v22 = vand.u32 4294901760, %v3446_v55  ;;  %v18977_v6 = vpop.permute.xlu1 %3266 }
 0x448   :  { %23466 = vst [vmem:[#allocation51_spill] sm:$0xff] %v18944_v57  ;;  %v2629_v53 = vrot.slane %v23455_v45, 7  ;;  %v2886_v32 = vmul.f32 %v23470_v25, %v2643_v42  ;;  %3853 = vmatmul.mubr.f32.gmra.mrb[38].mxu1 %v3852_v43  ;;  %v3876_v61 = vand.u32 4294901760, %v3875_v12  ;;  %v18958_v51 = vand.u32 4294901760, %v3449_v28  ;;  %23478 = vst [vmem:[#allocation198_spill] sm:$0xff] %v18977_v6 }
 0x449   :  { %23468 = vst [vmem:[#allocation50_spill] sm:$0xff] %v18950_v3  ;;  %23469 = vst [vmem:[#allocation194_spill] sm:$0xff] %v18952_v22  ;;  %v18960_v16 = vand.u32 4294901760, %v3334_v13  ;;  %3862 = vmatprep.mubr.f32.mxu1 %v3861_v31  ;;  %v23474_v26 = vand.u32 4294901760, %v18889_v17  ;;  %v23475_v37 = vrot.slane %v23455_v45, 1  ;;  %v18971_v25 = vsub.f32 %v3333_v52, %v18944_v57 }
 0x44a   :  { %23472 = vst [vmem:[#allocation195_spill] sm:$0xff] %v18958_v51  ;;  %v3867_v12 = vand.u32 4294901760, %v3866_v8  ;;  %v23477_v43 = vand.u32 4294901760, %v18906_v41  ;;  %v3452_v31 = vsel %vm2108_vm1, %v3176_v2, 0  ;;  %v18983_v45 = vsub.f32 %v3446_v55, %v18952_v22 }
 0x44b   :  { %23473 = vst [vmem:[#allocation196_spill] sm:$0xff] %v18960_v16  ;;  %v3890_v62 = vsub.f32 %v18889_v17, %v23474_v26  ;;  %v2929_v42 = vsel %vm2925_vm2, %v23475_v37, %v2921_v15  ;;  %23476 = vst [vmem:[#allocation197_spill] sm:$0xff] %v18971_v25  ;;  %v3335_v26 = vsel %vm2108_vm1, %v2886_v32, %v18956_v0  ;;  %v23480_v37 = vld [vmem:[#allocation123_spill] sm:$0xff]  ;;  %v2923_v8 = vrot.slane %v18180_v34, 1 }
 0x44c   :  { %v3881_v4 = vsub.f32 %v18906_v41, %v23477_v43  ;;  %23479 = vst [vmem:[#allocation199_spill] sm:$0xff] %v18983_v45  ;;  %v2922_v52 = vrot.slane %v23480_v37, 1  ;;  %v23481_v17 = vrot.slane %v23379_v39, 7  ;;  %3868 = vmatmul.mubr.f32.gmra.mrb[40].mxu1 %v3867_v12  ;;  %v18992_v2 = vsub.f32 %v3449_v28, %v18958_v51  ;;  %v23483_v41 = vld [vmem:[#allocation52_spill] sm:$0xff]  ;;  %v23489_v51 = vld [vmem:[#allocation53_spill] sm:$0xff] }
 0x44d   :  { %v3177_v32 = vmul.f32 %v23483_v41, %v2929_v42  ;;  %v18996_v58 = vsub.f32 %v3334_v13, %v18960_v16  ;;  %3877 = vmatprep.mubr.f32.mxu1 %v3876_v61  ;;  %v23484_v55 = vand.u32 4294901760, %v18934_v29  ;;  %v19001_v22 = vand.u32 4294901760, %v3452_v31 }
 0x44e   :  { %v2641_v43 = vsel %vm2636_vm3, %v23481_v17, %v2629_v53  ;;  %23482 = vst [vmem:[#allocation200_spill] sm:$0xff] %v18992_v2  ;;  %v2928_v39 = vsel %vm2925_vm2, %v2921_v15, %v2922_v52  ;;  %v3336_v17 = vsel %vm2108_vm1, %v2887_v20, %v18977_v6  ;;  %v19007_v28 = vand.u32 4294901760, %v3335_v26  ;;  %v19019_v20 = vpop.permute.xlu0 %3268  ;;  %v23491_v6 = vld [vmem:[#allocation55_spill] sm:$0xff] }
 0x44f   :  { %v3896_v0 = vsub.f32 %v18934_v29, %v23484_v55  ;;  %23485 = vst [vmem:[#allocation52_spill] sm:$0xff] %v19001_v22  ;;  %v3882_v12 = vand.u32 4294901760, %v3881_v4  ;;  %v23487_v13 = vrot.slane %v23465_v56, 7  ;;  %v3891_v42 = vand.u32 4294901760, %v3890_v62  ;;  %23490 = vst [vmem:[#allocation53_spill] sm:$0xff] %v19019_v20 }
 0x450   :  { %23486 = vst [vmem:[#allocation201_spill] sm:$0xff] %v19007_v28  ;;  %v23488_v55 = vand.u32 4294901760, %v18950_v3  ;;  %v22699_v15 = vand.u32 4294901760, %v18983_v45  ;;  %v2888_v16 = vmul.f32 %v23489_v51, %v2641_v43  ;;  %v3455_v41 = vsel %vm2108_vm1, %v3177_v32, 0 }
 0x451   :  { %v2640_v61 = vsel %vm2636_vm3, %v2629_v53, %v23487_v13  ;;  %3883 = vmatmul.mubr.f32.gmra.mrb[42].mxu1 %v3882_v12  ;;  %v3178_v57 = vmul.f32 %v23491_v6, %v2928_v39  ;;  %v19024_v24 = vand.u32 4294901760, %v3336_v17  ;;  %v19028_v62 = vsub.f32 %v3452_v31, %v19001_v22  ;;  %v19044_v31 = vpop.permute.xlu1 %3270 }
 0x452   :  { %v3905_v29 = vsub.f32 %v18950_v3, %v23488_v55  ;;  %3892 = vmatprep.mubr.f32.mxu1 %v3891_v42  ;;  %v2927_v51 = vsel %vm2925_vm2, %v2922_v52, %v2923_v8  ;;  %v23494_v43 = vrot.slane %v23480_v37, 7  ;;  %v23495_v12 = vmov %v23487_v13  ;;  %23498 = vst [vmem:[#allocation204_spill] sm:$0xff] %v19044_v31 }
 0x453   :  { %23492 = vst [vmem:[#allocation55_spill] sm:$0xff] %v19024_v24  ;;  %23493 = vst [vmem:[#allocation202_spill] sm:$0xff] %v19028_v62  ;;  %v19039_v39 = vsub.f32 %v3335_v26, %v19007_v28  ;;  %v3897_v6 = vand.u32 4294901760, %v3896_v0  ;;  %v23497_v13 = vand.u32 4294901760, %v18971_v25  ;;  %v3337_v52 = vsel %vm2108_vm1, %v2888_v16, %v19019_v20 }
 0x454   :  { %v2639_v32 = vsel %vm2636_vm3, %v23495_v12, %v23494_v43  ;;  %v3906_v55 = vand.u32 4294901760, %v3905_v29  ;;  %v3920_v4 = vsub.f32 %v18983_v45, %v22699_v15  ;;  %v19051_v53 = vand.u32 4294901760, %v3455_v41  ;;  %v23500_v43 = vld [vmem:[#allocation125_spill] sm:$0xff]  ;;  %v23502_v12 = vld [vmem:[#allocation54_spill] sm:$0xff] }
 0x455   :  { %23496 = vst [vmem:[#allocation203_spill] sm:$0xff] %v19039_v39  ;;  %v3911_v42 = vsub.f32 %v18971_v25, %v23497_v13  ;;  %v23501_v26 = vrot.slane %v23500_v43, 1  ;;  %v2889_v56 = vmul.f32 %v23502_v12, %v2640_v61  ;;  %3898 = vmatmul.mubr.f32.gmra.mrb[44].mxu1 %v3897_v6  ;;  %v3458_v13 = vsel %vm2108_vm1, %v3178_v57, 0  ;;  %v23503_v25 = vld [vmem:[#allocation6_spill] sm:$0xff]  ;;  %v23510_v12 = vld [vmem:[#allocation8_spill] sm:$0xff] }
 0x456   :  { %23499 = vst [vmem:[#allocation205_spill] sm:$0xff] %v19051_v53  ;;  %v3179_v3 = vmul.f32 %v23503_v25, %v2927_v51  ;;  %v19061_v29 = vsub.f32 %v3336_v17, %v19024_v24  ;;  %3907 = vmatprep.mubr.f32.mxu1 %v3906_v55  ;;  %v23504_v16 = vand.u32 4294901760, %v18996_v58  ;;  %v23505_v20 = vand.u32 4294901760, %v18992_v2 }
 0x457   :  { %v2926_v0 = vsel %vm2925_vm2, %v2923_v8, %v23501_v26  ;;  %v3338_v61 = vsel %vm2108_vm1, %v2889_v56, %v19044_v31  ;;  %v19072_v57 = vand.u32 4294901760, %v3337_v52  ;;  %v3912_v25 = vand.u32 4294901760, %v3911_v42  ;;  %v19080_v26 = vpop.permute.xlu0 %3272  ;;  %v23511_v8 = vld [vmem:[#allocation9_spill] sm:$0xff] }
 0x458   :  { %v3926_v15 = vsub.f32 %v18996_v58, %v23504_v16  ;;  %v3935_v45 = vsub.f32 %v18992_v2, %v23505_v20  ;;  %v3921_v51 = vand.u32 4294901760, %v3920_v4  ;;  %v19076_v6 = vsub.f32 %v3455_v41, %v19051_v53  ;;  %23509 = vst [vmem:[#allocation207_spill] sm:$0xff] %v19080_v26 }
 0x459   :  { %23506 = vst [vmem:[#allocation54_spill] sm:$0xff] %v19072_v57  ;;  %v19078_v55 = vand.u32 4294901760, %v3458_v13  ;;  %3913 = vmatmul.mubr.f32.gmra.mrb[46].mxu1 %v3912_v25  ;;  %v3461_v20 = vsel %vm2108_vm1, %v3179_v3, 0  ;;  %v3180_v16 = vmul.f32 %v23510_v12, %v2926_v0  ;;  %v2890_v56 = vmul.f32 %v23511_v8, %v2639_v32  ;;  %v23518_v12 = vld [vmem:[#allocation91_spill] sm:$0xff] }
 0x45a   :  { %23507 = vst [vmem:[#allocation6_spill] sm:$0xff] %v19076_v6  ;;  %v19085_v31 = vand.u32 4294901760, %v3338_v61  ;;  %3922 = vmatprep.mubr.f32.mxu1 %v3921_v51  ;;  %v3936_v42 = vand.u32 4294901760, %v3935_v45  ;;  %v23513_v4 = vand.u32 4294901760, %v19028_v62  ;;  %v19091_v17 = vsub.f32 %v3337_v52, %v19072_v57 }
 0x45b   :  { %23508 = vst [vmem:[#allocation206_spill] sm:$0xff] %v19078_v55  ;;  %v3927_v2 = vand.u32 4294901760, %v3926_v15  ;;  %v23515_v25 = vand.u32 4294901760, %v19039_v39  ;;  %v3339_v32 = vsel %vm2108_vm1, %v2890_v56, %v19080_v26  ;;  %v19101_v45 = vsub.f32 %v3458_v13, %v19078_v55 }
 0x45c   :  { %23512 = vst [vmem:[#allocation8_spill] sm:$0xff] %v19085_v31  ;;  %v3950_v41 = vsub.f32 %v19028_v62, %v23513_v4  ;;  %23514 = vst [vmem:[#allocation9_spill] sm:$0xff] %v19091_v17  ;;  %v19103_v51 = vand.u32 4294901760, %v3461_v20  ;;  %v2632_v52 = vrot.slane %v18180_v34, 7  ;;  %v23519_v15 = vrot.slane %v23518_v12, 1 }
 0x45d   :  { %v3941_v3 = vsub.f32 %v19039_v39, %v23515_v25  ;;  %23516 = vst [vmem:[#allocation208_spill] sm:$0xff] %v19101_v45  ;;  %v23520_v4 = vrot.slane %v23500_v43, 1  ;;  %3928 = vmatmul.mubr.f32.gmra.mrb[48].mxu1 %v3927_v2  ;;  %v3464_v0 = vsel %vm2108_vm1, %v3180_v16, 0  ;;  %v19115_v8 = vsub.f32 %v3338_v61, %v19085_v31 }
 0x45e   :  { %23517 = vst [vmem:[#allocation209_spill] sm:$0xff] %v19103_v51  ;;  %3937 = vmatprep.mubr.f32.mxu1 %v3936_v42  ;;  %v3951_v13 = vand.u32 4294901760, %v3950_v41  ;;  %v19117_v26 = vand.u32 4294901760, %v3339_v32  ;;  %v23523_v12 = vand.u32 4294901760, %v19061_v29  ;;  %v22713_v39 = vand.u32 4294901760, %v19091_v17 }
 0x45f   :  { %v2957_v25 = vsel %vm2925_vm2, %v23520_v4, %v23519_v15  ;;  %23521 = vst [vmem:[#allocation210_spill] sm:$0xff] %v19115_v8  ;;  %v3942_v34 = vand.u32 4294901760, %v3941_v3  ;;  %v23524_v2 = vand.u32 4294901760, %v19076_v6  ;;  %v19128_v61 = vsub.f32 %v3461_v20, %v19103_v51  ;;  %v19138_v4 = vpop.permute.xlu0 %3276 }
 0x460   :  { %v3181_v56 = vmul.f32 %v18435_v33, %v2957_v25  ;;  %23522 = vst [vmem:[#allocation211_spill] sm:$0xff] %v19117_v26  ;;  %v3956_v62 = vsub.f32 %v19061_v29, %v23523_v12  ;;  %v19130_v42 = vand.u32 4294901760, %v3464_v0  ;;  %v23527_v41 = vrot.slane %v23500_v43, 7  ;;  %23528 = vst [vmem:[#allocation214_spill] sm:$0xff] %v19138_v4 }
 0x461   :  { %v3965_v16 = vsub.f32 %v19076_v6, %v23524_v2  ;;  %23525 = vst [vmem:[#allocation212_spill] sm:$0xff] %v19128_v61  ;;  %3943 = vmatmul.mubr.f32.gmra.mrb[50].mxu1 %v3942_v34  ;;  %v19141_v25 = vsub.f32 %v3339_v32, %v19117_v26  ;;  %v3971_v2 = vsub.f32 %v19091_v17, %v22713_v39  ;;  %v22716_v33 = vand.u32 4294901760, %v19115_v8 }
 0x462   :  { %23526 = vst [vmem:[#allocation213_spill] sm:$0xff] %v19130_v42  ;;  %v2637_v3 = vsel %vm2636_vm3, %v2632_v52, %v23527_v41  ;;  %v3467_v15 = vsel %vm2108_vm1, %v3181_v56, 0  ;;  %3952 = vmatprep.mubr.f32.mxu1 %v3951_v13  ;;  %v3957_v20 = vand.u32 4294901760, %v3956_v62  ;;  %v23530_v34 = vand.u32 4294901760, %v19101_v45 }
 0x463   :  { %v2892_v12 = vmul.f32 %v18245_v44, %v2637_v3  ;;  %23529 = vst [vmem:[#allocation215_spill] sm:$0xff] %v19141_v25  ;;  %v3966_v43 = vand.u32 4294901760, %v3965_v16  ;;  %v19152_v41 = vsub.f32 %v3464_v0, %v19130_v42  ;;  %v19154_v13 = vand.u32 4294901760, %v3467_v15 }
 0x464   :  { %v3980_v44 = vsub.f32 %v19101_v45, %v23530_v34  ;;  %v23532_v32 = vrot.slane %v23480_v37, 7  ;;  %v3972_v3 = vand.u32 4294901760, %v3971_v2  ;;  %v3986_v34 = vsub.f32 %v19115_v8, %v22716_v33  ;;  %v23544_v37 = vld [vmem:[#allocation124_spill] sm:$0xff] }
 0x465   :  { %23531 = vst [vmem:[#allocation216_spill] sm:$0xff] %v19154_v13  ;;  %v3341_v62 = vsel %vm2108_vm1, %v2892_v12, %v19138_v4  ;;  %3958 = vmatmul.mubr.f32.gmra.mrb[52].mxu1 %v3957_v20  ;;  %v22718_v0 = vand.u32 4294901760, %v19141_v25  ;;  %v23534_v45 = vand.u32 4294901760, %v19128_v61  ;;  %v19174_v10 = vsub.f32 %v3467_v15, %v19154_v13 }
 0x466   :  { %3967 = vmatprep.mubr.f32.mxu1 %v3966_v43  ;;  %v2638_v16 = vsel %vm2636_vm3, %v23532_v32, %v2632_v52  ;;  %v19166_v39 = vand.u32 4294901760, %v3341_v62  ;;  %v3981_v56 = vand.u32 4294901760, %v3980_v44  ;;  %v22717_v43 = vand.u32 4294901760, %v19152_v41  ;;  %v19176_v52 = vpop.permute.xlu1 %3274 }
 0x467   :  { %v3995_v12 = vsub.f32 %v19128_v61, %v23534_v45  ;;  %v2891_v20 = vmul.f32 %v18357_v11, %v2638_v16  ;;  %23535 = vst [vmem:[#allocation218_spill] sm:$0xff] %v19174_v10  ;;  %23536 = vst [vmem:[#allocation219_spill] sm:$0xff] %v19176_v52  ;;  %v3987_v32 = vand.u32 4294901760, %v3986_v34  ;;  %v4001_v44 = vsub.f32 %v19141_v25, %v22718_v0  ;;  %v23542_v0 = vld [vmem:[#allocation58_spill] sm:$0xff] }
 0x468   :  { %23533 = vst [vmem:[#allocation217_spill] sm:$0xff] %v19166_v39  ;;  %v19184_v45 = vsub.f32 %v3341_v62, %v19166_v39  ;;  %v4010_v15 = vsub.f32 %v19152_v41, %v22717_v43  ;;  %vm12890_vm2 = vcmask 1024  }
 0x469   :  { %3973 = vmatmul.mubr.f32.gmra.mrb[54].mxu1 %v3972_v3  ;;  %v3340_v2 = vsel %vm2108_vm1, %v2891_v20, %v19176_v52  ;;  %v3996_v11 = vand.u32 4294901760, %v3995_v12  ;;  %v4002_v3 = vand.u32 4294901760, %v4001_v44  ;;  %v23552_v52 = vld [vmem:[#allocation128_spill] sm:$0xff] }
 0x46a   :  { %3982 = vmatprep.mubr.f32.mxu1 %v3981_v56  ;;  %23537 = vst [vmem:[#allocation220_spill] sm:$0xff] %v19184_v45  ;;  %v19186_v33 = vand.u32 4294901760, %v3340_v2  ;;  %v22719_v56 = vand.u32 4294901760, %v19174_v10  ;;  %v4011_v34 = vand.u32 4294901760, %v4010_v15  ;;  %v22723_v62 = vand.u32 4294901760, %v19184_v45  ;;  %v23540_v15 = vld [vmem:[#allocation96_spill] sm:$0xff] }
 0x46c   :  { %23538 = vst [vmem:[#allocation221_spill] sm:$0xff] %v19186_v33  ;;  %v19193_v16 = vsub.f32 %v3340_v2, %v19186_v33  ;;  %v4025_v12 = vsub.f32 %v19174_v10, %v22719_v56  ;;  %v4031_v2 = vsub.f32 %v19184_v45, %v22723_v62  ;;  %v23551_v62 = vld [vmem:[#allocation126_spill] sm:$0xff] }
 0x46d   :  { %3988 = vmatmul.mubr.f32.gmra.mrb[56].mxu1 %v3987_v32 }
 0x46e   :  { %23539 = vst [vmem:[#allocation222_spill] sm:$0xff] %v19193_v16  ;;  %3997 = vmatprep.mubr.f32.mxu1 %v3996_v11  ;;  %v22721_v20 = vand.u32 4294901760, %v19193_v16  ;;  %v4026_v44 = vand.u32 4294901760, %v4025_v12  ;;  %v4032_v11 = vand.u32 4294901760, %v4031_v2  ;;  %v23547_v12 = vld [vmem:[#allocation23_spill] sm:$0xff]  ;;  %v23549_v2 = vld [vmem:[#allocation64_spill] sm:$0xff] }
 0x470   :  { %v4016_v32 = vsub.f32 %v19193_v16, %v22721_v20  ;;  %v23546_v20 = vld [vmem:[#allocation61_spill] sm:$0xff] }
 0x471   :  { %4003 = vmatmul.mubr.f32.gmra.mrb[58].mxu1 %v4002_v3  ;;  %v23541_v3 = vld [vmem:[#allocation57_spill] sm:$0xff] }
 0x472   :  { %4012 = vmatprep.mubr.f32.mxu1 %v4011_v34  ;;  %v4017_v43 = vand.u32 4294901760, %v4016_v32  ;;  %v14618_v56 = vpack.c.bf16 %v23542_v0, %v23541_v3  ;;  %v23543_v34 = vld [vmem:[#allocation3_spill] sm:$0xff]  ;;  %v23545_v32 = vld [vmem:[#allocation60_spill] sm:$0xff] }
 0x473   :  { %v14621_v4 = vpack.c.bf16 %v23546_v20, %v23545_v32 }
 0x475   :  { %4018 = vmatmul.mubr.f32.gmra.mrb[60].mxu1 %v4017_v43  ;;  %v23548_v43 = vld [vmem:[#allocation18_spill] sm:$0xff] }
 0x476   :  { %4027 = vmatprep.mubr.f32.mxu1 %v4026_v44  ;;  %v23550_v44 = vld [vmem:[#allocation65_spill] sm:$0xff] }
 0x479   :  { %4033 = vmatmul.mubr.f32.gmra.mrb[62].mxu1 %v4032_v11  ;;  %v14624_v11 = vpack.c.bf16 %v23550_v44, %v23549_v2 }
 0x47a   :  { %4223 = vmatprep.mubr.f32.mxu1 %v23540_v15 }
 0x47d   :  { %4225 = vmatmul.mubr.f32.vlgmr.msra.gmra.mrb[0].mxu1 %v23543_v34  ;;  %v23562_v34 = vld [vmem:[#allocation38_spill] sm:$0xff] }
 0x47e   :  { %4230 = vmatprep.mubr.f32.mxu1 %v23544_v37  ;;  %14619 = vmatpush1.bf16.msra.mxu1 %v14618_v56  ;;  %v14627_v56 = vpack.c.bf16 %v23208_v49, %v17451_v36 }
 0x47f   :  { %14620 = vmatprep.subr.bf16.mxu1 %v23070_v46 }
 0x481   :  { %4232 = vmatmul.mubr.f32.gmra.mrb[2].mxu1 %v23547_v12  ;;  %v23556_v12 = vld [vmem:[#allocation12_spill] sm:$0xff] }
 0x482   :  { %4237 = vmatprep.mubr.f32.mxu1 %v23548_v43  ;;  %14622 = vmatpush1.bf16.msra.mxu1 %v14621_v4  ;;  %v14630_v4 = vpack.c.bf16 %v23223_v38, %v23222_v40 }
 0x483   :  { %14623 = vmatprep.subr.bf16.mxu1 %v23070_v46 }
 0x485   :  { %4239 = vmatmul.mubr.f32.gmra.mrb[4].mxu1 %v18149_v21  ;;  %v23553_v21 = vld [vmem:[#allocation131_spill] sm:$0xff] }
 0x486   :  { %4244 = vmatprep.mubr.f32.mxu1 %v23551_v62  ;;  %14625 = vmatpush1.bf16.msra.mxu1 %v14624_v11  ;;  %v23554_v11 = vld [vmem:[#allocation70_spill] sm:$0xff]  ;;  %v23555_v62 = vld [vmem:[#allocation71_spill] sm:$0xff] }
 0x487   :  { %14626 = vmatprep.subr.bf16.mxu1 %v23070_v46  ;;  %v14633_v43 = vpack.c.bf16 %v23555_v62, %v23554_v11 }
 0x489   :  { %4246 = vmatmul.mubr.f32.gmra.mrb[6].mxu1 %v18101_v59  ;;  %v23557_v59 = vld [vmem:[#allocation7_spill] sm:$0xff] }
 0x48a   :  { %4251 = vmatprep.mubr.f32.mxu1 %v23552_v52  ;;  %14628 = vmatpush1.bf16.msra.mxu1 %v14627_v56  ;;  %v14636_v56 = vpack.c.bf16 %v23247_v23, %v23246_v63  ;;  %v23558_v52 = vld [vmem:[#allocation141_spill] sm:$0xff] }
 0x48b   :  { %14629 = vmatprep.subr.bf16.mxu1 %v23070_v46  ;;  %v23566_v23 = vld [vmem:[#allocation145_spill] sm:$0xff] }
 0x48d   :  { %4253 = vmatmul.mubr.f32.gmra.mrb[8].mxu1 %v18222_v9  ;;  %v23559_v9 = vld [vmem:[#allocation5_spill] sm:$0xff] }
 0x48e   :  { %4258 = vmatprep.mubr.f32.mxu1 %v23553_v21  ;;  %14631 = vmatpush1.bf16.msra.mxu1 %v14630_v4  ;;  %v23560_v4 = vld [vmem:[#allocation75_spill] sm:$0xff]  ;;  %v23561_v21 = vld [vmem:[#allocation76_spill] sm:$0xff] }
 0x48f   :  { %14632 = vmatprep.subr.bf16.mxu1 %v23070_v46  ;;  %v14639_v37 = vpack.c.bf16 %v23561_v21, %v23560_v4 }
 0x491   :  { %4260 = vmatmul.mubr.f32.gmra.mrb[10].mxu1 %v23556_v12  ;;  %v23563_v12 = vld [vmem:[#allocation134_spill] sm:$0xff] }
 0x492   :  { %4265 = vmatprep.mubr.f32.mxu1 %v23557_v59  ;;  %14634 = vmatpush1.bf16.msra.mxu1 %v14633_v43  ;;  %v23564_v43 = vld [vmem:[#allocation81_spill] sm:$0xff]  ;;  %v23565_v59 = vld [vmem:[#allocation82_spill] sm:$0xff] }
 0x493   :  { %14635 = vmatprep.subr.bf16.mxu1 %v23070_v46  ;;  %v14642_v15 = vpack.c.bf16 %v23565_v59, %v23564_v43 }
 0x495   :  { %4267 = vmatmul.mubr.f32.gmra.mrb[12].mxu1 %v23558_v52  ;;  %v23567_v52 = vld [vmem:[#allocation140_spill] sm:$0xff] }
 0x496   :  { %4272 = vmatprep.mubr.f32.mxu1 %v23559_v9  ;;  %14637 = vmatpush1.bf16.msra.mxu1 %v14636_v56  ;;  %v23568_v56 = vld [vmem:[#allocation84_spill] sm:$0xff]  ;;  %v23569_v9 = vld [vmem:[#allocation85_spill] sm:$0xff] }
 0x497   :  { %14638 = vmatprep.subr.bf16.mxu1 %v23070_v46  ;;  %v14645_v21 = vpack.c.bf16 %v23569_v9, %v23568_v56 }
 0x499   :  { %4274 = vmatmul.mubr.f32.gmra.mrb[14].mxu1 %v23562_v34  ;;  %v23570_v34 = vld [vmem:[#allocation33_spill] sm:$0xff] }
 0x49a   :  { %4279 = vmatprep.mubr.f32.mxu1 %v23563_v12  ;;  %14640 = vmatpush1.bf16.msra.mxu1 %v14639_v37  ;;  %v14648_v37 = vpack.c.bf16 %v23366_v5, %v23364_v27  ;;  %v23621_v12 = vld [vmem:[#allocation143_spill] sm:$0xff] }
 0x49b   :  { %14641 = vmatprep.subr.bf16.mxu1 %v23070_v46 }
 0x49d   :  { %4281 = vmatmul.mubr.f32.gmra.mrb[16].mxu1 %v23566_v23  ;;  %v23571_v23 = vld [vmem:[#allocation146_spill] sm:$0xff] }
 0x49e   :  { %4286 = vmatprep.mubr.f32.mxu1 %v23567_v52  ;;  %14643 = vmatpush1.bf16.msra.mxu1 %v14642_v15  ;;  %v14651_v15 = vpack.c.bf16 %v23428_v19, %v23412_v50  ;;  %v23578_v52 = vld [vmem:[#allocation158_spill] sm:$0xff]  ;;  %v23632_v19 = vld [vmem:[#allocation19_spill] sm:$0xff] }
 0x49f   :  { %14644 = vmatprep.subr.bf16.mxu1 %v23070_v46  ;;  %v23633_v50 = vld [vmem:[#allocation35_spill] sm:$0xff] }
 0x4a1   :  { %4288 = vmatmul.mubr.f32.gmra.mrb[18].mxu1 %v18498_v60  ;;  %v23572_v60 = vld [vmem:[#allocation150_spill] sm:$0xff] }
 0x4a2   :  { %4293 = vmatprep.mubr.f32.mxu1 %v23570_v34  ;;  %14646 = vmatpush1.bf16.msra.mxu1 %v14645_v21  ;;  %v23573_v21 = vld [vmem:[#allocation22_spill] sm:$0xff]  ;;  %v23574_v34 = vld [vmem:[#allocation151_spill] sm:$0xff] }
 0x4a3   :  { %14647 = vmatprep.subr.bf16.mxu1 %v23070_v46 }
 0x4a5   :  { %4295 = vmatmul.mubr.f32.gmra.mrb[20].mxu1 %v18441_v7  ;;  %v23575_v7 = vld [vmem:[#allocation161_spill] sm:$0xff] }
 0x4a6   :  { %4300 = vmatprep.mubr.f32.mxu1 %v23571_v23  ;;  %14649 = vmatpush1.bf16.msra.mxu1 %v14648_v37  ;;  %v23576_v23 = vld [vmem:[#allocation37_spill] sm:$0xff]  ;;  %v23577_v37 = vld [vmem:[#allocation30_spill] sm:$0xff] }
 0x4a7   :  { %14650 = vmatprep.subr.bf16.mxu1 %v23070_v46 }
 0x4a9   :  { %4302 = vmatmul.mubr.f32.gmra.mrb[22].mxu1 %v18585_v30  ;;  %v23620_v30 = vld [vmem:[#allocation155_spill] sm:$0xff] }
 0x4aa   :  { %4307 = vmatprep.mubr.f32.mxu1 %v23572_v60  ;;  %14652 = vmatpush1.bf16.msra.mxu1 %v14651_v15  ;;  %v23579_v15 = vld [vmem:[#allocation165_spill] sm:$0xff]  ;;  %v23619_v60 = vld [vmem:[#allocation80_spill] sm:$0xff] }
 0x4ab   :  { %14653 = vmatprep.subr.bf16.mxu1 %v23070_v46 }
 0x4ad   :  { %4309 = vmatmul.mubr.f32.gmra.mrb[24].mxu1 %v23573_v21  ;;  %v23618_v21 = vld [vmem:[#allocation17_spill] sm:$0xff] }
 0x4ae   :  { %4314 = vmatprep.mubr.f32.mxu1 %v23574_v34  ;;  %v23580_v34 = vld [vmem:[#allocation39_spill] sm:$0xff] }
 0x4b1   :  { %4316 = vmatmul.mubr.f32.gmra.mrb[26].mxu1 %v23575_v7  ;;  %v23581_v7 = vld [vmem:[#allocation177_spill] sm:$0xff] }
 0x4b2   :  { %4321 = vmatprep.mubr.f32.mxu1 %v23576_v23  ;;  %v23617_v23 = vld [vmem:[#allocation34_spill] sm:$0xff] }
 0x4b5   :  { %4323 = vmatmul.mubr.f32.gmra.mrb[28].mxu1 %v23577_v37  ;;  %v23616_v37 = vld [vmem:[#allocation79_spill] sm:$0xff] }
 0x4b6   :  { %4328 = vmatprep.mubr.f32.mxu1 %v23578_v52  ;;  %v23582_v52 = vld [vmem:[#allocation183_spill] sm:$0xff] }
 0x4b9   :  { %4330 = vmatmul.mubr.f32.gmra.mrb[30].mxu1 %v18657_v48  ;;  %v23583_v48 = vld [vmem:[#allocation181_spill] sm:$0xff] }
 0x4ba   :  { %4335 = vmatprep.mubr.f32.mxu1 %v18663_v35  ;;  %v23584_v35 = vld [vmem:[#allocation189_spill] sm:$0xff] }
 0x4bd   :  { %4337 = vmatmul.mubr.f32.gmra.mrb[32].mxu1 %v18678_v47  ;;  %v23585_v47 = vld [vmem:[#allocation188_spill] sm:$0xff] }
 0x4be   :  { %4342 = vmatprep.mubr.f32.mxu1 %v23579_v15  ;;  %v23586_v15 = vld [vmem:[#allocation47_spill] sm:$0xff] }
 0x4c1   :  { %4344 = vmatmul.mubr.f32.gmra.mrb[34].mxu1 %v18737_v54  ;;  %v23587_v54 = vld [vmem:[#allocation192_spill] sm:$0xff] }
 0x4c2   :  { %4349 = vmatprep.mubr.f32.mxu1 %v18713_v18  ;;  %v23588_v18 = vld [vmem:[#allocation51_spill] sm:$0xff] }
 0x4c5   :  { %4351 = vmatmul.mubr.f32.gmra.mrb[36].mxu1 %v23580_v34  ;;  %v23589_v34 = vld [vmem:[#allocation194_spill] sm:$0xff] }
 0x4c6   :  { %4356 = vmatprep.mubr.f32.mxu1 %v23581_v7  ;;  %v23590_v7 = vld [vmem:[#allocation196_spill] sm:$0xff] }
 0x4c9   :  { %4358 = vmatmul.mubr.f32.gmra.mrb[38].mxu1 %v18804_v1  ;;  %v23591_v1 = vld [vmem:[#allocation195_spill] sm:$0xff] }
 0x4ca   :  { %4363 = vmatprep.mubr.f32.mxu1 %v18813_v14  ;;  %v23615_v14 = vld [vmem:[#allocation66_spill] sm:$0xff] }
 0x4cd   :  { %4365 = vmatmul.mubr.f32.gmra.mrb[40].mxu1 %v23582_v52  ;;  %v23614_v52 = vld [vmem:[#allocation147_spill] sm:$0xff] }
 0x4ce   :  { %4370 = vmatprep.mubr.f32.mxu1 %v23583_v48  ;;  %v23613_v48 = vld [vmem:[#allocation78_spill] sm:$0xff] }
 0x4d1   :  { %4372 = vmatmul.mubr.f32.gmra.mrb[42].mxu1 %v23584_v35  ;;  %v23612_v35 = vld [vmem:[#allocation15_spill] sm:$0xff] }
 0x4d2   :  { %4377 = vmatprep.mubr.f32.mxu1 %v23585_v47  ;;  %v23611_v47 = vld [vmem:[#allocation25_spill] sm:$0xff] }
 0x4d5   :  { %4379 = vmatmul.mubr.f32.gmra.mrb[44].mxu1 %v23586_v15  ;;  %v23610_v15 = vld [vmem:[#allocation77_spill] sm:$0xff] }
 0x4d6   :  { %4384 = vmatprep.mubr.f32.mxu1 %v23587_v54  ;;  %v23609_v54 = vld [vmem:[#allocation4_spill] sm:$0xff] }
 0x4d9   :  { %4386 = vmatmul.mubr.f32.gmra.mrb[46].mxu1 %v23588_v18  ;;  %v23608_v18 = vld [vmem:[#allocation138_spill] sm:$0xff] }
 0x4da   :  { %4391 = vmatprep.mubr.f32.mxu1 %v23589_v34  ;;  %v23607_v34 = vld [vmem:[#allocation74_spill] sm:$0xff] }
 0x4dd   :  { %4393 = vmatmul.mubr.f32.gmra.mrb[48].mxu1 %v23590_v7  ;;  %v23606_v7 = vld [vmem:[#allocation11_spill] sm:$0xff] }
 0x4de   :  { %4398 = vmatprep.mubr.f32.mxu1 %v23591_v1  ;;  %v23605_v1 = vld [vmem:[#allocation16_spill] sm:$0xff] }
 0x4e1   :  { %4400 = vmatmul.mubr.f32.gmra.mrb[50].mxu1 %v19007_v28  ;;  %v23604_v28 = vld [vmem:[#allocation68_spill] sm:$0xff] }
 0x4e2   :  { %4405 = vmatprep.mubr.f32.mxu1 %v19001_v22  ;;  %v23603_v22 = vld [vmem:[#allocation132_spill] sm:$0xff] }
 0x4e5   :  { %4407 = vmatmul.mubr.f32.gmra.mrb[52].mxu1 %v19024_v24  ;;  %v23592_v24 = vld [vmem:[#allocation97_spill] sm:$0xff] }
 0x4e6   :  { %4412 = vmatprep.mubr.f32.mxu1 %v19051_v53  ;;  %v23593_v53 = vld [vmem:[#allocation13_spill] sm:$0xff] }
 0x4e9   :  { %4414 = vmatmul.mubr.f32.gmra.mrb[54].mxu1 %v19072_v57  ;;  %v23594_v57 = vld [vmem:[#allocation127_spill] sm:$0xff] }
 0x4ea   :  { %4419 = vmatprep.mubr.f32.mxu1 %v19078_v55  ;;  %v23595_v55 = vld [vmem:[#allocation56_spill] sm:$0xff] }
 0x4ed   :  { %4421 = vmatmul.mubr.f32.gmra.mrb[56].mxu1 %v19085_v31  ;;  %v23602_v31 = vld [vmem:[#allocation28_spill] sm:$0xff] }
 0x4ee   :  { %4426 = vmatprep.mubr.f32.mxu1 %v19103_v51  ;;  %v23596_v51 = vld [vmem:[#allocation27_spill] sm:$0xff] }
 0x4f1   :  { %4428 = vmatmul.mubr.f32.gmra.mrb[58].mxu1 %v19117_v26  ;;  %v23597_v26 = vld [vmem:[#allocation129_spill] sm:$0xff] }
 0x4f2   :  { %4433 = vmatprep.mubr.f32.mxu1 %v19130_v42  ;;  %v23598_v42 = vld [vmem:[#allocation59_spill] sm:$0xff] }
 0x4f5   :  { %4435 = vmatmul.mubr.f32.gmra.mrb[60].mxu1 %v19186_v33  ;;  %v23601_v33 = vld [vmem:[#allocation63_spill] sm:$0xff] }
 0x4f6   :  { %4440 = vmatprep.mubr.f32.mxu1 %v19154_v13  ;;  %v23599_v13 = vld [vmem:[#allocation62_spill] sm:$0xff] }
 0x4f9   :  { %4442 = vmatmul.mubr.f32.gmra.mrb[62].mxu1 %v19166_v39  ;;  %v23600_v39 = vld [vmem:[#allocation130_spill] sm:$0xff] }
 0x4fa   :  { %4561 = vmatprep.mubr.f32.mxu1 %v23592_v24 }
 0x4fd   :  { %4564 = vmatmul.mubr.f32.vlgmr.msra.gmra.mrb[0].mxu1 %v23593_v53 }
 0x4fe   :  { %4570 = vmatprep.mubr.f32.mxu1 %v23594_v57  ;;  %14655 = vmatpush1.bf16.msra.mxu1 %v23595_v55  ;;  %v23631_v55 = vld [vmem:[#allocation89_spill] sm:$0xff] }
 0x4ff   :  { %14656 = vmatprep.subr.bf16.mxu1 %v23070_v46 }
 0x501   :  { %4573 = vmatmul.mubr.f32.gmra.mrb[2].mxu1 %v23596_v51 }
 0x502   :  { %4579 = vmatprep.mubr.f32.mxu1 %v23597_v26  ;;  %14658 = vmatpush1.bf16.msra.mxu1 %v23598_v42  ;;  %v23629_v42 = vld [vmem:[#allocation157_spill] sm:$0xff] }
 0x503   :  { %14659 = vmatprep.subr.bf16.mxu1 %v23070_v46 }
 0x505   :  { %4582 = vmatmul.mubr.f32.gmra.mrb[4].mxu1 %v23599_v13 }
 0x506   :  { %4588 = vmatprep.mubr.f32.mxu1 %v23600_v39  ;;  %14661 = vmatpush1.bf16.msra.mxu1 %v23601_v33  ;;  %v23628_v33 = vld [vmem:[#allocation90_spill] sm:$0xff] }
 0x507   :  { %14662 = vmatprep.subr.bf16.mxu1 %v23070_v46 }
 0x509   :  { %4591 = vmatmul.mubr.f32.gmra.mrb[6].mxu1 %v23602_v31 }
 0x50a   :  { %4597 = vmatprep.mubr.f32.mxu1 %v23603_v22  ;;  %14664 = vmatpush1.bf16.msra.mxu1 %v23604_v28  ;;  %v23626_v28 = vld [vmem:[#allocation29_spill] sm:$0xff] }
 0x50b   :  { %14665 = vmatprep.subr.bf16.mxu1 %v23070_v46 }
 0x50d   :  { %4600 = vmatmul.mubr.f32.gmra.mrb[8].mxu1 %v23605_v1 }
 0x50e   :  { %4606 = vmatprep.mubr.f32.mxu1 %v23606_v7  ;;  %14667 = vmatpush1.bf16.msra.mxu1 %v23607_v34  ;;  %v23625_v34 = vld [vmem:[#allocation86_spill] sm:$0xff] }
 0x50f   :  { %14668 = vmatprep.subr.bf16.mxu1 %v23070_v46 }
 0x511   :  { %4609 = vmatmul.mubr.f32.gmra.mrb[10].mxu1 %v23608_v18 }
 0x512   :  { %4615 = vmatprep.mubr.f32.mxu1 %v23609_v54  ;;  %14670 = vmatpush1.bf16.msra.mxu1 %v23610_v15  ;;  %v23623_v15 = vld [vmem:[#allocation20_spill] sm:$0xff] }
 0x513   :  { %14671 = vmatprep.subr.bf16.mxu1 %v23070_v46 }
 0x515   :  { %4618 = vmatmul.mubr.f32.gmra.mrb[12].mxu1 %v23611_v47 }
 0x516   :  { %4624 = vmatprep.mubr.f32.mxu1 %v23612_v35  ;;  %14673 = vmatpush1.bf16.msra.mxu1 %v23613_v48  ;;  %v23622_v48 = vld [vmem:[#allocation83_spill] sm:$0xff] }
 0x517   :  { %14674 = vmatprep.subr.bf16.mxu1 %v23070_v46 }
 0x519   :  { %4627 = vmatmul.mubr.f32.gmra.mrb[14].mxu1 %v23614_v52 }
 0x51a   :  { %4633 = vmatprep.mubr.f32.mxu1 %v23615_v14  ;;  %14676 = vmatpush1.bf16.msra.mxu1 %v23616_v37  ;;  %v23624_v37 = vld [vmem:[#allocation14_spill] sm:$0xff] }
 0x51b   :  { %14677 = vmatprep.subr.bf16.mxu1 %v23070_v46 }
 0x51d   :  { %4636 = vmatmul.mubr.f32.gmra.mrb[16].mxu1 %v23617_v23 }
 0x51e   :  { %4642 = vmatprep.mubr.f32.mxu1 %v23618_v21  ;;  %14679 = vmatpush1.bf16.msra.mxu1 %v23619_v60  ;;  %v23627_v60 = vld [vmem:[#allocation153_spill] sm:$0xff] }
 0x51f   :  { %14680 = vmatprep.subr.bf16.mxu1 %v23070_v46 }
 0x521   :  { %4645 = vmatmul.mubr.f32.gmra.mrb[18].mxu1 %v23620_v30 }
 0x522   :  { %4651 = vmatprep.mubr.f32.mxu1 %v23621_v12  ;;  %14682 = vmatpush1.bf16.msra.mxu1 %v23622_v48  ;;  %v23630_v48 = vld [vmem:[#allocation154_spill] sm:$0xff] }
 0x523   :  { %14683 = vmatprep.subr.bf16.mxu1 %v23070_v46 }
 0x525   :  { %4654 = vmatmul.mubr.f32.gmra.mrb[20].mxu1 %v23623_v15  ;;  %v23639_v15 = vld [vmem:[#allocation176_spill] sm:$0xff] }
 0x526   :  { %4660 = vmatprep.mubr.f32.mxu1 %v23624_v37  ;;  %14685 = vmatpush1.bf16.msra.mxu1 %v23625_v34  ;;  %v23634_v34 = vld [vmem:[#allocation88_spill] sm:$0xff]  ;;  %v23635_v37 = vld [vmem:[#allocation169_spill] sm:$0xff] }
 0x527   :  { %14686 = vmatprep.subr.bf16.mxu1 %v23070_v46 }
 0x529   :  { %4663 = vmatmul.mubr.f32.gmra.mrb[22].mxu1 %v23626_v28  ;;  %v23636_v28 = vld [vmem:[#allocation170_spill] sm:$0xff] }
 0x52a   :  { %4669 = vmatprep.mubr.f32.mxu1 %v23627_v60  ;;  %14688 = vmatpush1.bf16.msra.mxu1 %v23628_v33  ;;  %v23637_v60 = vld [vmem:[#allocation36_spill] sm:$0xff]  ;;  %v23638_v33 = vld [vmem:[#allocation171_spill] sm:$0xff] }
 0x52b   :  { %14689 = vmatprep.subr.bf16.mxu1 %v23070_v46 }
 0x52d   :  { %4672 = vmatmul.mubr.f32.gmra.mrb[24].mxu1 %v23629_v42  ;;  %v23640_v42 = vld [vmem:[#allocation175_spill] sm:$0xff] }
 0x52e   :  { %4678 = vmatprep.mubr.f32.mxu1 %v23630_v48  ;;  %v23641_v48 = vld [vmem:[#allocation178_spill] sm:$0xff] }
 0x531   :  { %4681 = vmatmul.mubr.f32.gmra.mrb[26].mxu1 %v23631_v55  ;;  %v23642_v55 = vld [vmem:[#allocation179_spill] sm:$0xff] }
 0x532   :  { %4687 = vmatprep.mubr.f32.mxu1 %v23632_v19  ;;  %v23643_v19 = vld [vmem:[#allocation185_spill] sm:$0xff] }
 0x535   :  { %4690 = vmatmul.mubr.f32.gmra.mrb[28].mxu1 %v23633_v50  ;;  %v23644_v50 = vld [vmem:[#allocation186_spill] sm:$0xff] }
 0x536   :  { %4696 = vmatprep.mubr.f32.mxu1 %v23634_v34  ;;  %v23645_v34 = vld [vmem:[#allocation44_spill] sm:$0xff] }
 0x539   :  { %4699 = vmatmul.mubr.f32.gmra.mrb[30].mxu1 %v23635_v37  ;;  %v23646_v37 = vld [vmem:[#allocation187_spill] sm:$0xff] }
 0x53a   :  { %4705 = vmatprep.mubr.f32.mxu1 %v23636_v28  ;;  %v23647_v28 = vld [vmem:[#allocation48_spill] sm:$0xff] }
 0x53d   :  { %4708 = vmatmul.mubr.f32.gmra.mrb[32].mxu1 %v23637_v60  ;;  %v23648_v60 = vld [vmem:[#allocation191_spill] sm:$0xff] }
 0x53e   :  { %4714 = vmatprep.mubr.f32.mxu1 %v23638_v33  ;;  %v23649_v33 = vld [vmem:[#allocation193_spill] sm:$0xff] }
 0x541   :  { %4717 = vmatmul.mubr.f32.gmra.mrb[34].mxu1 %v23639_v15  ;;  %v23650_v15 = vld [vmem:[#allocation50_spill] sm:$0xff] }
 0x542   :  { %4723 = vmatprep.mubr.f32.mxu1 %v23640_v42  ;;  %v23651_v42 = vld [vmem:[#allocation197_spill] sm:$0xff] }
 0x545   :  { %4726 = vmatmul.mubr.f32.gmra.mrb[36].mxu1 %v23641_v48  ;;  %v23652_v48 = vld [vmem:[#allocation199_spill] sm:$0xff] }
 0x546   :  { %4732 = vmatprep.mubr.f32.mxu1 %v23642_v55 }
 0x549   :  { %4735 = vmatmul.mubr.f32.gmra.mrb[38].mxu1 %v23643_v19  ;;  %v23653_v19 = vld [vmem:[#allocation200_spill] sm:$0xff] }
 0x54a   :  { %4741 = vmatprep.mubr.f32.mxu1 %v23644_v50  ;;  %v23654_v50 = vld [vmem:[#allocation203_spill] sm:$0xff] }
 0x54d   :  { %4744 = vmatmul.mubr.f32.gmra.mrb[40].mxu1 %v23645_v34  ;;  %v23655_v34 = vld [vmem:[#allocation202_spill] sm:$0xff] }
 0x54e   :  { %4750 = vmatprep.mubr.f32.mxu1 %v23646_v37 }
 0x551   :  { %4753 = vmatmul.mubr.f32.gmra.mrb[42].mxu1 %v23647_v28 }
 0x552   :  { %4759 = vmatprep.mubr.f32.mxu1 %v23648_v60 }
 0x555   :  { %4762 = vmatmul.mubr.f32.gmra.mrb[44].mxu1 %v23649_v33  ;;  %v23656_v33 = vld [vmem:[#allocation208_spill] sm:$0xff] }
 0x556   :  { %4768 = vmatprep.mubr.f32.mxu1 %v23650_v15 }
 0x559   :  { %4771 = vmatmul.mubr.f32.gmra.mrb[46].mxu1 %v23651_v42 }
 0x55a   :  { %4777 = vmatprep.mubr.f32.mxu1 %v23652_v48 }
 0x55d   :  { %4780 = vmatmul.mubr.f32.gmra.mrb[48].mxu1 %v18996_v58 }
 0x55e   :  { %4786 = vmatprep.mubr.f32.mxu1 %v23653_v19 }
 0x561   :  { %4789 = vmatmul.mubr.f32.gmra.mrb[50].mxu1 %v23654_v50 }
 0x562   :  { %4795 = vmatprep.mubr.f32.mxu1 %v23655_v34 }
 0x565   :  { %4798 = vmatmul.mubr.f32.gmra.mrb[52].mxu1 %v19061_v29 }
 0x566   :  { %4804 = vmatprep.mubr.f32.mxu1 %v19076_v6  ;;  %v23657_v6 = vand.u32 4294901760, %v23592_v24  ;;  %v23664_v24 = vand.u32 4294901760, %v23596_v51  ;;  %v23670_v51 = vand.u32 4294901760, %v17451_v36  ;;  %v23676_v36 = vand.u32 4294901760, %v23605_v1 }
 0x567   :  { %v23682_v1 = vand.u32 4294901760, %v23246_v63  ;;  %v23690_v63 = vand.u32 4294901760, %v23614_v52  ;;  %v23696_v52 = vand.u32 4294901760, %v23568_v56  ;;  %v23702_v56 = vld [vmem:[#allocation20_spill] sm:$0xff] }
 0x569   :  { %4807 = vmatmul.mubr.f32.gmra.mrb[54].mxu1 %v19091_v17  ;;  %v23658_v17 = vand.u32 4294901760, %v23541_v3  ;;  %v23685_v3 = vand.u32 4294901760, %v23611_v47  ;;  %v23692_v47 = vand.u32 4294901760, %v23564_v43  ;;  %v23698_v43 = vand.u32 4294901760, %v23620_v30  ;;  %v23706_v30 = vld [vmem:[#allocation92_spill] sm:$0xff] }
 0x56a   :  { %4813 = vmatprep.mubr.f32.mxu1 %v23656_v33  ;;  %v23659_v33 = vand.u32 4294901760, %v23542_v0  ;;  %v23673_v0 = vand.u32 4294901760, %v23603_v22  ;;  %v23679_v22 = vand.u32 4294901760, %v23555_v62  ;;  %v23686_v62 = vand.u32 4294901760, %v23612_v35 }
 0x56b   :  { %v23693_v35 = vand.u32 4294901760, %v23565_v59  ;;  %v23699_v59 = vand.u32 4294901760, %v23621_v12 }
 0x56d   :  { %4816 = vmatmul.mubr.f32.gmra.mrb[56].mxu1 %v19115_v8  ;;  %v14690_v8 = vpack.c.bf16 %v23659_v33, %v23658_v17  ;;  %v23669_v33 = vand.u32 4294901760, %v23600_v39  ;;  %v23675_v39 = vand.u32 4294901760, %v23223_v38  ;;  %v23681_v38 = vand.u32 4294901760, %v23609_v54 }
 0x56e   :  { %4822 = vmatprep.mubr.f32.mxu1 %v19128_v61  ;;  %v23660_v61 = vand.u32 4294901760, %v23593_v53  ;;  %v23666_v53 = vand.u32 4294901760, %v23549_v2 }
 0x571   :  { %4825 = vmatmul.mubr.f32.gmra.mrb[58].mxu1 %v19141_v25  ;;  %v23661_v25 = vand.u32 4294901760, %v23594_v57  ;;  %v23667_v57 = vand.u32 4294901760, %v23550_v44  ;;  %v23691_v44 = vand.u32 4294901760, %v23615_v14  ;;  %v23697_v14 = vand.u32 4294901760, %v23569_v9  ;;  %v23704_v9 = vld [vmem:[#allocation14_spill] sm:$0xff] }
 0x572   :  { %4831 = vmatprep.mubr.f32.mxu1 %v19152_v41 }
 0x573   :  { %v14696_v17 = vpack.c.bf16 %v23667_v57, %v23666_v53  ;;  %v23703_v57 = vand.u32 4294901760, %v23702_v56  ;;  %v23752_v56 = vand.u32 4294901760, %v23650_v15  ;;  %v23759_v15 = vand.u32 4294901760, %v19061_v29 }
 0x574   :  { %v23772_v29 = vand.u32 4294901760, %v19152_v41  ;;  %v23783_v41 = vld [vmem:[#allocation23_spill] sm:$0xff] }
 0x575   :  { %4834 = vmatmul.mubr.f32.gmra.mrb[60].mxu1 %v19193_v16  ;;  %v23662_v16 = vand.u32 4294901760, %v23545_v32  ;;  %v23688_v32 = vld [vmem:[#allocation76_spill] sm:$0xff] }
 0x576   :  { %4840 = vmatprep.mubr.f32.mxu1 %v19174_v10  ;;  %v23663_v10 = vand.u32 4294901760, %v23546_v20  ;;  %v23689_v54 = vand.u32 4294901760, %v23688_v32 }
 0x579   :  { %4843 = vmatmul.mubr.f32.gmra.mrb[62].mxu1 %v19184_v45  ;;  %v14693_v45 = vpack.c.bf16 %v23663_v10, %v23662_v16  ;;  %v23683_v16 = vld [vmem:[#allocation73_spill] sm:$0xff] }
 0x57a   :  { %4939 = vmatprep.mubr.f32.mxu1 %v23657_v6  ;;  %v23665_v6 = vand.u32 4294901760, %v23597_v26  ;;  %v23671_v26 = vand.u32 4294901760, %v23208_v49  ;;  %v23677_v49 = vand.u32 4294901760, %v23606_v7  ;;  %v23684_v7 = vand.u32 4294901760, %v23683_v16 }
 0x57c   :  { %v14708_v20 = vpack.c.bf16 %v23684_v7, %v23682_v1  ;;  %v23726_v1 = vld [vmem:[#allocation169_spill] sm:$0xff]  ;;  %v23728_v7 = vld [vmem:[#allocation170_spill] sm:$0xff] }
 0x57d   :  { %4943 = vmatmul.mubr.f32.vlgmr.msra.gmra.mrb[0].mxu1 %v23660_v61  ;;  %v14699_v61 = vpack.c.bf16 %v23671_v26, %v23670_v51  ;;  %v23727_v16 = vand.u32 4294901760, %v23726_v1  ;;  %v23789_v1 = vld [vmem:[#allocation135_spill] sm:$0xff] }
 0x57e   :  { %4950 = vmatprep.mubr.f32.mxu1 %v23661_v25  ;;  %14691 = vmatpush1.bf16.msra.mxu1 %v14690_v8  ;;  %v23668_v8 = vand.u32 4294901760, %v23599_v13  ;;  %v23672_v25 = vand.u32 4294901760, %v23602_v31  ;;  %v23674_v13 = vand.u32 4294901760, %v23222_v40  ;;  %v23678_v31 = vand.u32 4294901760, %v23554_v11 }
 0x57f   :  { %14692 = vmatprep.subr.bf16.mxu1 %v23070_v46  ;;  %v23680_v40 = vand.u32 4294901760, %v23608_v18  ;;  %v23687_v18 = vand.u32 4294901760, %v23560_v4  ;;  %v14714_v11 = vpack.c.bf16 %v23693_v35, %v23692_v47  ;;  %v23694_v4 = vand.u32 4294901760, %v23617_v23  ;;  %v23738_v47 = vld [vmem:[#allocation178_spill] sm:$0xff] }
 0x580   :  { %v14702_v10 = vpack.c.bf16 %v23675_v39, %v23674_v13  ;;  %v23700_v23 = vand.u32 4294901760, %v23364_v27  ;;  %v23710_v27 = vld [vmem:[#allocation29_spill] sm:$0xff]  ;;  %v23716_v13 = vld [vmem:[#allocation154_spill] sm:$0xff]  ;;  %v23739_v35 = vand.u32 4294901760, %v23738_v47 }
 0x581   :  { %4954 = vmatmul.mubr.f32.gmra.mrb[2].mxu1 %v23664_v24  ;;  %v14711_v2 = vpack.c.bf16 %v23689_v54, %v23687_v18  ;;  %v23695_v24 = vand.u32 4294901760, %v23618_v21  ;;  %v23701_v21 = vand.u32 4294901760, %v23366_v5  ;;  %v23711_v26 = vand.u32 4294901760, %v23710_v27  ;;  %v23712_v5 = vld [vmem:[#allocation153_spill] sm:$0xff]  ;;  %v23732_v18 = vld [vmem:[#allocation171_spill] sm:$0xff]  ;;  %v23734_v54 = vld [vmem:[#allocation176_spill] sm:$0xff] }
 0x582   :  { %4961 = vmatprep.mubr.f32.mxu1 %v23665_v6  ;;  %14694 = vmatpush1.bf16.msra.mxu1 %v14693_v45  ;;  %v14705_v45 = vpack.c.bf16 %v23679_v22, %v23678_v31  ;;  %v14717_v6 = vpack.c.bf16 %v23697_v14, %v23696_v52  ;;  %v23717_v39 = vand.u32 4294901760, %v23716_v13  ;;  %v23722_v22 = vld [vmem:[#allocation35_spill] sm:$0xff]  ;;  %v23733_v32 = vand.u32 4294901760, %v23732_v18  ;;  %v23743_v52 = vld [vmem:[#allocation186_spill] sm:$0xff]  ;;  %v23795_v18 = vld [vmem:[#allocation12_spill] sm:$0xff] }
 0x583   :  { %14695 = vmatprep.subr.bf16.mxu1 %v23070_v46  ;;  %v14720_v53 = vpack.c.bf16 %v23701_v21, %v23700_v23  ;;  %v23744_v14 = vand.u32 4294901760, %v23743_v52  ;;  %v23748_v23 = vand.u32 4294901760, %v23647_v28  ;;  %v23749_v21 = vand.u32 4294901760, %v23648_v60  ;;  %v23801_v47 = vld [vmem:[#allocation38_spill] sm:$0xff]  ;;  %v23806_v52 = vld [vmem:[#allocation80_spill] sm:$0xff] }
 0x584   :  { %v23756_v28 = vand.u32 4294901760, %v23653_v19  ;;  %v23757_v60 = vand.u32 4294901760, %v23654_v50  ;;  %v23766_v19 = vld [vmem:[#allocation210_spill] sm:$0xff]  ;;  %v23768_v50 = vld [vmem:[#allocation212_spill] sm:$0xff] }
 0x585   :  { %4965 = vmatmul.mubr.f32.gmra.mrb[4].mxu1 %v23668_v8  ;;  %v23707_v8 = vand.u32 4294901760, %v23706_v30 }
 0x586   :  { %4972 = vmatprep.mubr.f32.mxu1 %v23669_v33  ;;  %14697 = vmatpush1.bf16.msra.mxu1 %v14696_v17  ;;  %v23705_v17 = vand.u32 4294901760, %v23704_v9  ;;  %v23708_v33 = vld [vmem:[#allocation93_spill] sm:$0xff]  ;;  %v23754_v9 = vand.u32 4294901760, %v23652_v48 }
 0x587   :  { %14698 = vmatprep.subr.bf16.mxu1 %v23070_v46  ;;  %v23709_v12 = vand.u32 4294901760, %v23708_v33  ;;  %v23762_v48 = vld [vmem:[#allocation9_spill] sm:$0xff] }
 0x589   :  { %4976 = vmatmul.mubr.f32.gmra.mrb[6].mxu1 %v23672_v25  ;;  %v14723_v51 = vpack.c.bf16 %v23709_v12, %v23707_v8  ;;  %v23714_v25 = vld [vmem:[#allocation157_spill] sm:$0xff]  ;;  %v23763_v8 = vand.u32 4294901760, %v23762_v48  ;;  %v23767_v12 = vand.u32 4294901760, %v23766_v19 }
 0x58a   :  { %4983 = vmatprep.mubr.f32.mxu1 %v23673_v0  ;;  %14700 = vmatpush1.bf16.msra.mxu1 %v14699_v61  ;;  %v23713_v61 = vand.u32 4294901760, %v23712_v5  ;;  %v23715_v0 = vand.u32 4294901760, %v23714_v25  ;;  %v23825_v48 = vld [vmem:[#allocation165_spill] sm:$0xff] }
 0x58b   :  { %14701 = vmatprep.subr.bf16.mxu1 %v23070_v46  ;;  %v23829_v19 = vld [vmem:[#allocation177_spill] sm:$0xff] }
 0x58d   :  { %4987 = vmatmul.mubr.f32.gmra.mrb[8].mxu1 %v23676_v36 }
 0x58e   :  { %4994 = vmatprep.mubr.f32.mxu1 %v23677_v49  ;;  %14703 = vmatpush1.bf16.msra.mxu1 %v14702_v10  ;;  %v23718_v10 = vld [vmem:[#allocation89_spill] sm:$0xff]  ;;  %v23720_v49 = vld [vmem:[#allocation19_spill] sm:$0xff] }
 0x58f   :  { %14704 = vmatprep.subr.bf16.mxu1 %v23070_v46  ;;  %v23719_v36 = vand.u32 4294901760, %v23718_v10  ;;  %v23721_v31 = vand.u32 4294901760, %v23720_v49  ;;  %v23780_v10 = vld [vmem:[#allocation3_spill] sm:$0xff]  ;;  %v23782_v49 = vld [vmem:[#allocation56_spill] sm:$0xff] }
 0x591   :  { %4998 = vmatmul.mubr.f32.gmra.mrb[10].mxu1 %v23680_v40  ;;  %v23724_v40 = vld [vmem:[#allocation88_spill] sm:$0xff] }
 0x592   :  { %5005 = vmatprep.mubr.f32.mxu1 %v23681_v38  ;;  %14706 = vmatpush1.bf16.msra.mxu1 %v14705_v45  ;;  %v23723_v45 = vand.u32 4294901760, %v23722_v22  ;;  %v23725_v38 = vand.u32 4294901760, %v23724_v40  ;;  %v23785_v22 = vld [vmem:[#allocation59_spill] sm:$0xff]  ;;  %v23787_v40 = vld [vmem:[#allocation126_spill] sm:$0xff] }
 0x593   :  { %14707 = vmatprep.subr.bf16.mxu1 %v23070_v46 }
 0x595   :  { %5009 = vmatmul.mubr.f32.gmra.mrb[12].mxu1 %v23685_v3  ;;  %v23730_v3 = vld [vmem:[#allocation36_spill] sm:$0xff] }
 0x596   :  { %5016 = vmatprep.mubr.f32.mxu1 %v23686_v62  ;;  %14709 = vmatpush1.bf16.msra.mxu1 %v14708_v20  ;;  %v23729_v20 = vand.u32 4294901760, %v23728_v7  ;;  %v23731_v62 = vand.u32 4294901760, %v23730_v3  ;;  %v23791_v7 = vld [vmem:[#allocation68_spill] sm:$0xff]  ;;  %v23793_v3 = vld [vmem:[#allocation131_spill] sm:$0xff] }
 0x597   :  { %14710 = vmatprep.subr.bf16.mxu1 %v23070_v46 }
 0x599   :  { %5020 = vmatmul.mubr.f32.gmra.mrb[14].mxu1 %v23690_v63  ;;  %v23736_v63 = vld [vmem:[#allocation175_spill] sm:$0xff] }
 0x59a   :  { %5027 = vmatprep.mubr.f32.mxu1 %v23691_v44  ;;  %14712 = vmatpush1.bf16.msra.mxu1 %v14711_v2  ;;  %v23735_v2 = vand.u32 4294901760, %v23734_v54  ;;  %v23737_v44 = vand.u32 4294901760, %v23736_v63  ;;  %v23797_v54 = vld [vmem:[#allocation77_spill] sm:$0xff] }
 0x59b   :  { %14713 = vmatprep.subr.bf16.mxu1 %v23070_v46  ;;  %v23799_v63 = vld [vmem:[#allocation5_spill] sm:$0xff] }
 0x59d   :  { %5031 = vmatmul.mubr.f32.gmra.mrb[16].mxu1 %v23694_v4  ;;  %v23741_v4 = vld [vmem:[#allocation185_spill] sm:$0xff] }
 0x59e   :  { %5038 = vmatprep.mubr.f32.mxu1 %v23695_v24  ;;  %14715 = vmatpush1.bf16.msra.mxu1 %v14714_v11  ;;  %v23740_v11 = vand.u32 4294901760, %v23642_v55  ;;  %v23742_v24 = vand.u32 4294901760, %v23741_v4  ;;  %v23750_v55 = vld [vmem:[#allocation193_spill] sm:$0xff] }
 0x59f   :  { %14716 = vmatprep.subr.bf16.mxu1 %v23070_v46  ;;  %v23804_v4 = vld [vmem:[#allocation145_spill] sm:$0xff] }
 0x5a1   :  { %5042 = vmatmul.mubr.f32.gmra.mrb[18].mxu1 %v23698_v43 }
 0x5a2   :  { %5049 = vmatprep.mubr.f32.mxu1 %v23699_v59  ;;  %14718 = vmatpush1.bf16.msra.mxu1 %v14717_v6  ;;  %v23745_v6 = vld [vmem:[#allocation44_spill] sm:$0xff]  ;;  %v23747_v59 = vand.u32 4294901760, %v23646_v37  ;;  %v23755_v37 = vand.u32 4294901760, %v18996_v58 }
 0x5a3   :  { %14719 = vmatprep.subr.bf16.mxu1 %v23070_v46  ;;  %v23746_v43 = vand.u32 4294901760, %v23745_v6  ;;  %v23764_v58 = vld [vmem:[#allocation208_spill] sm:$0xff]  ;;  %v23808_v6 = vld [vmem:[#allocation33_spill] sm:$0xff] }
 0x5a4   :  { %v23765_v33 = vand.u32 4294901760, %v23764_v58  ;;  %v23827_v58 = vld [vmem:[#allocation172_spill] sm:$0xff] }
 0x5a5   :  { %5053 = vmatmul.mubr.f32.gmra.mrb[20].mxu1 %v23703_v57  ;;  %v23753_v57 = vand.u32 4294901760, %v23651_v42  ;;  %v23760_v42 = vld [vmem:[#allocation6_spill] sm:$0xff] }
 0x5a6   :  { %5060 = vmatprep.mubr.f32.mxu1 %v23705_v17  ;;  %14721 = vmatpush1.bf16.msra.mxu1 %v14720_v53  ;;  %v23751_v53 = vand.u32 4294901760, %v23750_v55  ;;  %v23758_v17 = vand.u32 4294901760, %v23655_v34  ;;  %v23761_v30 = vand.u32 4294901760, %v23760_v42  ;;  %v23770_v34 = vld [vmem:[#allocation215_spill] sm:$0xff]  ;;  %v23813_v55 = vld [vmem:[#allocation41_spill] sm:$0xff]  ;;  %v23823_v42 = vld [vmem:[#allocation164_spill] sm:$0xff] }
 0x5a7   :  { %14722 = vmatprep.subr.bf16.mxu1 %v23070_v46  ;;  %v23771_v27 = vand.u32 4294901760, %v23770_v34  ;;  %v23833_v34 = vld [vmem:[#allocation181_spill] sm:$0xff] }
 0x5a9   :  { %5064 = vmatmul.mubr.f32.gmra.mrb[22].mxu1 %v23711_v26  ;;  %v23773_v26 = vld [vmem:[#allocation222_spill] sm:$0xff] }
 0x5aa   :  { %5071 = vmatprep.mubr.f32.mxu1 %v23713_v61  ;;  %14724 = vmatpush1.bf16.msra.mxu1 %v14723_v51  ;;  %v23769_v51 = vand.u32 4294901760, %v23768_v50  ;;  %v23774_v5 = vand.u32 4294901760, %v23773_v26  ;;  %v23775_v61 = vld [vmem:[#allocation218_spill] sm:$0xff]  ;;  %v23831_v50 = vld [vmem:[#allocation180_spill] sm:$0xff]  ;;  %v23836_v26 = vld [vmem:[#allocation47_spill] sm:$0xff] }
 0x5ab   :  { %14725 = vmatprep.subr.bf16.mxu1 %v23070_v46  ;;  %v23776_v25 = vand.u32 4294901760, %v23775_v61  ;;  %v23838_v61 = vld [vmem:[#allocation51_spill] sm:$0xff] }
 0x5ad   :  { %5075 = vmatmul.mubr.f32.gmra.mrb[24].mxu1 %v23715_v0  ;;  %v23777_v0 = vld [vmem:[#allocation220_spill] sm:$0xff] }
 0x5ae   :  { %5082 = vmatprep.mubr.f32.mxu1 %v23717_v39  ;;  %v23778_v13 = vand.u32 4294901760, %v23777_v0  ;;  %v23779_v39 = vld [vmem:[#allocation96_spill] sm:$0xff] }
 0x5af   :  { %v23840_v0 = vld [vmem:[#allocation196_spill] sm:$0xff] }
 0x5b1   :  { %5086 = vmatmul.mubr.f32.gmra.mrb[26].mxu1 %v23719_v36  ;;  %v23781_v36 = vld [vmem:[#allocation124_spill] sm:$0xff] }
 0x5b2   :  { %5093 = vmatprep.mubr.f32.mxu1 %v23721_v31  ;;  %v23784_v31 = vld [vmem:[#allocation18_spill] sm:$0xff] }
 0x5b5   :  { %5097 = vmatmul.mubr.f32.gmra.mrb[28].mxu1 %v23723_v45  ;;  %v23786_v45 = vld [vmem:[#allocation137_spill] sm:$0xff] }
 0x5b6   :  { %5104 = vmatprep.mubr.f32.mxu1 %v23725_v38  ;;  %v23788_v38 = vld [vmem:[#allocation63_spill] sm:$0xff] }
 0x5b9   :  { %5108 = vmatmul.mubr.f32.gmra.mrb[30].mxu1 %v23727_v16  ;;  %v23790_v16 = vld [vmem:[#allocation128_spill] sm:$0xff] }
 0x5ba   :  { %5115 = vmatprep.mubr.f32.mxu1 %v23729_v20  ;;  %v23792_v20 = vld [vmem:[#allocation139_spill] sm:$0xff] }
 0x5bd   :  { %5119 = vmatmul.mubr.f32.gmra.mrb[32].mxu1 %v23731_v62  ;;  %v23794_v62 = vld [vmem:[#allocation74_spill] sm:$0xff] }
 0x5be   :  { %5126 = vmatprep.mubr.f32.mxu1 %v23733_v32  ;;  %v23796_v32 = vld [vmem:[#allocation7_spill] sm:$0xff] }
 0x5c1   :  { %5130 = vmatmul.mubr.f32.gmra.mrb[34].mxu1 %v23735_v2  ;;  %v23798_v2 = vld [vmem:[#allocation141_spill] sm:$0xff] }
 0x5c2   :  { %5137 = vmatprep.mubr.f32.mxu1 %v23737_v44  ;;  %v23800_v44 = vld [vmem:[#allocation78_spill] sm:$0xff] }
 0x5c5   :  { %5141 = vmatmul.mubr.f32.gmra.mrb[36].mxu1 %v23739_v35  ;;  %v23802_v35 = vld [vmem:[#allocation134_spill] sm:$0xff] }
 0x5c6   :  { %5148 = vmatprep.mubr.f32.mxu1 %v23740_v11  ;;  %v23803_v11 = vld [vmem:[#allocation79_spill] sm:$0xff] }
 0x5c9   :  { %5152 = vmatmul.mubr.f32.gmra.mrb[38].mxu1 %v23742_v24  ;;  %v23805_v24 = vld [vmem:[#allocation140_spill] sm:$0xff] }
 0x5ca   :  { %5159 = vmatprep.mubr.f32.mxu1 %v23744_v14  ;;  %v23807_v14 = vld [vmem:[#allocation31_spill] sm:$0xff] }
 0x5cd   :  { %5163 = vmatmul.mubr.f32.gmra.mrb[40].mxu1 %v23746_v43  ;;  %v23809_v43 = vld [vmem:[#allocation83_spill] sm:$0xff] }
 0x5ce   :  { %5170 = vmatprep.mubr.f32.mxu1 %v23747_v59  ;;  %v23810_v59 = vld [vmem:[#allocation148_spill] sm:$0xff] }
 0x5d1   :  { %5174 = vmatmul.mubr.f32.gmra.mrb[42].mxu1 %v23748_v23  ;;  %v23811_v23 = vld [vmem:[#allocation146_spill] sm:$0xff] }
 0x5d2   :  { %5181 = vmatprep.mubr.f32.mxu1 %v23749_v21  ;;  %v23812_v21 = vld [vmem:[#allocation86_spill] sm:$0xff] }
 0x5d5   :  { %5185 = vmatmul.mubr.f32.gmra.mrb[44].mxu1 %v23751_v53  ;;  %v23814_v53 = vld [vmem:[#allocation150_spill] sm:$0xff] }
 0x5d6   :  { %5192 = vmatprep.mubr.f32.mxu1 %v23752_v56  ;;  %v23815_v56 = vld [vmem:[#allocation90_spill] sm:$0xff] }
 0x5d9   :  { %5196 = vmatmul.mubr.f32.gmra.mrb[46].mxu1 %v23753_v57  ;;  %v23816_v57 = vld [vmem:[#allocation22_spill] sm:$0xff] }
 0x5da   :  { %5203 = vmatprep.mubr.f32.mxu1 %v23754_v9  ;;  %v23817_v9 = vld [vmem:[#allocation151_spill] sm:$0xff] }
 0x5dd   :  { %5207 = vmatmul.mubr.f32.gmra.mrb[48].mxu1 %v23755_v37  ;;  %v23818_v37 = vld [vmem:[#allocation161_spill] sm:$0xff] }
 0x5de   :  { %5214 = vmatprep.mubr.f32.mxu1 %v23756_v28  ;;  %v23819_v28 = vld [vmem:[#allocation37_spill] sm:$0xff] }
 0x5e1   :  { %5218 = vmatmul.mubr.f32.gmra.mrb[50].mxu1 %v23757_v60  ;;  %v23820_v60 = vld [vmem:[#allocation30_spill] sm:$0xff] }
 0x5e2   :  { %5225 = vmatprep.mubr.f32.mxu1 %v23758_v17  ;;  %v23821_v17 = vld [vmem:[#allocation158_spill] sm:$0xff] }
 0x5e5   :  { %5229 = vmatmul.mubr.f32.gmra.mrb[52].mxu1 %v23759_v15  ;;  %v23822_v15 = vld [vmem:[#allocation163_spill] sm:$0xff] }
 0x5e6   :  { %5236 = vmatprep.mubr.f32.mxu1 %v23761_v30  ;;  %v23824_v30 = vld [vmem:[#allocation167_spill] sm:$0xff] }
 0x5e9   :  { %5240 = vmatmul.mubr.f32.gmra.mrb[54].mxu1 %v23763_v8  ;;  %v23826_v8 = vld [vmem:[#allocation173_spill] sm:$0xff] }
 0x5ea   :  { %5247 = vmatprep.mubr.f32.mxu1 %v23765_v33  ;;  %v23828_v33 = vld [vmem:[#allocation39_spill] sm:$0xff] }
 0x5ed   :  { %5251 = vmatmul.mubr.f32.gmra.mrb[56].mxu1 %v23767_v12  ;;  %v23830_v12 = vld [vmem:[#allocation43_spill] sm:$0xff] }
 0x5ee   :  { %5258 = vmatprep.mubr.f32.mxu1 %v23769_v51  ;;  %v23832_v51 = vld [vmem:[#allocation183_spill] sm:$0xff] }
 0x5f1   :  { %5262 = vmatmul.mubr.f32.gmra.mrb[58].mxu1 %v23771_v27  ;;  %v23834_v27 = vld [vmem:[#allocation189_spill] sm:$0xff] }
 0x5f2   :  { %5269 = vmatprep.mubr.f32.mxu1 %v23772_v29  ;;  %v23835_v29 = vld [vmem:[#allocation188_spill] sm:$0xff] }
 0x5f5   :  { %5273 = vmatmul.mubr.f32.gmra.mrb[60].mxu1 %v23774_v5  ;;  %v23837_v5 = vld [vmem:[#allocation192_spill] sm:$0xff] }
 0x5f6   :  { %5280 = vmatprep.mubr.f32.mxu1 %v23776_v25  ;;  %v23839_v25 = vld [vmem:[#allocation194_spill] sm:$0xff] }
 0x5f9   :  { %5284 = vmatmul.mubr.f32.gmra.mrb[62].mxu1 %v23778_v13  ;;  %v23841_v13 = vld [vmem:[#allocation195_spill] sm:$0xff] }
 0x5fa   :  { %5426 = vmatprep.mubr.f32.mxu1 %v23779_v39 }
 0x5fd   :  { %5428 = vmatmul.mubr.f32.vlgmr.msra.gmra.mrb[0].mxu1 %v23780_v10 }
 0x5fe   :  { %5433 = vmatprep.mubr.f32.mxu1 %v23781_v36  ;;  %14727 = vmatpush1.bf16.msra.mxu1 %v23782_v49  ;;  %v23842_v49 = vld [vmem:[#allocation201_spill] sm:$0xff] }
 0x5ff   :  { %14728 = vmatprep.subr.bf16.mxu1 %v23070_v46 }
 0x601   :  { %5435 = vmatmul.mubr.f32.gmra.mrb[2].mxu1 %v23783_v41 }
 0x602   :  { %5440 = vmatprep.mubr.f32.mxu1 %v23784_v31  ;;  %14730 = vmatpush1.bf16.msra.mxu1 %v23785_v22  ;;  %v23843_v22 = vld [vmem:[#allocation52_spill] sm:$0xff] }
 0x603   :  { %14731 = vmatprep.subr.bf16.mxu1 %v23070_v46 }
 0x605   :  { %5442 = vmatmul.mubr.f32.gmra.mrb[4].mxu1 %v23786_v45 }
 0x606   :  { %5447 = vmatprep.mubr.f32.mxu1 %v23787_v40  ;;  %14733 = vmatpush1.bf16.msra.mxu1 %v23788_v38  ;;  %v23844_v38 = vld [vmem:[#allocation55_spill] sm:$0xff] }
 0x607   :  { %14734 = vmatprep.subr.bf16.mxu1 %v23070_v46 }
 0x609   :  { %5449 = vmatmul.mubr.f32.gmra.mrb[6].mxu1 %v23789_v1 }
 0x60a   :  { %5454 = vmatprep.mubr.f32.mxu1 %v23790_v16  ;;  %14736 = vmatpush1.bf16.msra.mxu1 %v23791_v7  ;;  %v23845_v7 = vld [vmem:[#allocation205_spill] sm:$0xff] }
 0x60b   :  { %14737 = vmatprep.subr.bf16.mxu1 %v23070_v46 }
 0x60d   :  { %5456 = vmatmul.mubr.f32.gmra.mrb[8].mxu1 %v23792_v20 }
 0x60e   :  { %5461 = vmatprep.mubr.f32.mxu1 %v23793_v3  ;;  %14739 = vmatpush1.bf16.msra.mxu1 %v23794_v62  ;;  %v23846_v62 = vld [vmem:[#allocation54_spill] sm:$0xff] }
 0x60f   :  { %14740 = vmatprep.subr.bf16.mxu1 %v23070_v46 }
 0x611   :  { %5463 = vmatmul.mubr.f32.gmra.mrb[10].mxu1 %v23795_v18 }
 0x612   :  { %5468 = vmatprep.mubr.f32.mxu1 %v23796_v32  ;;  %14742 = vmatpush1.bf16.msra.mxu1 %v23797_v54  ;;  %v23847_v54 = vld [vmem:[#allocation206_spill] sm:$0xff] }
 0x613   :  { %14743 = vmatprep.subr.bf16.mxu1 %v23070_v46 }
 0x615   :  { %5470 = vmatmul.mubr.f32.gmra.mrb[12].mxu1 %v23798_v2 }
 0x616   :  { %5475 = vmatprep.mubr.f32.mxu1 %v23799_v63  ;;  %14745 = vmatpush1.bf16.msra.mxu1 %v23800_v44  ;;  %v23848_v44 = vld [vmem:[#allocation8_spill] sm:$0xff] }
 0x617   :  { %14746 = vmatprep.subr.bf16.mxu1 %v23070_v46 }
 0x619   :  { %5477 = vmatmul.mubr.f32.gmra.mrb[14].mxu1 %v23801_v47 }
 0x61a   :  { %5482 = vmatprep.mubr.f32.mxu1 %v23802_v35  ;;  %14748 = vmatpush1.bf16.msra.mxu1 %v23803_v11  ;;  %v23849_v11 = vld [vmem:[#allocation209_spill] sm:$0xff] }
 0x61b   :  { %14749 = vmatprep.subr.bf16.mxu1 %v23070_v46 }
 0x61d   :  { %5484 = vmatmul.mubr.f32.gmra.mrb[16].mxu1 %v23804_v4 }
 0x61e   :  { %5489 = vmatprep.mubr.f32.mxu1 %v23805_v24  ;;  %14751 = vmatpush1.bf16.msra.mxu1 %v23806_v52  ;;  %v23850_v52 = vld [vmem:[#allocation211_spill] sm:$0xff] }
 0x61f   :  { %14752 = vmatprep.subr.bf16.mxu1 %v23070_v46 }
 0x621   :  { %5491 = vmatmul.mubr.f32.gmra.mrb[18].mxu1 %v23807_v14 }
 0x622   :  { %5496 = vmatprep.mubr.f32.mxu1 %v23808_v6  ;;  %14754 = vmatpush1.bf16.msra.mxu1 %v23809_v43  ;;  %v23851_v43 = vld [vmem:[#allocation213_spill] sm:$0xff] }
 0x623   :  { %14755 = vmatprep.subr.bf16.mxu1 %v23070_v46 }
 0x625   :  { %5498 = vmatmul.mubr.f32.gmra.mrb[20].mxu1 %v23810_v59 }
 0x626   :  { %5503 = vmatprep.mubr.f32.mxu1 %v23811_v23  ;;  %14757 = vmatpush1.bf16.msra.mxu1 %v23812_v21  ;;  %v23852_v21 = vld [vmem:[#allocation221_spill] sm:$0xff] }
 0x627   :  { %14758 = vmatprep.subr.bf16.mxu1 %v23070_v46 }
 0x629   :  { %5505 = vmatmul.mubr.f32.gmra.mrb[22].mxu1 %v23813_v55 }
 0x62a   :  { %5510 = vmatprep.mubr.f32.mxu1 %v23814_v53  ;;  %14760 = vmatpush1.bf16.msra.mxu1 %v23815_v56  ;;  %v23853_v56 = vld [vmem:[#allocation216_spill] sm:$0xff] }
 0x62b   :  { %15157 = vmatprep.subr.bf16.mxu1 %v23070_v46  ;;  %v23854_v46 = vld [vmem:[#allocation217_spill] sm:$0xff] }
 0x62d   :  { %5512 = vmatmul.mubr.f32.gmra.mrb[24].mxu1 %v23816_v57 }
 0x62e   :  { %5517 = vmatprep.mubr.f32.mxu1 %v23817_v9 }
 0x631   :  { %5519 = vmatmul.mubr.f32.gmra.mrb[26].mxu1 %v23818_v37 }
 0x632   :  { %5524 = vmatprep.mubr.f32.mxu1 %v23819_v28 }
 0x635   :  { %5526 = vmatmul.mubr.f32.gmra.mrb[28].mxu1 %v23820_v60 }
 0x636   :  { %5531 = vmatprep.mubr.f32.mxu1 %v23821_v17 }
 0x639   :  { %5533 = vmatmul.mubr.f32.gmra.mrb[30].mxu1 %v23822_v15 }
 0x63a   :  { %5538 = vmatprep.mubr.f32.mxu1 %v23823_v42 }
 0x63d   :  { %5540 = vmatmul.mubr.f32.gmra.mrb[32].mxu1 %v23824_v30 }
 0x63e   :  { %5545 = vmatprep.mubr.f32.mxu1 %v23825_v48 }
 0x641   :  { %5547 = vmatmul.mubr.f32.gmra.mrb[34].mxu1 %v23826_v8 }
 0x642   :  { %5552 = vmatprep.mubr.f32.mxu1 %v23827_v58 }
 0x645   :  { %5554 = vmatmul.mubr.f32.gmra.mrb[36].mxu1 %v23828_v33 }
 0x646   :  { %5559 = vmatprep.mubr.f32.mxu1 %v23829_v19 }
 0x649   :  { %5561 = vmatmul.mubr.f32.gmra.mrb[38].mxu1 %v23830_v12 }
 0x64a   :  { %5566 = vmatprep.mubr.f32.mxu1 %v23831_v50 }
 0x64d   :  { %5568 = vmatmul.mubr.f32.gmra.mrb[40].mxu1 %v23832_v51 }
 0x64e   :  { %5573 = vmatprep.mubr.f32.mxu1 %v23833_v34 }
 0x651   :  { %5575 = vmatmul.mubr.f32.gmra.mrb[42].mxu1 %v23834_v27 }
 0x652   :  { %5580 = vmatprep.mubr.f32.mxu1 %v23835_v29 }
 0x655   :  { %5582 = vmatmul.mubr.f32.gmra.mrb[44].mxu1 %v23836_v26 }
 0x656   :  { %5587 = vmatprep.mubr.f32.mxu1 %v23837_v5 }
 0x659   :  { %5589 = vmatmul.mubr.f32.gmra.mrb[46].mxu1 %v23838_v61 }
 0x65a   :  { %5594 = vmatprep.mubr.f32.mxu1 %v23839_v25 }
 0x65d   :  { %5596 = vmatmul.mubr.f32.gmra.mrb[48].mxu1 %v23840_v0 }
 0x65e   :  { %5601 = vmatprep.mubr.f32.mxu1 %v23841_v13 }
 0x661   :  { %5603 = vmatmul.mubr.f32.gmra.mrb[50].mxu1 %v23842_v49 }
 0x662   :  { %5608 = vmatprep.mubr.f32.mxu1 %v23843_v22 }
 0x665   :  { %5610 = vmatmul.mubr.f32.gmra.mrb[52].mxu1 %v23844_v38 }
 0x666   :  { %5615 = vmatprep.mubr.f32.mxu1 %v23845_v7 }
 0x669   :  { %5617 = vmatmul.mubr.f32.gmra.mrb[54].mxu1 %v23846_v62 }
 0x66a   :  { %5622 = vmatprep.mubr.f32.mxu1 %v23847_v54 }
 0x66d   :  { %5624 = vmatmul.mubr.f32.gmra.mrb[56].mxu1 %v23848_v44 }
 0x66e   :  { %5629 = vmatprep.mubr.f32.mxu1 %v23849_v11 }
 0x671   :  { %5631 = vmatmul.mubr.f32.gmra.mrb[58].mxu1 %v23850_v52 }
 0x672   :  { %5636 = vmatprep.mubr.f32.mxu1 %v23851_v43 }
 0x675   :  { %5638 = vmatmul.mubr.f32.gmra.mrb[60].mxu1 %v23852_v21 }
 0x676   :  { %5643 = vmatprep.mubr.f32.mxu1 %v23853_v56 }
 0x679   :  { %5645 = vmatmul.mubr.f32.gmra.mrb[62].mxu1 %v23854_v46 }
 0x67a   :  { %5739 = vmatprep.mubr.f32.mxu1 %v23779_v39  ;;  %v19737_v39 = vld [vmem:[%s12903_s16] ss:$0 sm:$0xff]  ;;  %s12920_s16 = sld [smem:[%s22276_s0 + %s16228_s13]]  }
 0x67d   :  { %5741 = vmatmul.mubr.f32.vlgmr.msra.gmra.mrb[0].mxu1 %v23780_v10 }
 0x67e   :  { %5746 = vmatprep.mubr.f32.mxu1 %v23781_v36 }
 0x681   :  { %5748 = vmatmul.mubr.f32.gmra.mrb[2].mxu1 %v23783_v41 }
 0x682   :  { %5753 = vmatprep.mubr.f32.mxu1 %v23784_v31 }
 0x685   :  { %5755 = vmatmul.mubr.f32.gmra.mrb[4].mxu1 %v23786_v45 }
 0x686   :  { %5760 = vmatprep.mubr.f32.mxu1 %v23787_v40 }
 0x689   :  { %5762 = vmatmul.mubr.f32.gmra.mrb[6].mxu1 %v23789_v1 }
 0x68a   :  { %5767 = vmatprep.mubr.f32.mxu1 %v23790_v16 }
 0x68d   :  { %5769 = vmatmul.mubr.f32.gmra.mrb[8].mxu1 %v23792_v20 }
 0x68e   :  { %5774 = vmatprep.mubr.f32.mxu1 %v23793_v3 }
 0x691   :  { %5776 = vmatmul.mubr.f32.gmra.mrb[10].mxu1 %v23795_v18 }
 0x692   :  { %5781 = vmatprep.mubr.f32.mxu1 %v23796_v32 }
 0x695   :  { %5783 = vmatmul.mubr.f32.gmra.mrb[12].mxu1 %v23798_v2 }
 0x696   :  { %5788 = vmatprep.mubr.f32.mxu1 %v23799_v63 }
 0x699   :  { %5790 = vmatmul.mubr.f32.gmra.mrb[14].mxu1 %v23801_v47 }
 0x69a   :  { %5795 = vmatprep.mubr.f32.mxu1 %v23802_v35 }
 0x69d   :  { %5797 = vmatmul.mubr.f32.gmra.mrb[16].mxu1 %v23804_v4 }
 0x69e   :  { %5802 = vmatprep.mubr.f32.mxu1 %v23805_v24 }
 0x6a1   :  { %5804 = vmatmul.mubr.f32.gmra.mrb[18].mxu1 %v23807_v14 }
 0x6a2   :  { %5809 = vmatprep.mubr.f32.mxu1 %v23808_v6 }
 0x6a5   :  { %5811 = vmatmul.mubr.f32.gmra.mrb[20].mxu1 %v23810_v59 }
 0x6a6   :  { %5816 = vmatprep.mubr.f32.mxu1 %v23811_v23 }
 0x6a9   :  { %5818 = vmatmul.mubr.f32.gmra.mrb[22].mxu1 %v23813_v55 }
 0x6aa   :  { %5823 = vmatprep.mubr.f32.mxu1 %v23814_v53 }
 0x6ad   :  { %5825 = vmatmul.mubr.f32.gmra.mrb[24].mxu1 %v23816_v57 }
 0x6ae   :  { %5830 = vmatprep.mubr.f32.mxu1 %v23817_v9 }
 0x6b1   :  { %5832 = vmatmul.mubr.f32.gmra.mrb[26].mxu1 %v23818_v37 }
 0x6b2   :  { %5837 = vmatprep.mubr.f32.mxu1 %v23819_v28 }
 0x6b5   :  { %5839 = vmatmul.mubr.f32.gmra.mrb[28].mxu1 %v23820_v60 }
 0x6b6   :  { %5844 = vmatprep.mubr.f32.mxu1 %v23821_v17 }
 0x6b9   :  { %5846 = vmatmul.mubr.f32.gmra.mrb[30].mxu1 %v23822_v15 }
 0x6ba   :  { %5851 = vmatprep.mubr.f32.mxu1 %v23823_v42 }
 0x6bd   :  { %5853 = vmatmul.mubr.f32.gmra.mrb[32].mxu1 %v23824_v30 }
 0x6be   :  { %5858 = vmatprep.mubr.f32.mxu1 %v23825_v48 }
 0x6c1   :  { %5860 = vmatmul.mubr.f32.gmra.mrb[34].mxu1 %v23826_v8 }
 0x6c2   :  { %5865 = vmatprep.mubr.f32.mxu1 %v23827_v58 }
 0x6c5   :  { %5867 = vmatmul.mubr.f32.gmra.mrb[36].mxu1 %v23828_v33 }
 0x6c6   :  { %5872 = vmatprep.mubr.f32.mxu1 %v23829_v19 }
 0x6c9   :  { %5874 = vmatmul.mubr.f32.gmra.mrb[38].mxu1 %v23830_v12 }
 0x6ca   :  { %5879 = vmatprep.mubr.f32.mxu1 %v23831_v50 }
 0x6cd   :  { %5881 = vmatmul.mubr.f32.gmra.mrb[40].mxu1 %v23832_v51 }
 0x6ce   :  { %5886 = vmatprep.mubr.f32.mxu1 %v23833_v34 }
 0x6d1   :  { %5888 = vmatmul.mubr.f32.gmra.mrb[42].mxu1 %v23834_v27 }
 0x6d2   :  { %5893 = vmatprep.mubr.f32.mxu1 %v23835_v29 }
 0x6d5   :  { %5895 = vmatmul.mubr.f32.gmra.mrb[44].mxu1 %v23836_v26 }
 0x6d6   :  { %5900 = vmatprep.mubr.f32.mxu1 %v23837_v5 }
 0x6d9   :  { %5902 = vmatmul.mubr.f32.gmra.mrb[46].mxu1 %v23838_v61 }
 0x6da   :  { %5907 = vmatprep.mubr.f32.mxu1 %v23839_v25 }
 0x6dd   :  { %5909 = vmatmul.mubr.f32.gmra.mrb[48].mxu1 %v23840_v0 }
 0x6de   :  { %5914 = vmatprep.mubr.f32.mxu1 %v23841_v13 }
 0x6e1   :  { %5916 = vmatmul.mubr.f32.gmra.mrb[50].mxu1 %v23842_v49 }
 0x6e2   :  { %5921 = vmatprep.mubr.f32.mxu1 %v23843_v22 }
 0x6e5   :  { %5923 = vmatmul.mubr.f32.gmra.mrb[52].mxu1 %v23844_v38 }
 0x6e6   :  { %5928 = vmatprep.mubr.f32.mxu1 %v23845_v7 }
 0x6e9   :  { %5930 = vmatmul.mubr.f32.gmra.mrb[54].mxu1 %v23846_v62 }
 0x6ea   :  { %5935 = vmatprep.mubr.f32.mxu1 %v23847_v54 }
 0x6ed   :  { %5937 = vmatmul.mubr.f32.gmra.mrb[56].mxu1 %v23848_v44 }
 0x6ee   :  { %5942 = vmatprep.mubr.f32.mxu1 %v23849_v11 }
 0x6f1   :  { %5944 = vmatmul.mubr.f32.gmra.mrb[58].mxu1 %v23850_v52 }
 0x6f2   :  { %5949 = vmatprep.mubr.f32.mxu1 %v23851_v43 }
 0x6f5   :  { %5951 = vmatmul.mubr.f32.gmra.mrb[60].mxu1 %v23852_v21 }
 0x6f6   :  { %5956 = vmatprep.mubr.f32.mxu1 %v23853_v56 }
 0x6f9   :  { %5958 = vmatmul.mubr.f32.gmra.mrb[62].mxu1 %v23854_v46 }
 0x750   :  { %v5742_v10 = vpop.f32.mrb[0].mxu1 }
 0x751   :  { %v19740_v36 = vadd.f32 %v19737_v39, %v5742_v10  ;;  %v5744_v41 = vpop.f32.mrb[1].mxu1 }
 0x753   :  { %6491 = vrot.lane.b32.xlu1 %v19740_v36, %s16208_s4  ;;  %v5965_v31 = vsel %vm2108_vm1, %v19740_v36, 0.0 }
 0x754   :  { %v5749_v45 = vpop.f32.mrb[2].mxu1  ;;  %5966 = vadd.xlane.f32.xlu0 %v5965_v31 }
 0x755   :  { %v5751_v46 = vpop.f32.mrb[3].mxu1  ;;  %v19749_v63 = vadd.f32 %v19737_v39, %v5749_v45 }
 0x757   :  { %v5968_v55 = vsel %vm2108_vm1, %v19749_v63, 0.0 }
 0x758   :  { %v5756_v40 = vpop.f32.mrb[4].mxu1 }
 0x759   :  { %v5758_v1 = vpop.f32.mrb[5].mxu1  ;;  %v19770_v17 = vadd.f32 %v19737_v39, %v5756_v40 }
 0x75b   :  { %v5971_v48 = vsel %vm2108_vm1, %v19770_v17, 0.0 }
 0x75c   :  { %v5763_v16 = vpop.f32.mrb[6].mxu1 }
 0x75d   :  { %v5765_v20 = vpop.f32.mrb[7].mxu1  ;;  %v19791_v26 = vadd.f32 %v19737_v39, %v5763_v16 }
 0x75f   :  { %v5974_v38 = vsel %vm2108_vm1, %v19791_v26, 0.0 }
 0x760   :  { %v5770_v3 = vpop.f32.mrb[8].mxu1 }
 0x761   :  { %v5772_v18 = vpop.f32.mrb[9].mxu1  ;;  %v19812_v21 = vadd.f32 %v19737_v39, %v5770_v3 }
 0x763   :  { %v5977_v31 = vsel %vm2108_vm1, %v19812_v21, 0.0 }
 0x764   :  { %v19746_v32 = vpop.f32.mrb[10].mxu1 }
 0x765   :  { %v5779_v2 = vpop.f32.mrb[11].mxu1 }
 0x766   :  { %v19830_v2 = vadd.f32 %v19737_v39, %v19746_v32 }
 0x768   :  { %v19751_v47 = vpop.f32.mrb[12].mxu1 }
 0x769   :  { %v5786_v35 = vpop.f32.mrb[13].mxu1 }
 0x76a   :  { %6493 = vrot.lane.b32.xlu0 %v19749_v63, %s16208_s4  ;;  %v5980_v35 = vsel %vm2108_vm1, %v19830_v2, 0.0 }
 0x76c   :  { %v19755_v4 = vpop.f32.mrb[14].mxu1 }
 0x76d   :  { %v5793_v24 = vpop.f32.mrb[15].mxu1  ;;  %v19846_v32 = vadd.f32 %v19737_v39, %v19755_v4 }
 0x76e   :  { %v19838_v24 = vadd.f32 %v19737_v39, %v19751_v47 }
 0x770   :  { %v19757_v14 = vpop.f32.mrb[16].mxu1 }
 0x771   :  { %v5800_v6 = vpop.f32.mrb[17].mxu1  ;;  %v19854_v47 = vadd.f32 %v19737_v39, %v19757_v14 }
 0x772   :  { %v5983_v6 = vsel %vm2108_vm1, %v19838_v24, 0.0 }
 0x774   :  { %v19759_v59 = vpop.f32.mrb[18].mxu1 }
 0x775   :  { %v5807_v23 = vpop.f32.mrb[19].mxu1  ;;  %v19862_v4 = vadd.f32 %v19737_v39, %v19759_v59 }
 0x776   :  { %v5986_v23 = vsel %vm2108_vm1, %v19846_v32, 0.0 }
 0x777   :  { %5969 = vadd.xlane.f32.xlu1 %v5968_v55  ;;  %v5989_v55 = vsel %vm2108_vm1, %v19854_v47, 0.0 }
 0x778   :  { %v19763_v53 = vpop.f32.mrb[20].mxu1 }
 0x779   :  { %v5814_v57 = vpop.f32.mrb[21].mxu1  ;;  %v19870_v14 = vadd.f32 %v19737_v39, %v19763_v53 }
 0x77a   :  { %v5992_v57 = vsel %vm2108_vm1, %v19862_v4, 0.0 }
 0x77c   :  { %v19765_v9 = vpop.f32.mrb[22].mxu1 }
 0x77d   :  { %v5821_v37 = vpop.f32.mrb[23].mxu1  ;;  %v19878_v59 = vadd.f32 %v19737_v39, %v19765_v9 }
 0x77e   :  { %v5995_v37 = vsel %vm2108_vm1, %v19870_v14, 0.0 }
 0x780   :  { %v19767_v28 = vpop.f32.mrb[24].mxu1 }
 0x781   :  { %v5828_v60 = vpop.f32.mrb[25].mxu1  ;;  %v19886_v53 = vadd.f32 %v19737_v39, %v19767_v28 }
 0x782   :  { %v5998_v60 = vsel %vm2108_vm1, %v19878_v59, 0.0 }
 0x784   :  { %v19772_v15 = vpop.f32.mrb[26].mxu1 }
 0x785   :  { %v5835_v42 = vpop.f32.mrb[27].mxu1  ;;  %v19894_v9 = vadd.f32 %v19737_v39, %v19772_v15 }
 0x786   :  { %v6001_v42 = vsel %vm2108_vm1, %v19886_v53, 0.0 }
 0x788   :  { %v19774_v30 = vpop.f32.mrb[28].mxu1  ;;  %6495 = vrot.lane.b32.xlu1 %v19770_v17, %s16208_s4 }
 0x789   :  { %v5842_v8 = vpop.f32.mrb[29].mxu1  ;;  %5972 = vadd.xlane.f32.xlu0 %v5971_v48  ;;  %v6004_v48 = vsel %vm2108_vm1, %v19894_v9, 0.0  ;;  %v19902_v28 = vadd.f32 %v19737_v39, %v19774_v30 }
 0x78b   :  { %v6007_v8 = vsel %vm2108_vm1, %v19902_v28, 0.0 }
 0x78c   :  { %v19780_v58 = vpop.f32.mrb[30].mxu1 }
 0x78d   :  { %v5849_v33 = vpop.f32.mrb[31].mxu1  ;;  %v19910_v15 = vadd.f32 %v19737_v39, %v19780_v58 }
 0x78f   :  { %v6010_v30 = vsel %vm2108_vm1, %v19910_v15, 0.0 }
 0x790   :  { %v19782_v19 = vpop.f32.mrb[32].mxu1 }
 0x791   :  { %v5856_v12 = vpop.f32.mrb[33].mxu1 }
 0x792   :  { %v19924_v12 = vadd.f32 %v19737_v39, %v19782_v19 }
 0x794   :  { %v19784_v50 = vpop.f32.mrb[34].mxu1 }
 0x795   :  { %v5863_v51 = vpop.f32.mrb[35].mxu1  ;;  %v19916_v33 = vadd.f32 %v19737_v39, %v19784_v50 }
 0x796   :  { %v6013_v51 = vsel %vm2108_vm1, %v19924_v12, 0.0 }
 0x797   :  { %v6016_v58 = vsel %vm2108_vm1, %v19916_v33, 0.0 }
 0x798   :  { %v19786_v34 = vpop.f32.mrb[36].mxu1 }
 0x799   :  { %v5870_v27 = vpop.f32.mrb[37].mxu1  ;;  %v19940_v19 = vadd.f32 %v19737_v39, %v19786_v34 }
 0x79c   :  { %v19788_v29 = vpop.f32.mrb[38].mxu1 }
 0x79d   :  { %v5877_v5 = vpop.f32.mrb[39].mxu1  ;;  %v19932_v50 = vadd.f32 %v19737_v39, %v19788_v29 }
 0x79e   :  { %v6019_v5 = vsel %vm2108_vm1, %v19940_v19, 0.0 }
 0x79f   :  { %6497 = vrot.lane.b32.xlu0 %v19791_v26, %s16208_s4  ;;  %v6022_v27 = vsel %vm2108_vm1, %v19932_v50, 0.0 }
 0x7a0   :  { %v19795_v61 = vpop.f32.mrb[40].mxu1 }
 0x7a1   :  { %v5884_v25 = vpop.f32.mrb[41].mxu1  ;;  %v19956_v34 = vadd.f32 %v19737_v39, %v19795_v61 }
 0x7a4   :  { %v19797_v0 = vpop.f32.mrb[42].mxu1 }
 0x7a5   :  { %v5891_v13 = vpop.f32.mrb[43].mxu1  ;;  %v19948_v29 = vadd.f32 %v19737_v39, %v19797_v0 }
 0x7a6   :  { %v6025_v13 = vsel %vm2108_vm1, %v19956_v34, 0.0 }
 0x7a7   :  { %v6028_v25 = vsel %vm2108_vm1, %v19948_v29, 0.0 }
 0x7a8   :  { %v19799_v49 = vpop.f32.mrb[44].mxu1 }
 0x7a9   :  { %v5898_v22 = vpop.f32.mrb[45].mxu1  ;;  %v19972_v61 = vadd.f32 %v19737_v39, %v19799_v49 }
 0x7ac   :  { %v19803_v7 = vpop.f32.mrb[46].mxu1  ;;  %5975 = vadd.xlane.f32.xlu1 %v5974_v38 }
 0x7ad   :  { %v5905_v62 = vpop.f32.mrb[47].mxu1  ;;  %v19964_v0 = vadd.f32 %v19737_v39, %v19803_v7  ;;  %v6031_v7 = vsel %vm2108_vm1, %v19972_v61, 0.0 }
 0x7af   :  { %v6034_v22 = vsel %vm2108_vm1, %v19964_v0, 0.0 }
 0x7b0   :  { %v19805_v54 = vpop.f32.mrb[48].mxu1 }
 0x7b1   :  { %v5912_v44 = vpop.f32.mrb[49].mxu1  ;;  %v19988_v49 = vadd.f32 %v19737_v39, %v19805_v54 }
 0x7b3   :  { %v6037_v54 = vsel %vm2108_vm1, %v19988_v49, 0.0 }
 0x7b4   :  { %v19807_v11 = vpop.f32.mrb[50].mxu1 }
 0x7b5   :  { %v5919_v52 = vpop.f32.mrb[51].mxu1  ;;  %v19980_v38 = vadd.f32 %v19737_v39, %v19807_v11 }
 0x7b7   :  { %v6040_v44 = vsel %vm2108_vm1, %v19980_v38, 0.0 }
 0x7b8   :  { %v19809_v43 = vpop.f32.mrb[52].mxu1 }
 0x7b9   :  { %v5926_v56 = vpop.f32.mrb[53].mxu1  ;;  %v19994_v62 = vadd.f32 %v19737_v39, %v19809_v43 }
 0x7bb   :  { %v6043_v11 = vsel %vm2108_vm1, %v19994_v62, 0.0 }
 0x7bc   :  { %v19814_v10 = vpop.f32.mrb[54].mxu1 }
 0x7bd   :  { %v5933_v41 = vpop.f32.mrb[55].mxu1  ;;  %6499 = vrot.lane.b32.xlu1 %v19812_v21, %s16208_s4  ;;  %v20002_v52 = vadd.f32 %v19737_v39, %v19814_v10 }
 0x7be   :  { %5978 = vadd.xlane.f32.xlu0 %v5977_v31 }
 0x7bf   :  { %v6046_v41 = vsel %vm2108_vm1, %v20002_v52, 0.0 }
 0x7c0   :  { %v19820_v45 = vpop.f32.mrb[56].mxu1 }
 0x7c1   :  { %v5940_v46 = vpop.f32.mrb[57].mxu1  ;;  %v20012_v43 = vadd.f32 %v19737_v39, %v19820_v45 }
 0x7c3   :  { %v6049_v56 = vsel %vm2108_vm1, %v20012_v43, 0.0 }
 0x7c4   :  { %v19822_v40 = vpop.f32.mrb[58].mxu1 }
 0x7c5   :  { %v5947_v1 = vpop.f32.mrb[59].mxu1  ;;  %v20018_v10 = vadd.f32 %v19737_v39, %v19822_v40  ;;  %v6492_v31 = vpop.permute.xlu1 %6491 }
 0x7c6   :  { %v6587_v46 = vsel %vm2108_vm1, %v6492_v31, 0.0 }
 0x7c8   :  { %v19824_v16 = vpop.f32.mrb[60].mxu1 }
 0x7c9   :  { %v5954_v20 = vpop.f32.mrb[61].mxu1  ;;  %v20028_v45 = vadd.f32 %v19737_v39, %v19824_v16 }
 0x7cb   :  { %v6055_v40 = vsel %vm2108_vm1, %v20028_v45, 0.0 }
 0x7cc   :  { %v19826_v3 = vpop.f32.mrb[62].mxu1 }
 0x7cd   :  { %v5961_v18 = vpop.f32.mrb[63].mxu1 }
 0x7d4   :  { %6501 = vrot.lane.b32.xlu0 %v19830_v2, %s16208_s4 }
 0x7e1   :  { %5981 = vadd.xlane.f32.xlu1 %v5980_v35  ;;  %v5967_v35 = vpop.xlane.xlu0 %5966 }
 0x7f2   :  { %6503 = vrot.lane.b32.xlu1 %v19838_v24, %s16208_s4 }
 0x7f3   :  { %5984 = vadd.xlane.f32.xlu0 %v5983_v6 }
 0x804   :  { %v20033_v1 = vpop.xlane.xlu1 %5969 }
 0x808   :  { %v6496_v20 = vpop.permute.xlu1 %6495 }
 0x809   :  { %6505 = vrot.lane.b32.xlu0 %v19846_v32, %s16208_s4 }
 0x816   :  { %5987 = vadd.xlane.f32.xlu1 %v5986_v23  ;;  %v6494_v23 = vpop.permute.xlu0 %6493 }
 0x827   :  { %6507 = vrot.lane.b32.xlu1 %v19854_v47, %s16208_s4 }
 0x828   :  { %5990 = vadd.xlane.f32.xlu0 %v5989_v55  ;;  %v20039_v55 = vadd.f32 %v19737_v39, %v19826_v3 }
 0x839   :  { %v20035_v18 = vpop.xlane.xlu1 %5975 }
 0x83d   :  { %v6500_v6 = vpop.permute.xlu1 %6499 }
 0x83e   :  { %6509 = vrot.lane.b32.xlu0 %v19862_v4, %s16208_s4 }
 0x84b   :  { %5993 = vadd.xlane.f32.xlu1 %v5992_v57  ;;  %v5973_v57 = vpop.xlane.xlu0 %5972 }
 0x85c   :  { %6511 = vrot.lane.b32.xlu1 %v19870_v14, %s16208_s4 }
 0x85d   :  { %5996 = vadd.xlane.f32.xlu0 %v5995_v37  ;;  %v6052_v37 = vsel %vm2108_vm1, %v20018_v10, 0.0 }
 0x86e   :  { %v20041_v16 = vpop.xlane.xlu1 %5981 }
 0x873   :  { %6513 = vrot.lane.b32.xlu0 %v19878_v59, %s16208_s4 }
 0x880   :  { %5999 = vadd.xlane.f32.xlu1 %v5998_v60  ;;  %v6504_v60 = vpop.permute.xlu1 %6503 }
 0x891   :  { %6515 = vrot.lane.b32.xlu1 %v19886_v53, %s16208_s4 }
 0x892   :  { %6002 = vadd.xlane.f32.xlu0 %v6001_v42  ;;  %v6498_v42 = vpop.permute.xlu0 %6497 }
 0x8a8   :  { %6517 = vrot.lane.b32.xlu0 %v19894_v9, %s16208_s4 }
 0x8b5   :  { %6005 = vadd.xlane.f32.xlu1 %v6004_v48  ;;  %v20047_v48 = vpop.xlane.xlu1 %5987 }
 0x8c6   :  { %6519 = vrot.lane.b32.xlu1 %v19902_v28, %s16208_s4 }
 0x8c7   :  { %6008 = vadd.xlane.f32.xlu0 %v6007_v8  ;;  %v5979_v8 = vpop.xlane.xlu0 %5978 }
 0x8dd   :  { %6521 = vrot.lane.b32.xlu0 %v19910_v15, %s16208_s4 }
 0x8e1   :  { %6525 = vrot.lane.b32.xlu0 %v19916_v33, %s16208_s4 }
 0x8ea   :  { %6011 = vadd.xlane.f32.xlu1 %v6010_v30  ;;  %v6508_v30 = vpop.permute.xlu1 %6507 }
 0x8ee   :  { %v20051_v39 = vpop.xlane.xlu1 %5993 }
 0x8fb   :  { %6523 = vrot.lane.b32.xlu1 %v19924_v12, %s16208_s4 }
 0x900   :  { %6017 = vadd.xlane.f32.xlu0 %v6016_v58  ;;  %v6502_v58 = vpop.permute.xlu0 %6501 }
 0x904   :  { %v5985_v3 = vpop.xlane.xlu0 %5984 }
 0x916   :  { %6529 = vrot.lane.b32.xlu0 %v19932_v50, %s16208_s4 }
 0x91f   :  { %6014 = vadd.xlane.f32.xlu1 %v6013_v51  ;;  %v6512_v51 = vpop.permute.xlu1 %6511 }
 0x930   :  { %6527 = vrot.lane.b32.xlu1 %v19940_v19, %s16208_s4 }
 0x935   :  { %6023 = vadd.xlane.f32.xlu0 %v6022_v27  ;;  %v6506_v27 = vpop.permute.xlu0 %6505 }
 0x94b   :  { %6533 = vrot.lane.b32.xlu0 %v19948_v29, %s16208_s4 }
 0x954   :  { %6020 = vadd.xlane.f32.xlu1 %v6019_v5  ;;  %v20053_v5 = vpop.xlane.xlu1 %5999 }
 0x965   :  { %6531 = vrot.lane.b32.xlu1 %v19956_v34, %s16208_s4 }
 0x96a   :  { %6029 = vadd.xlane.f32.xlu0 %v6028_v25  ;;  %v5991_v25 = vpop.xlane.xlu0 %5990 }
 0x980   :  { %6537 = vrot.lane.b32.xlu0 %v19964_v0, %s16208_s4 }
 0x989   :  { %6026 = vadd.xlane.f32.xlu1 %v6025_v13  ;;  %v6593_v13 = vsel %vm2108_vm1, %v6496_v20, 0.0 }
 0x99a   :  { %6535 = vrot.lane.b32.xlu1 %v19972_v61, %s16208_s4 }
 0x99f   :  { %6035 = vadd.xlane.f32.xlu0 %v6034_v22  ;;  %v6061_v22 = vmul.f32 0.015625, %v5967_v35 }
 0x9b5   :  { %6541 = vrot.lane.b32.xlu0 %v19980_v38, %s16208_s4 }
 0x9be   :  { %6032 = vadd.xlane.f32.xlu1 %v6031_v7  ;;  %v6599_v7 = vsel %vm2108_vm1, %v6500_v6, 0.0 }
 0x9cf   :  { %6539 = vrot.lane.b32.xlu1 %v19988_v49, %s16208_s4 }
 0x9d4   :  { %6041 = vadd.xlane.f32.xlu0 %v6040_v44  ;;  %v6516_v44 = vpop.permute.xlu1 %6515 }
 0x9d8   :  { %6044 = vadd.xlane.f32.xlu0 %v6043_v11  ;;  %v6510_v11 = vpop.permute.xlu0 %6509 }
 0x9dc   :  { %v5997_v31 = vpop.xlane.xlu0 %5996 }
 0x9ee   :  { %6545 = vrot.lane.b32.xlu0 %v20002_v52, %s16208_s4 }
 0x9f3   :  { %6038 = vadd.xlane.f32.xlu1 %v6037_v54  ;;  %v20058_v54 = vsub.f32 %v19740_v36, %v6061_v22  ;;  %v6065_v22 = vmul.f32 0.015625, %v5979_v8  ;;  %v6058_v8 = vsel %vm2108_vm1, %v20039_v55, 0.0 }
 0x9f5   :  { %23855 = vst [vmem:[#allocation57_spill] sm:$0xff] %v20058_v54  ;;  %v6125_v20 = vmul.f32 %v20058_v54, %v20058_v54 }
 0xa04   :  { %6543 = vrot.lane.b32.xlu1 %v19994_v62, %s16208_s4 }
 0xa0d   :  { %6050 = vadd.xlane.f32.xlu0 %v6049_v56  ;;  %v6605_v56 = vsel %vm2108_vm1, %v6504_v60, 0.0 }
 0xa23   :  { %6549 = vrot.lane.b32.xlu0 %v20018_v10, %s16208_s4 }
 0xa28   :  { %6047 = vadd.xlane.f32.xlu1 %v6046_v41  ;;  %v20061_v41 = vpop.xlane.xlu1 %6005 }
 0xa2c   :  { %v6520_v35 = vpop.permute.xlu1 %6519 }
 0xa30   :  { %v20072_v60 = vpop.xlane.xlu1 %6011 }
 0xa39   :  { %6547 = vrot.lane.b32.xlu1 %v20012_v43, %s16208_s4 }
 0xa42   :  { %6588 = vadd.xlane.f32.xlu0 %v6587_v46  ;;  %v6063_v46 = vmul.f32 0.015625, %v5973_v57  ;;  %v6617_v57 = vsel %vm2108_vm1, %v6512_v51, 0.0  ;;  %v6067_v51 = vmul.f32 0.015625, %v5985_v3 }
 0xa44   :  { %v20067_v6 = vsub.f32 %v19770_v17, %v6063_v46  ;;  %v20079_v46 = vsub.f32 %v19812_v21, %v6065_v22 }
 0xa46   :  { %6056 = vadd.xlane.f32.xlu0 %v6055_v40  ;;  %v6611_v40 = vsel %vm2108_vm1, %v6508_v30, 0.0  ;;  %23856 = vst [vmem:[#allocation58_spill] sm:$0xff] %v20067_v6  ;;  %v6127_v30 = vmul.f32 %v20067_v6, %v20067_v6  ;;  %23857 = vst [vmem:[#allocation60_spill] sm:$0xff] %v20079_v46  ;;  %v6069_v6 = vmul.f32 0.015625, %v5991_v25 }
 0xa48   :  { %v20103_v54 = vsub.f32 %v19854_v47, %v6069_v6 }
 0xa4a   :  { %23858 = vst [vmem:[#allocation61_spill] sm:$0xff] %v20103_v54  ;;  %v6133_v6 = vmul.f32 %v20103_v54, %v20103_v54 }
 0xa5c   :  { %6553 = vrot.lane.b32.xlu0 %v20039_v55, %s16208_s4 }
 0xa5d   :  { %6053 = vadd.xlane.f32.xlu1 %v6052_v37  ;;  %v20069_v37 = vpop.permute.xlu0 %6513 }
 0xa6e   :  { %6551 = vrot.lane.b32.xlu1 %v20028_v45, %s16208_s4 }
 0xa7b   :  { %6594 = vadd.xlane.f32.xlu0 %v6593_v13  ;;  %v6157_v13 = vsel %vm2108_vm1, %v6125_v20, 0.0  ;;  %v20082_v20 = vpop.permute.xlu1 %6523 }
 0xa7f   :  { %6600 = vadd.xlane.f32.xlu0 %v6599_v7  ;;  %v6003_v7 = vpop.xlane.xlu0 %6002  ;;  %v20091_v22 = vpop.xlane.xlu1 %6014 }
 0xa83   :  { %6606 = vadd.xlane.f32.xlu0 %v6605_v56  ;;  %v6590_v56 = vsel %vm2108_vm1, %v6494_v23, 0.0  ;;  %v6129_v23 = vmul.f32 %v20079_v46, %v20079_v46  ;;  %v6602_v46 = vsel %vm2108_vm1, %v6502_v58, 0.0 }
 0xa85   :  { %v6169_v3 = vsel %vm2108_vm1, %v6129_v23, 0.0 }
 0xa87   :  { %6612 = vadd.xlane.f32.xlu0 %v6611_v40  ;;  %v6163_v40 = vsel %vm2108_vm1, %v6127_v30, 0.0  ;;  %v6596_v30 = vsel %vm2108_vm1, %v6498_v42, 0.0  ;;  %v6629_v42 = vsel %vm2108_vm1, %v6520_v35, 0.0  ;;  %v6064_v35 = vmul.f32 0.015625, %v20035_v18 }
 0xa8b   :  { %6158 = vadd.xlane.f32.xlu0 %v6157_v13  ;;  %v20084_v13 = vpop.permute.xlu0 %6517 }
 0xa8f   :  { %6618 = vadd.xlane.f32.xlu0 %v6617_v57  ;;  %v6623_v57 = vsel %vm2108_vm1, %v6516_v44, 0.0  ;;  %v6062_v44 = vmul.f32 0.015625, %v20033_v1  ;;  %v6608_v1 = vsel %vm2108_vm1, %v6506_v27, 0.0 }
 0xa92   :  { %6591 = vadd.xlane.f32.xlu1 %v6590_v56  ;;  %v20093_v56 = vpop.xlane.xlu0 %6008 }
 0xa93   :  { %6164 = vadd.xlane.f32.xlu0 %v6163_v40  ;;  %v20097_v40 = vsub.f32 %v19838_v24, %v6067_v51  ;;  %v20111_v51 = vsub.f32 %v19749_v63, %v6062_v44  ;;  %v6071_v44 = vmul.f32 0.015625, %v5997_v31  ;;  %v6066_v31 = vmul.f32 0.015625, %v20041_v16 }
 0xa95   :  { %v6131_v25 = vmul.f32 %v20097_v40, %v20097_v40  ;;  %v20129_v54 = vsub.f32 %v19870_v14, %v6071_v44  ;;  %v20145_v44 = vsub.f32 %v19830_v2, %v6066_v31  ;;  %v6626_v31 = vsel %vm2108_vm1, %v20084_v13, 0.0 }
 0xa96   :  { %6059 = vadd.xlane.f32.xlu1 %v6058_v8  ;;  %v6528_v8 = vpop.permute.xlu1 %6527 }
 0xa97   :  { %6624 = vadd.xlane.f32.xlu0 %v6623_v57  ;;  %v20105_v57 = vpop.permute.xlu0 %6521  ;;  %v6175_v58 = vsel %vm2108_vm1, %v6131_v25, 0.0  ;;  %v20125_v25 = vsub.f32 %v19791_v26, %v6064_v35  ;;  %23860 = vst [vmem:[#allocation65_spill] sm:$0xff] %v20129_v54  ;;  %23861 = vst [vmem:[#allocation70_spill] sm:$0xff] %v20145_v44 }
 0xa99   :  { %23859 = vst [vmem:[#allocation64_spill] sm:$0xff] %v20125_v25  ;;  %v6128_v35 = vmul.f32 %v20125_v25, %v20125_v25 }
 0xa9a   :  { %6597 = vadd.xlane.f32.xlu1 %v6596_v30  ;;  %v20113_v23 = vpop.xlane.xlu1 %6020  ;;  %v6614_v30 = vsel %vm2108_vm1, %v6510_v11, 0.0 }
 0xa9b   :  { %6170 = vadd.xlane.f32.xlu0 %v6169_v3  ;;  %v6126_v3 = vmul.f32 %v20111_v51, %v20111_v51 }
 0xa9e   :  { %6603 = vadd.xlane.f32.xlu1 %v6602_v46  ;;  %v6526_v46 = vpop.permute.xlu0 %6525  ;;  %v6532_v27 = vpop.permute.xlu1 %6531 }
 0xa9f   :  { %6630 = vadd.xlane.f32.xlu0 %v6629_v42  ;;  %v6181_v42 = vsel %vm2108_vm1, %v6133_v6, 0.0  ;;  %v6638_v18 = vsel %vm2108_vm1, %v6526_v46, 0.0  ;;  %v6620_v6 = vsel %vm2108_vm1, %v20069_v37, 0.0  ;;  %v6135_v46 = vmul.f32 %v20129_v54, %v20129_v54 }
 0xaa2   :  { %6609 = vadd.xlane.f32.xlu1 %v6608_v1  ;;  %v6018_v1 = vpop.xlane.xlu0 %6017  ;;  %v20132_v11 = vpop.xlane.xlu1 %6026 }
 0xaa3   :  { %6176 = vadd.xlane.f32.xlu0 %v6175_v58  ;;  %v6160_v58 = vsel %vm2108_vm1, %v6126_v3, 0.0  ;;  %v6641_v3 = vsel %vm2108_vm1, %v6528_v8, 0.0  ;;  %v6068_v8 = vmul.f32 0.015625, %v20047_v48 }
 0xaa6   :  { %6615 = vadd.xlane.f32.xlu1 %v6614_v30  ;;  %v6073_v30 = vmul.f32 0.015625, %v6003_v7  ;;  %v6536_v16 = vpop.permute.xlu1 %6535  ;;  %v6187_v7 = vsel %vm2108_vm1, %v6135_v46, 0.0  ;;  %v20165_v46 = vsub.f32 %v19846_v32, %v6068_v8 }
 0xaa7   :  { %6182 = vadd.xlane.f32.xlu0 %v6181_v42  ;;  %v20139_v42 = vpop.permute.xlu0 %6529 }
 0xaa8   :  { %v20149_v37 = vsub.f32 %v19886_v53, %v6073_v30  ;;  %23863 = vst [vmem:[#allocation75_spill] sm:$0xff] %v20165_v46 }
 0xaaa   :  { %6161 = vadd.xlane.f32.xlu1 %v6160_v58  ;;  %v6166_v58 = vsel %vm2108_vm1, %v6128_v35, 0.0  ;;  %23862 = vst [vmem:[#allocation71_spill] sm:$0xff] %v20149_v37  ;;  %v6647_v35 = vsel %vm2108_vm1, %v6532_v27, 0.0  ;;  %v6137_v30 = vmul.f32 %v20149_v37, %v20149_v37  ;;  %v6070_v27 = vmul.f32 0.015625, %v20051_v39 }
 0xaab   :  { %6639 = vadd.xlane.f32.xlu0 %v6638_v18  ;;  %v20151_v18 = vpop.xlane.xlu0 %6023 }
 0xaac   :  { %v6193_v13 = vsel %vm2108_vm1, %v6137_v30, 0.0  ;;  %v20183_v30 = vsub.f32 %v19862_v4, %v6070_v27 }
 0xaae   :  { %6621 = vadd.xlane.f32.xlu1 %v6620_v6  ;;  %v20155_v6 = vpop.xlane.xlu1 %6032  ;;  %23865 = vst [vmem:[#allocation82_spill] sm:$0xff] %v20183_v30  ;;  %v6134_v27 = vmul.f32 %v20183_v30, %v20183_v30 }
 0xaaf   :  { %6642 = vadd.xlane.f32.xlu0 %v6641_v3  ;;  %v6130_v3 = vmul.f32 %v20145_v44, %v20145_v44 }
 0xab1   :  { %v6172_v48 = vsel %vm2108_vm1, %v6130_v3, 0.0 }
 0xab2   :  { %6167 = vadd.xlane.f32.xlu1 %v6166_v58  ;;  %v6534_v58 = vpop.permute.xlu0 %6533  ;;  %v6540_v54 = vpop.permute.xlu1 %6539 }
 0xab3   :  { %6188 = vadd.xlane.f32.xlu0 %v6187_v7  ;;  %v6078_v7 = vmul.f32 0.015625, %v6018_v1  ;;  %v6653_v1 = vsel %vm2108_vm1, %v6536_v16, 0.0  ;;  %v6072_v16 = vmul.f32 0.015625, %v20053_v5 }
 0xab5   :  { %v20177_v8 = vsub.f32 %v19916_v33, %v6078_v7 }
 0xab6   :  { %6627 = vadd.xlane.f32.xlu1 %v6626_v31  ;;  %v20169_v44 = vpop.xlane.xlu0 %6029  ;;  %v6632_v31 = vsel %vm2108_vm1, %v20105_v57, 0.0  ;;  %v20180_v3 = vpop.xlane.xlu1 %6038 }
 0xab7   :  { %6648 = vadd.xlane.f32.xlu0 %v6647_v35  ;;  %v6132_v35 = vmul.f32 %v20165_v46, %v20165_v46  ;;  %23864 = vst [vmem:[#allocation81_spill] sm:$0xff] %v20177_v8  ;;  %v6142_v7 = vmul.f32 %v20177_v8, %v20177_v8 }
 0xab9   :  { %v6178_v39 = vsel %vm2108_vm1, %v6132_v35, 0.0 }
 0xaba   :  { %6173 = vadd.xlane.f32.xlu1 %v6172_v48  ;;  %v6079_v48 = vmul.f32 0.015625, %v20113_v23  ;;  %v6538_v57 = vpop.permute.xlu0 %6537 }
 0xabb   :  { %6194 = vadd.xlane.f32.xlu0 %v6193_v13  ;;  %v6659_v13 = vsel %vm2108_vm1, %v6540_v54, 0.0  ;;  %v6208_v54 = vsel %vm2108_vm1, %v6142_v7, 0.0  ;;  %v6074_v7 = vmul.f32 0.015625, %v20061_v41 }
 0xabc   :  { %v20196_v35 = vsub.f32 %v19940_v19, %v6079_v48 }
 0xabe   :  { %6633 = vadd.xlane.f32.xlu1 %v6632_v31  ;;  %v6544_v31 = vpop.permute.xlu1 %6543  ;;  %23866 = vst [vmem:[#allocation84_spill] sm:$0xff] %v20196_v35  ;;  %v20198_v23 = vpop.xlane.xlu0 %6035  ;;  %v6143_v48 = vmul.f32 %v20196_v35, %v20196_v35 }
 0xabf   :  { %6654 = vadd.xlane.f32.xlu0 %v6653_v1  ;;  %v6635_v1 = vsel %vm2108_vm1, %v20082_v20, 0.0  ;;  %v6081_v20 = vmul.f32 0.015625, %v20132_v11  ;;  %v6665_v8 = vsel %vm2108_vm1, %v6544_v31, 0.0 }
 0xac0   :  { %v6211_v11 = vsel %vm2108_vm1, %v6143_v48, 0.0 }
 0xac2   :  { %6179 = vadd.xlane.f32.xlu1 %v6178_v39  ;;  %v20202_v39 = vsub.f32 %v19878_v59, %v6072_v16  ;;  %v20204_v5 = vpop.xlane.xlu1 %6047  ;;  %v6644_v16 = vsel %vm2108_vm1, %v20139_v42, 0.0 }
 0xac3   :  { %6660 = vadd.xlane.f32.xlu0 %v6659_v13  ;;  %v6184_v13 = vsel %vm2108_vm1, %v6134_v27, 0.0  ;;  %v20217_v27 = vsub.f32 %v19956_v34, %v6081_v20  ;;  %v6077_v20 = vmul.f32 0.015625, %v20091_v22 }
 0xac4   :  { %23867 = vst [vmem:[#allocation85_spill] sm:$0xff] %v20202_v39 }
 0xac5   :  { %23868 = vst [vmem:[#allocation97_spill] sm:$0xff] %v20217_v27 }
 0xac6   :  { %6636 = vadd.xlane.f32.xlu1 %v6635_v1  ;;  %v6542_v1 = vpop.permute.xlu0 %6541  ;;  %v6548_v31 = vpop.permute.xlu1 %6547 }
 0xac7   :  { %6209 = vadd.xlane.f32.xlu0 %v6208_v54  ;;  %v6136_v54 = vmul.f32 %v20202_v39, %v20202_v39  ;;  %v6671_v42 = vsel %vm2108_vm1, %v6548_v31, 0.0  ;;  %v6145_v39 = vmul.f32 %v20217_v27, %v20217_v27 }
 0xac9   :  { %v6190_v41 = vsel %vm2108_vm1, %v6136_v54, 0.0  ;;  %v20233_v54 = vsub.f32 %v19924_v12, %v6077_v20  ;;  %v6662_v20 = vsel %vm2108_vm1, %v6542_v1, 0.0  ;;  %v6085_v1 = vmul.f32 0.015625, %v20180_v3 }
 0xaca   :  { %6185 = vadd.xlane.f32.xlu1 %v6184_v13  ;;  %v6042_v13 = vpop.xlane.xlu0 %6041  ;;  %v6084_v3 = vmul.f32 0.015625, %v20198_v23 }
 0xacb   :  { %6666 = vadd.xlane.f32.xlu0 %v6665_v8  ;;  %v20221_v8 = vsub.f32 %v19894_v9, %v6074_v7  ;;  %v6217_v7 = vsel %vm2108_vm1, %v6145_v39, 0.0  ;;  %23870 = vst [vmem:[#allocation127_spill] sm:$0xff] %v20233_v54  ;;  %v6141_v22 = vmul.f32 %v20233_v54, %v20233_v54  ;;  %v6086_v23 = vmul.f32 0.015625, %v6042_v13 }
 0xacd   :  { %23869 = vst [vmem:[#allocation13_spill] sm:$0xff] %v20221_v8  ;;  %v6138_v48 = vmul.f32 %v20221_v8, %v20221_v8  ;;  %v6080_v8 = vmul.f32 0.015625, %v20151_v18 }
 0xace   :  { %6645 = vadd.xlane.f32.xlu1 %v6644_v16  ;;  %v6650_v16 = vsel %vm2108_vm1, %v6534_v58, 0.0 }
 0xacf   :  { %6212 = vadd.xlane.f32.xlu0 %v6211_v11  ;;  %v6045_v11 = vpop.xlane.xlu0 %6044  ;;  %v6196_v31 = vsel %vm2108_vm1, %v6138_v48, 0.0  ;;  %v20242_v39 = vsub.f32 %v19932_v50, %v6080_v8 }
 0xad1   :  { %23871 = vst [vmem:[#allocation27_spill] sm:$0xff] %v20242_v39 }
 0xad2   :  { %6191 = vadd.xlane.f32.xlu1 %v6190_v41 }
 0xad3   :  { %6672 = vadd.xlane.f32.xlu0 %v6671_v42  ;;  %v6546_v41 = vpop.permute.xlu0 %6545  ;;  %v6656_v42 = vsel %vm2108_vm1, %v6538_v57, 0.0  ;;  %v6082_v57 = vmul.f32 0.015625, %v20169_v44 }
 0xad6   :  { %6651 = vadd.xlane.f32.xlu1 %v6650_v16  ;;  %v6205_v16 = vsel %vm2108_vm1, %v6141_v22, 0.0  ;;  %v20257_v22 = vsub.f32 %v19948_v29, %v6082_v57 }
 0xad7   :  { %6218 = vadd.xlane.f32.xlu0 %v6217_v7  ;;  %v6051_v58 = vpop.xlane.xlu0 %6050  ;;  %v6083_v7 = vmul.f32 0.015625, %v20155_v6 }
 0xad8   :  { %23873 = vst [vmem:[#allocation62_spill] sm:$0xff] %v20257_v22 }
 0xad9   :  { %v20253_v8 = vsub.f32 %v19972_v61, %v6083_v7 }
 0xada   :  { %6197 = vadd.xlane.f32.xlu1 %v6196_v31  ;;  %v6668_v31 = vsel %vm2108_vm1, %v6546_v41, 0.0  ;;  %v6087_v41 = vmul.f32 0.015625, %v6045_v11 }
 0xadb   :  { %v6550_v48 = vpop.permute.xlu0 %6549  ;;  %23872 = vst [vmem:[#allocation129_spill] sm:$0xff] %v20253_v8 }
 0xadc   :  { %v6674_v57 = vsel %vm2108_vm1, %v6550_v48, 0.0  ;;  %v20273_v11 = vsub.f32 %v19994_v62, %v6087_v41 }
 0xade   :  { %6657 = vadd.xlane.f32.xlu1 %v6656_v42  ;;  %v6144_v42 = vmul.f32 %v20242_v39, %v20242_v39  ;;  %23875 = vst [vmem:[#allocation28_spill] sm:$0xff] %v20273_v11 }
 0xadf   :  { %v6589_v18 = vpop.xlane.xlu0 %6588 }
 0xae0   :  { %v6214_v6 = vsel %vm2108_vm1, %v6144_v42, 0.0  ;;  %v6146_v42 = vmul.f32 %v20257_v22, %v20257_v22 }
 0xae2   :  { %6206 = vadd.xlane.f32.xlu1 %v6205_v16  ;;  %v20261_v16 = vsub.f32 %v19988_v49, %v6085_v1  ;;  %v6089_v1 = vmul.f32 0.015625, %v6051_v58  ;;  %v6220_v48 = vsel %vm2108_vm1, %v6146_v42, 0.0  ;;  %v6151_v58 = vmul.f32 %v20273_v11, %v20273_v11 }
 0xae3   :  { %v20266_v7 = vpop.xlane.xlu0 %6056 }
 0xae4   :  { %23874 = vst [vmem:[#allocation130_spill] sm:$0xff] %v20261_v16 }
 0xae6   :  { %6663 = vadd.xlane.f32.xlu1 %v6662_v20 }
 0xaea   :  { %v20250_v54 = vpop.xlane.xlu1 %6053  ;;  %6669 = vadd.xlane.f32.xlu1 %v6668_v31  ;;  %v6147_v31 = vmul.f32 %v20253_v8, %v20253_v8  ;;  %v6554_v8 = vpop.permute.xlu0 %6553 }
 0xaeb   :  { %v6680_v13 = vsel %vm2108_vm1, %v6554_v8, 0.0  ;;  %v6090_v22 = vmul.f32 0.015625, %v20250_v54 }
 0xaed   :  { %v20354_v27 = vsub.f32 %v20018_v10, %v6090_v22 }
 0xaee   :  { %v6552_v44 = vpop.permute.xlu1 %6551  ;;  %6215 = vadd.xlane.f32.xlu1 %v6214_v6  ;;  %v6223_v6 = vsel %vm2108_vm1, %v6147_v31, 0.0  ;;  %v20289_v31 = vsub.f32 %v19980_v38, %v6086_v23 }
 0xaef   :  { %v6677_v20 = vsel %vm2108_vm1, %v6552_v44, 0.0  ;;  %v6149_v44 = vmul.f32 %v20261_v16, %v20261_v16  ;;  %23880 = vst [vmem:[#allocation4_spill] sm:$0xff] %v20354_v27  ;;  %v6154_v22 = vmul.f32 %v20354_v27, %v20354_v27 }
 0xaf0   :  { %6678 = vadd.xlane.f32.xlu0 %v6677_v20  ;;  %v20279_v20 = vsub.f32 %v19964_v0, %v6084_v3  ;;  %23878 = vst [vmem:[#allocation11_spill] sm:$0xff] %v20289_v31  ;;  %v6088_v3 = vmul.f32 0.015625, %v20204_v5  ;;  %v6150_v5 = vmul.f32 %v20289_v31, %v20289_v31 }
 0xaf1   :  { %v6229_v41 = vsel %vm2108_vm1, %v6149_v44, 0.0 }
 0xaf2   :  { %6675 = vadd.xlane.f32.xlu1 %v6674_v57  ;;  %23876 = vst [vmem:[#allocation132_spill] sm:$0xff] %v20279_v20  ;;  %v20283_v57 = vsub.f32 %v20012_v43, %v6089_v1  ;;  %v6148_v42 = vmul.f32 %v20279_v20, %v20279_v20  ;;  %v6235_v1 = vsel %vm2108_vm1, %v6151_v58, 0.0  ;;  %v20299_v44 = vsub.f32 %v20002_v52, %v6088_v3 }
 0xaf4   :  { %6224 = vadd.xlane.f32.xlu0 %v6223_v6  ;;  %23877 = vst [vmem:[#allocation16_spill] sm:$0xff] %v20283_v57  ;;  %v6153_v6 = vmul.f32 %v20283_v57, %v20283_v57  ;;  %23879 = vst [vmem:[#allocation138_spill] sm:$0xff] %v20299_v44  ;;  %v6226_v23 = vsel %vm2108_vm1, %v6148_v42, 0.0 }
 0xaf6   :  { %6221 = vadd.xlane.f32.xlu1 %v6220_v48  ;;  %v6241_v8 = vsel %vm2108_vm1, %v6153_v6, 0.0  ;;  %v6232_v48 = vsel %vm2108_vm1, %v6150_v5, 0.0 }
 0xaf8   :  { %6230 = vadd.xlane.f32.xlu0 %v6229_v41  ;;  %v6152_v41 = vmul.f32 %v20299_v44, %v20299_v44 }
 0xafa   :  { %6681 = vadd.xlane.f32.xlu1 %v6680_v13  ;;  %v6238_v58 = vsel %vm2108_vm1, %v6152_v41, 0.0 }
 0xafc   :  { %6236 = vadd.xlane.f32.xlu0 %v6235_v1  ;;  %v6683_v1 = vmul.f32 0.015625, %v6589_v18 }
 0xafe   :  { %6227 = vadd.xlane.f32.xlu1 %v6226_v23  ;;  %v20312_v57 = vsub.f32 %v19740_v36, %v6683_v1 }
 0xb00   :  { %6242 = vadd.xlane.f32.xlu0 %v6241_v8  ;;  %v6747_v6 = vmul.f32 %v20312_v57, %v20312_v57 }
 0xb02   :  { %6233 = vadd.xlane.f32.xlu1 %v6232_v48 }
 0xb06   :  { %6239 = vadd.xlane.f32.xlu1 %v6238_v58 }
 0xb08   :  { %v6595_v3 = vpop.xlane.xlu0 %6594 }
 0xb09   :  { %v6685_v37 = vmul.f32 0.015625, %v6595_v3 }
 0xb0c   :  { %v6601_v13 = vpop.xlane.xlu0 %6600 }
 0xb10   :  { %v20309_v42 = vpop.xlane.xlu0 %6606 }
 0xb14   :  { %v20314_v23 = vpop.xlane.xlu0 %6612 }
 0xb17   :  { %6811 = vrot.lane.b32.xlu1 %v6747_v6, %s16208_s4 }
 0xb18   :  { %v20319_v5 = vpop.xlane.xlu0 %6158 }
 0xb1c   :  { %v20321_v8 = vpop.xlane.xlu0 %6618 }
 0xb1f   :  { %v6592_v48 = vpop.xlane.xlu1 %6591 }
 0xb20   :  { %v6684_v41 = vmul.f32 0.015625, %v6592_v48  ;;  %v20323_v58 = vpop.xlane.xlu0 %6164 }
 0xb22   :  { %v20326_v18 = vsub.f32 %v19749_v63, %v6684_v41 }
 0xb23   :  { %v20328_v36 = vpop.xlane.xlu1 %6059 }
 0xb24   :  { %v6748_v1 = vmul.f32 %v20326_v18, %v20326_v18  ;;  %v20332_v44 = vpop.xlane.xlu0 %6624 }
 0xb26   :  { %6813 = vrot.lane.b32.xlu0 %v6748_v1, %s16208_s4 }
 0xb27   :  { %v6598_v6 = vpop.xlane.xlu1 %6597 }
 0xb28   :  { %v6686_v31 = vmul.f32 0.015625, %v6598_v6  ;;  %v20335_v20 = vpop.xlane.xlu0 %6170 }
 0xb2a   :  { %v20338_v48 = vsub.f32 %v19791_v26, %v6686_v31 }
 0xb2b   :  { %v6604_v11 = vpop.xlane.xlu1 %6603 }
 0xb2c   :  { %v6750_v63 = vmul.f32 %v20338_v48, %v20338_v48  ;;  %v6688_v41 = vmul.f32 0.015625, %v6604_v11  ;;  %v20342_v16 = vpop.xlane.xlu0 %6630 }
 0xb2e   :  { %v20346_v39 = vsub.f32 %v19830_v2, %v6688_v41  ;;  %6817 = vrot.lane.b32.xlu0 %v6750_v63, %s16208_s4 }
 0xb2f   :  { %v6610_v1 = vpop.xlane.xlu1 %6609 }
 0xb30   :  { %v6752_v6 = vmul.f32 %v20346_v39, %v20346_v39  ;;  %v6690_v26 = vmul.f32 0.015625, %v6610_v1  ;;  %v20351_v31 = vpop.xlane.xlu0 %6176 }
 0xb32   :  { %v20357_v11 = vsub.f32 %v19846_v32, %v6690_v26  ;;  %6821 = vrot.lane.b32.xlu0 %v6752_v6, %s16208_s4  ;;  %v6244_v26 = vsel %vm2108_vm1, %v6154_v22, 0.0 }
 0xb33   :  { %v6616_v54 = vpop.xlane.xlu1 %6615 }
 0xb34   :  { %v6754_v2 = vmul.f32 %v20357_v11, %v20357_v11  ;;  %v6692_v63 = vmul.f32 0.015625, %v6616_v54  ;;  %v20362_v41 = vpop.xlane.xlu0 %6182 }
 0xb36   :  { %v20365_v35 = vsub.f32 %v19862_v4, %v6692_v63  ;;  %6825 = vrot.lane.b32.xlu0 %v6754_v2, %s16208_s4 }
 0xb37   :  { %v20370_v1 = vpop.xlane.xlu1 %6161 }
 0xb38   :  { %v6756_v32 = vmul.f32 %v20365_v35, %v20365_v35  ;;  %v6640_v6 = vpop.xlane.xlu0 %6639 }
 0xb3a   :  { %6829 = vrot.lane.b32.xlu0 %v6756_v32, %s16208_s4 }
 0xb3b   :  { %v6622_v54 = vpop.xlane.xlu1 %6621  ;;  %6245 = vadd.xlane.f32.xlu1 %v6244_v26  ;;  %v20389_v26 = vsub.f32 %v19770_v17, %v6685_v37 }
 0xb3c   :  { %v6694_v30 = vmul.f32 0.015625, %v6622_v54  ;;  %v20376_v4 = vpop.xlane.xlu0 %6642  ;;  %v6687_v54 = vmul.f32 0.015625, %v6601_v13 }
 0xb3d   :  { %v6749_v3 = vmul.f32 %v20389_v26, %v20389_v26 }
 0xb3e   :  { %v20379_v2 = vsub.f32 %v19878_v59, %v6694_v30 }
 0xb3f   :  { %v20381_v63 = vpop.xlane.xlu1 %6167 }
 0xb40   :  { %23881 = vst [vmem:[#allocation25_spill] sm:$0xff] %v20379_v2  ;;  %v6758_v27 = vmul.f32 %v20379_v2, %v20379_v2  ;;  %v20385_v46 = vpop.xlane.xlu0 %6188 }
 0xb42   :  { %6833 = vrot.lane.b32.xlu0 %v6758_v27, %s16208_s4  ;;  %v20401_v27 = vsub.f32 %v19812_v21, %v6687_v54 }
 0xb43   :  { %v6628_v32 = vpop.xlane.xlu1 %6627 }
 0xb44   :  { %v6696_v22 = vmul.f32 0.015625, %v6628_v32  ;;  %v6649_v59 = vpop.xlane.xlu0 %6648  ;;  %v6689_v32 = vmul.f32 0.015625, %v20309_v42  ;;  %v6751_v13 = vmul.f32 %v20401_v27, %v20401_v27 }
 0xb46   :  { %v20392_v25 = vsub.f32 %v19894_v9, %v6696_v22  ;;  %v20411_v22 = vsub.f32 %v19838_v24, %v6689_v32  ;;  %v6693_v24 = vmul.f32 0.015625, %v20321_v8 }
 0xb47   :  { %v20394_v30 = vpop.xlane.xlu1 %6173 }
 0xb48   :  { %23882 = vst [vmem:[#allocation15_spill] sm:$0xff] %v20392_v25  ;;  %v6760_v2 = vmul.f32 %v20392_v25, %v20392_v25  ;;  %v20406_v9 = vpop.xlane.xlu0 %6194  ;;  %v6691_v25 = vmul.f32 0.015625, %v20314_v23  ;;  %v6753_v54 = vmul.f32 %v20411_v22, %v20411_v22 }
 0xb4a   :  { %6837 = vrot.lane.b32.xlu0 %v6760_v2, %s16208_s4 }
 0xb4b   :  { %v6634_v17 = vpop.xlane.xlu1 %6633 }
 0xb4c   :  { %v6698_v37 = vmul.f32 0.015625, %v6634_v17  ;;  %6815 = vrot.lane.b32.xlu1 %v6749_v3, %s16208_s4  ;;  %v20425_v3 = vsub.f32 %v19854_v47, %v6691_v25  ;;  %v6655_v23 = vpop.xlane.xlu0 %6654 }
 0xb4e   :  { %v20415_v21 = vsub.f32 %v19910_v15, %v6698_v37  ;;  %v6755_v37 = vmul.f32 %v20425_v3, %v20425_v3 }
 0xb4f   :  { %v20417_v42 = vpop.xlane.xlu1 %6179 }
 0xb50   :  { %23883 = vst [vmem:[#allocation147_spill] sm:$0xff] %v20415_v21  ;;  %v6762_v2 = vmul.f32 %v20415_v21, %v20415_v21  ;;  %6819 = vrot.lane.b32.xlu1 %v6751_v13, %s16208_s4  ;;  %v20433_v13 = vsub.f32 %v19870_v14, %v6693_v24  ;;  %v6695_v21 = vmul.f32 0.015625, %v20332_v44  ;;  %v6697_v14 = vmul.f32 0.015625, %v20342_v16 }
 0xb52   :  { %6841 = vrot.lane.b32.xlu0 %v6762_v2, %s16208_s4  ;;  %v6661_v2 = vpop.xlane.xlu0 %6660 }
 0xb53   :  { %v6637_v32 = vpop.xlane.xlu1 %6636 }
 0xb54   :  { %v6699_v17 = vmul.f32 0.015625, %v6637_v32  ;;  %6823 = vrot.lane.b32.xlu1 %v6753_v54, %s16208_s4  ;;  %v6757_v54 = vmul.f32 %v20433_v13, %v20433_v13  ;;  %v20447_v32 = vsub.f32 %v19886_v53, %v6695_v21 }
 0xb56   :  { %v20437_v47 = vsub.f32 %v19924_v12, %v6699_v17  ;;  %v6759_v24 = vmul.f32 %v20447_v32, %v20447_v32  ;;  %v20455_v17 = vsub.f32 %v19902_v28, %v6697_v14  ;;  %v20460_v53 = vpop.xlane.xlu0 %6209 }
 0xb57   :  { %v20439_v25 = vpop.xlane.xlu1 %6185 }
 0xb58   :  { %23884 = vst [vmem:[#allocation66_spill] sm:$0xff] %v20439_v25  ;;  %v6763_v8 = vmul.f32 %v20437_v47, %v20437_v47  ;;  %6827 = vrot.lane.b32.xlu1 %v6755_v37, %s16208_s4  ;;  %23885 = vst [vmem:[#allocation34_spill] sm:$0xff] %v20455_v17  ;;  %v6700_v37 = vmul.f32 0.015625, %v6640_v6  ;;  %v6701_v6 = vmul.f32 0.015625, %v20376_v4 }
 0xb5a   :  { %6843 = vrot.lane.b32.xlu0 %v6763_v8, %s16208_s4  ;;  %v6761_v8 = vmul.f32 %v20455_v17, %v20455_v17 }
 0xb5b   :  { %v6646_v12 = vpop.xlane.xlu1 %6645 }
 0xb5c   :  { %v6702_v44 = vmul.f32 0.015625, %v6646_v12  ;;  %6831 = vrot.lane.b32.xlu1 %v6757_v54, %s16208_s4  ;;  %v20470_v54 = vsub.f32 %v19916_v33, %v6700_v37  ;;  %v6667_v12 = vpop.xlane.xlu0 %6666 }
 0xb5e   :  { %v20458_v25 = vsub.f32 %v19932_v50, %v6702_v44  ;;  %v6764_v44 = vmul.f32 %v20470_v54, %v20470_v54 }
 0xb5f   :  { %v20462_v21 = vpop.xlane.xlu1 %6191 }
 0xb60   :  { %23886 = vst [vmem:[#allocation17_spill] sm:$0xff] %v20462_v21  ;;  %v6766_v16 = vmul.f32 %v20458_v25, %v20458_v25  ;;  %6835 = vrot.lane.b32.xlu1 %v6759_v24, %s16208_s4  ;;  %v20478_v24 = vsub.f32 %v19940_v19, %v6701_v6  ;;  %v6703_v21 = vmul.f32 0.015625, %v6649_v59  ;;  %v20494_v19 = vpop.xlane.xlu0 %6212  ;;  %v6707_v59 = vmul.f32 0.015625, %v6661_v2 }
 0xb62   :  { %6849 = vrot.lane.b32.xlu0 %v6766_v16, %s16208_s4  ;;  %v6765_v37 = vmul.f32 %v20478_v24, %v20478_v24  ;;  %v20491_v16 = vsub.f32 %v19956_v34, %v6703_v21  ;;  %v6709_v21 = vmul.f32 0.015625, %v6667_v12 }
 0xb63   :  { %v6652_v50 = vpop.xlane.xlu1 %6651 }
 0xb64   :  { %v6704_v14 = vmul.f32 0.015625, %v6652_v50  ;;  %6839 = vrot.lane.b32.xlu1 %v6761_v8, %s16208_s4  ;;  %v6705_v8 = vmul.f32 0.015625, %v6655_v23  ;;  %v6767_v50 = vmul.f32 %v20491_v16, %v20491_v16  ;;  %v20508_v23 = vsub.f32 %v19988_v49, %v6707_v59 }
 0xb66   :  { %v20481_v17 = vsub.f32 %v19948_v29, %v6704_v14  ;;  %v20500_v14 = vsub.f32 %v19972_v61, %v6705_v8  ;;  %v20519_v8 = vsub.f32 %v19994_v62, %v6709_v21 }
 0xb67   :  { %v20483_v33 = vpop.xlane.xlu1 %6197 }
 0xb68   :  { %23887 = vst [vmem:[#allocation155_spill] sm:$0xff] %v20483_v33  ;;  %v6768_v4 = vmul.f32 %v20481_v17, %v20481_v17  ;;  %6845 = vrot.lane.b32.xlu1 %v6764_v44, %s16208_s4 }
 0xb6a   :  { %6853 = vrot.lane.b32.xlu0 %v6768_v4, %s16208_s4  ;;  %v6673_v4 = vpop.xlane.xlu0 %6672 }
 0xb6b   :  { %v6658_v29 = vpop.xlane.xlu1 %6657  ;;  %v6711_v49 = vmul.f32 0.015625, %v6673_v4 }
 0xb6c   :  { %v6706_v6 = vmul.f32 0.015625, %v6658_v29  ;;  %6847 = vrot.lane.b32.xlu1 %v6765_v37, %s16208_s4  ;;  %v6769_v37 = vmul.f32 %v20500_v14, %v20500_v14 }
 0xb6e   :  { %v20503_v44 = vsub.f32 %v19964_v0, %v6706_v6  ;;  %v6771_v0 = vmul.f32 %v20508_v23, %v20508_v23  ;;  %v6773_v6 = vmul.f32 %v20519_v8, %v20519_v8 }
 0xb6f   :  { %v20505_v34 = vpop.xlane.xlu1 %6206 }
 0xb70   :  { %23888 = vst [vmem:[#allocation143_spill] sm:$0xff] %v20505_v34  ;;  %v6770_v2 = vmul.f32 %v20503_v44, %v20503_v44  ;;  %6851 = vrot.lane.b32.xlu1 %v6767_v50, %s16208_s4  ;;  %v20529_v50 = vsub.f32 %v20012_v43, %v6711_v49 }
 0xb72   :  { %6857 = vrot.lane.b32.xlu0 %v6770_v2, %s16208_s4  ;;  %23889 = vst [vmem:[#allocation179_spill] sm:$0xff] %v20529_v50  ;;  %v6775_v4 = vmul.f32 %v20529_v50, %v20529_v50 }
 0xb73   :  { %v6664_v61 = vpop.xlane.xlu1 %6663 }
 0xb74   :  { %v6708_v12 = vmul.f32 0.015625, %v6664_v61  ;;  %6855 = vrot.lane.b32.xlu1 %v6769_v37, %s16208_s4 }
 0xb76   :  { %v20523_v29 = vsub.f32 %v19980_v38, %v6708_v12  ;;  %6859 = vrot.lane.b32.xlu0 %v6771_v0, %s16208_s4  ;;  %v20553_v12 = vpop.xlane.xlu0 %6218 }
 0xb77   :  { %v6670_v59 = vpop.xlane.xlu1 %6669  ;;  %23894 = vst [vmem:[#allocation197_spill] sm:$0xff] %v20553_v12 }
 0xb78   :  { %v6772_v62 = vmul.f32 %v20523_v29, %v20523_v29  ;;  %v6710_v21 = vmul.f32 0.015625, %v6670_v59 }
 0xb7a   :  { %v20534_v2 = vsub.f32 %v20002_v52, %v6710_v21  ;;  %6861 = vrot.lane.b32.xlu1 %v6772_v62, %s16208_s4  ;;  %6863 = vrot.lane.b32.xlu0 %v6773_v6, %s16208_s4 }
 0xb7b   :  { %v20538_v38 = vpop.xlane.xlu1 %6215 }
 0xb7c   :  { %23890 = vst [vmem:[#allocation187_spill] sm:$0xff] %v20534_v2  ;;  %23891 = vst [vmem:[#allocation48_spill] sm:$0xff] %v20538_v38  ;;  %v6774_v43 = vmul.f32 %v20534_v2, %v20534_v2 }
 0xb7d   :  { %v6679_v6 = vpop.xlane.xlu0 %6678 }
 0xb7e   :  { %6865 = vrot.lane.b32.xlu1 %v6774_v43, %s16208_s4  ;;  %6867 = vrot.lane.b32.xlu0 %v6775_v4, %s16208_s4  ;;  %v6713_v34 = vmul.f32 0.015625, %v6679_v6 }
 0xb7f   :  { %v6676_v37 = vpop.xlane.xlu1 %6675 }
 0xb80   :  { %v6712_v61 = vmul.f32 0.015625, %v6676_v37 }
 0xb81   :  { %v20560_v4 = vpop.xlane.xlu0 %6224 }
 0xb82   :  { %v20547_v52 = vsub.f32 %v20018_v10, %v6712_v61  ;;  %23897 = vst [vmem:[#allocation203_spill] sm:$0xff] %v20560_v4 }
 0xb83   :  { %v20549_v0 = vpop.xlane.xlu1 %6221 }
 0xb84   :  { %23892 = vst [vmem:[#allocation191_spill] sm:$0xff] %v20547_v52  ;;  %23893 = vst [vmem:[#allocation50_spill] sm:$0xff] %v20549_v0  ;;  %v6776_v49 = vmul.f32 %v20547_v52, %v20547_v52 }
 0xb85   :  { %v20564_v10 = vpop.xlane.xlu0 %6230 }
 0xb86   :  { %6869 = vrot.lane.b32.xlu1 %v6776_v49, %s16208_s4  ;;  %23899 = vst [vmem:[#allocation73_spill] sm:$0xff] %v20564_v10 }
 0xb87   :  { %v6682_v59 = vpop.xlane.xlu1 %6681 }
 0xb88   :  { %v6714_v10 = vmul.f32 0.015625, %v6682_v59 }
 0xb89   :  { %v20566_v61 = vpop.xlane.xlu0 %6236 }
 0xb8a   :  { %23900 = vst [vmem:[#allocation76_spill] sm:$0xff] %v20566_v61  ;;  %v20579_v61 = vsub.f32 %v20039_v55, %v6714_v10 }
 0xb8b   :  { %v20556_v62 = vpop.xlane.xlu1 %6227 }
 0xb8c   :  { %23895 = vst [vmem:[#allocation199_spill] sm:$0xff] %v20556_v62  ;;  %23903 = vst [vmem:[#allocation92_spill] sm:$0xff] %v20579_v61 }
 0xb8d   :  { %v20569_v38 = vpop.xlane.xlu0 %6242 }
 0xb8e   :  { %23901 = vst [vmem:[#allocation20_spill] sm:$0xff] %v20569_v38 }
 0xb8f   :  { %v20558_v21 = vpop.xlane.xlu1 %6233 }
 0xb90   :  { %23896 = vst [vmem:[#allocation200_spill] sm:$0xff] %v20558_v21  ;;  %v20573_v21 = vsub.f32 %v20028_v45, %v6713_v34 }
 0xb92   :  { %23902 = vst [vmem:[#allocation14_spill] sm:$0xff] %v20573_v21 }
 0xb93   :  { %v20562_v43 = vpop.xlane.xlu1 %6239 }
 0xb94   :  { %23898 = vst [vmem:[#allocation202_spill] sm:$0xff] %v20562_v43  ;;  %v6777_v43 = vmul.f32 %v20573_v21, %v20573_v21 }
 0xb97   :  { %v6812_v37 = vpop.permute.xlu1 %6811 }
 0xb98   :  { %v6907_v0 = vsel %vm2108_vm1, %v6812_v37, 0.0  ;;  %v6814_v49 = vpop.permute.xlu0 %6813 }
 0xb99   :  { %v6910_v62 = vsel %vm2108_vm1, %v6814_v49, 0.0 }
 0xb9d   :  { %6908 = vadd.xlane.f32.xlu0 %v6907_v0  ;;  %v6778_v0 = vmul.f32 %v20579_v61, %v20579_v61 }
 0xba0   :  { %v6818_v6 = vpop.permute.xlu0 %6817 }
 0xba1   :  { %v6916_v52 = vsel %vm2108_vm1, %v6818_v6, 0.0 }
 0xba4   :  { %v6822_v37 = vpop.permute.xlu0 %6821 }
 0xba8   :  { %v6826_v49 = vpop.permute.xlu0 %6825 }
 0xbaa   :  { %6911 = vadd.xlane.f32.xlu1 %v6910_v62 }
 0xbac   :  { %v6830_v59 = vpop.permute.xlu0 %6829 }
 0xbad   :  { %v6934_v6 = vsel %vm2108_vm1, %v6830_v59, 0.0 }
 0xbb3   :  { %6871 = vrot.lane.b32.xlu0 %v6777_v43, %s16208_s4 }
 0xbb4   :  { %v6834_v4 = vpop.permute.xlu0 %6833 }
 0xbbb   :  { %6873 = vrot.lane.b32.xlu1 %v6778_v0, %s16208_s4 }
 0xbbc   :  { %v6838_v0 = vpop.permute.xlu0 %6837 }
 0xbc8   :  { %v20584_v62 = vpop.xlane.xlu1 %6245 }
 0xbc9   :  { %23904 = vst [vmem:[#allocation93_spill] sm:$0xff] %v20584_v62 }
 0xbcc   :  { %v6816_v34 = vpop.permute.xlu1 %6815 }
 0xbcd   :  { %v6913_v21 = vsel %vm2108_vm1, %v6816_v34, 0.0  ;;  %v6842_v34 = vpop.permute.xlu0 %6841 }
 0xbd0   :  { %v6820_v38 = vpop.permute.xlu1 %6819 }
 0xbd1   :  { %v6919_v10 = vsel %vm2108_vm1, %v6820_v38, 0.0  ;;  %v6922_v38 = vsel %vm2108_vm1, %v6822_v37, 0.0 }
 0xbd2   :  { %6914 = vadd.xlane.f32.xlu0 %v6913_v21 }
 0xbd4   :  { %v6824_v43 = vpop.permute.xlu1 %6823 }
 0xbd5   :  { %v6925_v61 = vsel %vm2108_vm1, %v6824_v43, 0.0  ;;  %v6928_v43 = vsel %vm2108_vm1, %v6826_v49, 0.0 }
 0xbd6   :  { %6920 = vadd.xlane.f32.xlu0 %v6919_v10  ;;  %v6844_v10 = vpop.permute.xlu0 %6843 }
 0xbd7   :  { %v6955_v37 = vsel %vm2108_vm1, %v6844_v10, 0.0 }
 0xbd8   :  { %v6828_v33 = vpop.permute.xlu1 %6827 }
 0xbd9   :  { %v6931_v62 = vsel %vm2108_vm1, %v6828_v33, 0.0 }
 0xbda   :  { %6926 = vadd.xlane.f32.xlu0 %v6925_v61  ;;  %v6850_v33 = vpop.permute.xlu0 %6849 }
 0xbdc   :  { %v6832_v12 = vpop.permute.xlu1 %6831 }
 0xbdd   :  { %v6937_v2 = vsel %vm2108_vm1, %v6832_v12, 0.0 }
 0xbde   :  { %6932 = vadd.xlane.f32.xlu0 %v6931_v62 }
 0xbdf   :  { %6917 = vadd.xlane.f32.xlu1 %v6916_v52 }
 0xbe0   :  { %v6836_v21 = vpop.permute.xlu1 %6835 }
 0xbe1   :  { %v6943_v61 = vsel %vm2108_vm1, %v6836_v21, 0.0 }
 0xbe2   :  { %6938 = vadd.xlane.f32.xlu0 %v6937_v2  ;;  %v6854_v2 = vpop.permute.xlu0 %6853 }
 0xbe3   :  { %6923 = vadd.xlane.f32.xlu1 %v6922_v38  ;;  %v6940_v38 = vsel %vm2108_vm1, %v6834_v4, 0.0 }
 0xbe4   :  { %v6840_v50 = vpop.permute.xlu1 %6839 }
 0xbe5   :  { %v6949_v52 = vsel %vm2108_vm1, %v6840_v50, 0.0 }
 0xbe6   :  { %6944 = vadd.xlane.f32.xlu0 %v6943_v61  ;;  %v6858_v21 = vpop.permute.xlu0 %6857 }
 0xbe7   :  { %6929 = vadd.xlane.f32.xlu1 %v6928_v43  ;;  %v6946_v43 = vsel %vm2108_vm1, %v6838_v0, 0.0  ;;  %v6964_v0 = vsel %vm2108_vm1, %v6850_v33, 0.0 }
 0xbe8   :  { %v6846_v62 = vpop.permute.xlu1 %6845 }
 0xbe9   :  { %v6958_v4 = vsel %vm2108_vm1, %v6846_v62, 0.0  ;;  %v6976_v62 = vsel %vm2108_vm1, %v6858_v21, 0.0 }
 0xbea   :  { %6950 = vadd.xlane.f32.xlu0 %v6949_v52  ;;  %v6860_v59 = vpop.permute.xlu0 %6859 }
 0xbeb   :  { %6935 = vadd.xlane.f32.xlu1 %v6934_v6  ;;  %v6952_v6 = vsel %vm2108_vm1, %v6842_v34, 0.0 }
 0xbec   :  { %v6848_v12 = vpop.permute.xlu1 %6847 }
 0xbed   :  { %v6961_v49 = vsel %vm2108_vm1, %v6848_v12, 0.0  ;;  %v6979_v12 = vsel %vm2108_vm1, %v6860_v59, 0.0  ;;  %v6092_v59 = vmul.f32 0.015625, %v20328_v36 }
 0xbee   :  { %6956 = vadd.xlane.f32.xlu0 %v6955_v37  ;;  %v6864_v37 = vpop.permute.xlu0 %6863 }
 0xbef   :  { %6941 = vadd.xlane.f32.xlu1 %v6940_v38  ;;  %v6985_v38 = vsel %vm2108_vm1, %v6864_v37, 0.0 }
 0xbf0   :  { %v6852_v61 = vpop.permute.xlu1 %6851 }
 0xbf1   :  { %v6967_v50 = vsel %vm2108_vm1, %v6852_v61, 0.0  ;;  %v6970_v61 = vsel %vm2108_vm1, %v6854_v2, 0.0  ;;  %v20615_v2 = vsub.f32 %v20039_v55, %v6092_v59 }
 0xbf2   :  { %6962 = vadd.xlane.f32.xlu0 %v6961_v49  ;;  %v6868_v49 = vpop.permute.xlu0 %6867 }
 0xbf3   :  { %6947 = vadd.xlane.f32.xlu1 %v6946_v43  ;;  %v6991_v43 = vsel %vm2108_vm1, %v6868_v49, 0.0  ;;  %v6156_v36 = vmul.f32 %v20615_v2, %v20615_v2 }
 0xbf4   :  { %v6856_v52 = vpop.permute.xlu1 %6855 }
 0xbf5   :  { %v6973_v10 = vsel %vm2108_vm1, %v6856_v52, 0.0  ;;  %v6076_v52 = vmul.f32 0.015625, %v20072_v60  ;;  %v6250_v37 = vsel %vm2108_vm1, %v6156_v36, 0.0  ;;  %v23905_v36 = vld [vmem:[#allocation156_spill] sm:$0xff] }
 0xbf6   :  { %6968 = vadd.xlane.f32.xlu0 %v6967_v50 }
 0xbf7   :  { %6953 = vadd.xlane.f32.xlu1 %v6952_v6 }
 0xbf8   :  { %v6862_v34 = vpop.permute.xlu1 %6861 }
 0xbf9   :  { %v6982_v33 = vsel %vm2108_vm1, %v6862_v34, 0.0 }
 0xbfa   :  { %6974 = vadd.xlane.f32.xlu0 %v6973_v10 }
 0xbfb   :  { %6959 = vadd.xlane.f32.xlu1 %v6958_v4  ;;  %v20619_v4 = vsub.f32 %v19910_v15, %v6076_v52  ;;  %v6075_v15 = vmul.f32 0.015625, %v20093_v56 }
 0xbfc   :  { %v6866_v50 = vpop.permute.xlu1 %6865 }
 0xbfd   :  { %v6988_v6 = vsel %vm2108_vm1, %v6866_v50, 0.0  ;;  %v6140_v60 = vmul.f32 %v20619_v4, %v20619_v4  ;;  %v20634_v34 = vsub.f32 %v19902_v28, %v6075_v15 }
 0xbfe   :  { %6980 = vadd.xlane.f32.xlu0 %v6979_v12  ;;  %v6091_v12 = vmul.f32 0.015625, %v20266_v7 }
 0xbff   :  { %6965 = vadd.xlane.f32.xlu1 %v6964_v0  ;;  %v6202_v55 = vsel %vm2108_vm1, %v6140_v60, 0.0  ;;  %v6139_v56 = vmul.f32 %v20634_v34, %v20634_v34 }
 0xc00   :  { %v6870_v10 = vpop.permute.xlu1 %6869 }
 0xc01   :  { %v6994_v21 = vsel %vm2108_vm1, %v6870_v10, 0.0  ;;  %v6199_v59 = vsel %vm2108_vm1, %v6139_v56, 0.0 }
 0xc02   :  { %6986 = vadd.xlane.f32.xlu0 %v6985_v38  ;;  %v20631_v38 = vsub.f32 %v20028_v45, %v6091_v12 }
 0xc03   :  { %6971 = vadd.xlane.f32.xlu1 %v6970_v61 }
 0xc04   :  { %v6155_v50 = vmul.f32 %v20631_v38, %v20631_v38 }
 0xc06   :  { %6992 = vadd.xlane.f32.xlu0 %v6991_v43  ;;  %v6247_v7 = vsel %vm2108_vm1, %v6155_v50, 0.0 }
 0xc07   :  { %6977 = vadd.xlane.f32.xlu1 %v6976_v62 }
 0xc0b   :  { %6983 = vadd.xlane.f32.xlu1 %v6982_v33 }
 0xc0f   :  { %6989 = vadd.xlane.f32.xlu1 %v6988_v6 }
 0xc13   :  { %6995 = vadd.xlane.f32.xlu1 %v6994_v21 }
 0xc17   :  { %6251 = vadd.xlane.f32.xlu1 %v6250_v37 }
 0xc1b   :  { %6203 = vadd.xlane.f32.xlu1 %v6202_v55  ;;  %v6253_v55 = vmul.f32 0.015625, %v20319_v5 }
 0xc2a   :  { %v6909_v0 = vpop.xlane.xlu0 %6908 }
 0xc2b   :  { %v7003_v61 = vmul.f32 0.015625, %v6909_v0  ;;  %v23906_v0 = vld [vmem:[#allocation142_spill] sm:$0xff] }
 0xc2d   :  { %v7035_v43 = vadd.f32 1e-05, %v7003_v61 }
 0xc2e   :  { %v6872_v49 = vpop.permute.xlu0 %6871 }
 0xc2f   :  { %v6997_v62 = vsel %vm2108_vm1, %v6872_v49, 0.0  ;;  %15923 = vrsqrt.f32 %v7035_v43  ;;  %v6285_v49 = vadd.f32 1e-05, %v6253_v55 }
 0xc30   :  { %6998 = vadd.xlane.f32.xlu0 %v6997_v62  ;;  %v23907_v62 = vld [vmem:[#allocation21_spill] sm:$0xff] }
 0xc34   :  { %6248 = vadd.xlane.f32.xlu0 %v6247_v7  ;;  %v23908_v7 = vld [vmem:[#allocation10_spill] sm:$0xff] }
 0xc37   :  { %v6912_v45 = vpop.xlane.xlu1 %6911 }
 0xc38   :  { %v7004_v33 = vmul.f32 0.015625, %v6912_v45  ;;  %6200 = vadd.xlane.f32.xlu0 %v6199_v59  ;;  %v6257_v45 = vmul.f32 0.015625, %v20335_v20  ;;  %v23910_v20 = vld [vmem:[#allocation58_spill] sm:$0xff] }
 0xc39   :  { %v15924_v10 = vpop.eup %15923 }
 0xc3a   :  { %v7036_v28 = vadd.f32 1e-05, %v7004_v33  ;;  %v7099_v21 = vmul.f32 %v15924_v10, %v20312_v57  ;;  %v6255_v57 = vmul.f32 0.015625, %v20323_v58  ;;  %v23909_v58 = vld [vmem:[#allocation57_spill] sm:$0xff]  ;;  %v20669_v33 = vld [vmem:[%s20659_s20] ss:$0 sm:$0xff] }
 0xc3b   :  { %v6874_v52 = vpop.permute.xlu1 %6873 }
 0xc3c   :  { %15925 = vrsqrt.f32 %v7036_v28  ;;  %v7000_v6 = vsel %vm2108_vm1, %v6874_v52, 0.0  ;;  %v7139_v37 = vmul.f32 %v23905_v36, %v7099_v21  ;;  %v6287_v5 = vadd.f32 1e-05, %v6255_v57  ;;  %v20673_v21 = vld [vmem:[%s20664_s24] ss:$0 sm:$0xff] }
 0xc3d   :  { %7001 = vadd.xlane.f32.xlu1 %v7000_v6  ;;  %15927 = vrsqrt.f32 %v6285_v49  ;;  %v6289_v28 = vadd.f32 1e-05, %v6257_v45 }
 0xc3e   :  { %v7179_v15 = vadd.f32 %v23906_v0, %v7139_v37  ;;  %15929 = vrsqrt.f32 %v6287_v5 }
 0xc3f   :  { %15931 = vrsqrt.f32 %v6289_v28 }
 0xc40   :  { %v7403_v50 = vsub.f32 %v7179_v15, %v23907_v62 }
 0xc46   :  { %v15926_v60 = vpop.eup %15925 }
 0xc47   :  { %v7100_v12 = vmul.f32 %v15926_v60, %v20326_v18  ;;  %v15928_v18 = vpop.eup %15927 }
 0xc48   :  { %v6349_v59 = vmul.f32 %v15928_v18, %v23909_v58  ;;  %v15930_v60 = vpop.eup %15929 }
 0xc49   :  { %v7140_v61 = vmul.f32 %v23905_v36, %v7100_v12  ;;  %v15932_v5 = vpop.eup %15931 }
 0xc4a   :  { %v6387_v52 = vmul.f32 %v20669_v33, %v6349_v59 }
 0xc4b   :  { %v7180_v43 = vadd.f32 %v23906_v0, %v7140_v61  ;;  %v6351_v61 = vmul.f32 %v15930_v60, %v23910_v20  ;;  %v6261_v60 = vmul.f32 0.015625, %v20362_v41 }
 0xc4c   :  { %v6425_v12 = vadd.f32 %v20673_v21, %v6387_v52 }
 0xc4d   :  { %v7404_v56 = vsub.f32 %v7180_v43, %v23908_v7  ;;  %v6259_v43 = vmul.f32 0.015625, %v20351_v31 }
 0xc4e   :  { %7467 = vrot.lane.b32.xlu1 %v7403_v50, %s16208_s4  ;;  %v12939_v50 = vmul.f32 -1.442695, %v6425_v12 }
 0xc4f   :  { %7469 = vrot.lane.b32.xlu0 %v7404_v56, %s16208_s4  ;;  %v6389_v56 = vmul.f32 %v20669_v33, %v6351_v61  ;;  %v6291_v18 = vadd.f32 1e-05, %v6259_v43 }
 0xc51   :  { %v6427_v31 = vadd.f32 %v20673_v21, %v6389_v56 }
 0xc5f   :  { %v6915_v6 = vpop.xlane.xlu0 %6914 }
 0xc60   :  { %v7005_v10 = vmul.f32 0.015625, %v6915_v6  ;;  %v23911_v6 = vld [vmem:[#allocation60_spill] sm:$0xff] }
 0xc62   :  { %v7037_v37 = vadd.f32 1e-05, %v7005_v10  ;;  %v6353_v10 = vmul.f32 %v15932_v5, %v23911_v6  ;;  %v6293_v5 = vadd.f32 1e-05, %v6261_v60  ;;  %v23912_v6 = vld [vmem:[#allocation136_spill] sm:$0xff] }
 0xc63   :  { %v6921_v55 = vpop.xlane.xlu0 %6920 }
 0xc64   :  { %15933 = vrsqrt.f32 %v7037_v37  ;;  %v7007_v15 = vmul.f32 0.015625, %v6921_v55 }
 0xc66   :  { %v7039_v49 = vadd.f32 1e-05, %v7007_v15 }
 0xc67   :  { %v6927_v62 = vpop.xlane.xlu0 %6926 }
 0xc68   :  { %15935 = vrsqrt.f32 %v7039_v49  ;;  %v7009_v7 = vmul.f32 0.015625, %v6927_v62 }
 0xc69   :  { %15937 = vpow2.f32 %v12939_v50  ;;  %v6391_v50 = vmul.f32 %v20669_v33, %v6353_v10 }
 0xc6a   :  { %v7041_v57 = vadd.f32 1e-05, %v7009_v7  ;;  %v6254_v7 = vmul.f32 0.015625, %v20370_v1 }
 0xc6b   :  { %v6933_v45 = vpop.xlane.xlu0 %6932 }
 0xc6c   :  { %15939 = vrsqrt.f32 %v7041_v57  ;;  %v7011_v58 = vmul.f32 0.015625, %v6933_v45  ;;  %v6918_v59 = vpop.xlane.xlu1 %6917  ;;  %v12941_v57 = vmul.f32 -1.442695, %v6427_v31 }
 0xc6d   :  { %v7006_v28 = vmul.f32 0.015625, %v6918_v59  ;;  %15941 = vrsqrt.f32 %v6291_v18 }
 0xc6e   :  { %v15934_v52 = vpop.eup %15933  ;;  %v7043_v37 = vadd.f32 1e-05, %v7011_v58 }
 0xc6f   :  { %v7101_v55 = vmul.f32 %v15934_v52, %v20389_v26  ;;  %v7038_v12 = vadd.f32 1e-05, %v7006_v28  ;;  %v6939_v15 = vpop.xlane.xlu0 %6938 }
 0xc70   :  { %15943 = vrsqrt.f32 %v7043_v37  ;;  %v7013_v20 = vmul.f32 0.015625, %v6939_v15  ;;  %v6924_v61 = vpop.xlane.xlu1 %6923 }
 0xc71   :  { %15945 = vrsqrt.f32 %v7038_v12  ;;  %v7008_v49 = vmul.f32 0.015625, %v6924_v61  ;;  %v7141_v43 = vmul.f32 %v23905_v36, %v7101_v55  ;;  %v6286_v55 = vadd.f32 1e-05, %v6254_v7  ;;  %v23913_v7 = vld [vmem:[#allocation69_spill] sm:$0xff] }
 0xc72   :  { %v15936_v62 = vpop.eup %15935  ;;  %v7045_v56 = vadd.f32 1e-05, %v7013_v20 }
 0xc73   :  { %v7103_v41 = vmul.f32 %v15936_v62, %v20401_v27  ;;  %v7040_v26 = vadd.f32 1e-05, %v7008_v49  ;;  %v6945_v18 = vpop.xlane.xlu0 %6944  ;;  %v7181_v45 = vadd.f32 %v23906_v0, %v7141_v43  ;;  %v15938_v28 = vpop.eup %15937  ;;  %v6429_v27 = vadd.f32 %v20673_v21, %v6391_v50 }
 0xc74   :  { %15947 = vrsqrt.f32 %v7045_v56  ;;  %v7015_v58 = vmul.f32 0.015625, %v6945_v18  ;;  %v6930_v59 = vpop.xlane.xlu1 %6929  ;;  %v7307_v49 = vadd.f32 1.0, %v15938_v28 }
 0xc75   :  { %15949 = vrsqrt.f32 %v7040_v26  ;;  %v7010_v52 = vmul.f32 0.015625, %v6930_v59  ;;  %v7405_v37 = vsub.f32 %v7181_v45, %v23912_v6  ;;  %v7143_v10 = vmul.f32 %v23905_v36, %v7103_v41 }
 0xc76   :  { %v15940_v1 = vpop.eup %15939  ;;  %v7047_v31 = vadd.f32 1e-05, %v7015_v58  ;;  %15951 = vpow2.f32 %v12941_v57  ;;  %v6256_v41 = vmul.f32 0.015625, %v20381_v63 }
 0xc77   :  { %15953 = vrsqrt.f32 %v6293_v5  ;;  %v7105_v60 = vmul.f32 %v15940_v1, %v20411_v22  ;;  %v7042_v12 = vadd.f32 1e-05, %v7010_v52  ;;  %7471 = vrot.lane.b32.xlu1 %v7405_v37, %s16208_s4  ;;  %v20693_v15 = vpop.xlane.xlu0 %6950  ;;  %v7183_v20 = vadd.f32 %v23906_v0, %v7143_v10  ;;  %v15942_v43 = vpop.eup %15941  ;;  %v23914_v10 = vld [vmem:[#allocation72_spill] sm:$0xff] }
 0xc78   :  { %15955 = vrsqrt.f32 %v7047_v31  ;;  %v6936_v61 = vpop.xlane.xlu1 %6935  ;;  %v12943_v22 = vmul.f32 -1.442695, %v6429_v27  ;;  %v6355_v59 = vmul.f32 %v15942_v43, %v20097_v40  ;;  %v6288_v40 = vadd.f32 1e-05, %v6256_v41 }
 0xc79   :  { %15957 = vrsqrt.f32 %v7042_v12  ;;  %v7012_v62 = vmul.f32 0.015625, %v6936_v61  ;;  %v7407_v56 = vsub.f32 %v7183_v20, %v23913_v7  ;;  %v7145_v50 = vmul.f32 %v23905_v36, %v7105_v60 }
 0xc7a   :  { %v15944_v57 = vpop.eup %15943  ;;  %15959 = vrsqrt.f32 %v6286_v55  ;;  %v6263_v55 = vmul.f32 0.015625, %v20385_v46 }
 0xc7b   :  { %v15946_v5 = vpop.eup %15945  ;;  %v7107_v26 = vmul.f32 %v15944_v57, %v20425_v3  ;;  %v7044_v18 = vadd.f32 1e-05, %v7012_v62  ;;  %7475 = vrot.lane.b32.xlu1 %v7407_v56, %s16208_s4  ;;  %v6957_v45 = vpop.xlane.xlu0 %6956  ;;  %v7185_v58 = vadd.f32 %v23906_v0, %v7145_v50  ;;  %15961 = vrcp.f32 %v7307_v49 }
 0xc7c   :  { %v7102_v28 = vmul.f32 %v15946_v5, %v20338_v48  ;;  %v7019_v52 = vmul.f32 0.015625, %v6957_v45  ;;  %v6942_v6 = vpop.xlane.xlu1 %6941  ;;  %v6295_v41 = vadd.f32 1e-05, %v6263_v55 }
 0xc7d   :  { %15963 = vrsqrt.f32 %v7044_v18  ;;  %v7014_v37 = vmul.f32 0.015625, %v6942_v6  ;;  %v7409_v1 = vsub.f32 %v7185_v58, %v23914_v10  ;;  %v7147_v63 = vmul.f32 %v23905_v36, %v7107_v26  ;;  %v23916_v18 = vld [vmem:[#allocation133_spill] sm:$0xff] }
 0xc7e   :  { %v15948_v3 = vpop.eup %15947  ;;  %v7051_v31 = vadd.f32 1e-05, %v7019_v52  ;;  %v7142_v27 = vmul.f32 %v23905_v36, %v7102_v28  ;;  %15965 = vpow2.f32 %v12943_v22  ;;  %v6258_v26 = vmul.f32 0.015625, %v20394_v30 }
 0xc7f   :  { %v15950_v60 = vpop.eup %15949  ;;  %v7109_v48 = vmul.f32 %v15948_v3, %v20433_v13  ;;  %v7046_v12 = vadd.f32 1e-05, %v7014_v37  ;;  %7479 = vrot.lane.b32.xlu1 %v7409_v1, %s16208_s4  ;;  %v6963_v20 = vpop.xlane.xlu0 %6962  ;;  %v7187_v61 = vadd.f32 %v23906_v0, %v7147_v63  ;;  %v23915_v13 = vld [vmem:[#allocation144_spill] sm:$0xff]  ;;  %v6265_v28 = vmul.f32 0.015625, %v20406_v9 }
 0xc80   :  { %v20711_v49 = vpop.eup %15951  ;;  %v7104_v43 = vmul.f32 %v15950_v60, %v20346_v39  ;;  %15967 = vrsqrt.f32 %v7051_v31  ;;  %v7021_v46 = vmul.f32 0.015625, %v6963_v20  ;;  %v6948_v62 = vpop.xlane.xlu1 %6947  ;;  %v7182_v7 = vadd.f32 %v23906_v0, %v7142_v27 }
 0xc81   :  { %v20715_v56 = vpop.eup %15953  ;;  %15969 = vrsqrt.f32 %v7046_v12  ;;  %v7016_v50 = vmul.f32 0.015625, %v6948_v62  ;;  %v7411_v57 = vsub.f32 %v7187_v61, %v23915_v13  ;;  %v7149_v22 = vmul.f32 %v23905_v36, %v7109_v48 }
 0xc82   :  { %v15956_v5 = vpop.eup %15955  ;;  %v7406_v45 = vsub.f32 %v7182_v7, %v23916_v18  ;;  %v7144_v39 = vmul.f32 %v23905_v36, %v7104_v43  ;;  %v6393_v63 = vmul.f32 %v20669_v33, %v6355_v59  ;;  %v7053_v31 = vadd.f32 1e-05, %v7021_v46  ;;  %v23918_v59 = vld [vmem:[#allocation26_spill] sm:$0xff] }
 0xc83   :  { %v15958_v58 = vpop.eup %15957  ;;  %v7111_v52 = vmul.f32 %v15956_v5, %v20447_v32  ;;  %v7048_v6 = vadd.f32 1e-05, %v7016_v50  ;;  %7483 = vrot.lane.b32.xlu1 %v7411_v57, %s16208_s4  ;;  %v6969_v37 = vpop.xlane.xlu0 %6968  ;;  %v7189_v10 = vadd.f32 %v23906_v0, %v7149_v22  ;;  %v23917_v32 = vld [vmem:[#allocation32_spill] sm:$0xff]  ;;  %v6290_v12 = vadd.f32 1e-05, %v6258_v26 }
 0xc84   :  { %v15960_v1 = vpop.eup %15959  ;;  %v7106_v30 = vmul.f32 %v15958_v58, %v20357_v11  ;;  %v7023_v3 = vmul.f32 0.015625, %v6969_v37  ;;  %v20728_v55 = vpop.xlane.xlu1 %6953  ;;  %7473 = vrot.lane.b32.xlu0 %v7406_v45, %s16208_s4  ;;  %v7184_v9 = vadd.f32 %v23906_v0, %v7144_v39  ;;  %v6297_v62 = vadd.f32 1e-05, %v6265_v28  ;;  %v23920_v45 = vld [vmem:[#allocation24_spill] sm:$0xff] }
 0xc85   :  { %15971 = vrsqrt.f32 %v7048_v6  ;;  %v7413_v27 = vsub.f32 %v7189_v10, %v23917_v32  ;;  %v7151_v60 = vmul.f32 %v23905_v36, %v7111_v52  ;;  %v20734_v48 = vpop.eup %15961  ;;  %v6350_v43 = vmul.f32 %v15960_v1, %v20111_v51  ;;  %v23921_v1 = vld [vmem:[#allocation25_spill] sm:$0xff] }
 0xc86   :  { %15973 = vrsqrt.f32 %v6288_v40  ;;  %v7408_v20 = vsub.f32 %v7184_v9, %v23918_v59  ;;  %v7146_v11 = vmul.f32 %v23905_v36, %v7106_v30  ;;  %v7055_v40 = vadd.f32 1e-05, %v7023_v3  ;;  %v23922_v32 = vld [vmem:[#allocation61_spill] sm:$0xff]  ;;  %v23923_v59 = vld [vmem:[#allocation152_spill] sm:$0xff] }
 0xc87   :  { %v15964_v61 = vpop.eup %15963  ;;  %15975 = vrsqrt.f32 %v6295_v41  ;;  %7487 = vrot.lane.b32.xlu1 %v7413_v27, %s16208_s4  ;;  %v6975_v46 = vpop.xlane.xlu0 %6974  ;;  %v7191_v7 = vadd.f32 %v23906_v0, %v7151_v60  ;;  %v23919_v41 = vld [vmem:[#allocation149_spill] sm:$0xff]  ;;  %v6431_v28 = vadd.f32 %v20673_v21, %v6393_v63  ;;  %v6388_v52 = vmul.f32 %v20669_v33, %v6350_v43 }
 0xc88   :  { %v20741_v50 = vpop.eup %15965  ;;  %v7108_v13 = vmul.f32 %v15964_v61, %v20365_v35  ;;  %v7025_v57 = vmul.f32 0.015625, %v6975_v46  ;;  %v6960_v22 = vpop.xlane.xlu1 %6959  ;;  %7477 = vrot.lane.b32.xlu0 %v7408_v20, %s16208_s4  ;;  %v7186_v5 = vadd.f32 %v23906_v0, %v7146_v11  ;;  %15977 = vrsqrt.f32 %v7053_v31 }
 0xc89   :  { %v7020_v51 = vmul.f32 0.015625, %v6960_v22  ;;  %v7415_v26 = vsub.f32 %v7191_v7, %v23919_v41  ;;  %15979 = vrsqrt.f32 %v6290_v12  ;;  %v6357_v63 = vmul.f32 %v20715_v56, %v23922_v32 }
 0xc8a   :  { %v15968_v18 = vpop.eup %15967  ;;  %v7410_v39 = vsub.f32 %v7186_v5, %v23920_v45  ;;  %v7148_v58 = vmul.f32 %v23905_v36, %v7108_v13  ;;  %15981 = vrsqrt.f32 %v6297_v62  ;;  %v7057_v6 = vadd.f32 1e-05, %v7025_v57 }
 0xc8b   :  { %v15970_v35 = vpop.eup %15969  ;;  %v7052_v37 = vadd.f32 1e-05, %v7020_v51  ;;  %7491 = vrot.lane.b32.xlu1 %v7415_v26, %s16208_s4  ;;  %v6981_v10 = vpop.xlane.xlu0 %6980  ;;  %15983 = vrsqrt.f32 %v7055_v40  ;;  %v6260_v60 = vmul.f32 0.015625, %v20417_v42  ;;  %v7115_v12 = vmul.f32 %v15968_v18, %v20437_v47  ;;  %v23924_v40 = vld [vmem:[#allocation15_spill] sm:$0xff]  ;;  %v23925_v18 = vld [vmem:[#allocation46_spill] sm:$0xff] }
 0xc8c   :  { %v7110_v30 = vmul.f32 %v15970_v35, %v23921_v1  ;;  %v7027_v3 = vmul.f32 0.015625, %v6981_v10  ;;  %v6966_v9 = vpop.xlane.xlu1 %6965  ;;  %7481 = vrot.lane.b32.xlu0 %v7410_v39, %s16208_s4  ;;  %v7188_v31 = vadd.f32 %v23906_v0, %v7148_v58  ;;  %v6426_v46 = vadd.f32 %v20673_v21, %v6388_v52 }
 0xc8d   :  { %15985 = vrsqrt.f32 %v7052_v37  ;;  %v7022_v27 = vmul.f32 0.015625, %v6966_v9  ;;  %v12945_v7 = vmul.f32 -1.442695, %v6431_v28  ;;  %v6395_v51 = vmul.f32 %v20669_v33, %v6357_v63 }
 0xc8e   :  { %v7412_v20 = vsub.f32 %v7188_v31, %v23923_v59  ;;  %v7150_v11 = vmul.f32 %v23905_v36, %v7110_v30  ;;  %15987 = vrsqrt.f32 %v7057_v6  ;;  %v7059_v57 = vadd.f32 1e-05, %v7027_v3  ;;  %v23926_v31 = vld [vmem:[#allocation64_spill] sm:$0xff]  ;;  %v23927_v59 = vld [vmem:[#allocation159_spill] sm:$0xff] }
 0xc8f   :  { %v15972_v61 = vpop.eup %15971  ;;  %v7054_v43 = vadd.f32 1e-05, %v7022_v27  ;;  %v6987_v62 = vpop.xlane.xlu0 %6986  ;;  %v6292_v26 = vadd.f32 1e-05, %v6260_v60  ;;  %v7155_v58 = vmul.f32 %v23905_v36, %v7115_v12  ;;  %v12940_v6 = vmul.f32 -1.442695, %v6426_v46 }
 0xc90   :  { %v15974_v13 = vpop.eup %15973  ;;  %v7112_v56 = vmul.f32 %v15972_v61, %v23924_v40  ;;  %v7029_v22 = vmul.f32 0.015625, %v6987_v62  ;;  %v6972_v5 = vpop.xlane.xlu1 %6971  ;;  %7485 = vrot.lane.b32.xlu0 %v7412_v20, %s16208_s4  ;;  %v7190_v42 = vadd.f32 %v23906_v0, %v7150_v11  ;;  %v6433_v27 = vadd.f32 %v20673_v21, %v6395_v51 }
 0xc91   :  { %v15976_v47 = vpop.eup %15975  ;;  %15989 = vrsqrt.f32 %v7054_v43  ;;  %v7024_v41 = vmul.f32 0.015625, %v6972_v5  ;;  %v6352_v32 = vmul.f32 %v15974_v13, %v23926_v31  ;;  %v7195_v11 = vadd.f32 %v23906_v0, %v7155_v58  ;;  %v23928_v43 = vld [vmem:[#allocation65_spill] sm:$0xff] }
 0xc92   :  { %v7414_v45 = vsub.f32 %v7190_v42, %v23925_v18  ;;  %v7152_v39 = vmul.f32 %v23905_v36, %v7112_v56  ;;  %v15978_v28 = vpop.eup %15977  ;;  %15991 = vpow2.f32 %v12945_v7  ;;  %v7061_v10 = vadd.f32 1e-05, %v7029_v22  ;;  %v23929_v42 = vld [vmem:[#allocation160_spill] sm:$0xff]  ;;  %v23930_v18 = vld [vmem:[#allocation70_spill] sm:$0xff] }
 0xc93   :  { %v7056_v35 = vadd.f32 1e-05, %v7024_v41  ;;  %v6993_v52 = vpop.xlane.xlu0 %6992  ;;  %v15980_v37 = vpop.eup %15979  ;;  %15993 = vrsqrt.f32 %v7059_v57  ;;  %v7117_v12 = vmul.f32 %v15978_v28, %v20478_v24  ;;  %v6359_v62 = vmul.f32 %v15976_v47, %v23928_v43  ;;  %v23931_v28 = vld [vmem:[#allocation66_spill] sm:$0xff] }
 0xc94   :  { %v7031_v1 = vmul.f32 0.015625, %v6993_v52  ;;  %v6978_v30 = vpop.xlane.xlu1 %6977  ;;  %7489 = vrot.lane.b32.xlu0 %v7414_v45, %s16208_s4  ;;  %v7192_v3 = vadd.f32 %v23906_v0, %v7152_v39  ;;  %v15982_v9 = vpop.eup %15981  ;;  %v6390_v57 = vmul.f32 %v20669_v33, %v6352_v32  ;;  %v20780_v22 = vmul.f32 -1.442695, %v6433_v27 }
 0xc95   :  { %15995 = vrsqrt.f32 %v7056_v35  ;;  %v7026_v63 = vmul.f32 0.015625, %v6978_v30  ;;  %v15984_v60 = vpop.eup %15983  ;;  %v7419_v47 = vsub.f32 %v7195_v11, %v23929_v42  ;;  %v6354_v45 = vmul.f32 %v15980_v37, %v23930_v18  ;;  %v23935_v42 = vld [vmem:[#allocation168_spill] sm:$0xff] }
 0xc96   :  { %15997 = vrsqrt.f32 %v6292_v26  ;;  %v7416_v20 = vsub.f32 %v7192_v3, %v23927_v59  ;;  %v7063_v13 = vadd.f32 1e-05, %v7031_v1  ;;  %v7119_v5 = vmul.f32 %v15984_v60, %v20491_v16  ;;  %v23932_v3 = vld [vmem:[#allocation166_spill] sm:$0xff]  ;;  %v23933_v60 = vld [vmem:[#allocation71_spill] sm:$0xff] }
 0xc97   :  { %v15986_v61 = vpop.eup %15985  ;;  %v7058_v46 = vadd.f32 1e-05, %v7026_v63  ;;  %15999 = vpow2.f32 %v12940_v6  ;;  %v6397_v26 = vmul.f32 %v20669_v33, %v6359_v62  ;;  %v6270_v39 = vmul.f32 0.015625, %v20460_v53 }
 0xc98   :  { %v7116_v7 = vmul.f32 %v15986_v61, %v20470_v54  ;;  %16001 = vrsqrt.f32 %v7061_v10  ;;  %v6984_v40 = vpop.xlane.xlu1 %6983  ;;  %7493 = vrot.lane.b32.xlu0 %v7416_v20, %s16208_s4  ;;  %v15988_v56 = vpop.eup %15987  ;;  %v7157_v54 = vmul.f32 %v23905_v36, %v7117_v12  ;;  %v6262_v35 = vmul.f32 0.015625, %v23931_v28 }
 0xc99   :  { %16003 = vrsqrt.f32 %v7058_v46  ;;  %v7028_v24 = vmul.f32 0.015625, %v6984_v40  ;;  %v7121_v1 = vmul.f32 %v15988_v56, %v20500_v14  ;;  %v6428_v37 = vadd.f32 %v20673_v21, %v6390_v57 }
 0xc9a   :  { %v7156_v51 = vmul.f32 %v23905_v36, %v7116_v7  ;;  %16005 = vrsqrt.f32 %v7063_v13  ;;  %v7159_v63 = vmul.f32 %v23905_v36, %v7119_v5  ;;  %v6361_v12 = vmul.f32 %v15982_v9, %v23933_v60 }
 0xc9b   :  { %v15990_v41 = vpop.eup %15989  ;;  %v7060_v58 = vadd.f32 1e-05, %v7028_v24  ;;  %v6302_v59 = vadd.f32 1e-05, %v6270_v39  ;;  %v6435_v14 = vadd.f32 %v20673_v21, %v6397_v26  ;;  %v6392_v61 = vmul.f32 %v20669_v33, %v6354_v45  ;;  %v23934_v24 = vld [vmem:[#allocation174_spill] sm:$0xff]  ;;  %v23936_v26 = vld [vmem:[#allocation75_spill] sm:$0xff] }
 0xc9c   :  { %v7118_v52 = vmul.f32 %v15990_v41, %v20458_v25  ;;  %v6990_v16 = vpop.xlane.xlu1 %6989  ;;  %7499 = vrot.lane.b32.xlu0 %v7419_v47, %s16208_s4  ;;  %v7196_v6 = vadd.f32 %v23906_v0, %v7156_v51  ;;  %v20793_v10 = vpop.eup %15991  ;;  %v7197_v25 = vadd.f32 %v23906_v0, %v7157_v54  ;;  %v6294_v43 = vadd.f32 1e-05, %v6262_v35 }
 0xc9d   :  { %16007 = vrsqrt.f32 %v7060_v58  ;;  %v7030_v30 = vmul.f32 0.015625, %v6990_v16  ;;  %v15994_v53 = vpop.eup %15993  ;;  %v7161_v56 = vmul.f32 %v23905_v36, %v7121_v1  ;;  %v7199_v51 = vadd.f32 %v23906_v0, %v7159_v63  ;;  %v23937_v1 = vld [vmem:[#allocation182_spill] sm:$0xff] }
 0xc9e   :  { %v7420_v31 = vsub.f32 %v7196_v6, %v23932_v3  ;;  %v7158_v32 = vmul.f32 %v23905_v36, %v7118_v52  ;;  %v7123_v40 = vmul.f32 %v15994_v53, %v20508_v23  ;;  %v7421_v47 = vsub.f32 %v7197_v25, %v23935_v42 }
 0xc9f   :  { %v15996_v27 = vpop.eup %15995  ;;  %v7062_v20 = vadd.f32 1e-05, %v7030_v30  ;;  %v6399_v41 = vmul.f32 %v20669_v33, %v6361_v12  ;;  %v6430_v58 = vadd.f32 %v20673_v21, %v6392_v61  ;;  %v7201_v28 = vadd.f32 %v23906_v0, %v7161_v56  ;;  %v23941_v61 = vld [vmem:[#allocation190_spill] sm:$0xff]  ;;  %v23943_v56 = vld [vmem:[#allocation187_spill] sm:$0xff] }
 0xca0   :  { %v15998_v11 = vpop.eup %15997  ;;  %v7120_v62 = vmul.f32 %v15996_v27, %v20481_v17  ;;  %v6996_v46 = vpop.xlane.xlu1 %6995  ;;  %7501 = vrot.lane.b32.xlu1 %v7420_v31, %s16208_s4  ;;  %v7198_v7 = vadd.f32 %v23906_v0, %v7158_v32  ;;  %v7163_v35 = vmul.f32 %v23905_v36, %v7123_v40  ;;  %v12942_v52 = vmul.f32 -1.442695, %v6428_v37  ;;  %v23942_v40 = vld [vmem:[#allocation17_spill] sm:$0xff] }
 0xca1   :  { %v20807_v13 = vpop.eup %15999  ;;  %16009 = vrsqrt.f32 %v7062_v20  ;;  %v7032_v9 = vmul.f32 0.015625, %v6996_v46  ;;  %v6356_v18 = vmul.f32 %v15998_v11, %v23936_v26  ;;  %v12949_v25 = vmul.f32 -1.442695, %v6435_v14  ;;  %v23940_v14 = vld [vmem:[#allocation179_spill] sm:$0xff] }
 0xca2   :  { %v16002_v57 = vpop.eup %16001  ;;  %v7422_v5 = vsub.f32 %v7198_v7, %v23934_v24  ;;  %v7160_v17 = vmul.f32 %v23905_v36, %v7120_v62  ;;  %16011 = vrsqrt.f32 %v6302_v59  ;;  %v6437_v63 = vadd.f32 %v20673_v21, %v6399_v41  ;;  %v23939_v59 = vld [vmem:[#allocation184_spill] sm:$0xff] }
 0xca3   :  { %v16004_v54 = vpop.eup %16003  ;;  %v7064_v23 = vadd.f32 1e-05, %v7032_v9  ;;  %16013 = vrsqrt.f32 %v6294_v43  ;;  %v7125_v6 = vmul.f32 %v16002_v57, %v20519_v8  ;;  %v6394_v32 = vmul.f32 %v20669_v33, %v6356_v18 }
 0xca4   :  { %v7122_v45 = vmul.f32 %v16004_v54, %v20503_v44  ;;  %7505 = vrot.lane.b32.xlu0 %v7422_v5, %s16208_s4  ;;  %7503 = vrot.lane.b32.xlu1 %v7421_v47, %s16208_s4  ;;  %v7200_v39 = vadd.f32 %v23906_v0, %v7160_v17  ;;  %v16006_v16 = vpop.eup %16005  ;;  %v23938_v44 = vld [vmem:[#allocation40_spill] sm:$0xff]  ;;  %v7309_v37 = vadd.f32 1.0, %v20711_v49  ;;  %v12944_v60 = vmul.f32 -1.442695, %v6430_v58  ;;  %v23944_v47 = vld [vmem:[#allocation45_spill] sm:$0xff]  ;;  %v23946_v58 = vld [vmem:[#allocation191_spill] sm:$0xff] }
 0xca5   :  { %16015 = vrsqrt.f32 %v7064_v23  ;;  %v7423_v53 = vsub.f32 %v7199_v51, %v23938_v44  ;;  %v6271_v12 = vmul.f32 0.015625, %v20494_v19  ;;  %v7425_v20 = vsub.f32 %v7201_v28, %v23939_v59  ;;  %v23945_v51 = vld [vmem:[#allocation49_spill] sm:$0xff] }
 0xca6   :  { %v7424_v30 = vsub.f32 %v7200_v39, %v23937_v1  ;;  %v7162_v3 = vmul.f32 %v23905_v36, %v7122_v45  ;;  %16017 = vpow2.f32 %v20780_v22  ;;  %v7203_v22 = vadd.f32 %v23906_v0, %v7163_v35  ;;  %v23948_v1 = vld [vmem:[#allocation197_spill] sm:$0xff] }
 0xca7   :  { %v16008_v31 = vpop.eup %16007  ;;  %16019 = vpow2.f32 %v12942_v52  ;;  %v7127_v11 = vmul.f32 %v16006_v16, %v23940_v14  ;;  %v7165_v62 = vmul.f32 %v23905_v36, %v7125_v6  ;;  %v7311_v7 = vadd.f32 1.0, %v20741_v50  ;;  %v23947_v16 = vld [vmem:[#allocation82_spill] sm:$0xff] }
 0xca8   :  { %v7124_v27 = vmul.f32 %v16008_v31, %v20523_v29  ;;  %7509 = vrot.lane.b32.xlu0 %v7424_v30, %s16208_s4  ;;  %7507 = vrot.lane.b32.xlu1 %v7423_v53, %s16208_s4  ;;  %v7202_v8 = vadd.f32 %v23906_v0, %v7162_v3  ;;  %16021 = vpow2.f32 %v12949_v25  ;;  %v12951_v49 = vmul.f32 -1.442695, %v6437_v63  ;;  %v23949_v53 = vld [vmem:[#allocation53_spill] sm:$0xff]  ;;  %v23950_v31 = vld [vmem:[#allocation198_spill] sm:$0xff] }
 0xca9   :  { %v6432_v19 = vadd.f32 %v20673_v21, %v6394_v32  ;;  %v6264_v9 = vmul.f32 0.015625, %v23942_v40  ;;  %16023 = vpow2.f32 %v12944_v60  ;;  %v6303_v42 = vadd.f32 1e-05, %v6271_v12  ;;  %v23952_v60 = vld [vmem:[#allocation155_spill] sm:$0xff] }
 0xcaa   :  { %v7426_v29 = vsub.f32 %v7202_v8, %v23941_v61  ;;  %v7164_v43 = vmul.f32 %v23905_v36, %v7124_v27  ;;  %v7427_v17 = vsub.f32 %v7203_v22, %v23944_v47  ;;  %16025 = vrcp.f32 %v7309_v37  ;;  %v23951_v8 = vld [vmem:[#allocation81_spill] sm:$0xff] }
 0xcab   :  { %v16010_v46 = vpop.eup %16009  ;;  %v7205_v26 = vadd.f32 %v23906_v0, %v7165_v62  ;;  %v7167_v18 = vmul.f32 %v23905_v36, %v7127_v11  ;;  %16027 = vpow2.f32 %v12951_v49  ;;  %v12946_v45 = vmul.f32 -1.442695, %v6432_v19 }
 0xcac   :  { %v7126_v57 = vmul.f32 %v16010_v46, %v23943_v56  ;;  %7513 = vrot.lane.b32.xlu0 %v7426_v29, %s16208_s4  ;;  %7511 = vrot.lane.b32.xlu1 %v7425_v20, %s16208_s4  ;;  %v7204_v24 = vadd.f32 %v23906_v0, %v7164_v43  ;;  %v16012_v5 = vpop.eup %16011  ;;  %v6296_v39 = vadd.f32 1e-05, %v6264_v9  ;;  %16029 = vrcp.f32 %v7311_v7  ;;  %v23953_v43 = vld [vmem:[#allocation207_spill] sm:$0xff] }
 0xcad   :  { %v16014_v50 = vpop.eup %16013  ;;  %16031 = vrsqrt.f32 %v6303_v42  ;;  %v6273_v30 = vmul.f32 0.015625, %v23948_v1  ;;  %v7313_v44 = vadd.f32 1.0, %v20793_v10  ;;  %v7429_v32 = vsub.f32 %v7205_v26, %v23950_v31  ;;  %v23955_v9 = vld [vmem:[#allocation143_spill] sm:$0xff]  ;;  %v23956_v26 = vld [vmem:[#allocation48_spill] sm:$0xff]  ;;  %v23959_v1 = vld [vmem:[#allocation50_spill] sm:$0xff]  ;;  %v20893_v31 = vpop.xlane.xlu1 %6251 }
 0xcae   :  { %v7428_v54 = vsub.f32 %v7204_v24, %v23945_v51  ;;  %v7166_v41 = vmul.f32 %v23905_v36, %v7126_v57  ;;  %v6358_v6 = vmul.f32 %v16014_v50, %v23947_v16  ;;  %v7207_v63 = vadd.f32 %v23906_v0, %v7167_v18  ;;  %v23958_v16 = vld [vmem:[#allocation84_spill] sm:$0xff] }
 0xcaf   :  { %v16016_v23 = vpop.eup %16015  ;;  %v6366_v37 = vmul.f32 %v16012_v5, %v23951_v8  ;;  %v6266_v12 = vmul.f32 0.015625, %v23952_v60  ;;  %v7308_v59 = vadd.f32 1.0, %v20807_v13  ;;  %16033 = vpow2.f32 %v12946_v45  ;;  %v23954_v13 = vld [vmem:[#allocation204_spill] sm:$0xff] }
 0xcb0   :  { %v7128_v28 = vmul.f32 %v16016_v23, %v23946_v58  ;;  %7517 = vrot.lane.b32.xlu0 %v7428_v54, %s16208_s4  ;;  %7515 = vrot.lane.b32.xlu1 %v7427_v17, %s16208_s4  ;;  %v7206_v35 = vadd.f32 %v23906_v0, %v7166_v41  ;;  %v16018_v52 = vpop.eup %16017  ;;  %16035 = vrsqrt.f32 %v6296_v39  ;;  %v6396_v14 = vmul.f32 %v20669_v33, %v6358_v6  ;;  %v23957_v58 = vld [vmem:[#allocation203_spill] sm:$0xff]  ;;  %v23962_v60 = vld [vmem:[#allocation76_spill] sm:$0xff] }
 0xcb1   :  { %v16020_v27 = vpop.eup %16019  ;;  %v7315_v20 = vadd.f32 1.0, %v16018_v52  ;;  %v6305_v11 = vadd.f32 1e-05, %v6273_v30  ;;  %16037 = vrcp.f32 %v7313_v44  ;;  %v7017_v29 = vmul.f32 0.015625, %v20693_v15 }
 0xcb2   :  { %v7430_v3 = vsub.f32 %v7206_v35, %v23949_v53  ;;  %v7168_v25 = vmul.f32 %v23905_v36, %v7128_v28  ;;  %v16022_v22 = vpop.eup %16021  ;;  %v7431_v46 = vsub.f32 %v7207_v63, %v23954_v13  ;;  %v7310_v7 = vadd.f32 1.0, %v16020_v27  ;;  %v23960_v53 = vld [vmem:[#allocation73_spill] sm:$0xff] }
 0xcb3   :  { %v16024_v61 = vpop.eup %16023  ;;  %v6404_v19 = vmul.f32 %v20669_v33, %v6366_v37  ;;  %v6298_v40 = vadd.f32 1e-05, %v6266_v12  ;;  %v6269_v56 = vmul.f32 0.015625, %v23955_v9  ;;  %16039 = vrcp.f32 %v7308_v59  ;;  %v23961_v27 = vld [vmem:[#allocation85_spill] sm:$0xff] }
 0xcb4   :  { %7521 = vrot.lane.b32.xlu0 %v7430_v3, %s16208_s4  ;;  %7519 = vrot.lane.b32.xlu1 %v7429_v32, %s16208_s4  ;;  %v7208_v10 = vadd.f32 %v23906_v0, %v7168_v25  ;;  %v20876_v49 = vpop.eup %16025  ;;  %16041 = vrcp.f32 %v7315_v20  ;;  %v7317_v57 = vadd.f32 1.0, %v16022_v22  ;;  %v7312_v24 = vadd.f32 1.0, %v16024_v61  ;;  %v23963_v22 = vld [vmem:[#allocation199_spill] sm:$0xff] }
 0xcb5   :  { %v16028_v15 = vpop.eup %16027  ;;  %16043 = vrsqrt.f32 %v6305_v11  ;;  %v6434_v5 = vadd.f32 %v20673_v21, %v6396_v14  ;;  %v7049_v47 = vadd.f32 1e-05, %v7017_v29  ;;  %v6301_v50 = vadd.f32 1e-05, %v6269_v56  ;;  %v23965_v56 = vld [vmem:[#allocation200_spill] sm:$0xff] }
 0xcb6   :  { %v7432_v62 = vsub.f32 %v7208_v10, %v23953_v43  ;;  %v20883_v42 = vpop.eup %16029  ;;  %16045 = vrcp.f32 %v7310_v7  ;;  %v6442_v51 = vadd.f32 %v20673_v21, %v6404_v19  ;;  %v7319_v54 = vadd.f32 1.0, %v16028_v15 }
 0xcb7   :  { %v16032_v17 = vpop.eup %16031  ;;  %16047 = vrsqrt.f32 %v6298_v40  ;;  %v6272_v18 = vmul.f32 0.015625, %v23956_v26  ;;  %v12948_v45 = vmul.f32 -1.442695, %v6434_v5  ;;  %v6275_v28 = vmul.f32 0.015625, %v23957_v58  ;;  %v23966_v5 = vld [vmem:[#allocation97_spill] sm:$0xff] }
 0xcb8   :  { %7525 = vrot.lane.b32.xlu0 %v7432_v62, %s16208_s4  ;;  %7523 = vrot.lane.b32.xlu1 %v7431_v46, %s16208_s4  ;;  %16049 = vrcp.f32 %v7317_v57  ;;  %v6367_v6 = vmul.f32 %v16032_v17, %v23958_v16  ;;  %v6274_v30 = vmul.f32 0.015625, %v23959_v1  ;;  %v12956_v44 = vmul.f32 -1.442695, %v6442_v51  ;;  %v23964_v46 = vld [vmem:[#allocation20_spill] sm:$0xff]  ;;  %v23967_v17 = vld [vmem:[#allocation202_spill] sm:$0xff]  ;;  %v20915_v51 = vpop.xlane.xlu1 %6203 }
 0xcb9   :  { %v16034_v41 = vpop.eup %16033  ;;  %16051 = vrcp.f32 %v7312_v24  ;;  %v6277_v3 = vmul.f32 0.015625, %v23960_v53  ;;  %v6304_v37 = vadd.f32 1e-05, %v6272_v18  ;;  %v6279_v12 = vmul.f32 0.015625, %v23962_v60 }
 0xcba   :  { %v16036_v39 = vpop.eup %16035  ;;  %16053 = vrsqrt.f32 %v7049_v47  ;;  %v7314_v25 = vadd.f32 1.0, %v16034_v41  ;;  %v6307_v20 = vadd.f32 1e-05, %v6275_v28  ;;  %v6276_v14 = vmul.f32 0.015625, %v23963_v22  ;;  %v23971_v22 = vld [vmem:[#allocation87_spill] sm:$0xff] }
 0xcbb   :  { %v20888_v52 = vpop.eup %16037  ;;  %16055 = vrsqrt.f32 %v6301_v50  ;;  %v6360_v8 = vmul.f32 %v16036_v39, %v23961_v27  ;;  %v6405_v61 = vmul.f32 %v20669_v33, %v6367_v6  ;;  %v6306_v29 = vadd.f32 1e-05, %v6274_v30 }
 0xcbc   :  { %16057 = vrcp.f32 %v7319_v54  ;;  %v7018_v43 = vmul.f32 0.015625, %v20728_v55  ;;  %v6309_v13 = vadd.f32 1e-05, %v6277_v3  ;;  %v6281_v7 = vmul.f32 0.015625, %v23964_v46 }
 0xcbd   :  { %v6999_v23 = vpop.xlane.xlu0 %6998  ;;  %v16040_v63 = vpop.eup %16039  ;;  %16059 = vpow2.f32 %v12948_v45  ;;  %v6398_v40 = vmul.f32 %v20669_v33, %v6360_v8  ;;  %v6311_v9 = vadd.f32 1e-05, %v6279_v12  ;;  %v6278_v57 = vmul.f32 0.015625, %v23965_v56  ;;  %v23970_v12 = vld [vmem:[#allocation127_spill] sm:$0xff] }
 0xcbe   :  { %v7033_v35 = vmul.f32 0.015625, %v6999_v23  ;;  %v20899_v10 = vpop.eup %16041  ;;  %v6308_v47 = vadd.f32 1e-05, %v6276_v14  ;;  %v6280_v50 = vmul.f32 0.015625, %v23967_v17  ;;  %v7050_v41 = vadd.f32 1e-05, %v7018_v43 }
 0xcbf   :  { %v16044_v11 = vpop.eup %16043  ;;  %v6443_v26 = vadd.f32 %v20673_v21, %v6405_v61  ;;  %v23968_v23 = vld [vmem:[#allocation13_spill] sm:$0xff]  ;;  %v6313_v39 = vadd.f32 1e-05, %v6281_v7  ;;  %v6310_v28 = vadd.f32 1e-05, %v6278_v57  ;;  %v6436_v16 = vadd.f32 %v20673_v21, %v6398_v40 }
 0xcc0   :  { %v7065_v32 = vadd.f32 1e-05, %v7033_v35  ;;  %v20904_v62 = vpop.eup %16045  ;;  %v6369_v55 = vmul.f32 %v16044_v11, %v23966_v5  ;;  %v6312_v30 = vadd.f32 1e-05, %v6280_v50  ;;  %v23972_v61 = vld [vmem:[#allocation93_spill] sm:$0xff] }
 0xcc1   :  { %v20897_v59 = vpop.xlane.xlu0 %6248  ;;  %v16048_v19 = vpop.eup %16047  ;;  %v12957_v8 = vmul.f32 -1.442695, %v6443_v26 }
 0xcc2   :  { %16061 = vrsqrt.f32 %v7065_v32  ;;  %v20911_v24 = vpop.eup %16049  ;;  %v6362_v45 = vmul.f32 %v16048_v19, %v23968_v23  ;;  %v6407_v1 = vmul.f32 %v20669_v33, %v6369_v55  ;;  %v23969_v32 = vld [vmem:[#allocation34_spill] sm:$0xff]  ;;  %v12950_v19 = vmul.f32 -1.442695, %v6436_v16 }
 0xcc3   :  { %16063 = vpow2.f32 %v12956_v44  ;;  %v20917_v54 = vpop.eup %16051 }
 0xcc4   :  { %16065 = vrcp.f32 %v7314_v25  ;;  %v16054_v18 = vpop.eup %16053  ;;  %v6400_v60 = vmul.f32 %v20669_v33, %v6362_v45  ;;  %v6445_v40 = vadd.f32 %v20673_v21, %v6407_v1 }
 0xcc5   :  { %16067 = vrsqrt.f32 %v6304_v37  ;;  %v20909_v15 = vpop.xlane.xlu0 %6200  ;;  %v16056_v58 = vpop.eup %16055  ;;  %v7113_v25 = vmul.f32 %v16054_v18, %v23969_v32 }
 0xcc6   :  { %16069 = vrsqrt.f32 %v6307_v20  ;;  %v20922_v6 = vpop.eup %16057  ;;  %v6365_v20 = vmul.f32 %v16056_v58, %v23970_v12  ;;  %v6438_v26 = vadd.f32 %v20673_v21, %v6400_v60  ;;  %v12959_v16 = vmul.f32 -1.442695, %v6445_v40  ;;  %v23977_v21 = vld [vmem:[#allocation219_spill] sm:$0xff]  ;;  %v23978_v60 = vld [vmem:[#allocation129_spill] sm:$0xff] }
 0xcc7   :  { %16071 = vrsqrt.f32 %v6306_v29  ;;  %v16060_v3 = vpop.eup %16059  ;;  %v23973_v29 = vld [vmem:[#allocation14_spill] sm:$0xff]  ;;  %v7153_v5 = vmul.f32 %v23905_v36, %v7113_v25 }
 0xcc8   :  { %16073 = vrsqrt.f32 %v6309_v13  ;;  %v12952_v25 = vmul.f32 -1.442695, %v6438_v26 }
 0xcc9   :  { %16075 = vrsqrt.f32 %v6311_v9  ;;  %v7470_v35 = vpop.permute.xlu0 %7469 }
 0xcca   :  { %16077 = vrsqrt.f32 %v6308_v47  ;;  %v7564_v44 = vmul.f32 %v16040_v63, %v7470_v35  ;;  %v7002_v53 = vpop.xlane.xlu1 %7001  ;;  %v6282_v63 = vmul.f32 0.015625, %v23972_v61  ;;  %v20941_v47 = vld [vmem:[%s20659_s20] ss:$0 sm:$0xff]  ;;  %s12923_s20 = sld [smem:[%s22276_s0 + %s16229_s17]]  }
 0xccb   :  { %16079 = vrsqrt.f32 %v7050_v41  ;;  %v7034_v27 = vmul.f32 0.015625, %v7002_v53  ;;  %v6403_v17 = vmul.f32 %v20941_v47, %v6365_v20  ;;  %v7316_v41 = vadd.f32 1.0, %v16060_v3 }
 0xccc   :  { %v16062_v37 = vpop.eup %16061  ;;  %16081 = vrsqrt.f32 %v6313_v39  ;;  %v20929_v14 = vadd.f32 %v7564_v44, %v23971_v22  ;;  %v6314_v23 = vadd.f32 1e-05, %v6282_v63  ;;  %v7193_v3 = vadd.f32 %v23906_v0, %v7153_v5 }
 0xccd   :  { %v16064_v11 = vpop.eup %16063  ;;  %16083 = vrsqrt.f32 %v6310_v28  ;;  %v7129_v43 = vmul.f32 %v16062_v37, %v23973_v29  ;;  %v7066_v13 = vadd.f32 1e-05, %v7034_v27  ;;  %v23976_v28 = vld [vmem:[#allocation27_spill] sm:$0xff]  ;;  %v20960_v27 = vld [vmem:[%s20664_s24] ss:$0 sm:$0xff]  ;;  %s12921_s24 = sld [smem:[%s22276_s0 + %s16230_s21]]  }
 0xcce   :  { %v20933_v46 = vpop.eup %16065  ;;  %16085 = vrsqrt.f32 %v6312_v30  ;;  %v22838_v7 = vand.u32 4294901760, %v20929_v14  ;;  %v7468_v33 = vpop.permute.xlu1 %7467  ;;  %v7324_v22 = vadd.f32 1.0, %v16064_v11  ;;  %v23980_v29 = vld [vmem:[#allocation62_spill] sm:$0xff]  ;;  %v23983_v11 = vld [vmem:[#allocation28_spill] sm:$0xff] }
 0xccf   :  { %v16068_v9 = vpop.eup %16067  ;;  %16087 = vrsqrt.f32 %v7066_v13  ;;  %v7563_v56 = vmul.f32 %v20734_v48, %v7468_v33  ;;  %v7169_v57 = vmul.f32 %v23905_v36, %v7129_v43  ;;  %v23975_v48 = vld [vmem:[#allocation91_spill] sm:$0xff]  ;;  %v23981_v13 = vld [vmem:[#allocation130_spill] sm:$0xff] }
 0xcd0   :  { %v16070_v55 = vpop.eup %16069  ;;  %v20947_v50 = vsub.f32 %v20929_v14, %v22838_v7  ;;  %16089 = vpow2.f32 %v12957_v8  ;;  %v6368_v35 = vmul.f32 %v16068_v9, %v23976_v28  ;;  %v6441_v8 = vadd.f32 %v20960_v27, %v6403_v17 }
 0xcd1   :  { %v16072_v18 = vpop.eup %16071  ;;  %v20951_v45 = vadd.f32 %v7563_v56, %v23975_v48  ;;  %v7209_v39 = vadd.f32 %v23906_v0, %v7169_v57  ;;  %16091 = vpow2.f32 %v12950_v19  ;;  %v6371_v12 = vmul.f32 %v16070_v55, %v23978_v60  ;;  %v23982_v56 = vld [vmem:[#allocation42_spill] sm:$0xff]  ;;  %v23989_v60 = vld [vmem:[#allocation16_spill] sm:$0xff] }
 0xcd2   :  { %23974 = vst [vmem:[#allocation29_spill] sm:$0xff] %v20947_v50  ;;  %v16074_v58 = vpop.eup %16073  ;;  %v7802_v30 = vand.u32 4294901760, %v20947_v50  ;;  %16093 = vrcp.f32 %v7316_v41  ;;  %v6406_v63 = vmul.f32 %v20941_v47, %v6368_v35  ;;  %v6370_v43 = vmul.f32 %v16072_v18, %v23980_v29  ;;  %v23984_v41 = vld [vmem:[#allocation147_spill] sm:$0xff] }
 0xcd3   :  { %v16076_v1 = vpop.eup %16075  ;;  %v22840_v44 = vand.u32 4294901760, %v20951_v45  ;;  %v7433_v53 = vsub.f32 %v7209_v39, %v23977_v21  ;;  %16095 = vrsqrt.f32 %v6314_v23  ;;  %v6373_v33 = vmul.f32 %v16074_v58, %v23981_v13  ;;  %v23985_v39 = vld [vmem:[#allocation132_spill] sm:$0xff]  ;;  %v23987_v21 = vld [vmem:[#allocation11_spill] sm:$0xff] }
 0xcd4   :  { %v16078_v32 = vpop.eup %16077  ;;  %16097 = vpow2.f32 %v12959_v16  ;;  %v7803_v40 = vsub.f32 %v20947_v50, %v7802_v30  ;;  %v7417_v57 = vsub.f32 %v7193_v3, %v23982_v56  ;;  %v6375_v17 = vmul.f32 %v16076_v1, %v23983_v11  ;;  %v23988_v1 = vld [vmem:[#allocation92_spill] sm:$0xff] }
 0xcd5   :  { %v16080_v37 = vpop.eup %16079  ;;  %v20967_v20 = vsub.f32 %v20951_v45, %v22840_v44  ;;  %7527 = vrot.lane.b32.xlu1 %v7433_v53, %s16208_s4  ;;  %16099 = vpow2.f32 %v12952_v25  ;;  %v12955_v18 = vmul.f32 -1.442695, %v6441_v8  ;;  %v6409_v48 = vmul.f32 %v20941_v47, %v6371_v12 }
 0xcd6   :  { %v16082_v61 = vpop.eup %16081  ;;  %v7114_v26 = vmul.f32 %v16080_v37, %v23984_v41  ;;  %v6372_v58 = vmul.f32 %v16078_v32, %v23985_v39  ;;  %v6408_v16 = vmul.f32 %v20941_v47, %v6370_v43  ;;  %v6444_v25 = vadd.f32 %v20960_v27, %v6406_v63 }
 0xcd7   :  { %23979 = vst [vmem:[#allocation153_spill] sm:$0xff] %v20967_v20  ;;  %v16084_v19 = vpop.eup %16083  ;;  %v7795_v9 = vand.u32 4294901760, %v20967_v20  ;;  %v6411_v37 = vmul.f32 %v20941_v47, %v6373_v33  ;;  %v6377_v12 = vmul.f32 %v16082_v61, %v23989_v60  ;;  %v7804_v29 = vand.u32 4294901760, %v7803_v40 }
 0xcd8   :  { %v16086_v55 = vpop.eup %16085  ;;  %v6374_v53 = vmul.f32 %v16084_v19, %v23987_v21  ;;  %v6413_v56 = vmul.f32 %v20941_v47, %v6375_v17  ;;  %v7154_v19 = vmul.f32 %v23905_v36, %v7114_v26  ;;  %16101 = vpow2.f32 %v12955_v18 }
 0xcd9   :  { %v16088_v23 = vpop.eup %16087  ;;  %v7796_v28 = vsub.f32 %v20967_v20, %v7795_v9  ;;  %7495 = vrot.lane.b32.xlu1 %v7417_v57, %s16208_s4  ;;  %v20984_v35 = vpack.c.bf16 %v7802_v30, %v7795_v9  ;;  %v23990_v30 = vld [vmem:[#allocation138_spill] sm:$0xff]  ;;  %v6410_v57 = vmul.f32 %v20941_v47, %v6372_v58  ;;  %v6447_v63 = vadd.f32 %v20960_v27, %v6409_v48 }
 0xcda   :  { %v7130_v3 = vmul.f32 %v16088_v23, %v23988_v1  ;;  %v16090_v8 = vpop.eup %16089  ;;  %v6376_v9 = vmul.f32 %v16086_v55, %v23990_v30  ;;  %v6412_v61 = vmul.f32 %v20941_v47, %v6374_v53  ;;  %v12958_v17 = vmul.f32 -1.442695, %v6444_v25  ;;  %v23991_v58 = vld [vmem:[#allocation214_spill] sm:$0xff]  ;;  %v23992_v25 = vld [vmem:[#allocation4_spill] sm:$0xff] }
 0xcdb   :  { %23986 = vst [vmem:[#allocation157_spill] sm:$0xff] %v20984_v35  ;;  %v7797_v32 = vand.u32 4294901760, %v7796_v28  ;;  %v16092_v13 = vpop.eup %16091  ;;  %v6446_v55 = vadd.f32 %v20960_v27, %v6408_v16  ;;  %v6415_v23 = vmul.f32 %v20941_v47, %v6377_v12  ;;  %v7325_v26 = vadd.f32 1.0, %v16090_v8 }
 0xcdc   :  { %v7170_v43 = vmul.f32 %v23905_v36, %v7130_v3  ;;  %v21000_v33 = vpop.eup %16093  ;;  %v7318_v36 = vadd.f32 1.0, %v16092_v13  ;;  %v6449_v18 = vadd.f32 %v20960_v27, %v6411_v37  ;;  %v6414_v48 = vmul.f32 %v20941_v47, %v6376_v9 }
 0xcdd   :  { %v20998_v11 = vpack.c.bf16 %v7804_v29, %v7797_v32  ;;  %v16096_v41 = vpop.eup %16095  ;;  %v7194_v21 = vadd.f32 %v23906_v0, %v7154_v19  ;;  %v6451_v53 = vadd.f32 %v20960_v27, %v6413_v56  ;;  %16103 = vrcp.f32 %v7324_v22 }
 0xcde   :  { %v7210_v40 = vadd.f32 %v23906_v0, %v7170_v43  ;;  %v16098_v39 = vpop.eup %16097  ;;  %v12961_v1 = vmul.f32 -1.442695, %v6447_v63  ;;  %v6448_v16 = vadd.f32 %v20960_v27, %v6410_v57  ;;  %v6378_v60 = vmul.f32 %v16096_v41, %v23992_v25  ;;  %v23993_v0 = vld [vmem:[#allocation162_spill] sm:$0xff] }
 0xcdf   :  { %v16100_v3 = vpop.eup %16099  ;;  %16105 = vpow2.f32 %v12958_v17  ;;  %v12960_v8 = vmul.f32 -1.442695, %v6446_v55  ;;  %v6450_v37 = vadd.f32 %v20960_v27, %v6412_v61  ;;  %v12963_v12 = vmul.f32 -1.442695, %v6449_v18 }
 0xce0   :  { %v7434_v28 = vsub.f32 %v7210_v40, %v23991_v58  ;;  %16107 = vrcp.f32 %v7325_v26  ;;  %v6453_v32 = vadd.f32 %v20960_v27, %v6415_v23  ;;  %v7418_v29 = vsub.f32 %v7194_v21, %v23993_v0 }
 0xce1   :  { %16109 = vrcp.f32 %v7318_v36  ;;  %v12965_v22 = vmul.f32 -1.442695, %v6451_v53  ;;  %v6452_v13 = vadd.f32 %v20960_v27, %v6414_v48  ;;  %v12962_v56 = vmul.f32 -1.442695, %v6448_v16  ;;  %v7628_v36 = vld [vmem:[%s21021_s28 + $0x8] sm:$0xff] }
 0xce2   :  { %7529 = vrot.lane.b32.xlu0 %v7434_v28, %s16208_s4  ;;  %16111 = vpow2.f32 %v12961_v1  ;;  %v6416_v30 = vmul.f32 %v20941_v47, %v6378_v60  ;;  %v12964_v9 = vmul.f32 -1.442695, %v6450_v37  ;;  %v16102_v43 = vpop.eup %16101  ;;  %v12967_v19 = vmul.f32 -1.442695, %v6453_v32  ;;  %v23995_v28 = vld [vmem:[#allocation95_spill] sm:$0xff] }
 0xce3   :  { %16113 = vpow2.f32 %v12960_v8  ;;  %v6284_v57 = vmul.f32 0.015625, %v20893_v31  ;;  %v12966_v63 = vmul.f32 -1.442695, %v6452_v13  ;;  %v6283_v61 = vmul.f32 0.015625, %v20897_v59 }
 0xce4   :  { %16115 = vpow2.f32 %v12963_v12  ;;  %v7327_v17 = vadd.f32 1.0, %v16098_v39  ;;  %v7320_v41 = vadd.f32 1.0, %v16100_v3  ;;  %v6454_v23 = vadd.f32 %v20960_v27, %v6416_v30 }
 0xce5   :  { %16117 = vpow2.f32 %v12965_v22  ;;  %v7323_v18 = vadd.f32 1.0, %v16102_v43  ;;  %v21032_v48 = vand.u32 4294901760, %v7628_v36  ;;  %v6316_v58 = vadd.f32 1e-05, %v6284_v57 }
 0xce6   :  { %7497 = vrot.lane.b32.xlu0 %v7418_v29, %s16208_s4  ;;  %16119 = vpow2.f32 %v12962_v56  ;;  %v6267_v59 = vmul.f32 0.015625, %v20909_v15  ;;  %v6268_v21 = vmul.f32 0.015625, %v20915_v51  ;;  %v6315_v53 = vadd.f32 1e-05, %v6283_v61  ;;  %v23997_v29 = vld [vmem:[#allocation99_spill] sm:$0xff]  ;;  %s12918_s4 = sld [smem:[%s22276_s0 + %s16225_s1]]  }
 0xce7   :  { %16121 = vpow2.f32 %v12964_v9  ;;  %v21030_v26 = vpop.eup %16103  ;;  %23994 = vst [vmem:[#allocation154_spill] sm:$0xff] %v21032_v48  ;;  %v21042_v16 = vsub.f32 %v7628_v36, %v21032_v48  ;;  %v12968_v60 = vmul.f32 -1.442695, %v6454_v23 }
 0xce8   :  { %16123 = vpow2.f32 %v12967_v19  ;;  %v6299_v32 = vadd.f32 1e-05, %v6267_v59 }
 0xce9   :  { %v7472_v40 = vpop.permute.xlu1 %7471  ;;  %v16106_v31 = vpop.eup %16105  ;;  %16125 = vpow2.f32 %v12966_v63  ;;  %23996 = vst [vmem:[#allocation89_spill] sm:$0xff] %v21042_v16  ;;  %v22824_v12 = vand.u32 4294901760, %v21042_v16 }
 0xcea   :  { %v7565_v55 = vmul.f32 %v20876_v49, %v7472_v40  ;;  %v21038_v49 = vpop.eup %16107  ;;  %16127 = vrcp.f32 %v7327_v17  ;;  %v7326_v37 = vadd.f32 1.0, %v16106_v31 }
 0xceb   :  { %v21044_v3 = vpop.eup %16109  ;;  %16129 = vrcp.f32 %v7320_v41  ;;  %v7734_v30 = vsub.f32 %v21042_v16, %v22824_v12  ;;  %v23998_v41 = vld [vmem:[#allocation100_spill] sm:$0xff] }
 0xcec   :  { %v21036_v39 = vadd.f32 %v7565_v55, %v23995_v28  ;;  %v16112_v8 = vpop.eup %16111  ;;  %16131 = vrcp.f32 %v7323_v18 }
 0xced   :  { %v7476_v1 = vpop.permute.xlu1 %7475  ;;  %v16114_v51 = vpop.eup %16113  ;;  %16133 = vrsqrt.f32 %v6316_v58  ;;  %v7329_v57 = vadd.f32 1.0, %v16112_v8  ;;  %v7735_v40 = vand.u32 4294901760, %v7734_v30 }
 0xcee   :  { %v22835_v25 = vand.u32 4294901760, %v21036_v39  ;;  %v7567_v15 = vmul.f32 %v20883_v42, %v7476_v1  ;;  %v16116_v13 = vpop.eup %16115  ;;  %v6300_v42 = vadd.f32 1e-05, %v6268_v21  ;;  %16135 = vrsqrt.f32 %v6315_v53 }
 0xcef   :  { %v16118_v9 = vpop.eup %16117  ;;  %16137 = vpow2.f32 %v12968_v60  ;;  %v7328_v61 = vadd.f32 1.0, %v16114_v51  ;;  %v7331_v36 = vadd.f32 1.0, %v16116_v13  ;;  %7736 = vmatprep.mubr.f32.mxu0 %v7735_v40  ;;  %v23999_v51 = vld [vmem:[#allocation102_spill] sm:$0xff] }
 0xcf0   :  { %v21052_v0 = vsub.f32 %v21036_v39, %v22835_v25  ;;  %v21055_v22 = vadd.f32 %v7567_v15, %v23997_v29  ;;  %v16120_v63 = vpop.eup %16119  ;;  %16139 = vrcp.f32 %v7326_v37  ;;  %v7333_v31 = vadd.f32 1.0, %v16118_v9  ;;  %v24000_v13 = vld [vmem:[#allocation94_spill] sm:$0xff] }
 0xcf1   :  { %v7480_v56 = vpop.permute.xlu1 %7479  ;;  %v16122_v17 = vpop.eup %16121  ;;  %16141 = vrsqrt.f32 %v6299_v32  ;;  %v7330_v53 = vadd.f32 1.0, %v16120_v63 }
 0xcf2   :  { %v22829_v43 = vand.u32 4294901760, %v21055_v22  ;;  %v7569_v19 = vmul.f32 %v20888_v52, %v7480_v56  ;;  %v16124_v18 = vpop.eup %16123  ;;  %16143 = vrsqrt.f32 %v6300_v42  ;;  %v7332_v60 = vadd.f32 1.0, %v16122_v17 }
 0xcf3   :  { %v16126_v58 = vpop.eup %16125  ;;  %16145 = vrcp.f32 %v7329_v57 }
 0xcf4   :  { %v21065_v55 = vsub.f32 %v21055_v22, %v22829_v43  ;;  %v21068_v23 = vadd.f32 %v7569_v19, %v23998_v41  ;;  %v21072_v1 = vpop.eup %16127  ;;  %16147 = vrcp.f32 %v7328_v61  ;;  %v7334_v56 = vadd.f32 1.0, %v16126_v58 }
 0xcf5   :  { %v7484_v52 = vpop.permute.xlu1 %7483  ;;  %v21075_v8 = vpop.eup %16129  ;;  %16149 = vrcp.f32 %v7331_v36  ;;  %v22832_v41 = vand.u32 4294901760, %v21052_v0 }
 0xcf6   :  { %v22827_v59 = vand.u32 4294901760, %v21068_v23  ;;  %v7571_v28 = vmul.f32 %v20899_v10, %v7484_v52  ;;  %v7474_v21 = vpop.permute.xlu0 %7473  ;;  %v7335_v10 = vadd.f32 1.0, %v16124_v18  ;;  %v21085_v29 = vpop.eup %16131  ;;  %16151 = vrcp.f32 %v7333_v31  ;;  %v24001_v18 = vld [vmem:[#allocation104_spill] sm:$0xff] }
 0xcf7   :  { %v7566_v15 = vmul.f32 %v20904_v62, %v7474_v21  ;;  %v16134_v30 = vpop.eup %16133  ;;  %16153 = vrcp.f32 %v7330_v53 }
 0xcf8   :  { %v21080_v37 = vsub.f32 %v21068_v23, %v22827_v59  ;;  %v21083_v32 = vadd.f32 %v7571_v28, %v23999_v51  ;;  %v16136_v63 = vpop.eup %16135  ;;  %16155 = vrcp.f32 %v7332_v60  ;;  %v6380_v53 = vmul.f32 %v16134_v30, %v20615_v2 }
 0xcf9   :  { %v21088_v42 = vadd.f32 %v7566_v15, %v24000_v13  ;;  %v7488_v62 = vpop.permute.xlu1 %7487  ;;  %v16138_v17 = vpop.eup %16137  ;;  %16157 = vrcp.f32 %v7335_v10  ;;  %v6379_v15 = vmul.f32 %v16136_v63, %v20631_v38  ;;  %v7810_v2 = vsub.f32 %v21052_v0, %v22832_v41 }
 0xcfa   :  { %v22826_v9 = vand.u32 4294901760, %v21083_v32  ;;  %v7573_v19 = vmul.f32 %v20911_v24, %v7488_v62  ;;  %v7478_v57 = vpop.permute.xlu0 %7477  ;;  %v21103_v24 = vpop.eup %16139  ;;  %16159 = vrcp.f32 %v7334_v56  ;;  %v22831_v38 = vand.u32 4294901760, %v21065_v55  ;;  %v24004_v56 = vld [vmem:[#allocation107_spill] sm:$0xff] }
 0xcfb   :  { %v22834_v61 = vand.u32 4294901760, %v21088_v42  ;;  %v7568_v40 = vmul.f32 %v20917_v54, %v7478_v57  ;;  %v24002_v54 = vld [vmem:[#allocation98_spill] sm:$0xff]  ;;  %v16142_v21 = vpop.eup %16141 }
 0xcfc   :  { %v21098_v36 = vsub.f32 %v21083_v32, %v22826_v9  ;;  %v21101_v52 = vadd.f32 %v7573_v19, %v24001_v18  ;;  %v16144_v13 = vpop.eup %16143 }
 0xcfd   :  { %v21108_v31 = vsub.f32 %v21088_v42, %v22834_v61  ;;  %v21111_v58 = vadd.f32 %v7568_v40, %v24002_v54  ;;  %v7492_v28 = vpop.permute.xlu1 %7491  ;;  %v7336_v40 = vadd.f32 1.0, %v16138_v17  ;;  %v21120_v18 = vpop.eup %16145 }
 0xcfe   :  { %v22825_v60 = vand.u32 4294901760, %v21101_v52  ;;  %v7575_v51 = vmul.f32 %v20922_v6, %v7492_v28  ;;  %v7482_v10 = vpop.permute.xlu0 %7481  ;;  %v21134_v63 = vpop.eup %16147  ;;  %v24005_v28 = vld [vmem:[#allocation101_spill] sm:$0xff] }
 0xcff   :  { %v22830_v62 = vand.u32 4294901760, %v21108_v31  ;;  %v22828_v19 = vand.u32 4294901760, %v21111_v58  ;;  %v7570_v57 = vmul.f32 %v20933_v46, %v7482_v10  ;;  %v6363_v46 = vmul.f32 %v16142_v21, %v20634_v34  ;;  %v21148_v12 = vpop.eup %16149 }
 0xd00   :  { %v21129_v6 = vsub.f32 %v21101_v52, %v22825_v60  ;;  %v21132_v30 = vadd.f32 %v7575_v51, %v24004_v56  ;;  %v6418_v51 = vmul.f32 %v20941_v47, %v6380_v53  ;;  %v6364_v56 = vmul.f32 %v16144_v13, %v20619_v4  ;;  %v21154_v60 = vpop.eup %16151 }
 0xd01   :  { %v7817_v17 = vsub.f32 %v21108_v31, %v22830_v62  ;;  %v21143_v54 = vsub.f32 %v21111_v58, %v22828_v19  ;;  %v21146_v10 = vadd.f32 %v7570_v57, %v24005_v28  ;;  %v6417_v34 = vmul.f32 %v20941_v47, %v6379_v15  ;;  %v21159_v19 = vpop.eup %16153 }
 0xd02   :  { %24003 = vst [vmem:[#allocation19_spill] sm:$0xff] %v21129_v6  ;;  %v22833_v21 = vand.u32 4294901760, %v21132_v30  ;;  %v7486_v5 = vpop.permute.xlu0 %7485  ;;  %v7824_v4 = vsub.f32 %v21065_v55, %v22831_v38  ;;  %v22839_v53 = vand.u32 4294901760, %v21080_v37  ;;  %v7811_v13 = vand.u32 4294901760, %v7810_v2  ;;  %v21170_v43 = vpop.eup %16155 }
 0xd03   :  { %v22836_v9 = vand.u32 4294901760, %v21143_v54  ;;  %v22837_v59 = vand.u32 4294901760, %v21146_v10  ;;  %v7572_v57 = vmul.f32 %v21000_v33, %v7486_v5  ;;  %v7818_v28 = vand.u32 4294901760, %v7817_v17  ;;  %v24007_v17 = vld [vmem:[#allocation103_spill] sm:$0xff]  ;;  %v21184_v41 = vpop.eup %16157 }
 0xd04   :  { %v21168_v15 = vsub.f32 %v21132_v30, %v22833_v21  ;;  %v6401_v62 = vmul.f32 %v20941_v47, %v6363_v46  ;;  %16161 = vrcp.f32 %v7336_v40  ;;  %v6455_v2 = vadd.f32 %v20960_v27, %v6417_v34  ;;  %v21190_v25 = vpop.eup %16159 }
 0xd05   :  { %v7831_v5 = vsub.f32 %v21143_v54, %v22836_v9  ;;  %v21179_v33 = vsub.f32 %v21146_v10, %v22837_v59  ;;  %v21182_v38 = vadd.f32 %v7572_v57, %v24007_v17  ;;  %v6456_v46 = vadd.f32 %v20960_v27, %v6418_v51 }
 0xd06   :  { %24006 = vst [vmem:[#allocation35_spill] sm:$0xff] %v21168_v15  ;;  %v7490_v21 = vpop.permute.xlu0 %7489  ;;  %v21188_v61 = vpack.c.bf16 %v7818_v28, %v7811_v13  ;;  %v6402_v17 = vmul.f32 %v20941_v47, %v6364_v56  ;;  %v7838_v40 = vsub.f32 %v21080_v37, %v22839_v53  ;;  %v7851_v34 = vand.u32 4294901760, %v21098_v36 }
 0xd07   :  { %v22841_v9 = vand.u32 4294901760, %v21179_v33  ;;  %v22842_v59 = vand.u32 4294901760, %v21182_v38  ;;  %v7574_v7 = vmul.f32 %v21044_v3, %v7490_v21  ;;  %v7832_v57 = vand.u32 4294901760, %v7831_v5  ;;  %v24009_v3 = vld [vmem:[#allocation105_spill] sm:$0xff] }
 0xd08   :  { %24008 = vst [vmem:[#allocation88_spill] sm:$0xff] %v21188_v61  ;;  %v7825_v51 = vand.u32 4294901760, %v7824_v4  ;;  %v6439_v47 = vadd.f32 %v20960_v27, %v6401_v62  ;;  %v7865_v56 = vand.u32 4294901760, %v21129_v6  ;;  %v12969_v53 = vmul.f32 -1.442695, %v6455_v2 }
 0xd09   :  { %v7845_v28 = vsub.f32 %v21179_v33, %v22841_v9  ;;  %v21206_v13 = vsub.f32 %v21182_v38, %v22842_v59  ;;  %v21209_v21 = vadd.f32 %v7574_v7, %v24009_v3  ;;  %v21213_v44 = vmul.f32 -1.442695, %v6456_v46 }
 0xd0a   :  { %v7494_v5 = vpop.permute.xlu0 %7493  ;;  %v21215_v4 = vpack.c.bf16 %v7832_v57, %v7825_v51  ;;  %v7852_v7 = vsub.f32 %v21098_v36, %v7851_v34  ;;  %v21222_v3 = vadd.f32 %v20960_v27, %v6402_v17  ;;  %v7839_v62 = vand.u32 4294901760, %v7838_v40  ;;  %v24011_v51 = vld [vmem:[#allocation106_spill] sm:$0xff] }
 0xd0b   :  { %v7858_v9 = vand.u32 4294901760, %v21206_v13  ;;  %v22847_v35 = vand.u32 4294901760, %v21209_v21  ;;  %v7576_v59 = vmul.f32 %v21075_v8, %v7494_v5  ;;  %v7846_v16 = vand.u32 4294901760, %v7845_v28 }
 0xd0c   :  { %24010 = vst [vmem:[#allocation169_spill] sm:$0xff] %v21215_v4  ;;  %v12953_v8 = vmul.f32 -1.442695, %v6439_v47  ;;  %v24012_v28 = vand.u32 4294901760, %v20951_v45  ;;  %v24013_v27 = vand.u32 4294901760, %v20929_v14  ;;  %v7866_v40 = vsub.f32 %v21129_v6, %v7865_v56 }
 0xd0d   :  { %v7859_v46 = vsub.f32 %v21206_v13, %v7858_v9  ;;  %v21230_v57 = vsub.f32 %v21209_v21, %v22847_v35  ;;  %v21233_v20 = vadd.f32 %v7576_v59, %v24011_v51  ;;  %16163 = vpow2.f32 %v12969_v53 }
 0xd0e   :  { %v21239_v17 = vpack.c.bf16 %v24013_v27, %v24012_v28  ;;  %v7500_v5 = vpop.permute.xlu0 %7499  ;;  %v21242_v2 = vpack.c.bf16 %v7846_v16, %v7839_v62  ;;  %v21247_v47 = vpop.eup %16161  ;;  %v7879_v45 = vand.u32 4294901760, %v21168_v15  ;;  %v7853_v14 = vand.u32 4294901760, %v7852_v7  ;;  %v24017_v27 = vld [vmem:[#allocation110_spill] sm:$0xff] }
 0xd0f   :  { %v7872_v50 = vand.u32 4294901760, %v21230_v57  ;;  %v7675_v35 = vand.u32 4294901760, %v21233_v20  ;;  %v7579_v59 = vmul.f32 %v21085_v29, %v7500_v5  ;;  %v7860_v51 = vand.u32 4294901760, %v7859_v46 }
 0xd10   :  { %24014 = vst [vmem:[#allocation170_spill] sm:$0xff] %v21239_v17  ;;  %24015 = vst [vmem:[#allocation36_spill] sm:$0xff] %v21242_v2  ;;  %16165 = vpow2.f32 %v12953_v8  ;;  %v24018_v29 = vand.u32 4294901760, %v21036_v39  ;;  %v24019_v46 = vand.u32 4294901760, %v21088_v42  ;;  %v7867_v28 = vand.u32 4294901760, %v7866_v40 }
 0xd11   :  { %v7873_v16 = vsub.f32 %v21230_v57, %v7872_v50  ;;  %v21256_v62 = vsub.f32 %v21233_v20, %v7675_v35  ;;  %v7611_v48 = vadd.f32 %v7579_v59, %v24017_v27  ;;  %v21265_v2 = vpack.c.bf16 %v7860_v51, %v7853_v14 }
 0xd12   :  { %v21263_v5 = vpack.c.bf16 %v24019_v46, %v24018_v29  ;;  %v7502_v7 = vpop.permute.xlu1 %7501  ;;  %v7880_v8 = vsub.f32 %v21168_v15, %v7879_v45  ;;  %v24021_v51 = vand.u32 4294901760, %v21052_v0  ;;  %v24022_v40 = vand.u32 4294901760, %v21108_v31 }
 0xd13   :  { %24016 = vst [vmem:[#allocation171_spill] sm:$0xff] %v21256_v62  ;;  %v7886_v4 = vand.u32 4294901760, %v21256_v62  ;;  %v7684_v20 = vand.u32 4294901760, %v7611_v48  ;;  %v7580_v61 = vmul.f32 %v21030_v26, %v7502_v7  ;;  %v7874_v59 = vand.u32 4294901760, %v7873_v16  ;;  %v24024_v26 = vld [vmem:[#allocation111_spill] sm:$0xff] }
 0xd14   :  { %24020 = vst [vmem:[#allocation176_spill] sm:$0xff] %v21263_v5  ;;  %v21280_v14 = vpack.c.bf16 %v24022_v40, %v24021_v51  ;;  %v24025_v39 = vand.u32 4294901760, %v21065_v55  ;;  %v24026_v42 = vand.u32 4294901760, %v21143_v54  ;;  %v24028_v6 = vand.u32 4294901760, %v21080_v37 }
 0xd15   :  { %v7887_v27 = vsub.f32 %v21256_v62, %v7886_v4  ;;  %v21283_v29 = vsub.f32 %v7611_v48, %v7684_v20  ;;  %v7612_v16 = vadd.f32 %v7580_v61, %v24024_v26  ;;  %v21286_v46 = vpack.c.bf16 %v7874_v59, %v7867_v28 }
 0xd16   :  { %24023 = vst [vmem:[#allocation175_spill] sm:$0xff] %v21280_v14  ;;  %v7504_v7 = vpop.permute.xlu1 %7503  ;;  %v7506_v53 = vpop.permute.xlu0 %7505  ;;  %v21292_v15 = vpack.c.bf16 %v24026_v42, %v24025_v39  ;;  %v24029_v51 = vand.u32 4294901760, %v21179_v33  ;;  %v21300_v48 = vpack.c.bf16 %v7858_v9, %v7851_v34  ;;  %v21302_v14 = vpack.c.bf16 %v7872_v50, %v7865_v56  ;;  %v24037_v56 = vld [vmem:[#allocation112_spill] sm:$0xff] }
 0xd17   :  { %v7687_v61 = vand.u32 4294901760, %v7612_v16  ;;  %v7581_v28 = vmul.f32 %v21038_v49, %v7504_v7  ;;  %v7582_v59 = vmul.f32 %v21103_v24, %v7506_v53  ;;  %v7907_v26 = vand.u32 4294901760, %v21283_v29  ;;  %v21307_v62 = vpop.eup %16163  ;;  %v24038_v7 = vld [vmem:[#allocation113_spill] sm:$0xff] }
 0xd18   :  { %24027 = vst [vmem:[#allocation178_spill] sm:$0xff] %v21292_v15  ;;  %v21298_v40 = vpack.c.bf16 %v24029_v51, %v24028_v6  ;;  %24031 = vst [vmem:[#allocation186_spill] sm:$0xff] %v21300_v48  ;;  %v24033_v39 = vand.u32 4294901760, %v21055_v22  ;;  %v24034_v42 = vand.u32 4294901760, %v21111_v58  ;;  %v7881_v6 = vand.u32 4294901760, %v7880_v8 }
 0xd19   :  { %24032 = vst [vmem:[#allocation44_spill] sm:$0xff] %v21302_v14  ;;  %v7888_v9 = vand.u32 4294901760, %v7887_v27  ;;  %v21315_v34 = vpack.c.bf16 %v7886_v4, %v7879_v45  ;;  %v21317_v50 = vsub.f32 %v7612_v16, %v7687_v61  ;;  %v7613_v49 = vadd.f32 %v7581_v28, %v24037_v56 }
 0xd1a   :  { %24030 = vst [vmem:[#allocation185_spill] sm:$0xff] %v21298_v40  ;;  %v21313_v15 = vpack.c.bf16 %v24034_v42, %v24033_v39  ;;  %v7614_v24 = vadd.f32 %v7582_v59, %v24038_v7  ;;  %v21321_v53 = vpack.c.bf16 %v7687_v61, %v7684_v20  ;;  %v24040_v51 = vand.u32 4294901760, %v21068_v23  ;;  %v7508_v45 = vpop.permute.xlu1 %7507  ;;  %v7510_v27 = vpop.permute.xlu0 %7509 }
 0xd1b   :  { %24036 = vst [vmem:[#allocation6_spill] sm:$0xff] %v21315_v34  ;;  %v24041_v22 = vand.u32 4294901760, %v21146_v10  ;;  %v24043_v58 = vand.u32 4294901760, %v21083_v32  ;;  %v24044_v8 = vand.u32 4294901760, %v21182_v38  ;;  %v7908_v16 = vsub.f32 %v21283_v29, %v7907_v26  ;;  %v21338_v20 = vpop.eup %16165  ;;  %v24062_v34 = vld [vmem:[#allocation120_spill] sm:$0xff] }
 0xd1c   :  { %24035 = vst [vmem:[#allocation193_spill] sm:$0xff] %v21313_v15  ;;  %24039 = vst [vmem:[#allocation9_spill] sm:$0xff] %v21321_v53  ;;  %v21336_v28 = vpack.c.bf16 %v7888_v9, %v7881_v6  ;;  %v7690_v61 = vand.u32 4294901760, %v7613_v49  ;;  %v7693_v23 = vand.u32 4294901760, %v7614_v24  ;;  %v7583_v10 = vmul.f32 %v21072_v1, %v7508_v45  ;;  %14762 = vmatprep.subr.bf16.mxu0 %v21321_v53 }
 0xd1d   :  { %v21327_v14 = vpack.c.bf16 %v24041_v22, %v24040_v51  ;;  %v21333_v4 = vpack.c.bf16 %v24044_v8, %v24043_v58  ;;  %v7584_v59 = vmul.f32 %v21134_v63, %v7510_v27  ;;  %v24046_v32 = vand.u32 4294901760, %v21101_v52  ;;  %14764 = vmatpush3.bf16.msra.mxu0 %v21239_v17  ;;  %v24051_v52 = vld [vmem:[#allocation115_spill] sm:$0xff] }
 0xd1e   :  { %v24047_v38 = vand.u32 4294901760, %v21209_v21  ;;  %v24049_v42 = vand.u32 4294901760, %v21132_v30  ;;  %v7914_v9 = vand.u32 4294901760, %v21317_v50  ;;  %v21357_v63 = vsub.f32 %v7613_v49, %v7690_v61  ;;  %v24052_v21 = vld [vmem:[#allocation114_spill] sm:$0xff]  ;;  %v7512_v22 = vpop.permute.xlu1 %7511  ;;  %v7514_v58 = vpop.permute.xlu0 %7513 }
 0xd1f   :  { %24042 = vst [vmem:[#allocation208_spill] sm:$0xff] %v21327_v14  ;;  %24045 = vst [vmem:[#allocation210_spill] sm:$0xff] %v21333_v4  ;;  %v21359_v56 = vsub.f32 %v7614_v24, %v7693_v23  ;;  %v7615_v7 = vadd.f32 %v7583_v10, %v24051_v52  ;;  %v7616_v51 = vadd.f32 %v7584_v59, %v24052_v21  ;;  %16167 = vpow2.f32 %v21213_v44 }
 0xd20   :  { %v21347_v39 = vpack.c.bf16 %v24047_v38, %v24046_v32  ;;  %v21351_v6 = vpack.c.bf16 %v7675_v35, %v24049_v42  ;;  %v21363_v30 = vpack.c.bf16 %v7693_v23, %v7690_v61  ;;  %v7909_v35 = vand.u32 4294901760, %v7908_v16  ;;  %v24055_v23 = vld [vmem:[#allocation117_spill] sm:$0xff]  ;;  %v24058_v16 = vld [vmem:[#allocation118_spill] sm:$0xff] }
 0xd21   :  { %v7915_v8 = vsub.f32 %v21317_v50, %v7914_v9  ;;  %v21366_v45 = vpack.c.bf16 %v7914_v9, %v7907_v26  ;;  %v7696_v27 = vand.u32 4294901760, %v7615_v7  ;;  %v7699_v32 = vand.u32 4294901760, %v7616_v51  ;;  %v24056_v9 = vld [vmem:[#allocation116_spill] sm:$0xff] }
 0xd22   :  { %24048 = vst [vmem:[#allocation212_spill] sm:$0xff] %v21347_v39  ;;  %24050 = vst [vmem:[#allocation215_spill] sm:$0xff] %v21351_v6  ;;  %v7585_v49 = vmul.f32 %v21120_v18, %v7512_v22  ;;  %v7586_v24 = vmul.f32 %v21159_v19, %v7514_v58  ;;  %14766 = vmatprep.subr.bf16.mxu0 %v21363_v30  ;;  %v22854_v59 = vand.u32 4294901760, %v21357_v63  ;;  %v22853_v38 = vand.u32 4294901760, %v21359_v56  ;;  %v7516_v19 = vpop.permute.xlu1 %7515  ;;  %v7518_v52 = vpop.permute.xlu0 %7517 }
 0xd23   :  { %24053 = vst [vmem:[#allocation222_spill] sm:$0xff] %v21363_v30  ;;  %24054 = vst [vmem:[#allocation218_spill] sm:$0xff] %v21366_v45  ;;  %v7916_v10 = vand.u32 4294901760, %v7915_v8  ;;  %v21375_v61 = vsub.f32 %v7615_v7, %v7696_v27  ;;  %v21377_v26 = vsub.f32 %v7616_v51, %v7699_v32  ;;  %14768 = vmatpush3.bf16.msra.mxu0 %v21263_v5 }
 0xd24   :  { %v7617_v42 = vadd.f32 %v7585_v49, %v24055_v23  ;;  %v7618_v18 = vadd.f32 %v7586_v24, %v24056_v9  ;;  %v21382_v21 = vpack.c.bf16 %v7699_v32, %v7696_v27  ;;  %v7922_v58 = vsub.f32 %v21357_v63, %v22854_v59 }
 0xd25   :  { %v21384_v22 = vpack.c.bf16 %v7916_v10, %v7909_v35  ;;  %v7929_v7 = vsub.f32 %v21359_v56, %v22853_v38  ;;  %v7587_v49 = vmul.f32 %v21148_v12, %v7516_v19  ;;  %v7588_v24 = vmul.f32 %v21170_v43, %v7518_v52  ;;  %v24059_v38 = vld [vmem:[#allocation119_spill] sm:$0xff] }
 0xd26   :  { %24057 = vst [vmem:[#allocation220_spill] sm:$0xff] %v21382_v21  ;;  %v7702_v51 = vand.u32 4294901760, %v7617_v42  ;;  %v7705_v8 = vand.u32 4294901760, %v7618_v18  ;;  %14770 = vmatprep.subr.bf16.mxu0 %v21382_v21  ;;  %v7923_v27 = vand.u32 4294901760, %v7922_v58  ;;  %v22855_v35 = vand.u32 4294901760, %v21375_v61  ;;  %v7520_v12 = vpop.permute.xlu1 %7519  ;;  %v7522_v43 = vpop.permute.xlu0 %7521 }
 0xd27   :  { %v7930_v32 = vand.u32 4294901760, %v7929_v7  ;;  %v22856_v10 = vand.u32 4294901760, %v21377_v26  ;;  %v7619_v1 = vadd.f32 %v7587_v49, %v24058_v16  ;;  %v7620_v59 = vadd.f32 %v7588_v24, %v24059_v38  ;;  %14772 = vmatpush3.bf16.msra.mxu0 %v21313_v15 }
 0xd28   :  { %v21397_v23 = vsub.f32 %v7617_v42, %v7702_v51  ;;  %v21399_v9 = vsub.f32 %v7618_v18, %v7705_v8  ;;  %v21404_v19 = vpack.c.bf16 %v7705_v8, %v7702_v51  ;;  %v7936_v58 = vsub.f32 %v21375_v61, %v22855_v35  ;;  %v24061_v35 = vld [vmem:[#allocation121_spill] sm:$0xff] }
 0xd29   :  { %v21406_v52 = vpack.c.bf16 %v7930_v32, %v7923_v27  ;;  %v7943_v42 = vsub.f32 %v21377_v26, %v22856_v10  ;;  %v7708_v18 = vand.u32 4294901760, %v7619_v1  ;;  %v7711_v16 = vand.u32 4294901760, %v7620_v59 }
 0xd2a   :  { %24060 = vst [vmem:[#allocation96_spill] sm:$0xff] %v21404_v19  ;;  %v7589_v38 = vmul.f32 %v21154_v60, %v7520_v12  ;;  %v7590_v7 = vmul.f32 %v21190_v25, %v7522_v43  ;;  %14774 = vmatprep.subr.bf16.mxu0 %v21404_v19  ;;  %v7937_v51 = vand.u32 4294901760, %v7936_v58  ;;  %v7949_v49 = vand.u32 4294901760, %v21397_v23  ;;  %v7524_v60 = vpop.permute.xlu1 %7523  ;;  %v7526_v25 = vpop.permute.xlu0 %7525 }
 0xd2b   :  { %v7944_v8 = vand.u32 4294901760, %v7943_v42  ;;  %v7956_v24 = vand.u32 4294901760, %v21399_v9  ;;  %v21419_v27 = vsub.f32 %v7619_v1, %v7708_v18  ;;  %v21421_v32 = vsub.f32 %v7620_v59, %v7711_v16  ;;  %14776 = vmatpush3.bf16.msra.mxu0 %v21327_v14  ;;  %v24065_v14 = vld [vmem:[#allocation123_spill] sm:$0xff] }
 0xd2c   :  { %v7621_v10 = vadd.f32 %v7589_v38, %v24061_v35  ;;  %v7622_v48 = vadd.f32 %v7590_v7, %v24062_v34  ;;  %v21426_v12 = vpack.c.bf16 %v7711_v16, %v7708_v18  ;;  %v7950_v58 = vsub.f32 %v21397_v23, %v7949_v49 }
 0xd2d   :  { %v21428_v43 = vpack.c.bf16 %v7944_v8, %v7937_v51  ;;  %v7957_v42 = vsub.f32 %v21399_v9, %v7956_v24  ;;  %v7591_v59 = vmul.f32 %v21184_v41, %v7524_v60  ;;  %v7592_v35 = vmul.f32 %v21247_v47, %v7526_v25  ;;  %v24064_v8 = vld [vmem:[#allocation122_spill] sm:$0xff] }
 0xd2e   :  { %24063 = vst [vmem:[#allocation3_spill] sm:$0xff] %v21426_v12  ;;  %v7714_v1 = vand.u32 4294901760, %v7621_v10  ;;  %v7717_v40 = vand.u32 4294901760, %v7622_v48  ;;  %14778 = vmatprep.subr.bf16.mxu0 %v21426_v12  ;;  %v7951_v34 = vand.u32 4294901760, %v7950_v58  ;;  %v7963_v7 = vand.u32 4294901760, %v21419_v27 }
 0xd2f   :  { %v7958_v38 = vand.u32 4294901760, %v7957_v42  ;;  %v7970_v18 = vand.u32 4294901760, %v21421_v32  ;;  %v7623_v45 = vadd.f32 %v7591_v59, %v24064_v8  ;;  %v7624_v19 = vadd.f32 %v7592_v35, %v24065_v14  ;;  %14780 = vmatpush3.bf16.msra.mxu0 %v21333_v4 }
 0xd30   :  { %v21437_v16 = vsub.f32 %v7621_v10, %v7714_v1  ;;  %v21439_v51 = vsub.f32 %v7622_v48, %v7717_v40  ;;  %v21444_v41 = vpack.c.bf16 %v7717_v40, %v7714_v1  ;;  %v7964_v60 = vsub.f32 %v21419_v27, %v7963_v7 }
 0xd31   :  { %v21446_v47 = vpack.c.bf16 %v7958_v38, %v7951_v34  ;;  %v7971_v25 = vsub.f32 %v21421_v32, %v7970_v18  ;;  %v7720_v58 = vand.u32 4294901760, %v7623_v45  ;;  %v7723_v42 = vand.u32 4294901760, %v7624_v19 }
 0xd32   :  { %24066 = vst [vmem:[#allocation124_spill] sm:$0xff] %v21444_v41  ;;  %v7977_v10 = vand.u32 4294901760, %v21437_v16  ;;  %v7984_v48 = vand.u32 4294901760, %v21439_v51  ;;  %14782 = vmatprep.subr.bf16.mxu0 %v21444_v41  ;;  %v7965_v59 = vand.u32 4294901760, %v7964_v60  ;;  %v24071_v40 = vand.u32 4294901760, %v21359_v56 }
 0xd33   :  { %v7972_v14 = vand.u32 4294901760, %v7971_v25  ;;  %v21457_v35 = vsub.f32 %v7623_v45, %v7720_v58  ;;  %v21459_v34 = vsub.f32 %v7624_v19, %v7723_v42  ;;  %14784 = vmatpush3.bf16.msra.mxu0 %v21347_v39  ;;  %v21462_v38 = vpack.c.bf16 %v7723_v42, %v7720_v58 }
 0xd34   :  { %v7978_v8 = vsub.f32 %v21437_v16, %v7977_v10  ;;  %v7985_v60 = vsub.f32 %v21439_v51, %v7984_v48  ;;  %v24073_v25 = vand.u32 4294901760, %v21375_v61  ;;  %v24074_v1 = vand.u32 4294901760, %v21377_v26 }
 0xd35   :  { %24067 = vst [vmem:[#allocation56_spill] sm:$0xff] %v21457_v35  ;;  %24068 = vst [vmem:[#allocation23_spill] sm:$0xff] %v21459_v34  ;;  %v21465_v4 = vpack.c.bf16 %v7972_v14, %v7965_v59  ;;  %14786 = vmatprep.subr.bf16.mxu0 %v21462_v38  ;;  %v7991_v19 = vand.u32 4294901760, %v21457_v35  ;;  %v7998_v58 = vand.u32 4294901760, %v21459_v34  ;;  %v24070_v14 = vand.u32 4294901760, %v21357_v63 }
 0xd36   :  { %24069 = vst [vmem:[#allocation18_spill] sm:$0xff] %v21462_v38  ;;  %v7979_v45 = vand.u32 4294901760, %v7978_v8  ;;  %v7986_v59 = vand.u32 4294901760, %v7985_v60  ;;  %v21487_v38 = vpack.c.bf16 %v24074_v1, %v24073_v25  ;;  %v21489_v8 = vpack.c.bf16 %v7956_v24, %v7949_v49 }
 0xd37   :  { %v21481_v39 = vpack.c.bf16 %v24071_v40, %v24070_v14  ;;  %14788 = vmatpush3.bf16.msra.mxu0 %v21351_v6  ;;  %v7992_v41 = vsub.f32 %v21457_v35, %v7991_v19  ;;  %v7999_v60 = vsub.f32 %v21459_v34, %v7998_v58  ;;  %v21494_v42 = vpack.c.bf16 %v7970_v18, %v7963_v7 }
 0xd38   :  { %24075 = vst [vmem:[#allocation137_spill] sm:$0xff] %v21487_v38  ;;  %24076 = vst [vmem:[#allocation126_spill] sm:$0xff] %v21489_v8  ;;  %v21496_v12 = vpack.c.bf16 %v7984_v48, %v7977_v10  ;;  %v21498_v40 = vpack.c.bf16 %v7986_v59, %v7979_v45  ;;  %v21500_v14 = vpack.c.bf16 %v7998_v58, %v7991_v19  ;;  %v12954_v49 = vmul.f32 -1.442695, %v21222_v3  ;;  %v16168_v10 = vpop.eup %16167  ;;  %v7627_v45 = vld [vmem:[%s21021_s28] sm:$0xff]  ;;  %v7630_v3 = vld [vmem:[%s21021_s28 + $0x18] sm:$0xff] }
 0xd39   :  { %24072 = vst [vmem:[#allocation59_spill] sm:$0xff] %v21481_v39  ;;  %24077 = vst [vmem:[#allocation63_spill] sm:$0xff] %v21494_v42  ;;  %v7993_v39 = vand.u32 4294901760, %v7992_v41  ;;  %v8000_v1 = vand.u32 4294901760, %v7999_v60  ;;  %v7337_v7 = vadd.f32 1.0, %v21307_v62  ;;  %v7321_v18 = vadd.f32 1.0, %v21338_v20 }
 0xd3a   :  { %24078 = vst [vmem:[#allocation135_spill] sm:$0xff] %v21496_v12  ;;  %24079 = vst [vmem:[#allocation128_spill] sm:$0xff] %v21500_v14  ;;  %16169 = vpow2.f32 %v12954_v49  ;;  %v7338_v48 = vadd.f32 1.0, %v16168_v10  ;;  %v21510_v59 = vand.u32 4294901760, %v7627_v45  ;;  %v21512_v62 = vand.u32 4294901760, %v7630_v3  ;;  %v7629_v20 = vld [vmem:[%s21021_s28 + $0x10] sm:$0xff] }
 0xd3b   :  { %v21504_v24 = vpack.c.bf16 %v8000_v1, %v7993_v39  ;;  %16171 = vrcp.f32 %v7337_v7  ;;  %v24080_v1 = vld [vmem:[#allocation67_spill] sm:$0xff]  ;;  %v24083_v12 = vld [vmem:[#allocation109_spill] sm:$0xff] }
 0xd3c   :  { %16173 = vrcp.f32 %v7321_v18  ;;  %v7632_v18 = vld [vmem:[%s21021_s28 + $0x28] sm:$0xff]  ;;  %v21518_v10 = vsub.f32 %v7627_v45, %v21510_v59 }
 0xd3d   :  { %16175 = vrcp.f32 %v7338_v48  ;;  %v21520_v48 = vand.u32 4294901760, %v7629_v20 }
 0xd3e   :  { %24081 = vst [vmem:[#allocation68_spill] sm:$0xff] %v21518_v10  ;;  %v24085_v30 = vand.u32 4294901760, %v21518_v10 }
 0xd3f   :  { %v21532_v45 = vsub.f32 %v7629_v20, %v21520_v48  ;;  %v7633_v20 = vld [vmem:[%s21021_s28 + $0x30] sm:$0xff] }
 0xd41   :  { %v24091_v34 = vand.u32 4294901760, %v21532_v45 }
 0xd44   :  { %v16170_v41 = vpop.eup %16169 }
 0xd45   :  { %v7322_v44 = vadd.f32 1.0, %v16170_v41  ;;  %v16172_v19 = vpop.eup %16171  ;;  %v21523_v41 = vsub.f32 %v7630_v3, %v21512_v62 }
 0xd46   :  { %v16174_v60 = vpop.eup %16173 }
 0xd47   :  { %v7528_v25 = vpop.permute.xlu1 %7527  ;;  %16177 = vrcp.f32 %v7322_v44  ;;  %24082 = vst [vmem:[#allocation139_spill] sm:$0xff] %v21523_v41  ;;  %v24088_v35 = vand.u32 4294901760, %v21523_v41 }
 0xd48   :  { %v7593_v39 = vmul.f32 %v16172_v19, %v7528_v25  ;;  %v16176_v25 = vpop.eup %16175  ;;  %v21525_v19 = vand.u32 4294901760, %v7632_v18 }
 0xd4a   :  { %v7625_v49 = vadd.f32 %v7593_v39, %v24080_v1  ;;  %v7631_v39 = vld [vmem:[%s21021_s28 + $0x20] sm:$0xff]  ;;  %v24084_v1 = vld [vmem:[#allocation125_spill] sm:$0xff]  ;;  %v21537_v21 = vsub.f32 %v7632_v18, %v21525_v19  ;;  %v24086_v18 = vld [vmem:[#allocation108_spill] sm:$0xff] }
 0xd4b   :  { %v7496_v58 = vpop.permute.xlu1 %7495  ;;  %v21539_v5 = vand.u32 4294901760, %v7631_v39 }
 0xd4c   :  { %v7577_v7 = vmul.f32 %v16174_v60, %v7496_v58  ;;  %v7726_v14 = vand.u32 4294901760, %v7625_v49  ;;  %v7634_v58 = vld [vmem:[%s21021_s28 + $0x38] sm:$0xff]  ;;  %s12922_s28 = sld [smem:[%s22276_s0 + %s16231_s25]]  }
 0xd4e   :  { %v7609_v42 = vadd.f32 %v7577_v7, %v24083_v12  ;;  %v21541_v12 = vand.u32 4294901760, %v7634_v58  ;;  %v21543_v7 = vsub.f32 %v7625_v49, %v7726_v14  ;;  %v7749_v49 = vsub.f32 %v21523_v41, %v24088_v35 }
 0xd51   :  { %v16178_v6 = vpop.eup %16177 }
 0xd54   :  { %v7530_v44 = vpop.permute.xlu0 %7529 }
 0xd55   :  { %v7594_v8 = vmul.f32 %v16176_v25, %v7530_v44  ;;  %v7678_v25 = vand.u32 4294901760, %v7609_v42 }
 0xd57   :  { %v7626_v38 = vadd.f32 %v7594_v8, %v24084_v1  ;;  %v7740_v8 = vsub.f32 %v21518_v10, %v24085_v30  ;;  %v21565_v30 = vand.u32 4294901760, %v7633_v20 }
 0xd58   :  { %v7498_v15 = vpop.permute.xlu0 %7497 }
 0xd59   :  { %v7729_v44 = vand.u32 4294901760, %v7626_v38  ;;  %v7578_v60 = vmul.f32 %v16178_v6, %v7498_v15  ;;  %v21560_v15 = vsub.f32 %v7631_v39, %v21539_v5  ;;  %v21563_v6 = vsub.f32 %v7634_v58, %v21541_v12 }
 0xd5a   :  { %v7741_v39 = vand.u32 4294901760, %v7740_v8  ;;  %v7750_v58 = vand.u32 4294901760, %v7749_v49 }
 0xd5b   :  { %v21550_v3 = vsub.f32 %v7626_v38, %v7729_v44  ;;  %v7610_v17 = vadd.f32 %v7578_v60, %v24086_v18  ;;  %v21553_v53 = vpack.c.bf16 %v7729_v44, %v7726_v14  ;;  %v21567_v38 = vsub.f32 %v7609_v42, %v7678_v25 }
 0xd5c   :  { %v8005_v14 = vand.u32 4294901760, %v21543_v7  ;;  %v7755_v42 = vsub.f32 %v21532_v45, %v24091_v34  ;;  %v22895_v41 = vand.u32 4294901760, %v21560_v15 }
 0xd5d   :  { %24087 = vst [vmem:[#allocation131_spill] sm:$0xff] %v21553_v53  ;;  %v7681_v1 = vand.u32 4294901760, %v7610_v17  ;;  %14790 = vmatprep.subr.bf16.mxu0 %v21553_v53  ;;  %v8012_v60 = vand.u32 4294901760, %v21550_v3  ;;  %v21583_v53 = vsub.f32 %v7633_v20, %v21565_v30  ;;  %v7893_v10 = vand.u32 4294901760, %v21567_v38 }
 0xd5e   :  { %v7756_v49 = vand.u32 4294901760, %v7755_v42  ;;  %v7770_v20 = vsub.f32 %v21560_v15, %v22895_v41  ;;  %v24093_v42 = vld [vmem:[#allocation88_spill] sm:$0xff] }
 0xd5f   :  { %v21572_v35 = vpack.c.bf16 %v7681_v1, %v7678_v25  ;;  %v21574_v44 = vsub.f32 %v7610_v17, %v7681_v1  ;;  %v21576_v18 = vpack.c.bf16 %v8012_v60, %v8005_v14  ;;  %v24092_v17 = vand.u32 4294901760, %v21537_v21 }
 0xd60   :  { %v7778_v1 = vand.u32 4294901760, %v21563_v6 }
 0xd61   :  { %24089 = vst [vmem:[#allocation74_spill] sm:$0xff] %v21572_v35  ;;  %24090 = vst [vmem:[#allocation12_spill] sm:$0xff] %v21576_v18  ;;  %v7900_v25 = vand.u32 4294901760, %v21574_v44  ;;  %14792 = vmatpush3.bf16.msra.mxu0 %v21572_v35  ;;  %v7764_v8 = vsub.f32 %v21537_v21, %v24092_v17  ;;  %v7784_v18 = vand.u32 4294901760, %v21583_v53 }
 0xd62   :  { %14794 = vmatprep.subr.bf16.mxu0 %v21384_v22  ;;  %v7779_v17 = vsub.f32 %v21563_v6, %v7778_v1  ;;  %v7771_v22 = vand.u32 4294901760, %v7770_v20 }
 0xd63   :  { %v21593_v34 = vpack.c.bf16 %v7900_v25, %v7893_v10  ;;  %v7765_v35 = vand.u32 4294901760, %v7764_v8  ;;  %v24096_v8 = vld [vmem:[#allocation154_spill] sm:$0xff] }
 0xd64   :  { %7742 = vmatmul.mubr.f32.vlgmr.msra.gmra.mrb[32].mxu0 %v7741_v39  ;;  %v7785_v39 = vsub.f32 %v21583_v53, %v7784_v18  ;;  %v7780_v41 = vand.u32 4294901760, %v7779_v17 }
 0xd65   :  { %14796 = vmatpush3.bf16.msra.mxu0 %v20998_v11  ;;  %7751 = vmatprep.mubr.f32.mxu0 %v7750_v58  ;;  %v24094_v58 = vld [vmem:[#allocation169_spill] sm:$0xff] }
 0xd66   :  { %14798 = vmatprep.subr.bf16.mxu0 %v21406_v52  ;;  %v7786_v11 = vand.u32 4294901760, %v7785_v39  ;;  %v24095_v52 = vld [vmem:[#allocation36_spill] sm:$0xff] }
 0xd67   :  { %v24128_v39 = vld [vmem:[#allocation208_spill] sm:$0xff] }
 0xd68   :  { %7757 = vmatmul.mubr.f32.gmra.mrb[34].mxu0 %v7756_v49  ;;  %v8013_v49 = vsub.f32 %v21550_v3, %v8012_v60 }
 0xd69   :  { %14800 = vmatpush3.bf16.msra.mxu0 %v24093_v42  ;;  %7766 = vmatprep.mubr.f32.mxu0 %v7765_v35  ;;  %v7901_v35 = vsub.f32 %v21574_v44, %v7900_v25 }
 0xd6a   :  { %14802 = vmatprep.subr.bf16.mxu0 %v21428_v43  ;;  %v8006_v43 = vsub.f32 %v21543_v7, %v8005_v14  ;;  %v24099_v14 = vld [vmem:[#allocation153_spill] sm:$0xff] }
 0xd6b   :  { %v7902_v17 = vand.u32 4294901760, %v7901_v35  ;;  %v24135_v35 = vld [vmem:[#allocation215_spill] sm:$0xff] }
 0xd6c   :  { %7772 = vmatmul.mubr.f32.gmra.mrb[36].mxu0 %v7771_v22  ;;  %v8007_v20 = vand.u32 4294901760, %v8006_v43  ;;  %v24123_v22 = vld [vmem:[#allocation222_spill] sm:$0xff] }
 0xd6d   :  { %14804 = vmatpush3.bf16.msra.mxu0 %v24094_v58  ;;  %7781 = vmatprep.mubr.f32.mxu0 %v7780_v41  ;;  %v8014_v41 = vand.u32 4294901760, %v8013_v49  ;;  %v24131_v58 = vld [vmem:[#allocation210_spill] sm:$0xff]  ;;  %v24133_v49 = vld [vmem:[#allocation212_spill] sm:$0xff] }
 0xd6e   :  { %14806 = vmatprep.subr.bf16.mxu0 %v21446_v47  ;;  %v7894_v47 = vsub.f32 %v21567_v38, %v7893_v10  ;;  %v24098_v10 = vld [vmem:[#allocation29_spill] sm:$0xff]  ;;  %v24134_v43 = vld [vmem:[#allocation18_spill] sm:$0xff] }
 0xd70   :  { %7787 = vmatmul.mubr.f32.gmra.mrb[38].mxu0 %v7786_v11  ;;  %v7895_v60 = vand.u32 4294901760, %v7894_v47  ;;  %v24130_v11 = vld [vmem:[#allocation3_spill] sm:$0xff]  ;;  %v24137_v47 = vld [vmem:[#allocation74_spill] sm:$0xff] }
 0xd71   :  { %14808 = vmatpush3.bf16.msra.mxu0 %v24095_v52  ;;  %8017 = vmatprep.mubr.f32.mxu0 %v24096_v8  ;;  %v24132_v52 = vld [vmem:[#allocation124_spill] sm:$0xff] }
 0xd72   :  { %14810 = vmatprep.subr.bf16.mxu0 %v21465_v4  ;;  %v14821_v4 = vpack.c.bf16 %v8014_v41, %v8007_v20  ;;  %v24136_v41 = vld [vmem:[#allocation131_spill] sm:$0xff]  ;;  %v24138_v20 = vld [vmem:[#allocation218_spill] sm:$0xff] }
 0xd75   :  { %14812 = vmatpush3.bf16.msra.mxu0 %v21265_v2  ;;  %v14823_v2 = vpack.c.bf16 %v7902_v17, %v7895_v60 }
 0xd76   :  { %14814 = vmatprep.subr.bf16.mxu0 %v21498_v40  ;;  %v24097_v40 = vpack.c.bf16 %v21317_v50, %v21283_v29  ;;  %v24103_v29 = vpack.c.bf16 %v21377_v26, %v21375_v61  ;;  %v24104_v50 = vpack.c.bf16 %v21143_v54, %v21065_v55  ;;  %v24109_v55 = vpack.c.bf16 %v21206_v13, %v21098_v36  ;;  %v24111_v61 = vld [vmem:[#allocation19_spill] sm:$0xff]  ;;  %v24119_v13 = vld [vmem:[#allocation9_spill] sm:$0xff] }
 0xd77   :  { %v24110_v54 = vpack.c.bf16 %v21439_v51, %v21437_v16  ;;  %v24112_v26 = vpack.c.bf16 %v21230_v57, %v24111_v61  ;;  %v14855_v36 = vpack.c.bf16 %v21574_v44, %v21567_v38  ;;  %v24120_v57 = vld [vmem:[#allocation68_spill] sm:$0xff]  ;;  %v24121_v16 = vld [vmem:[#allocation170_spill] sm:$0xff]  ;;  %v24122_v51 = vld [vmem:[#allocation139_spill] sm:$0xff] }
 0xd78   :  { %v24126_v38 = vld [vmem:[#allocation193_spill] sm:$0xff]  ;;  %v24127_v44 = vld [vmem:[#allocation96_spill] sm:$0xff]  ;;  %v24139_v17 = vand.u32 4294901760, %v24120_v57  ;;  %v24141_v60 = vand.u32 4294901760, %v24122_v51 }
 0xd79   :  { %14816 = vmatpush3.bf16.msra.mxu0 %v21286_v46  ;;  %v24100_v46 = vpack.c.bf16 %v24098_v10, %v24099_v14  ;;  %v24144_v10 = vld [vmem:[#allocation175_spill] sm:$0xff]  ;;  %v24145_v14 = vand.u32 4294901760, %v21537_v21 }
 0xd7a   :  { %14818 = vmatprep.subr.bf16.mxu0 %v21504_v24  ;;  %v24101_v24 = vpack.c.bf16 %v21359_v56, %v21357_v63  ;;  %v24105_v63 = vpack.c.bf16 %v21399_v9, %v21397_v23  ;;  %v24108_v56 = vpack.c.bf16 %v21421_v32, %v21419_v27  ;;  %v14853_v9 = vpack.c.bf16 %v21550_v3, %v21543_v7  ;;  %v24116_v27 = vld [vmem:[#allocation171_spill] sm:$0xff]  ;;  %v24124_v3 = vld [vmem:[#allocation176_spill] sm:$0xff] }
 0xd7b   :  { %v24117_v32 = vld [vmem:[#allocation35_spill] sm:$0xff]  ;;  %v24125_v7 = vld [vmem:[#allocation220_spill] sm:$0xff] }
 0xd7c   :  { %v24118_v25 = vpack.c.bf16 %v24116_v27, %v24117_v32 }
 0xd7d   :  { %14820 = vmatpush3.bf16.msra.mxu0 %v21336_v28  ;;  %v24102_v28 = vpack.c.bf16 %v21108_v31, %v21052_v0  ;;  %v24106_v0 = vpack.c.bf16 %v21179_v33, %v21080_v37  ;;  %v24107_v31 = vld [vmem:[#allocation89_spill] sm:$0xff]  ;;  %v24113_v37 = vld [vmem:[#allocation23_spill] sm:$0xff]  ;;  %v24114_v33 = vld [vmem:[#allocation56_spill] sm:$0xff] }
 0xd7e   :  { %14822 = vmatprep.subr.bf16.mxu0 %v14821_v4  ;;  %v24115_v23 = vpack.c.bf16 %v24113_v37, %v24114_v33  ;;  %v24129_v42 = vand.u32 4294901760, %v24107_v31  ;;  %v24140_v4 = vld [vmem:[#allocation157_spill] sm:$0xff] }
 0xd81   :  { %14824 = vmatpush3.bf16.msra.mxu0 %v14823_v2  ;;  %v24142_v2 = vld [vmem:[#allocation59_spill] sm:$0xff] }
 0xd82   :  { %14826 = vmatprep.subr.bf16.mxu0 %v24097_v40  ;;  %v24143_v40 = vand.u32 4294901760, %v21532_v45 }
 0xd84   :  { %8019 = vmatmul.mubr.f32.vlgmr.msra.gmra.mrb[40].mxu0 %v21510_v59 }
 0xd85   :  { %14828 = vmatpush3.bf16.msra.mxu0 %v24100_v46  ;;  %8024 = vmatprep.mubr.f32.mxu0 %v21512_v62  ;;  %v24146_v46 = vld [vmem:[#allocation137_spill] sm:$0xff] }
 0xd86   :  { %14830 = vmatprep.subr.bf16.mxu0 %v24101_v24  ;;  %v24147_v24 = vand.u32 4294901760, %v21560_v15 }
 0xd88   :  { %8026 = vmatmul.mubr.f32.gmra.mrb[42].mxu0 %v21520_v48 }
 0xd89   :  { %14832 = vmatpush3.bf16.msra.mxu0 %v24102_v28  ;;  %8031 = vmatprep.mubr.f32.mxu0 %v21525_v19  ;;  %v24148_v28 = vld [vmem:[#allocation178_spill] sm:$0xff] }
 0xd8a   :  { %14834 = vmatprep.subr.bf16.mxu0 %v24103_v29  ;;  %v24149_v29 = vld [vmem:[#allocation126_spill] sm:$0xff] }
 0xd8c   :  { %8033 = vmatmul.mubr.f32.gmra.mrb[44].mxu0 %v21539_v5 }
 0xd8d   :  { %14836 = vmatpush3.bf16.msra.mxu0 %v24104_v50  ;;  %8038 = vmatprep.mubr.f32.mxu0 %v21541_v12  ;;  %v24152_v50 = vld [vmem:[#allocation186_spill] sm:$0xff] }
 0xd8e   :  { %14838 = vmatprep.subr.bf16.mxu0 %v24105_v63  ;;  %v24154_v63 = vld [vmem:[#allocation44_spill] sm:$0xff] }
 0xd90   :  { %8040 = vmatmul.mubr.f32.gmra.mrb[46].mxu0 %v21565_v30 }
 0xd91   :  { %14840 = vmatpush3.bf16.msra.mxu0 %v24106_v0  ;;  %8175 = vmatprep.mubr.f32.mxu0 %v24107_v31  ;;  %v24155_v0 = vld [vmem:[#allocation128_spill] sm:$0xff] }
 0xd92   :  { %14842 = vmatprep.subr.bf16.mxu0 %v24108_v56 }
 0xd95   :  { %14844 = vmatpush3.bf16.msra.mxu0 %v24109_v55 }
 0xd96   :  { %14846 = vmatprep.subr.bf16.mxu0 %v24110_v54 }
 0xd99   :  { %14848 = vmatpush3.bf16.msra.mxu0 %v24112_v26 }
 0xd9a   :  { %14850 = vmatprep.subr.bf16.mxu0 %v24115_v23 }
 0xd9d   :  { %14852 = vmatpush3.bf16.msra.mxu0 %v24118_v25 }
 0xd9e   :  { %14854 = vmatprep.subr.bf16.mxu0 %v14853_v9 }
 0xda1   :  { %14856 = vmatpush3.bf16.msra.mxu0 %v14855_v36 }
 0xda2   :  { %14858 = vmatprep.subr.bf16.mxu0 %v24119_v13 }
 0xda4   :  { %8178 = vmatmul.mubr.f32.vlgmr.msra.gmra.mrb[48].mxu0 %v24120_v57 }
 0xda5   :  { %14860 = vmatpush3.bf16.msra.mxu0 %v24121_v16  ;;  %8184 = vmatprep.mubr.f32.mxu0 %v24122_v51  ;;  %v8665_v51 = vld [vmem:[%s12909_s2] sm:$0xff] }
 0xda6   :  { %14862 = vmatprep.subr.bf16.mxu0 %v24123_v22 }
 0xda8   :  { %8187 = vmatmul.mubr.f32.gmra.mrb[50].mxu0 %v21532_v45  ;;  %v24150_v45 = vld [vmem:[#allocation185_spill] sm:$0xff] }
 0xda9   :  { %14864 = vmatpush3.bf16.msra.mxu0 %v24124_v3  ;;  %8193 = vmatprep.mubr.f32.mxu0 %v21537_v21  ;;  %v24151_v21 = vld [vmem:[#allocation63_spill] sm:$0xff] }
 0xdaa   :  { %14866 = vmatprep.subr.bf16.mxu0 %v24125_v7 }
 0xdac   :  { %8196 = vmatmul.mubr.f32.gmra.mrb[52].mxu0 %v21560_v15  ;;  %v24153_v15 = vld [vmem:[#allocation135_spill] sm:$0xff] }
 0xdad   :  { %14868 = vmatpush3.bf16.msra.mxu0 %v24126_v38  ;;  %8202 = vmatprep.mubr.f32.mxu0 %v21563_v6  ;;  %v24156_v6 = vld [vmem:[#allocation6_spill] sm:$0xff] }
 0xdae   :  { %14870 = vmatprep.subr.bf16.mxu0 %v24127_v44 }
 0xdb0   :  { %8205 = vmatmul.mubr.f32.gmra.mrb[54].mxu0 %v21583_v53 }
 0xdb1   :  { %14872 = vmatpush3.bf16.msra.mxu0 %v24128_v39  ;;  %8309 = vmatprep.mubr.f32.mxu0 %v24129_v42  ;;  %v8669_v42 = vld [vmem:[%s12909_s2 + $0x20] sm:$0xff] }
 0xdb2   :  { %14874 = vmatprep.subr.bf16.mxu0 %v24130_v11 }
 0xdb5   :  { %14876 = vmatpush3.bf16.msra.mxu0 %v24131_v58 }
 0xdb6   :  { %14878 = vmatprep.subr.bf16.mxu0 %v24132_v52 }
 0xdb9   :  { %14880 = vmatpush3.bf16.msra.mxu0 %v24133_v49 }
 0xdba   :  { %14882 = vmatprep.subr.bf16.mxu0 %v24134_v43 }
 0xdbd   :  { %14884 = vmatpush3.bf16.msra.mxu0 %v24135_v35 }
 0xdbe   :  { %14886 = vmatprep.subr.bf16.mxu0 %v24136_v41 }
 0xdc1   :  { %14888 = vmatpush3.bf16.msra.mxu0 %v24137_v47 }
 0xdc2   :  { %14890 = vmatprep.subr.bf16.mxu0 %v24138_v20 }
 0xdc4   :  { %8313 = vmatmul.mubr.f32.vlgmr.msra.gmra.mrb[56].mxu0 %v24139_v17 }
 0xdc5   :  { %14892 = vmatpush3.bf16.msra.mxu0 %v24140_v4  ;;  %8320 = vmatprep.mubr.f32.mxu0 %v24141_v60 }
 0xdc6   :  { %14894 = vmatprep.subr.bf16.mxu0 %v24142_v2 }
 0xdc8   :  { %8324 = vmatmul.mubr.f32.gmra.mrb[58].mxu0 %v24143_v40 }
 0xdc9   :  { %14896 = vmatpush3.bf16.msra.mxu0 %v24144_v10  ;;  %8331 = vmatprep.mubr.f32.mxu0 %v24145_v14 }
 0xdca   :  { %14898 = vmatprep.subr.bf16.mxu0 %v24146_v46 }
 0xdcc   :  { %8335 = vmatmul.mubr.f32.gmra.mrb[60].mxu0 %v24147_v24 }
 0xdcd   :  { %14900 = vmatpush3.bf16.msra.mxu0 %v24148_v28  ;;  %8342 = vmatprep.mubr.f32.mxu0 %v7778_v1  ;;  %v24157_v1 = vld [vmem:[#allocation12_spill] sm:$0xff] }
 0xdce   :  { %14902 = vmatprep.subr.bf16.mxu0 %v24149_v29 }
 0xdd0   :  { %8346 = vmatmul.mubr.f32.gmra.mrb[62].mxu0 %v7784_v18 }
 0xdd1   :  { %14904 = vmatpush3.bf16.msra.mxu0 %v24150_v45  ;;  %8512 = vmatprep.mubr.f32.mxu0 %v24096_v8 }
 0xdd2   :  { %14906 = vmatprep.subr.bf16.mxu0 %v24151_v21 }
 0xdd5   :  { %14908 = vmatpush3.bf16.msra.mxu0 %v24152_v50 }
 0xdd6   :  { %14910 = vmatprep.subr.bf16.mxu0 %v24153_v15 }
 0xdd9   :  { %14912 = vmatpush3.bf16.msra.mxu0 %v24154_v63 }
 0xdda   :  { %14914 = vmatprep.subr.bf16.mxu0 %v24155_v0 }
 0xddd   :  { %14916 = vmatpush3.bf16.msra.mxu0 %v24156_v6 }
 0xdde   :  { %14918 = vmatprep.subr.bf16.mxu0 %v24157_v1 }
 0xde1   :  { %14920 = vmatpush3.bf16.msra.mxu0 %v21593_v34 }
 0xde2   :  { %14922 = vmatprep.subr.bf16.mxu0 %v24119_v13 }
 0xde4   :  { %8514 = vmatmul.mubr.f32.vlgmr.msra.gmra.mrb[64].mxu0 %v21510_v59 }
 0xde5   :  { %14924 = vmatpush3.bf16.msra.mxu0 %v24121_v16  ;;  %8519 = vmatprep.mubr.f32.mxu0 %v21512_v62 }
 0xde6   :  { %14926 = vmatprep.subr.bf16.mxu0 %v24123_v22  ;;  %v8666_v22 = vld [vmem:[%s12909_s2 + $0x8] sm:$0xff] }
 0xde8   :  { %8521 = vmatmul.mubr.f32.gmra.mrb[66].mxu0 %v21520_v48 }
 0xde9   :  { %14928 = vmatpush3.bf16.msra.mxu0 %v24124_v3  ;;  %8526 = vmatprep.mubr.f32.mxu0 %v21525_v19  ;;  %v8693_v3 = vand.u32 4294901760, %v8665_v51 }
 0xdea   :  { %14930 = vmatprep.subr.bf16.mxu0 %v24125_v7  ;;  %v8696_v7 = vand.u32 4294901760, %v8666_v22 }
 0xdec   :  { %8528 = vmatmul.mubr.f32.gmra.mrb[68].mxu0 %v21539_v5  ;;  %v21780_v20 = vsub.f32 %v8666_v22, %v8696_v7 }
 0xded   :  { %14932 = vmatpush3.bf16.msra.mxu0 %v24126_v38  ;;  %8533 = vmatprep.mubr.f32.mxu0 %v21541_v12  ;;  %v21775_v38 = vpack.c.bf16 %v8696_v7, %v8693_v3 }
 0xdee   :  { %14934 = vmatprep.subr.bf16.mxu0 %v24127_v44  ;;  %v8667_v44 = vld [vmem:[%s12909_s2 + $0x10] sm:$0xff]  ;;  %v8815_v14 = vand.u32 4294901760, %v21780_v20 }
 0xdf0   :  { %8535 = vmatmul.mubr.f32.gmra.mrb[70].mxu0 %v21565_v30  ;;  %v8816_v29 = vsub.f32 %v21780_v20, %v8815_v14 }
 0xdf1   :  { %14936 = vmatpush3.bf16.msra.mxu0 %v24128_v39  ;;  %8637 = vmatprep.mubr.f32.mxu0 %v24096_v8  ;;  %v8668_v39 = vld [vmem:[%s12909_s2 + $0x18] sm:$0xff] }
 0xdf2   :  { %14938 = vmatprep.subr.bf16.mxu0 %v24130_v11  ;;  %v8699_v11 = vand.u32 4294901760, %v8667_v44  ;;  %v8817_v6 = vand.u32 4294901760, %v8816_v29 }
 0xdf4   :  { %v21785_v2 = vsub.f32 %v8667_v44, %v8699_v11 }
 0xdf5   :  { %14940 = vmatpush3.bf16.msra.mxu0 %v24131_v58  ;;  %v8702_v58 = vand.u32 4294901760, %v8668_v39 }
 0xdf6   :  { %14942 = vmatprep.subr.bf16.mxu0 %v24132_v52  ;;  %v8670_v52 = vld [vmem:[%s12909_s2 + $0x28] sm:$0xff]  ;;  %v8822_v24 = vand.u32 4294901760, %v21785_v2 }
 0xdf7   :  { %v21783_v17 = vpack.c.bf16 %v8702_v58, %v8699_v11  ;;  %v21791_v46 = vsub.f32 %v8668_v39, %v8702_v58 }
 0xdf8   :  { %v8823_v21 = vsub.f32 %v21785_v2, %v8822_v24 }
 0xdf9   :  { %14944 = vmatpush3.bf16.msra.mxu0 %v24133_v49  ;;  %v8705_v49 = vand.u32 4294901760, %v8669_v42  ;;  %v8829_v45 = vand.u32 4294901760, %v21791_v46  ;;  %v21840_v11 = vpack.c.bf16 %v21791_v46, %v21785_v2 }
 0xdfa   :  { %14946 = vmatprep.subr.bf16.mxu0 %v24134_v43  ;;  %v8708_v43 = vand.u32 4294901760, %v8670_v52 }
 0xdfb   :  { %v21806_v50 = vsub.f32 %v8669_v42, %v8705_v49  ;;  %v8830_v1 = vsub.f32 %v21791_v46, %v8829_v45 }
 0xdfc   :  { %v21787_v40 = vpack.c.bf16 %v8708_v43, %v8705_v49  ;;  %v21808_v15 = vsub.f32 %v8670_v52, %v8708_v43 }
 0xdfd   :  { %14948 = vmatpush3.bf16.msra.mxu0 %v24135_v35  ;;  %v8671_v35 = vld [vmem:[%s12909_s2 + $0x30] sm:$0xff] }
 0xdfe   :  { %14950 = vmatprep.subr.bf16.mxu0 %v24136_v41  ;;  %v8672_v41 = vld [vmem:[%s12909_s2 + $0x38] sm:$0xff]  ;;  %v8711_v4 = vand.u32 4294901760, %v8671_v35  ;;  %v21844_v58 = vpack.c.bf16 %v21808_v15, %v21806_v50  ;;  %s12924_s2 = sld [smem:[%s22276_s0 + %s16232_s29]]  }
 0xdff   :  { %v8714_v60 = vand.u32 4294901760, %v8672_v41 }
 0xe01   :  { %14952 = vmatpush3.bf16.msra.mxu0 %v24137_v47  ;;  %v21778_v47 = vsub.f32 %v8665_v51, %v8693_v3  ;;  %v21811_v63 = vpack.c.bf16 %v8714_v60, %v8711_v4 }
 0xe02   :  { %14954 = vmatprep.subr.bf16.mxu0 %v21775_v38 }
 0xe03   :  { %v8808_v10 = vand.u32 4294901760, %v21778_v47  ;;  %v21833_v22 = vpack.c.bf16 %v21780_v20, %v21778_v47 }
 0xe04   :  { %8639 = vmatmul.mubr.f32.vlgmr.msra.gmra.mrb[72].mxu0 %v21510_v59 }
 0xe05   :  { %8644 = vmatprep.mubr.f32.mxu0 %v21512_v62  ;;  %14956 = vmatpush3.bf16.msra.mxu0 %v21775_v38  ;;  %v8809_v28 = vsub.f32 %v21778_v47, %v8808_v10 }
 0xe06   :  { %14958 = vmatprep.subr.bf16.mxu0 %v21783_v17 }
 0xe07   :  { %v8810_v0 = vand.u32 4294901760, %v8809_v28 }
 0xe08   :  { %8646 = vmatmul.mubr.f32.gmra.mrb[74].mxu0 %v21520_v48 }
 0xe09   :  { %8651 = vmatprep.mubr.f32.mxu0 %v21525_v19  ;;  %14960 = vmatpush3.bf16.msra.mxu0 %v21783_v17 }
 0xe0a   :  { %14962 = vmatprep.subr.bf16.mxu0 %v21787_v40 }
 0xe0c   :  { %8653 = vmatmul.mubr.f32.gmra.mrb[76].mxu0 %v21539_v5 }
 0xe0d   :  { %8658 = vmatprep.mubr.f32.mxu0 %v21541_v12  ;;  %14964 = vmatpush3.bf16.msra.mxu0 %v21787_v40 }
 0xe0e   :  { %14966 = vmatprep.subr.bf16.mxu0 %v21811_v63 }
 0xe10   :  { %8660 = vmatmul.mubr.f32.gmra.mrb[78].mxu0 %v21565_v30 }
 0xe11   :  { %14968 = vmatpush3.bf16.msra.mxu0 %v21811_v63 }
 0xe37   :  { %v13233_v53 = vpop.f32.mrb[32].mxu0 }
 0xe38   :  { %v13234_v18 = vpop.f32.mrb[33].mxu0 }
 0xe39   :  { %v13235_v34 = vadd.f32 %v13234_v18, %v13233_v53  ;;  %v8824_v53 = vand.u32 4294901760, %v8823_v21  ;;  %v8836_v18 = vand.u32 4294901760, %v21806_v50 }
 0xe3b   :  { %v13236_v8 = vpop.f32.mrb[34].mxu0 }
 0xe3c   :  { %v13237_v31 = vpop.f32.mrb[35].mxu0 }
 0xe3d   :  { %v13238_v56 = vadd.f32 %v13237_v31, %v13236_v8  ;;  %v8831_v8 = vand.u32 4294901760, %v8830_v1  ;;  %v8837_v31 = vsub.f32 %v21806_v50, %v8836_v18  ;;  %v21854_v50 = vpack.c.bf16 %v8815_v14, %v8808_v10 }
 0xe3f   :  { %v13239_v55 = vpop.f32.mrb[36].mxu0 }
 0xe40   :  { %v13240_v59 = vpop.f32.mrb[37].mxu0 }
 0xe41   :  { %v13241_v54 = vadd.f32 %v13240_v59, %v13239_v55  ;;  %v8849_v55 = vsub.f32 %v8671_v35, %v8711_v4  ;;  %v8856_v59 = vsub.f32 %v8672_v41, %v8714_v60 }
 0xe43   :  { %v13242_v62 = vpop.f32.mrb[38].mxu0  ;;  %v21847_v41 = vpack.c.bf16 %v8856_v59, %v8849_v55 }
 0xe44   :  { %v13243_v61 = vpop.f32.mrb[39].mxu0 }
 0xe45   :  { %v13244_v48 = vadd.f32 %v13243_v61, %v13242_v62  ;;  %v21824_v62 = vpack.c.bf16 %v8831_v8, %v8824_v53 }
 0xe57   :  { %v13277_v26 = vpop.f32.mrb[40].mxu0 }
 0xe58   :  { %v13278_v19 = vpop.f32.mrb[41].mxu0 }
 0xe59   :  { %v13279_v37 = vadd.f32 %v13278_v19, %v13277_v26  ;;  %v8850_v19 = vand.u32 4294901760, %v8849_v55 }
 0xe5b   :  { %v21764_v5 = vadd.f32 %v13279_v37, %v13235_v34  ;;  %v13280_v12 = vpop.f32.mrb[42].mxu0  ;;  %v8843_v34 = vand.u32 4294901760, %v21808_v15  ;;  %v8857_v37 = vand.u32 4294901760, %v8856_v59 }
 0xe5c   :  { %v13281_v33 = vpop.f32.mrb[43].mxu0 }
 0xe5d   :  { %v13282_v30 = vadd.f32 %v13281_v33, %v13280_v12  ;;  %v21862_v8 = vpack.c.bf16 %v8843_v34, %v8836_v18  ;;  %v21864_v20 = vpack.c.bf16 %v8857_v37, %v8850_v19 }
 0xe5f   :  { %v21766_v23 = vadd.f32 %v13282_v30, %v13238_v56  ;;  %v13283_v9 = vpop.f32.mrb[44].mxu0  ;;  %v8844_v56 = vsub.f32 %v21808_v15, %v8843_v34 }
 0xe60   :  { %v13284_v27 = vpop.f32.mrb[45].mxu0 }
 0xe61   :  { %v13285_v32 = vadd.f32 %v13284_v27, %v13283_v9  ;;  %v8845_v26 = vand.u32 4294901760, %v8844_v56  ;;  %v8851_v9 = vsub.f32 %v8849_v55, %v8850_v19  ;;  %v8858_v27 = vsub.f32 %v8856_v59, %v8857_v37 }
 0xe63   :  { %v21771_v25 = vadd.f32 %v13285_v32, %v13241_v54  ;;  %v13286_v36 = vpop.f32.mrb[46].mxu0  ;;  %v21822_v54 = vpack.c.bf16 %v8817_v6, %v8810_v0 }
 0xe64   :  { %v13287_v13 = vpop.f32.mrb[47].mxu0 }
 0xe65   :  { %v13288_v57 = vadd.f32 %v13287_v13, %v13286_v36  ;;  %14970 = vmatprep.subr.bf16.mxu0 %v21822_v54  ;;  %v8852_v13 = vand.u32 4294901760, %v8851_v9 }
 0xe67   :  { %v21773_v16 = vadd.f32 %v13288_v57, %v13244_v48  ;;  %v8838_v48 = vand.u32 4294901760, %v8837_v31  ;;  %v8859_v57 = vand.u32 4294901760, %v8858_v27 }
 0xe69   :  { %v21827_v30 = vpack.c.bf16 %v8845_v26, %v8838_v48  ;;  %v21835_v7 = vpack.c.bf16 %v8859_v57, %v8852_v13 }
 0xe77   :  { %v13321_v61 = vpop.f32.mrb[48].mxu0 }
 0xe78   :  { %v13322_v12 = vpop.f32.mrb[49].mxu0 }
 0xe79   :  { %v13323_v33 = vadd.f32 %v13322_v12, %v13321_v61 }
 0xe7b   :  { %v8180_v32 = vadd.f32 %v13323_v33, %v21764_v5  ;;  %v13324_v36 = vpop.f32.mrb[50].mxu0 }
 0xe7c   :  { %v13325_v51 = vpop.f32.mrb[51].mxu0 }
 0xe7d   :  { %v13326_v3 = vadd.f32 %v13325_v51, %v13324_v36 }
 0xe7f   :  { %v8189_v44 = vadd.f32 %v13326_v3, %v21766_v23  ;;  %v13327_v39 = vpop.f32.mrb[52].mxu0 }
 0xe80   :  { %v13328_v42 = vpop.f32.mrb[53].mxu0 }
 0xe81   :  { %v13329_v5 = vadd.f32 %v13328_v42, %v13327_v39 }
 0xe83   :  { %v8198_v52 = vadd.f32 %v13329_v5, %v21771_v25  ;;  %v13330_v49 = vpop.f32.mrb[54].mxu0 }
 0xe84   :  { %v13331_v43 = vpop.f32.mrb[55].mxu0 }
 0xe85   :  { %v13332_v35 = vadd.f32 %v13331_v43, %v13330_v49 }
 0xe87   :  { %v8207_v23 = vadd.f32 %v13332_v35, %v21773_v16  ;;  %v21860_v16 = vpack.c.bf16 %v8829_v45, %v8822_v24 }
 0xe97   :  { %v13365_v4 = vpop.f32.mrb[56].mxu0 }
 0xe98   :  { %v13366_v60 = vpop.f32.mrb[57].mxu0 }
 0xe99   :  { %v13367_v28 = vadd.f32 %v13366_v60, %v13365_v4 }
 0xe9b   :  { %v8315_v29 = vadd.f32 %v13367_v28, %v8180_v32  ;;  %v13368_v21 = vpop.f32.mrb[58].mxu0 }
 0xe9c   :  { %v13369_v0 = vpop.f32.mrb[59].mxu0 }
 0xe9d   :  { %v13370_v25 = vadd.f32 %v13369_v0, %v13368_v21 }
 0xe9f   :  { %v8326_v15 = vadd.f32 %v13370_v25, %v8189_v44  ;;  %v13371_v6 = vpop.f32.mrb[60].mxu0 }
 0xea0   :  { %v13372_v1 = vpop.f32.mrb[61].mxu0 }
 0xea1   :  { %v13373_v53 = vadd.f32 %v13372_v1, %v13371_v6 }
 0xea3   :  { %v8337_v31 = vadd.f32 %v13373_v53, %v8198_v52  ;;  %v13374_v56 = vpop.f32.mrb[62].mxu0 }
 0xea4   :  { %v13375_v47 = vpop.f32.mrb[63].mxu0 }
 0xea5   :  { %v13376_v55 = vadd.f32 %v13375_v47, %v13374_v56 }
 0xea7   :  { %v8348_v10 = vadd.f32 %v13376_v55, %v8207_v23 }
 0xeb7   :  { %v13409_v14 = vpop.f32.mrb[64].mxu0 }
 0xeb8   :  { %v13410_v59 = vpop.f32.mrb[65].mxu0 }
 0xeb9   :  { %v13411_v61 = vadd.f32 %v13410_v59, %v13409_v14 }
 0xebb   :  { %v8516_v48 = vadd.f32 %v13411_v61, %v8315_v29  ;;  %v13412_v26 = vpop.f32.mrb[66].mxu0 }
 0xebc   :  { %v13413_v2 = vpop.f32.mrb[67].mxu0 }
 0xebd   :  { %v13414_v12 = vadd.f32 %v13413_v2, %v13412_v26 }
 0xebf   :  { %v8523_v46 = vadd.f32 %v13414_v12, %v8326_v15  ;;  %v13415_v24 = vpop.f32.mrb[68].mxu0 }
 0xec0   :  { %v13416_v45 = vpop.f32.mrb[69].mxu0 }
 0xec1   :  { %v13417_v33 = vadd.f32 %v13416_v45, %v13415_v24 }
 0xec3   :  { %v8530_v18 = vadd.f32 %v13417_v33, %v8337_v31  ;;  %v13418_v34 = vpop.f32.mrb[70].mxu0 }
 0xec4   :  { %v13419_v9 = vpop.f32.mrb[71].mxu0 }
 0xec5   :  { %v13420_v27 = vadd.f32 %v13419_v9, %v13418_v34 }
 0xec7   :  { %v8537_v32 = vadd.f32 %v13420_v27, %v8348_v10 }
 0xed7   :  { %v13453_v36 = vpop.f32.mrb[72].mxu0 }
 0xed8   :  { %v13454_v19 = vpop.f32.mrb[73].mxu0 }
 0xed9   :  { %v13455_v37 = vadd.f32 %v13454_v19, %v13453_v36 }
 0xedb   :  { %v8641_v13 = vadd.f32 %v13455_v37, %v8516_v48  ;;  %v13456_v57 = vpop.f32.mrb[74].mxu0 }
 0xedc   :  { %v13457_v51 = vpop.f32.mrb[75].mxu0 }
 0xedd   :  { %v8681_v3 = vsel %vm2108_vm1, %v8641_v13, 0  ;;  %v13458_v44 = vadd.f32 %v13457_v51, %v13456_v57 }
 0xede   :  { %v21867_v39 = vand.u32 4294901760, %v8681_v3 }
 0xedf   :  { %v8648_v42 = vadd.f32 %v13458_v44, %v8523_v46  ;;  %v13459_v5 = vpop.f32.mrb[76].mxu0 }
 0xee0   :  { %v8766_v52 = vsub.f32 %v8681_v3, %v21867_v39  ;;  %v13460_v49 = vpop.f32.mrb[77].mxu0 }
 0xee1   :  { %v8684_v43 = vsel %vm2108_vm1, %v8648_v42, 0  ;;  %v13461_v35 = vadd.f32 %v13460_v49, %v13459_v5  ;;  %v16218_v5 = vmov 0.0   ;;  %v21958_v49 = vld [vmem:[%s21952_s10 + $0x8] sm:$0xff] }
 0xee2   :  { %v21871_v23 = vand.u32 4294901760, %v8684_v43  ;;  %v8767_v4 = vand.u32 4294901760, %v8766_v52  ;;  %14369 = vmatprep.mubr.msk.f32.mxu1 %vm16217_vm4, %v16218_v5 }
 0xee3   :  { %v8655_v60 = vadd.f32 %v13461_v35, %v8530_v18  ;;  %v13462_v28 = vpop.f32.mrb[78].mxu0  ;;  %v9955_v35 = vand.u32 4294901760, %v21958_v49 }
 0xee4   :  { %v8776_v29 = vsub.f32 %v8684_v43, %v21871_v23  ;;  %v13463_v21 = vpop.f32.mrb[79].mxu0  ;;  %v8768_v0 = vsub.f32 %v8766_v52, %v8767_v4 }
 0xee5   :  { %v8687_v25 = vsel %vm2108_vm1, %v8655_v60, 0  ;;  %v13464_v15 = vadd.f32 %v13463_v21, %v13462_v28 }
 0xee6   :  { %v8777_v6 = vand.u32 4294901760, %v8776_v29  ;;  %v21875_v1 = vand.u32 4294901760, %v8687_v25  ;;  %v8769_v53 = vand.u32 4294901760, %v8768_v0 }
 0xee7   :  { %v8662_v31 = vadd.f32 %v13464_v15, %v8537_v32 }
 0xee8   :  { %v8778_v56 = vsub.f32 %v8776_v29, %v8777_v6  ;;  %v8786_v47 = vsub.f32 %v8687_v25, %v21875_v1  ;;  %14039 = vmatprep.mubr.f32.mxu0 %v8769_v53 }
 0xee9   :  { %v8690_v55 = vsel %vm2108_vm1, %v8662_v31, 0 }
 0xeea   :  { %v8779_v10 = vand.u32 4294901760, %v8778_v56  ;;  %v21879_v14 = vand.u32 4294901760, %v8690_v55  ;;  %v8787_v59 = vand.u32 4294901760, %v8786_v47 }
 0xeec   :  { %v8796_v61 = vsub.f32 %v8690_v55, %v21879_v14  ;;  %14040 = vmatmul.mubr.f32.vlgmr.msra.gmra.mrb[80].mxu0 %v8779_v10  ;;  %v8788_v48 = vsub.f32 %v8786_v47, %v8787_v59  ;;  %v12972_v10 = vld [vmem:[%s12911_s18] ss:$0 sm:$0xff]  ;;  %s12928_s18 = sld [smem:[%s22276_s0 + %s16236_s15]]  }
 0xeed   :  { %14972 = vmatpush3.bf16.msra.mxu0 %v21822_v54  ;;  %v24158_v54 = vmov 0.0|0.0  }
 0xeee   :  { %14974 = vmatprep.subr.bf16.mxu0 %v21824_v62  ;;  %v8789_v26 = vand.u32 4294901760, %v8788_v48  ;;  %v8797_v2 = vand.u32 4294901760, %v8796_v61 }
 0xef0   :  { %14042 = vmatprep.mubr.f32.mxu0 %v8789_v26  ;;  %v8798_v12 = vsub.f32 %v8796_v61, %v8797_v2  ;;  %v12973_v26 = vld [vmem:[%s12912_s22] ss:$0 sm:$0xff]  ;;  %s12929_s22 = sld [smem:[%s22276_s0 + %s16237_s19]]  }
 0xef1   :  { %14976 = vmatpush3.bf16.msra.mxu0 %v21824_v62 }
 0xef2   :  { %14978 = vmatprep.subr.bf16.mxu0 %v21827_v30  ;;  %v8799_v46 = vand.u32 4294901760, %v8798_v12 }
 0xef4   :  { %14043 = vmatmul.mubr.f32.gmra.mrb[82].mxu0 %v8799_v46 }
 0xef5   :  { %14980 = vmatpush3.bf16.msra.mxu0 %v21827_v30  ;;  %14061 = vmatprep.mubr.f32.mxu0 %v21867_v39 }
 0xef6   :  { %14982 = vmatprep.subr.bf16.mxu0 %v21835_v7 }
 0xef9   :  { %14984 = vmatpush3.bf16.msra.mxu0 %v21835_v7 }
 0xefa   :  { %14986 = vmatprep.subr.bf16.mxu0 %v21833_v22 }
 0xefc   :  { %14062 = vmatmul.mubr.f32.vlgmr.msra.gmra.mrb[80].mxu0 %v21871_v23 }
 0xefd   :  { %14064 = vmatprep.mubr.f32.mxu0 %v21875_v1  ;;  %14988 = vmatpush3.bf16.msra.mxu0 %v21833_v22 }
 0xefe   :  { %14990 = vmatprep.subr.bf16.mxu0 %v21840_v11 }
 0xf00   :  { %14065 = vmatmul.mubr.f32.gmra.mrb[82].mxu0 %v21879_v14 }
 0xf01   :  { %14992 = vmatpush3.bf16.msra.mxu0 %v21840_v11  ;;  %14083 = vmatprep.mubr.f32.mxu0 %v8766_v52  ;;  %v21955_v52 = vld [vmem:[%s21952_s10] sm:$0xff] }
 0xf02   :  { %14994 = vmatprep.subr.bf16.mxu0 %v21844_v58  ;;  %v9952_v43 = vand.u32 4294901760, %v21955_v52 }
 0xf05   :  { %14996 = vmatpush3.bf16.msra.mxu0 %v21844_v58 }
 0xf06   :  { %14998 = vmatprep.subr.bf16.mxu0 %v21847_v41 }
 0xf09   :  { %15000 = vmatpush3.bf16.msra.mxu0 %v21847_v41 }
 0xf0a   :  { %15002 = vmatprep.subr.bf16.mxu0 %v21775_v38 }
 0xf0c   :  { %14084 = vmatmul.mubr.f32.vlgmr.msra.gmra.mrb[80].mxu0 %v8776_v29 }
 0xf0d   :  { %14086 = vmatprep.mubr.f32.mxu0 %v8786_v47  ;;  %15004 = vmatpush3.bf16.msra.mxu0 %v21775_v38  ;;  %v9444_v47 = vld [vmem:[%s12913_s14] sm:$0xff]  ;;  %s12926_s14 = sld [smem:[%s22276_s0 + %s16235_s11]]  }
 0xf0e   :  { %15006 = vmatprep.subr.bf16.mxu0 %v21783_v17 }
 0xf10   :  { %14087 = vmatmul.mubr.f32.gmra.mrb[82].mxu0 %v8796_v61 }
 0xf11   :  { %15008 = vmatpush3.bf16.msra.mxu0 %v21783_v17  ;;  %14105 = vmatprep.mubr.f32.mxu0 %v8767_v4  ;;  %v21970_v4 = vsub.f32 %v21958_v49, %v9955_v35 }
 0xf12   :  { %15010 = vmatprep.subr.bf16.mxu0 %v21787_v40 }
 0xf15   :  { %15012 = vmatpush3.bf16.msra.mxu0 %v21787_v40 }
 0xf16   :  { %15014 = vmatprep.subr.bf16.mxu0 %v21811_v63 }
 0xf19   :  { %15016 = vmatpush3.bf16.msra.mxu0 %v21811_v63 }
 0xf1a   :  { %15018 = vmatprep.subr.bf16.mxu0 %v21854_v50 }
 0xf1c   :  { %14106 = vmatmul.mubr.f32.vlgmr.msra.gmra.mrb[80].mxu0 %v8777_v6 }
 0xf1d   :  { %14108 = vmatprep.mubr.f32.mxu0 %v8787_v59  ;;  %15020 = vmatpush3.bf16.msra.mxu0 %v21854_v50 }
 0xf1e   :  { %15022 = vmatprep.subr.bf16.mxu0 %v21860_v16 }
 0xf20   :  { %14109 = vmatmul.mubr.f32.gmra.mrb[82].mxu0 %v8797_v2 }
 0xf21   :  { %15024 = vmatpush3.bf16.msra.mxu0 %v21860_v16  ;;  %14127 = vmatprep.mubr.f32.mxu0 %v21867_v39 }
 0xf22   :  { %15026 = vmatprep.subr.bf16.mxu0 %v21862_v8 }
 0xf25   :  { %15028 = vmatpush3.bf16.msra.mxu0 %v21862_v8 }
 0xf26   :  { %15030 = vmatprep.subr.bf16.mxu0 %v21864_v20 }
 0xf29   :  { %15032 = vmatpush3.bf16.msra.mxu0 %v21864_v20 }
 0xf2a   :  { %15034 = vmatprep.subr.bf16.mxu0 %v21775_v38 }
 0xf2c   :  { %14128 = vmatmul.mubr.f32.vlgmr.msra.gmra.mrb[80].mxu0 %v21871_v23 }
 0xf2d   :  { %14130 = vmatprep.mubr.f32.mxu0 %v21875_v1  ;;  %15036 = vmatpush3.bf16.msra.mxu0 %v21775_v38  ;;  %v12971_v38 = vld [vmem:[%s12910_s6] ss:$0 sm:$0xff]  ;;  %s12927_s6 = sld [smem:[%s22276_s0 + %s16233_s3]]  }
 0xf2e   :  { %15038 = vmatprep.subr.bf16.mxu0 %v21783_v17 }
 0xf30   :  { %14131 = vmatmul.mubr.f32.gmra.mrb[82].mxu0 %v21879_v14 }
 0xf31   :  { %15040 = vmatpush3.bf16.msra.mxu0 %v21783_v17  ;;  %14149 = vmatprep.mubr.f32.mxu0 %v21867_v39 }
 0xf32   :  { %15042 = vmatprep.subr.bf16.mxu0 %v21787_v40 }
 0xf35   :  { %15044 = vmatpush3.bf16.msra.mxu0 %v21787_v40 }
 0xf36   :  { %15046 = vmatprep.subr.bf16.mxu0 %v21811_v63 }
 0xf39   :  { %15048 = vmatpush3.bf16.msra.mxu0 %v21811_v63 }
 0xf3a   :  { %15049 = vmatprep.subr.bf16.mxu0 %v24158_v54 }
 0xf3c   :  { %14150 = vmatmul.mubr.f32.vlgmr.msra.gmra.mrb[80].mxu0 %v21871_v23  ;;  %v21965_v23 = vsub.f32 %v21955_v52, %v9952_v43 }
 0xf3d   :  { %14152 = vmatprep.mubr.f32.mxu0 %v21875_v1 }
 0xf40   :  { %14153 = vmatmul.mubr.f32.gmra.mrb[82].mxu0 %v21879_v14  ;;  %v9446_v14 = vsel %vm191_vm0, %v9444_v47, 0 }
 0xf41   :  { %14163 = vmatprep.mubr.msk.f32.mxu0 %vm16217_vm4, %v16218_v5  ;;  %v21982_v12 = vand.u32 4294901760, %v9446_v14 }
0x100f   :  { %v14151_v17 = vpop.f32.mrb[80].mxu0 }
0x1010   :  { %v15239_v40 = vadd.f32 %v14151_v17, %v12971_v38  ;;  %v9336_v62 = vpop.f32.mrb[81].mxu0 }
0x1011   :  { %v15240_v30 = vadd.f32 %v12971_v38, %v9336_v62 }
0x1012   :  { %v9363_v63 = vsel %vm2108_vm1, %v15239_v40, 0.0 }
0x1013   :  { %9364 = vadd.xlane.f32.xlu0 %v9363_v63  ;;  %v14154_v22 = vpop.f32.mrb[82].mxu0  ;;  %v9360_v7 = vsel %vm2108_vm1, %v15240_v30, 0.0 }
0x1014   :  { %v15241_v11 = vadd.f32 %v14154_v22, %v12971_v38  ;;  %v9348_v58 = vpop.f32.mrb[83].mxu0  ;;  %9361 = vadd.xlane.f32.xlu1 %v9360_v7  ;;  %v21985_v7 = vsub.f32 %v9446_v14, %v21982_v12 }
0x1015   :  { %v15242_v41 = vadd.f32 %v12971_v38, %v9348_v58 }
0x1016   :  { %v9369_v50 = vsel %vm2108_vm1, %v15241_v11, 0.0 }
0x1017   :  { %v9366_v16 = vsel %vm2108_vm1, %v15242_v41, 0.0 }
0x1018   :  { %9367 = vadd.xlane.f32.xlu0 %v9366_v16  ;;  %9370 = vadd.xlane.f32.xlu1 %v9369_v50 }
0x10a0   :  { %v9365_v8 = vpop.xlane.xlu0 %9364 }
0x10a1   :  { %v9373_v20 = vmul.f32 0.015625, %v9365_v8  ;;  %v9362_v24 = vpop.xlane.xlu1 %9361 }
0x10a2   :  { %v9372_v45 = vmul.f32 0.015625, %v9362_v24 }
0x10a3   :  { %v9377_v33 = vsub.f32 %v15239_v40, %v9373_v20 }
0x10a4   :  { %v9376_v18 = vsub.f32 %v15240_v30, %v9372_v45 }
0x10a5   :  { %v9368_v34 = vpop.xlane.xlu0 %9367  ;;  %v9371_v9 = vpop.xlane.xlu1 %9370  ;;  %v9381_v27 = vmul.f32 %v9377_v33, %v9377_v33 }
0x10a6   :  { %v9374_v32 = vmul.f32 0.015625, %v9368_v34  ;;  %v9375_v36 = vmul.f32 0.015625, %v9371_v9  ;;  %v9380_v19 = vmul.f32 %v9376_v18, %v9376_v18 }
0x10a7   :  { %v9387_v37 = vsel %vm2108_vm1, %v9381_v27, 0.0 }
0x10a8   :  { %v9378_v13 = vsub.f32 %v15242_v41, %v9374_v32  ;;  %v9379_v57 = vsub.f32 %v15241_v11, %v9375_v36  ;;  %9388 = vadd.xlane.f32.xlu1 %v9387_v37  ;;  %v9384_v51 = vsel %vm2108_vm1, %v9380_v19, 0.0 }
0x10a9   :  { %9385 = vadd.xlane.f32.xlu0 %v9384_v51 }
0x10aa   :  { %v9382_v3 = vmul.f32 %v9378_v13, %v9378_v13  ;;  %v9383_v44 = vmul.f32 %v9379_v57, %v9379_v57 }
0x10ac   :  { %v9390_v39 = vsel %vm2108_vm1, %v9382_v3, 0.0  ;;  %v9393_v42 = vsel %vm2108_vm1, %v9383_v44, 0.0 }
0x10ad   :  { %9391 = vadd.xlane.f32.xlu0 %v9390_v39  ;;  %9394 = vadd.xlane.f32.xlu1 %v9393_v42 }
0x1135   :  { %v9389_v60 = vpop.xlane.xlu1 %9388 }
0x1136   :  { %v9397_v28 = vmul.f32 0.015625, %v9389_v60  ;;  %v9386_v29 = vpop.xlane.xlu0 %9385 }
0x1137   :  { %v9396_v21 = vmul.f32 0.015625, %v9386_v29 }
0x1138   :  { %v9401_v0 = vadd.f32 1e-05, %v9397_v28 }
0x1139   :  { %v9400_v25 = vadd.f32 1e-05, %v9396_v21 }
0x113a   :  { %16179 = vrsqrt.f32 %v9401_v0  ;;  %v9392_v15 = vpop.xlane.xlu0 %9391  ;;  %v9395_v6 = vpop.xlane.xlu1 %9394 }
0x113b   :  { %16181 = vrsqrt.f32 %v9400_v25  ;;  %v9398_v1 = vmul.f32 0.015625, %v9392_v15  ;;  %v9399_v53 = vmul.f32 0.015625, %v9395_v6 }
0x113d   :  { %v9402_v31 = vadd.f32 1e-05, %v9398_v1  ;;  %v9403_v56 = vadd.f32 1e-05, %v9399_v53 }
0x113f   :  { %16183 = vrsqrt.f32 %v9402_v31 }
0x1140   :  { %16185 = vrsqrt.f32 %v9403_v56 }
0x1144   :  { %v16180_v55 = vpop.eup %16179 }
0x1145   :  { %v16182_v59 = vpop.eup %16181  ;;  %v9409_v61 = vmul.f32 %v16180_v55, %v9377_v33  ;;  %v9519_v33 = vand.u32 4294901760, %v21985_v7 }
0x1146   :  { %v9408_v48 = vmul.f32 %v16182_v59, %v9376_v18 }
0x1147   :  { %v9419_v2 = vmul.f32 %v12972_v10, %v9409_v61  ;;  %v22017_v61 = vpack.c.bf16 %v9955_v35, %v9952_v43  ;;  %v9939_v43 = vld [vmem:[%s21952_s10 + $0x30] sm:$0xff]  ;;  %v9940_v35 = vld [vmem:[%s21952_s10 + $0x38] sm:$0xff] }
0x1148   :  { %v9418_v46 = vmul.f32 %v12972_v10, %v9408_v48  ;;  %v9935_v48 = vld [vmem:[%s21952_s10 + $0x10] sm:$0xff] }
0x1149   :  { %v16184_v38 = vpop.eup %16183  ;;  %v9429_v17 = vadd.f32 %v12973_v26, %v9419_v2  ;;  %v9937_v2 = vld [vmem:[%s21952_s10 + $0x20] sm:$0xff] }
0x114a   :  { %v16186_v40 = vpop.eup %16185  ;;  %v9410_v62 = vmul.f32 %v16184_v38, %v9378_v13  ;;  %v9428_v30 = vadd.f32 %v12973_v26, %v9418_v46  ;;  %v9958_v46 = vand.u32 4294901760, %v9935_v48  ;;  %v9938_v38 = vld [vmem:[%s21952_s10 + $0x28] sm:$0xff]  ;;  %v9964_v49 = vand.u32 4294901760, %v9937_v2 }
0x114b   :  { %v9411_v63 = vmul.f32 %v16186_v40, %v9379_v57  ;;  %vm9433_vm5 = vcmp.ge.f32.partialorder %v9429_v17, 0.0  ;;  %v9437_v22 = vmul.f32 0.05, %v9429_v17  ;;  %v9520_v57 = vsub.f32 %v21985_v7, %v9519_v33 }
0x114c   :  { %v9420_v11 = vmul.f32 %v12972_v10, %v9410_v62  ;;  %vm9432_vm6 = vcmp.ge.f32.partialorder %v9428_v30, 0.0  ;;  %v9436_v58 = vmul.f32 0.05, %v9428_v30  ;;  %v9970_v40 = vand.u32 4294901760, %v9939_v43 }
0x114d   :  { %v9421_v41 = vmul.f32 %v12972_v10, %v9411_v63  ;;  %v9441_v50 = vsel %vm9433_vm5, %v9429_v17, %v9437_v22  ;;  %v9521_v21 = vand.u32 4294901760, %v9520_v57  ;;  %v9967_v17 = vand.u32 4294901760, %v9938_v38 }
0x114e   :  { %v9440_v16 = vsel %vm9432_vm6, %v9428_v30, %v9436_v58  ;;  %v9452_v8 = vand.u32 4294901760, %v9441_v50  ;;  %v9430_v20 = vadd.f32 %v12973_v26, %v9420_v11  ;;  %v9973_v62 = vand.u32 4294901760, %v9940_v35 }
0x114f   :  { %v9449_v24 = vand.u32 4294901760, %v9440_v16  ;;  %v9431_v45 = vadd.f32 %v12973_v26, %v9421_v41  ;;  %v9936_v26 = vld [vmem:[%s21952_s10 + $0x18] sm:$0xff]  ;;  %v22034_v63 = vsub.f32 %v9935_v48, %v9958_v46  ;;  %v22040_v11 = vpack.c.bf16 %v9967_v17, %v9964_v49  ;;  %s12925_s10 = sld [smem:[%s22276_s0 + %s16234_s7]]  }
0x1150   :  { %v9536_v18 = vsub.f32 %v9441_v50, %v9452_v8  ;;  %vm9434_vm7 = vcmp.ge.f32.partialorder %v9430_v20, 0.0  ;;  %v9438_v34 = vmul.f32 0.05, %v9430_v20  ;;  %v9961_v52 = vand.u32 4294901760, %v9936_v26 }
0x1151   :  { %v15050_v9 = vpack.c.bf16 %v9452_v8, %v9449_v24  ;;  %v9529_v27 = vsub.f32 %v9440_v16, %v9449_v24  ;;  %vm9435_vm8 = vcmp.ge.f32.partialorder %v9431_v45, 0.0  ;;  %v9439_v32 = vmul.f32 0.05, %v9431_v45 }
0x1152   :  { %v9442_v36 = vsel %vm9434_vm7, %v9430_v20, %v9438_v34  ;;  %v9537_v19 = vand.u32 4294901760, %v9536_v18  ;;  %v22032_v30 = vpack.c.bf16 %v9961_v52, %v9958_v46  ;;  %v22036_v22 = vsub.f32 %v9936_v26, %v9961_v52 }
0x1153   :  { %15051 = vmatpush3.bf16.msra.mxu0 %v15050_v9  ;;  %v9443_v37 = vsel %vm9435_vm8, %v9431_v45, %v9439_v32  ;;  %v9455_v13 = vand.u32 4294901760, %v9442_v36  ;;  %v9530_v51 = vand.u32 4294901760, %v9529_v27  ;;  %v15062_v55 = vpack.c.bf16 %v9536_v18, %v9529_v27 }
0x1154   :  { %15052 = vmatprep.subr.bf16.mxu0 %v24158_v54  ;;  %v9458_v3 = vand.u32 4294901760, %v9443_v37  ;;  %v9538_v44 = vsub.f32 %v9536_v18, %v9537_v19  ;;  %v22042_v58 = vsub.f32 %v9938_v38, %v9967_v17  ;;  %v22044_v41 = vsub.f32 %v9939_v43, %v9970_v40 }
0x1155   :  { %v9543_v39 = vsub.f32 %v9442_v36, %v9455_v13  ;;  %v9531_v42 = vsub.f32 %v9529_v27, %v9530_v51  ;;  %v15074_v14 = vpack.c.bf16 %v9537_v19, %v9530_v51  ;;  %v22047_v50 = vsub.f32 %v9940_v35, %v9973_v62 }
0x1156   :  { %v15053_v60 = vpack.c.bf16 %v9458_v3, %v9455_v13  ;;  %v9550_v28 = vsub.f32 %v9443_v37, %v9458_v3  ;;  %v9539_v29 = vand.u32 4294901760, %v9538_v44  ;;  %v10044_v8 = vand.u32 4294901760, %v21970_v4 }
0x1157   :  { %v9532_v0 = vand.u32 4294901760, %v9531_v42  ;;  %v9544_v25 = vand.u32 4294901760, %v9543_v39  ;;  %v10051_v20 = vand.u32 4294901760, %v22034_v63  ;;  %v10058_v24 = vand.u32 4294901760, %v22036_v22 }
0x1158   :  { %15054 = vmatpush3.bf16.msra.mxu0 %v15053_v60  ;;  %v9551_v15 = vand.u32 4294901760, %v9550_v28  ;;  %v15065_v10 = vpack.c.bf16 %v9550_v28, %v9543_v39  ;;  %v10072_v27 = vand.u32 4294901760, %v22042_v58  ;;  %v22060_v32 = vpack.c.bf16 %v9973_v62, %v9970_v40 }
0x1159   :  { %15055 = vmatprep.subr.bf16.mxu0 %v24158_v54  ;;  %v15056_v6 = vpack.c.bf16 %v9539_v29, %v9532_v0  ;;  %v9545_v1 = vsub.f32 %v9543_v39, %v9544_v25  ;;  %v10052_v18 = vsub.f32 %v22034_v63, %v10051_v20  ;;  %v10059_v34 = vsub.f32 %v22036_v22, %v10058_v24 }
0x115a   :  { %v9552_v53 = vsub.f32 %v9550_v28, %v9551_v15  ;;  %v15077_v59 = vpack.c.bf16 %v9551_v15, %v9544_v25  ;;  %v10073_v57 = vsub.f32 %v22042_v58, %v10072_v27  ;;  %v10079_v42 = vand.u32 4294901760, %v22044_v41 }
0x115b   :  { %14164 = vmatmul.mubr.f32.vlgmr.msra.gmra.mrb[84].mxu0 %v9521_v21  ;;  %v9546_v31 = vand.u32 4294901760, %v9545_v1  ;;  %v10053_v19 = vand.u32 4294901760, %v10052_v18  ;;  %v10060_v37 = vand.u32 4294901760, %v10059_v34  ;;  %v15110_v15 = vpack.c.bf16 %v21970_v4, %v21965_v23  ;;  %v12975_v34 = vld [vmem:[%s12916_s8] ss:$0 sm:$0xff] }
0x115c   :  { %15057 = vmatpush3.bf16.msra.mxu0 %v15056_v6  ;;  %v9553_v56 = vand.u32 4294901760, %v9552_v53  ;;  %14174 = vmatprep.mubr.msk.f32.mxu0 %vm16217_vm4, %v16218_v5  ;;  %v10074_v39 = vand.u32 4294901760, %v10073_v57  ;;  %v10080_v29 = vsub.f32 %v22044_v41, %v10079_v42  ;;  %v15113_v1 = vpack.c.bf16 %v22036_v22, %v22034_v63  ;;  %v10974_v63 = vld [vmem:[%s12919_s30 + $0x8] sm:$0xff] }
0x115d   :  { %15058 = vmatprep.subr.bf16.mxu0 %v24158_v54  ;;  %v15101_v3 = vpack.c.bf16 %v10060_v37, %v10053_v19 }
0x115e   :  { %v15059_v47 = vpack.c.bf16 %v9553_v56, %v9546_v31  ;;  %v10081_v0 = vand.u32 4294901760, %v10080_v29  ;;  %v15119_v31 = vpack.c.bf16 %v22047_v50, %v22044_v41 }
0x1160   :  { %15060 = vmatpush3.bf16.msra.mxu0 %v15059_v47  ;;  %v15137_v47 = vpack.c.bf16 %v10058_v24, %v10051_v20 }
0x1161   :  { %15061 = vmatprep.subr.bf16.mxu0 %v24158_v54 }
0x1163   :  { %14175 = vmatmul.mubr.f32.vlgmr.msra.gmra.mrb[84].mxu0 %v21982_v12 }
0x1164   :  { %15063 = vmatpush3.bf16.msra.mxu0 %v15062_v55  ;;  %14185 = vmatprep.mubr.msk.f32.mxu0 %vm16217_vm4, %v16218_v5 }
0x1165   :  { %15064 = vmatprep.subr.bf16.mxu0 %v24158_v54 }
0x1168   :  { %15066 = vmatpush3.bf16.msra.mxu0 %v15065_v10 }
0x1169   :  { %15067 = vmatprep.subr.bf16.mxu0 %v24158_v54 }
0x116b   :  { %14186 = vmatmul.mubr.f32.vlgmr.msra.gmra.mrb[84].mxu0 %v21985_v7  ;;  %v22038_v7 = vsub.f32 %v9937_v2, %v9964_v49 }
0x116c   :  { %15069 = vmatpush3.bf16.msra.mxu0 %v15050_v9  ;;  %14196 = vmatprep.mubr.msk.f32.mxu0 %vm16217_vm4, %v16218_v5 }
0x116d   :  { %15070 = vmatprep.subr.bf16.mxu0 %v24158_v54  ;;  %v15116_v53 = vpack.c.bf16 %v22042_v58, %v22038_v7 }
0x1170   :  { %15072 = vmatpush3.bf16.msra.mxu0 %v15053_v60 }
0x1171   :  { %15073 = vmatprep.subr.bf16.mxu0 %v24158_v54 }
0x1173   :  { %14197 = vmatmul.mubr.f32.vlgmr.msra.gmra.mrb[84].mxu0 %v9519_v33  ;;  %v10045_v33 = vsub.f32 %v21970_v4, %v10044_v8 }
0x1174   :  { %15075 = vmatpush3.bf16.msra.mxu0 %v15074_v14  ;;  %14207 = vmatprep.mubr.msk.f32.mxu0 %vm16217_vm4, %v16218_v5 }
0x1175   :  { %15076 = vmatprep.subr.bf16.mxu0 %v24158_v54  ;;  %v10046_v36 = vand.u32 4294901760, %v10045_v33 }
0x1178   :  { %15078 = vmatpush3.bf16.msra.mxu0 %v15077_v59 }
0x1179   :  { %15079 = vmatprep.subr.bf16.mxu0 %v24158_v54 }
0x117b   :  { %14208 = vmatmul.mubr.f32.vlgmr.msra.gmra.mrb[84].mxu0 %v21982_v12 }
0x117c   :  { %15081 = vmatpush3.bf16.msra.mxu0 %v15050_v9  ;;  %14218 = vmatprep.mubr.msk.f32.mxu0 %vm16217_vm4, %v16218_v5  ;;  %v10065_v9 = vand.u32 4294901760, %v22038_v7 }
0x117d   :  { %15082 = vmatprep.subr.bf16.mxu0 %v24158_v54 }
0x117e   :  { %v10066_v13 = vsub.f32 %v22038_v7, %v10065_v9  ;;  %v15140_v55 = vpack.c.bf16 %v10072_v27, %v10065_v9  ;;  %v10989_v7 = vand.u32 4294901760, %v10974_v63 }
0x1180   :  { %15084 = vmatpush3.bf16.msra.mxu0 %v15053_v60  ;;  %v10067_v44 = vand.u32 4294901760, %v10066_v13  ;;  %v10086_v60 = vand.u32 4294901760, %v22047_v50  ;;  %v22132_v41 = vsub.f32 %v10974_v63, %v10989_v7 }
0x1181   :  { %15085 = vmatprep.subr.bf16.mxu0 %v24158_v54 }
0x1182   :  { %v15104_v28 = vpack.c.bf16 %v10074_v39, %v10067_v44  ;;  %v10087_v21 = vsub.f32 %v22047_v50, %v10086_v60  ;;  %v15143_v10 = vpack.c.bf16 %v10086_v60, %v10079_v42  ;;  %v11072_v29 = vand.u32 4294901760, %v22132_v41 }
0x1183   :  { %14219 = vmatmul.mubr.f32.vlgmr.msra.gmra.mrb[84].mxu0 %v21982_v12  ;;  %v10037_v12 = vand.u32 4294901760, %v21965_v23 }
0x1184   :  { %15087 = vmatpush3.bf16.msra.mxu0 %v22017_v61  ;;  %14237 = vmatprep.mubr.msk.f32.mxu0 %vm16217_vm4, %v16218_v5  ;;  %v10088_v25 = vand.u32 4294901760, %v10087_v21 }
0x1185   :  { %15088 = vmatprep.subr.bf16.mxu0 %v24158_v54  ;;  %v10038_v16 = vsub.f32 %v21965_v23, %v10037_v12  ;;  %v15134_v56 = vpack.c.bf16 %v10044_v8, %v10037_v12  ;;  %v10522_v8 = vld [vmem:[%s12918_s4] sm:$0xf] }
0x1186   :  { %v15107_v6 = vpack.c.bf16 %v10088_v25, %v10081_v0  ;;  %v10525_v24 = vsel %vm10523_vm10, %v10522_v8, 0  ;;  %v11073_v0 = vsub.f32 %v22132_v41, %v11072_v29 }
0x1187   :  { %v10039_v45 = vand.u32 4294901760, %v10038_v16 }
0x1188   :  { %15090 = vmatpush3.bf16.msra.mxu0 %v22032_v30 }
0x1189   :  { %15091 = vmatprep.subr.bf16.mxu0 %v24158_v54  ;;  %v15098_v51 = vpack.c.bf16 %v10046_v36, %v10039_v45  ;;  %v10593_v45 = vand.u32 4294901760, %v10525_v24 }
0x118b   :  { %v10594_v33 = vsub.f32 %v10525_v24, %v10593_v45 }
0x118c   :  { %15093 = vmatpush3.bf16.msra.mxu0 %v22040_v11 }
0x118d   :  { %15094 = vmatprep.subr.bf16.mxu0 %v24158_v54  ;;  %v10595_v27 = vand.u32 4294901760, %v10594_v33 }
0x118f   :  { %v10596_v37 = vsub.f32 %v10594_v33, %v10595_v27 }
0x1190   :  { %15096 = vmatpush3.bf16.msra.mxu0 %v22060_v32 }
0x1191   :  { %15097 = vmatprep.subr.bf16.mxu0 %v24158_v54 }
0x1256   :  { %v9929_v14 = vpop.f32.mrb[84].mxu0 }
0x1257   :  { %v9949_v59 = vsel %vm2108_vm1, %v9929_v14, 0  ;;  %v14220_v48 = vpop.f32.mrb[85].mxu0  ;;  %vm11974_vm1 = vcmask 1043456  }
0x1258   :  { %v10024_v26 = vand.u32 4294901760, %v9949_v59 }
0x125a   :  { %v10025_v23 = vsub.f32 %v9949_v59, %v10024_v26 }
0x125c   :  { %v10026_v4 = vand.u32 4294901760, %v10025_v23 }
0x125e   :  { %v10027_v2 = vsub.f32 %v10025_v23, %v10026_v4 }
0x1260   :  { %v10028_v46 = vand.u32 4294901760, %v10027_v2 }
0x1262   :  { %14238 = vmatmul.mubr.f32.vlgmr.msra.gmra.mrb[86].mxu0 %v10028_v46 }
0x1263   :  { %15099 = vmatpush3.bf16.msra.mxu0 %v15098_v51  ;;  %14256 = vmatprep.mubr.msk.f32.mxu0 %vm16217_vm4, %v16218_v5  ;;  %v10597_v51 = vand.u32 4294901760, %v10596_v37 }
0x1264   :  { %15100 = vmatprep.subr.bf16.mxu0 %v24158_v54 }
0x1267   :  { %15102 = vmatpush3.bf16.msra.mxu0 %v15101_v3 }
0x1268   :  { %15103 = vmatprep.subr.bf16.mxu0 %v24158_v54 }
0x126b   :  { %15105 = vmatpush3.bf16.msra.mxu0 %v15104_v28 }
0x126c   :  { %15106 = vmatprep.subr.bf16.mxu0 %v24158_v54 }
0x126f   :  { %15108 = vmatpush3.bf16.msra.mxu0 %v15107_v6 }
0x1270   :  { %15109 = vmatprep.subr.bf16.mxu0 %v24158_v54 }
0x1272   :  { %14257 = vmatmul.mubr.f32.vlgmr.msra.gmra.mrb[86].mxu0 %v10024_v26 }
0x1273   :  { %15111 = vmatpush3.bf16.msra.mxu0 %v15110_v15  ;;  %14275 = vmatprep.mubr.msk.f32.mxu0 %vm16217_vm4, %v16218_v5  ;;  %v11074_v15 = vand.u32 4294901760, %v11073_v0 }
0x1274   :  { %15112 = vmatprep.subr.bf16.mxu0 %v24158_v54 }
0x1277   :  { %15114 = vmatpush3.bf16.msra.mxu0 %v15113_v1 }
0x1278   :  { %15115 = vmatprep.subr.bf16.mxu0 %v24158_v54 }
0x127b   :  { %15117 = vmatpush3.bf16.msra.mxu0 %v15116_v53 }
0x127c   :  { %15118 = vmatprep.subr.bf16.mxu0 %v24158_v54 }
0x127f   :  { %15120 = vmatpush3.bf16.msra.mxu0 %v15119_v31 }
0x1280   :  { %15121 = vmatprep.subr.bf16.mxu0 %v24158_v54 }
0x1282   :  { %14276 = vmatmul.mubr.f32.vlgmr.msra.gmra.mrb[86].mxu0 %v10025_v23 }
0x1283   :  { %15123 = vmatpush3.bf16.msra.mxu0 %v22017_v61  ;;  %14294 = vmatprep.mubr.msk.f32.mxu0 %vm16217_vm4, %v16218_v5 }
0x1284   :  { %15124 = vmatprep.subr.bf16.mxu0 %v24158_v54 }
0x1287   :  { %15126 = vmatpush3.bf16.msra.mxu0 %v22032_v30 }
0x1288   :  { %15127 = vmatprep.subr.bf16.mxu0 %v24158_v54 }
0x128b   :  { %15129 = vmatpush3.bf16.msra.mxu0 %v22040_v11 }
0x128c   :  { %15130 = vmatprep.subr.bf16.mxu0 %v24158_v54 }
0x128f   :  { %15132 = vmatpush3.bf16.msra.mxu0 %v22060_v32 }
0x1290   :  { %15133 = vmatprep.subr.bf16.mxu0 %v24158_v54 }
0x1292   :  { %14295 = vmatmul.mubr.f32.vlgmr.msra.gmra.mrb[86].mxu0 %v10026_v4 }
0x1293   :  { %15135 = vmatpush3.bf16.msra.mxu0 %v15134_v56  ;;  %14313 = vmatprep.mubr.msk.f32.mxu0 %vm16217_vm4, %v16218_v5 }
0x1294   :  { %15136 = vmatprep.subr.bf16.mxu0 %v24158_v54 }
0x1297   :  { %15138 = vmatpush3.bf16.msra.mxu0 %v15137_v47 }
0x1298   :  { %15139 = vmatprep.subr.bf16.mxu0 %v24158_v54 }
0x129b   :  { %15141 = vmatpush3.bf16.msra.mxu0 %v15140_v55 }
0x129c   :  { %15142 = vmatprep.subr.bf16.mxu0 %v24158_v54 }
0x129f   :  { %15144 = vmatpush3.bf16.msra.mxu0 %v15143_v10 }
0x12a0   :  { %15145 = vmatprep.subr.bf16.mxu0 %v24158_v54 }
0x12a2   :  { %14314 = vmatmul.mubr.f32.vlgmr.msra.gmra.mrb[86].mxu0 %v10024_v26 }
0x12a3   :  { %15147 = vmatpush3.bf16.msra.mxu0 %v22017_v61  ;;  %14332 = vmatprep.mubr.msk.f32.mxu0 %vm16217_vm4, %v16218_v5  ;;  %v12974_v61 = vld [vmem:[%s12915_s26] ss:$0 sm:$0xff]  ;;  %s12930_s26 = sld [smem:[%s22276_s0 + %s16238_s23]]  }
0x12a4   :  { %15148 = vmatprep.subr.bf16.mxu0 %v24158_v54 }
0x12a7   :  { %15150 = vmatpush3.bf16.msra.mxu0 %v22032_v30  ;;  %v10973_v30 = vld [vmem:[%s12919_s30] sm:$0xff] }
0x12a8   :  { %15151 = vmatprep.subr.bf16.mxu0 %v24158_v54  ;;  %v10986_v22 = vand.u32 4294901760, %v10973_v30 }
0x12aa   :  { %v22130_v58 = vsub.f32 %v10973_v30, %v10986_v22  ;;  %v12978_v30 = vld [vmem:[%s12921_s24] ss:$0 sm:$0xff] }
0x12ab   :  { %15153 = vmatpush3.bf16.msra.mxu0 %v22040_v11  ;;  %v22128_v11 = vpack.c.bf16 %v10989_v7, %v10986_v22  ;;  %v12979_v22 = vld [vmem:[%s12922_s28] ss:$0 sm:$0xff] }
0x12ac   :  { %15154 = vmatprep.subr.bf16.mxu0 %v24158_v54  ;;  %v11065_v28 = vand.u32 4294901760, %v22130_v58  ;;  %v15164_v1 = vpack.c.bf16 %v22132_v41, %v22130_v58 }
0x12ad   :  { %15159 = vmatpush3.bf16.msra.mxu1 %v22128_v11 }
0x12ae   :  { %15160 = vmatprep.subr.bf16.mxu1 %v24158_v54  ;;  %v11066_v21 = vsub.f32 %v22130_v58, %v11065_v28  ;;  %v15170_v53 = vpack.c.bf16 %v11072_v29, %v11065_v28  ;;  %v11969_v28 = vld [vmem:[%s12927_s6] sm:$0x3] }
0x12af   :  { %15156 = vmatpush3.bf16.msra.mxu0 %v22060_v32  ;;  %v12976_v32 = vld [vmem:[%s12917_s12] ss:$0 sm:$0xff]  ;;  %v11972_v29 = vsel %vm11970_vm15, %v11969_v28, 0 }
0x12b0   :  { %14335 = vmatprep.subr.mxu0 %v16218_v5  ;;  %v11067_v25 = vand.u32 4294901760, %v11066_v21  ;;  %v12044_v21 = vand.u32 4294901760, %v11972_v29 }
0x12b2   :  { %14333 = vmatmul.mubr.f32.vlgmr.msra.gmra.mrb[86].mxu0 %v10024_v26  ;;  %v15161_v6 = vpack.c.bf16 %v11074_v15, %v11067_v25  ;;  %v12977_v26 = vld [vmem:[%s12920_s16] ss:$0 sm:$0xff]  ;;  %v12045_v0 = vsub.f32 %v11972_v29, %v12044_v21 }
0x12b3   :  { %14337 = vmatprep.mubr.msk.f32.mxu0 %vm16217_vm4, %v16218_v5  ;;  %v12981_v15 = vld [vmem:[%s12925_s10] ss:$0 sm:$0xff] }
0x1385   :  { %v10484_v52 = vpop.f32.mrb[86].mxu0 }
0x1386   :  { %v15243_v38 = vadd.f32 %v12974_v61, %v10484_v52  ;;  %v14334_v49 = vpop.f32.mrb[87].mxu0 }
0x1388   :  { %v10491_v43 = vsel %vm10490_vm9, %v15243_v38, 0.0 }
0x1389   :  { %10492 = vadd.xlane.f32.xlu0 %v10491_v43  ;;  %v11478_v43 = vld [vmem:[%s12923_s20] sm:$0xff] }
0x1416   :  { %v10493_v35 = vpop.xlane.xlu0 %10492 }
0x1417   :  { %v10495_v17 = vmul.f32 0.0625, %v10493_v35  ;;  %v11490_v35 = vand.u32 4294901760, %v11478_v43 }
0x1419   :  { %v10496_v40 = vsub.f32 %v15243_v38, %v10495_v17  ;;  %v11567_v58 = vsub.f32 %v11478_v43, %v11490_v35 }
0x141b   :  { %v10497_v62 = vmul.f32 %v10496_v40, %v10496_v40  ;;  %v11568_v8 = vand.u32 4294901760, %v11567_v58 }
0x141d   :  { %v10498_v12 = vsel %vm10490_vm9, %v10497_v62, 0.0 }
0x141e   :  { %10499 = vadd.xlane.f32.xlu1 %v10498_v12 }
0x14ab   :  { %v10500_v50 = vpop.xlane.xlu1 %10499 }
0x14ac   :  { %v10501_v16 = vmul.f32 0.0625, %v10500_v50 }
0x14ae   :  { %v10502_v20 = vadd.f32 1e-05, %v10501_v16 }
0x14b0   :  { %16187 = vrsqrt.f32 %v10502_v20 }
0x14ba   :  { %v16188_v18 = vpop.eup %16187 }
0x14bb   :  { %v10504_v9 = vmul.f32 %v16188_v18, %v10496_v40 }
0x14bd   :  { %v10511_v36 = vmul.f32 %v12975_v34, %v10504_v9 }
0x14bf   :  { %v10518_v19 = vadd.f32 %v12976_v32, %v10511_v36 }
0x14c1   :  { %vm10519_vm11 = vcmp.ge.f32.partialorder %v10518_v19, 0.0  ;;  %v10520_v13 = vmul.f32 0.05, %v10518_v19 }
0x14c3   :  { %v10521_v57 = vsel %vm10519_vm11, %v10518_v19, %v10520_v13 }
0x14c4   :  { %v10528_v3 = vand.u32 4294901760, %v10521_v57 }
0x14c6   :  { %14336 = vmatpush3.msra.mxu0 %v10528_v3  ;;  %v10605_v44 = vsub.f32 %v10521_v57, %v10528_v3 }
0x14c7   :  { %14338 = vmatmul.mubr.f32.vlgmr.msra.gmra.mrb[88].mxu0 %v10597_v51  ;;  %14340 = vmatprep.subr.mxu0 %v16218_v5 }
0x14c8   :  { %v10606_v39 = vand.u32 4294901760, %v10605_v44  ;;  %14342 = vmatprep.mubr.msk.f32.mxu0 %vm16217_vm4, %v16218_v5 }
0x14ca   :  { %v10607_v42 = vsub.f32 %v10605_v44, %v10606_v39 }
0x14cc   :  { %v10608_v60 = vand.u32 4294901760, %v10607_v42 }
0x14ce   :  { %14341 = vmatpush3.msra.mxu0 %v10608_v60 }
0x14cf   :  { %14343 = vmatmul.mubr.f32.vlgmr.msra.gmra.mrb[88].mxu0 %v10593_v45  ;;  %14345 = vmatprep.subr.mxu0 %v16218_v5 }
0x14d0   :  { %14346 = vmatpush3.msra.mxu0 %v10605_v44  ;;  %14347 = vmatprep.mubr.msk.f32.mxu0 %vm16217_vm4, %v16218_v5 }
0x14d1   :  { %14350 = vmatprep.subr.mxu0 %v16218_v5 }
0x14d7   :  { %14348 = vmatmul.mubr.f32.vlgmr.msra.gmra.mrb[88].mxu0 %v10594_v33 }
0x14d8   :  { %14351 = vmatpush3.msra.mxu0 %v10528_v3  ;;  %14352 = vmatprep.mubr.msk.f32.mxu0 %vm16217_vm4, %v16218_v5 }
0x14d9   :  { %14355 = vmatprep.subr.mxu0 %v16218_v5 }
0x14df   :  { %14353 = vmatmul.mubr.f32.vlgmr.msra.gmra.mrb[88].mxu0 %v10595_v27  ;;  %v12980_v27 = vld [vmem:[%s12924_s2] ss:$0 sm:$0xff] }
0x14e0   :  { %14356 = vmatpush3.msra.mxu0 %v10606_v39  ;;  %14357 = vmatprep.mubr.msk.f32.mxu0 %vm16217_vm4, %v16218_v5 }
0x14e1   :  { %14360 = vmatprep.subr.mxu0 %v16218_v5 }
0x14e7   :  { %14358 = vmatmul.mubr.f32.vlgmr.msra.gmra.mrb[88].mxu0 %v10593_v45 }
0x14e8   :  { %14361 = vmatpush3.msra.mxu0 %v10528_v3  ;;  %14362 = vmatprep.mubr.msk.f32.mxu0 %vm16217_vm4, %v16218_v5 }
0x14e9   :  { %14407 = vmatprep.subr.mxu0 %v16218_v5 }
0x14ef   :  { %14363 = vmatmul.mubr.f32.vlgmr.msra.gmra.mrb[88].mxu0 %v10593_v45  ;;  %v11569_v45 = vsub.f32 %v11567_v58, %v11568_v8 }
0x14f0   :  { %14409 = vmatprep.mubr.msk.f32.mxu0 %vm16217_vm4, %v16218_v5  ;;  %14408 = vmatpush3.msra.mxu0 %v11490_v35 }
0x14f1   :  { %14412 = vmatprep.subr.mxu0 %v16218_v5  ;;  %v11570_v34 = vand.u32 4294901760, %v11569_v45 }
0x15c2   :  { %v10969_v31 = vpop.f32.mrb[88].mxu0 }
0x15c3   :  { %v10983_v56 = vsel %vm10490_vm9, %v10969_v31, 0  ;;  %v14364_v47 = vpop.f32.mrb[89].mxu0 }
0x15c4   :  { %v11052_v55 = vand.u32 4294901760, %v10983_v56 }
0x15c6   :  { %v11053_v10 = vsub.f32 %v10983_v56, %v11052_v55 }
0x15c8   :  { %v11054_v14 = vand.u32 4294901760, %v11053_v10 }
0x15ca   :  { %v11055_v59 = vsub.f32 %v11053_v10, %v11054_v14 }
0x15cc   :  { %v11056_v48 = vand.u32 4294901760, %v11055_v59 }
0x15ce   :  { %14370 = vmatmul.mubr.f32.vlgmr.msra.gmra.mrb[64].mxu1 %v11056_v48 }
0x15cf   :  { %15162 = vmatpush3.bf16.msra.mxu1 %v15161_v6  ;;  %14376 = vmatprep.mubr.msk.f32.mxu1 %vm16217_vm4, %v16218_v5 }
0x15d0   :  { %15163 = vmatprep.subr.bf16.mxu1 %v24158_v54 }
0x15d6   :  { %14377 = vmatmul.mubr.f32.vlgmr.msra.gmra.mrb[64].mxu1 %v11052_v55 }
0x15d7   :  { %15165 = vmatpush3.bf16.msra.mxu1 %v15164_v1  ;;  %14383 = vmatprep.mubr.msk.f32.mxu1 %vm16217_vm4, %v16218_v5  ;;  %v12982_v1 = vld [vmem:[%s12926_s14] ss:$0 sm:$0xff] }
0x15d8   :  { %15166 = vmatprep.subr.bf16.mxu1 %v24158_v54 }
0x15de   :  { %14384 = vmatmul.mubr.f32.vlgmr.msra.gmra.mrb[64].mxu1 %v11053_v10 }
0x15df   :  { %15168 = vmatpush3.bf16.msra.mxu1 %v22128_v11  ;;  %14390 = vmatprep.mubr.msk.f32.mxu1 %vm16217_vm4, %v16218_v5 }
0x15e0   :  { %15169 = vmatprep.subr.bf16.mxu1 %v24158_v54 }
0x15e6   :  { %14391 = vmatmul.mubr.f32.vlgmr.msra.gmra.mrb[64].mxu1 %v11054_v14 }
0x15e7   :  { %15171 = vmatpush3.bf16.msra.mxu1 %v15170_v53  ;;  %14397 = vmatprep.mubr.msk.f32.mxu1 %vm16217_vm4, %v16218_v5  ;;  %v12046_v53 = vand.u32 4294901760, %v12045_v0 }
0x15e8   :  { %15172 = vmatprep.subr.bf16.mxu1 %v24158_v54 }
0x15e9   :  { %v12047_v47 = vsub.f32 %v12045_v0, %v12046_v53 }
0x15eb   :  { %v12048_v59 = vand.u32 4294901760, %v12047_v47 }
0x15ee   :  { %14398 = vmatmul.mubr.f32.vlgmr.msra.gmra.mrb[64].mxu1 %v11052_v55 }
0x15ef   :  { %15174 = vmatpush3.bf16.msra.mxu1 %v22128_v11  ;;  %14404 = vmatprep.mubr.msk.f32.mxu1 %vm16217_vm4, %v16218_v5 }
0x15f0   :  { %14437 = vmatprep.subr.mxu1 %v16218_v5 }
0x15f6   :  { %14405 = vmatmul.mubr.f32.vlgmr.msra.gmra.mrb[64].mxu1 %v11052_v55 }
0x15f7   :  { %14439 = vmatprep.mubr.msk.f32.mxu1 %vm16217_vm4, %v16218_v5 }
0x16c9   :  { %v11440_v23 = vpop.f32.mrb[64].mxu1 }
0x16ca   :  { %v15244_v54 = vadd.f32 %v12977_v26, %v11440_v23  ;;  %v14406_v4 = vpop.f32.mrb[65].mxu1 }
0x16cc   :  { %v11447_v2 = vsel %vm11446_vm12, %v15244_v54, 0.0 }
0x16cd   :  { %11448 = vadd.xlane.f32.xlu0 %v11447_v2  ;;  %v12424_v2 = vld [vmem:[%s12928_s18] sm:$0xf] }
0x175a   :  { %v11449_v46 = vpop.xlane.xlu0 %11448 }
0x175b   :  { %v11451_v61 = vmul.f32 0.125, %v11449_v46  ;;  %v12436_v46 = vsel %vm11974_vm1, %v12424_v2, 0 }
0x175d   :  { %v11452_v52 = vsub.f32 %v15244_v54, %v11451_v61  ;;  %v12439_v61 = vand.u32 4294901760, %v12436_v46 }
0x175f   :  { %v11453_v38 = vmul.f32 %v11452_v52, %v11452_v52 }
0x1761   :  { %v11454_v49 = vsel %vm11446_vm12, %v11453_v38, 0.0  ;;  %v12516_v38 = vsub.f32 %v12436_v46, %v12439_v61 }
0x1762   :  { %11455 = vadd.xlane.f32.xlu1 %v11454_v49 }
0x17ef   :  { %v11456_v17 = vpop.xlane.xlu1 %11455 }
0x17f0   :  { %v11457_v40 = vmul.f32 0.125, %v11456_v17  ;;  %v12517_v17 = vand.u32 4294901760, %v12516_v38 }
0x17f2   :  { %v11458_v62 = vadd.f32 1e-05, %v11457_v40 }
0x17f4   :  { %16189 = vrsqrt.f32 %v11458_v62 }
0x17fe   :  { %v16190_v12 = vpop.eup %16189 }
0x17ff   :  { %v11460_v63 = vmul.f32 %v16190_v12, %v11452_v52  ;;  %v76_v52 = vstv %s12929_s22  ;;  %v12518_v12 = vsub.f32 %v12516_v38, %v12517_v17 }
0x1800   :  { %77 = vst [vmem:[#allocation2] sm:$0x1] %v76_v52 }
0x1801   :  { %v11467_v7 = vmul.f32 %v12978_v30, %v11460_v63 }
0x1803   :  { %v11474_v11 = vadd.f32 %v12979_v22, %v11467_v7  ;;  %v12519_v22 = vand.u32 4294901760, %v12518_v12 }
0x1805   :  { %vm11475_vm13 = vcmp.ge.f32.partialorder %v11474_v11, 0.0  ;;  %v11476_v41 = vmul.f32 0.05, %v11474_v11 }
0x1807   :  { %v11477_v50 = vsel %vm11475_vm13, %v11474_v11, %v11476_v41  ;;  %v12983_v11 = vld [vmem:[#allocation2] ss:$0 sm:$0xff] }
0x1808   :  { %v11487_v16 = vsel %vm10523_vm10, %v11477_v50, 0 }
0x1809   :  { %v11555_v20 = vand.u32 4294901760, %v11487_v16 }
0x180b   :  { %v11556_v24 = vsub.f32 %v11487_v16, %v11555_v20 }
0x180d   :  { %v11557_v33 = vand.u32 4294901760, %v11556_v24 }
0x180f   :  { %v11558_v18 = vsub.f32 %v11556_v24, %v11557_v33 }
0x1811   :  { %v11559_v9 = vand.u32 4294901760, %v11558_v18 }
0x1813   :  { %14410 = vmatmul.mubr.f32.vlgmr.msra.gmra.mrb[90].mxu0 %v11559_v9 }
0x1814   :  { %14413 = vmatpush3.msra.mxu0 %v11570_v34  ;;  %14414 = vmatprep.mubr.msk.f32.mxu0 %vm16217_vm4, %v16218_v5 }
0x1815   :  { %14417 = vmatprep.subr.mxu0 %v16218_v5 }
0x181b   :  { %14415 = vmatmul.mubr.f32.vlgmr.msra.gmra.mrb[90].mxu0 %v11555_v20 }
0x181c   :  { %14418 = vmatpush3.msra.mxu0 %v11567_v58  ;;  %14419 = vmatprep.mubr.msk.f32.mxu0 %vm16217_vm4, %v16218_v5 }
0x181d   :  { %14422 = vmatprep.subr.mxu0 %v16218_v5 }
0x1823   :  { %14420 = vmatmul.mubr.f32.vlgmr.msra.gmra.mrb[90].mxu0 %v11556_v24 }
0x1824   :  { %14423 = vmatpush3.msra.mxu0 %v11490_v35  ;;  %14424 = vmatprep.mubr.msk.f32.mxu0 %vm16217_vm4, %v16218_v5 }
0x1825   :  { %14427 = vmatprep.subr.mxu0 %v16218_v5 }
0x182b   :  { %14425 = vmatmul.mubr.f32.vlgmr.msra.gmra.mrb[90].mxu0 %v11557_v33 }
0x182c   :  { %14428 = vmatpush3.msra.mxu0 %v11568_v8  ;;  %14429 = vmatprep.mubr.msk.f32.mxu0 %vm16217_vm4, %v16218_v5 }
0x182d   :  { %14432 = vmatprep.subr.mxu0 %v16218_v5 }
0x1833   :  { %14430 = vmatmul.mubr.f32.vlgmr.msra.gmra.mrb[90].mxu0 %v11555_v20 }
0x1834   :  { %14433 = vmatpush3.msra.mxu0 %v11490_v35  ;;  %14434 = vmatprep.mubr.msk.f32.mxu0 %vm16217_vm4, %v16218_v5 }
0x1835   :  { %14467 = vmatprep.subr.mxu0 %v16218_v5 }
0x183b   :  { %14435 = vmatmul.mubr.f32.vlgmr.msra.gmra.mrb[90].mxu0 %v11555_v20 }
0x183c   :  { %14469 = vmatprep.mubr.msk.f32.mxu0 %vm16217_vm4, %v16218_v5  ;;  %14468 = vmatpush3.msra.mxu0 %v12439_v61 }
0x183d   :  { %14472 = vmatprep.subr.mxu0 %v16218_v5 }
0x190e   :  { %v11931_v32 = vpop.f32.mrb[90].mxu0 }
0x190f   :  { %v15245_v36 = vadd.f32 %v12980_v27, %v11931_v32  ;;  %v14436_v19 = vpop.f32.mrb[91].mxu0 }
0x1911   :  { %v11938_v37 = vsel %vm11937_vm14, %v15245_v36, 0.0 }
0x1912   :  { %11939 = vadd.xlane.f32.xlu0 %v11938_v37 }
0x199f   :  { %v11940_v13 = vpop.xlane.xlu0 %11939 }
0x19a0   :  { %v11942_v57 = vmul.f32 0.25, %v11940_v13 }
0x19a2   :  { %v11943_v51 = vsub.f32 %v15245_v36, %v11942_v57 }
0x19a4   :  { %v11944_v3 = vmul.f32 %v11943_v51, %v11943_v51 }
0x19a6   :  { %v11945_v44 = vsel %vm11937_vm14, %v11944_v3, 0.0 }
0x19a7   :  { %11946 = vadd.xlane.f32.xlu1 %v11945_v44 }
0x1a34   :  { %v11947_v39 = vpop.xlane.xlu1 %11946 }
0x1a35   :  { %v11948_v42 = vmul.f32 0.25, %v11947_v39 }
0x1a37   :  { %v11949_v60 = vadd.f32 1e-05, %v11948_v42 }
0x1a39   :  { %16191 = vrsqrt.f32 %v11949_v60 }
0x1a43   :  { %v16192_v25 = vpop.eup %16191 }
0x1a44   :  { %v11951_v6 = vmul.f32 %v16192_v25, %v11943_v51 }
0x1a46   :  { %v11958_v31 = vmul.f32 %v12981_v15, %v11951_v6 }
0x1a48   :  { %v11965_v56 = vadd.f32 %v12982_v1, %v11958_v31 }
0x1a4a   :  { %vm11966_vm0 = vcmp.ge.f32.partialorder %v11965_v56, 0.0  ;;  %v11967_v55 = vmul.f32 0.05, %v11965_v56 }
0x1a4c   :  { %v11968_v10 = vsel %vm11966_vm0, %v11965_v56, %v11967_v55 }
0x1a4d   :  { %v11976_v14 = vsel %vm11974_vm1, %v11968_v10, 0 }
0x1a4e   :  { %v11979_v48 = vand.u32 4294901760, %v11976_v14 }
0x1a50   :  { %14438 = vmatpush3.msra.mxu1 %v11979_v48  ;;  %v12056_v26 = vsub.f32 %v11976_v14, %v11979_v48 }
0x1a51   :  { %14440 = vmatmul.mubr.f32.vlgmr.msra.gmra.mrb[66].mxu1 %v12048_v59  ;;  %14442 = vmatprep.subr.mxu1 %v16218_v5 }
0x1a52   :  { %v12057_v23 = vand.u32 4294901760, %v12056_v26  ;;  %14444 = vmatprep.mubr.msk.f32.mxu1 %vm16217_vm4, %v16218_v5 }
0x1a54   :  { %v12058_v54 = vsub.f32 %v12056_v26, %v12057_v23 }
0x1a56   :  { %v12059_v4 = vand.u32 4294901760, %v12058_v54 }
0x1a58   :  { %14443 = vmatpush3.msra.mxu1 %v12059_v4 }
0x1a59   :  { %14445 = vmatmul.mubr.f32.vlgmr.msra.gmra.mrb[66].mxu1 %v12044_v21  ;;  %14447 = vmatprep.subr.mxu1 %v16218_v5 }
0x1a5a   :  { %14448 = vmatpush3.msra.mxu1 %v12056_v26  ;;  %14449 = vmatprep.mubr.msk.f32.mxu1 %vm16217_vm4, %v16218_v5 }
0x1a5b   :  { %14452 = vmatprep.subr.mxu1 %v16218_v5 }
0x1a61   :  { %14450 = vmatmul.mubr.f32.vlgmr.msra.gmra.mrb[66].mxu1 %v12045_v0 }
0x1a62   :  { %14453 = vmatpush3.msra.mxu1 %v11979_v48  ;;  %14454 = vmatprep.mubr.msk.f32.mxu1 %vm16217_vm4, %v16218_v5 }
0x1a63   :  { %14457 = vmatprep.subr.mxu1 %v16218_v5 }
0x1a69   :  { %14455 = vmatmul.mubr.f32.vlgmr.msra.gmra.mrb[66].mxu1 %v12046_v53 }
0x1a6a   :  { %14458 = vmatpush3.msra.mxu1 %v12057_v23  ;;  %14459 = vmatprep.mubr.msk.f32.mxu1 %vm16217_vm4, %v16218_v5 }
0x1a6b   :  { %14462 = vmatprep.subr.mxu1 %v16218_v5 }
0x1a71   :  { %14460 = vmatmul.mubr.f32.vlgmr.msra.gmra.mrb[66].mxu1 %v12044_v21 }
0x1a72   :  { %14463 = vmatpush3.msra.mxu1 %v11979_v48  ;;  %14464 = vmatprep.mubr.msk.f32.mxu1 %vm16217_vm4, %v16218_v5 }
0x1a79   :  { %14465 = vmatmul.mubr.f32.vlgmr.msra.gmra.mrb[66].mxu1 %v12044_v21 }
0x1b4c   :  { %v12420_v49 = vpop.f32.mrb[66].mxu1 }
0x1b4d   :  { %v12433_v43 = vsel %vm11970_vm15, %v12420_v49, 0  ;;  %v14466_v35 = vpop.f32.mrb[67].mxu1 }
0x1b4e   :  { %v12504_v40 = vand.u32 4294901760, %v12433_v43 }
0x1b50   :  { %v12505_v62 = vsub.f32 %v12433_v43, %v12504_v40 }
0x1b52   :  { %v12506_v30 = vand.u32 4294901760, %v12505_v62 }
0x1b54   :  { %v12507_v63 = vsub.f32 %v12505_v62, %v12506_v30 }
0x1b56   :  { %v12508_v7 = vand.u32 4294901760, %v12507_v63 }
0x1b58   :  { %14470 = vmatmul.mubr.f32.vlgmr.msra.gmra.mrb[92].mxu0 %v12508_v7 }
0x1b59   :  { %14473 = vmatpush3.msra.mxu0 %v12519_v22  ;;  %14474 = vmatprep.mubr.msk.f32.mxu0 %vm16217_vm4, %v16218_v5 }
0x1b5a   :  { %14477 = vmatprep.subr.mxu0 %v16218_v5 }
0x1b60   :  { %14475 = vmatmul.mubr.f32.vlgmr.msra.gmra.mrb[92].mxu0 %v12504_v40 }
0x1b61   :  { %14478 = vmatpush3.msra.mxu0 %v12516_v38  ;;  %14479 = vmatprep.mubr.msk.f32.mxu0 %vm16217_vm4, %v16218_v5 }
0x1b62   :  { %14482 = vmatprep.subr.mxu0 %v16218_v5 }
0x1b68   :  { %14480 = vmatmul.mubr.f32.vlgmr.msra.gmra.mrb[92].mxu0 %v12505_v62 }
0x1b69   :  { %14483 = vmatpush3.msra.mxu0 %v12439_v61  ;;  %14484 = vmatprep.mubr.msk.f32.mxu0 %vm16217_vm4, %v16218_v5 }
0x1b6a   :  { %14487 = vmatprep.subr.mxu0 %v16218_v5 }
0x1b70   :  { %14485 = vmatmul.mubr.f32.vlgmr.msra.gmra.mrb[92].mxu0 %v12506_v30 }
0x1b71   :  { %14488 = vmatpush3.msra.mxu0 %v12517_v17  ;;  %14489 = vmatprep.mubr.msk.f32.mxu0 %vm16217_vm4, %v16218_v5 }
0x1b72   :  { %14492 = vmatprep.subr.mxu0 %v16218_v5 }
0x1b78   :  { %14490 = vmatmul.mubr.f32.vlgmr.msra.gmra.mrb[92].mxu0 %v12504_v40 }
0x1b79   :  { %14493 = vmatpush3.msra.mxu0 %v12439_v61  ;;  %14494 = vmatprep.mubr.msk.f32.mxu0 %vm16217_vm4, %v16218_v5 }
0x1b80   :  { %14495 = vmatmul.mubr.f32.vlgmr.msra.gmra.mrb[92].mxu0 %v12504_v40 }
0x1c53   :  { %v12880_v58 = vpop.f32.mrb[92].mxu0 }
0x1c54   :  { %v15246_v41 = vadd.f32 %v12983_v11, %v12880_v58  ;;  %v14496_v50 = vpop.f32.mrb[93].mxu0 }
0x1c56   :  { %v12984_v16 = vmul.f32 -1.442695, %v15246_v41 }
0x1c58   :  { %16193 = vpow2.f32 %v12984_v16 }
0x1c62   :  { %v16194_v8 = vpop.eup %16193 }
0x1c63   :  { %v12887_v20 = vadd.f32 1.0, %v16194_v8 }
0x1c65   :  { %16195 = vrcp.f32 %v12887_v20 }
0x1c6f   :  { %v16196_v24 = vpop.eup %16195 }
0x1c70   :  { %12891 = vst.msk [vmem:[%s12930_s26] sm:$0x3] %vm12890_vm2, %v16196_v24 }

</bundles_post_ra>
